<compile_context>
chip_gen: v7x
topology: tpu7x:2x2x1
jax: 0.10.0
libtpu: 0.0.40
codegen_flags: <defaults>
</compile_context>

<pallas_src>
import math

import jax
import jax.numpy as jnp
from jax import lax
from jax.experimental import pallas as pl
from jax.experimental.pallas import tpu as pltpu

# -----------------------------------------------------------------------------
# Static config: PCVM(input_dim=32, output_dim=32, d_state=16, d_conv=8, expand=2)
# -----------------------------------------------------------------------------
INPUT_DIM = 32
OUTPUT_DIM = 32
D_STATE = 16
D_CONV = 8
EXPAND = 2
D_MODEL = INPUT_DIM // 2                    # mamba d_model = 16
D_INNER = EXPAND * D_MODEL                  # 32
DT_RANK = max(1, math.ceil(D_MODEL / 16))   # 1
DT2 = 2 * D_INNER                           # 64 fused channels (2 shared-weight chunks)
SF = D_STATE * DT2                          # 1024 flattened scan lanes
EPS = 1e-5                                  # nn.LayerNorm default

# rows of the packed small-parameter array (SMALL_ROWS, 128)
ROW_NORM_W = 0
ROW_NORM_B = 1
ROW_CONV_B = 2
ROW_DT_B = 3
ROW_D = 4
ROW_CONV_W0 = 8                             # rows 8 .. 8+D_CONV-1 hold the conv taps
SMALL_ROWS = 16


def _silu(v):
    return v * jax.nn.sigmoid(v)


def _softplus(v):
    # numerically stable softplus; log(1+exp(-|x|)) form (verified to lower in Mosaic).
    return jnp.maximum(v, 0.0) + jnp.log(1.0 + jnp.exp(-jnp.abs(v)))


# -----------------------------------------------------------------------------
# Pallas kernel: one grid step == one batch element.
# The two shared-weight Mamba chunks are fused side-by-side on the lane axis
# (cols [0:32] = chunk0, [32:64] = chunk1); the scan additionally flattens the
# state dim onto the lanes: lane = s*64 + chunk*32 + d  (1024 dense lanes).
# -----------------------------------------------------------------------------
def pcvm_kernel(x_ref, small_ref, a_flat_ref, w_in_ref, w_bcd_ref,
                w_out_ref, proj_w_ref, proj_b_ref, out_ref):
    L = x_ref.shape[1]
    C = x_ref.shape[2]
    x = x_ref[0]                                              # (L, C) fp32

    norm_w = small_ref[ROW_NORM_W:ROW_NORM_W + 1, :C]         # (1, C)
    norm_b = small_ref[ROW_NORM_B:ROW_NORB if False else ROW_NORM_B + 1, :C]  # (1, C)
    conv_b = small_ref[ROW_CONV_B:ROW_CONV_B + 1, :DT2]       # (1, 64)
    dt_b = small_ref[ROW_DT_B:ROW_DT_B + 1, :DT2]             # (1, 64)
    d_skip = small_ref[ROW_D:ROW_D + 1, :DT2]                 # (1, 64)

    def layer_norm(v):
        mu = jnp.mean(v, axis=-1, keepdims=True)
        var = jnp.mean((v - mu) ** 2, axis=-1, keepdims=True)
        return (v - mu) * lax.rsqrt(var + EPS) * norm_w + norm_b

    x_norm = layer_norm(x)                                     # (L, C)

    # ---- fused in_proj (block-diag weight keeps the 2 chunks on lane groups)
    xz = jnp.dot(x_norm, w_in_ref[...],
                 preferred_element_type=jnp.float32)           # (L, 2*DT2) = (L, 128)
    xin = xz[:, :DT2]                                          # (L, 64)
    z = xz[:, DT2:]                                            # (L, 64)

    # ---- causal depthwise conv1d via XLU sublane rolls + causal row mask
    tpos_c = lax.broadcasted_iota(jnp.int32, (L, DT2), 0)      # row (time) index
    acc = xin * small_ref[ROW_CONV_W0 + D_CONV - 1:ROW_CONV_W0 + D_CONV, :DT2]
    for k in range(D_CONV - 1):
        s = D_CONV - 1 - k                                     # shift 7..1
        shifted = pltpu.roll(xin, shift=s, axis=0)             # row t <- row t-s
        shifted = jnp.where(tpos_c >= s, shifted, 0.0)         # zero first s rows
        acc = acc + shifted * small_ref[ROW_CONV_W0 + k:ROW_CONV_W0 + k + 1, :DT2]
    xact = _silu(acc + conv_b)                                 # (L, 64)

    # ---- single fused, lane-dense projection: [Bexp(1024) | Cexp(1024) | dt(64)]
    bcd = jnp.dot(xact, w_bcd_ref[...],
                  preferred_element_type=jnp.float32)          # (L, 2*SF + DT2)
    Bexp = bcd[:, :SF]                                         # (L, 1024)
    Cexp = bcd[:, SF:2 * SF]                                   # (L, 1024)
    delta = _softplus(bcd[:, 2 * SF:] + dt_b)                  # (L, 64)

    # ---- discretize on the flattened scan lanes (exact lane-tiling via concat)
    n_s = SF // DT2                                            # D_STATE
    delta_f = jnp.concatenate([delta] * n_s, axis=1)           # (L, 1024)
    du_f = jnp.concatenate([delta * xact] * n_s, axis=1)       # (L, 1024)

    dA = jnp.exp(delta_f * a_flat_ref[...])                    # (L, 1024)
    dBu = du_f * Bexp                                          # (L, 1024)

    # ---- Hillis-Steele associative scan over time:
    #      h_t = dA_t * h_{t-1} + dBu_t  with h_{-1} = 0
    # shifts via pltpu.roll + causal mask (identity 0 for H, 1 for A).
    tpos_s = lax.broadcasted_iota(jnp.int32, (L, SF), 0)
    Acc = dA
    Hcc = dBu
    off = 1
    while off < L:
        mask = tpos_s >= off
        h_prev = jnp.where(mask, pltpu.roll(Hcc, shift=off, axis=0), 0.0)
        Hcc = Acc * h_prev + Hcc
        if off * 2 < L:                                        # Acc dead after last pass
            a_prev = jnp.where(mask, pltpu.roll(Acc, shift=off, axis=0), 1.0)
            Acc = Acc * a_prev
        off *= 2

    # ---- output contraction: ys[t, f] = sum_s (h * C)[t, s*DT2 + f]
    # exact log2 halving tree of lane-slice adds (no relayout, no extra MXU pass)
    v = Hcc * Cexp                                             # (L, 1024)
    width = SF
    while width > DT2:
        width //= 2
        v = v[:, :width] + v[:, width:2 * width]
    ys = v                                                     # (L, 64)

    y = (ys + xact * d_skip) * _silu(z)                        # (L, 64)

    # out_proj per chunk (block-diag) directly yields cat(x_mambas) layout.
    x_mamba = jnp.dot(y, w_out_ref[...],
                      preferred_element_type=jnp.float32)      # (L, C)

    # NOTE: PyTorch re-uses the SAME self.norm module for both LayerNorms.
    # TODO(synk): skip_scale / x_mamba_sum in PCVM.forward is dead code w.r.t.
    # the returned output, so it is intentionally omitted.
    x_mamba = layer_norm(x_mamba)

    # Final proj written channel-major (OUT, L) => wrapper needs no transpose.
    out_cl = lax.dot_general(proj_w_ref[...], x_mamba,
                             (((1,), (1,)), ((), ())),
                             preferred_element_type=jnp.float32)   # (OUT, L)
    out_cl = out_cl + proj_b_ref[...]                              # (OUT, 1) bias
    out_ref[0] = out_cl.astype(out_ref.dtype)


# fix accidental typo-guard above (keeps a single definition path)
ROW_NORB = ROW_NORM_B


# -----------------------------------------------------------------------------
# One-time fused weight construction (hoisted out of the per-call forward).
# -----------------------------------------------------------------------------
def _block_diag2(w):
    """[[w, 0], [0, w]] -- duplicates shared weights for the 2 fused chunks."""
    z = jnp.zeros_like(w)
    return jnp.concatenate(
        [jnp.concatenate([w, z], axis=1), jnp.concatenate([z, w], axis=1)],
        axis=0)


def prepare_params(params):
    """Build the fused / expanded kernel weights ONCE (not per forward call)."""
    # in_proj: block-diagonal so the 2 chunks land on disjoint lane groups.
    wx = params["in_proj_wT"][:, :D_INNER]
    wz = params["in_proj_wT"][:, D_INNER:]
    w_in = jnp.concatenate([_block_diag2(wx), _block_diag2(wz)], axis=1)    # (C, 128)

    # packed small row-vector parameters + conv taps (one VMEM block).
    small = jnp.zeros((SMALL_ROWS, 128), jnp.float32)
    small = small.at[ROW_NORM_W, :INPUT_DIM].set(params["norm_w"][0])
    small = small.at[ROW_NORM_B, :INPUT_DIM].set(params["norm_b"][0])
    small = small.at[ROW_CONV_B, :DT2].set(jnp.tile(params["conv_b"], (1, 2))[0])
    small = small.at[ROW_DT_B, :DT2].set(jnp.tile(params["dt_proj_b"], (1, 2))[0])
    small = small.at[ROW_D, :DT2].set(jnp.tile(params["D"], (1, 2))[0])
    small = small.at[ROW_CONV_W0:ROW_CONV_W0 + D_CONV, :DT2].set(
        jnp.tile(params["conv_w"], (1, 2)))

    # A flattened onto the scan lanes: lane = s*DT2 + chunk*D_INNER + d
    a_neg = -jnp.exp(params["A_logT"])                                       # (S, D_INNER)
    a_flat = jnp.broadcast_to(a_neg[:, None, :],
                              (D_STATE, 2, D_INNER)).reshape(1, SF)

    # B / C projections expanded straight onto the flattened scan lanes, plus
    # the folded low-rank dt projection, fused into one (64, 2112) weight.
    def expand(w):                                                           # (D_INNER, S)
        blk = jnp.broadcast_to(w[:, :, None], (D_INNER, D_STATE, D_INNER))
        full = jnp.zeros((2, D_INNER, D_STATE, 2, D_INNER), jnp.float32)
        full = full.at[0, :, :, 0, :].set(blk)
        full = full.at[1, :, :, 1, :].set(blk)
        return full.reshape(DT2, SF)

    w_bexp = expand(params["xproj_B_wT"])                                    # (64, 1024)
    w_cexp = expand(params["xproj_C_wT"])                                    # (64, 1024)
    w_dt = _block_diag2(params["xproj_dt_w"].T @ params["dt_proj_wT"])       # (64, 64)
    w_bcd = jnp.concatenate([w_bexp, w_cexp, w_dt], axis=1)                  # (64, 2112)

    w_out = _block_diag2(params["out_proj_wT"])                              # (64, C)
    proj_w = params["proj_wT"].T                                             # (OUT, C)
    proj_b = params["proj_b"].reshape(OUTPUT_DIM, 1)                         # (OUT, 1)

    return (small, a_flat, w_in, w_bcd, w_out, proj_w, proj_b)


# -----------------------------------------------------------------------------
# Forward wrapper: layout conversion + pallas_call plumbing only.
# -----------------------------------------------------------------------------
@jax.jit
def pcvm_forward(x_nchw, fused):
    x_nchw = x_nchw.astype(jnp.float32)
    B, C, H, W = x_nchw.shape
    assert C == INPUT_DIM
    L = H * W
    x_blc = jnp.transpose(x_nchw.reshape(B, C, L), (0, 2, 1))                # (B, L, C)

    small, a_flat, w_in, w_bcd, w_out, proj_w, proj_b = fused
    param_list = [small, a_flat, w_in, w_bcd, w_out, proj_w, proj_b]

    def full_spec(shape):
        nd = len(shape)
        return pl.BlockSpec(shape, lambda b, _nd=nd: (0,) * _nd)

    in_specs = [pl.BlockSpec((1, L, C), lambda b: (b, 0, 0))]
    in_specs += [full_spec(tuple(p.shape)) for p in param_list]

    out = pl.pallas_call(
        pcvm_kernel,
        out_shape=jax.ShapeDtypeStruct((B, OUTPUT_DIM, L), jnp.float32),
        grid=(B,),
        in_specs=in_specs,
        out_specs=pl.BlockSpec((1, OUTPUT_DIM, L), lambda b: (b, 0, 0)),
        compiler_params=pltpu.CompilerParams(
            dimension_semantics=("parallel",),       # megacore on v7x, no-op elsewhere
            vmem_limit_bytes=32 * 1024 * 1024),
    )(x_blc, *param_list)

    # output is already channel-major: pure reshape, no transpose kernel.
    return out.reshape(B, OUTPUT_DIM, H, W)


# -----------------------------------------------------------------------------
# Deterministic synthetic parameter init (shapes follow PCVM.__init__ / Mamba)
# -----------------------------------------------------------------------------
def init_params(key):
    ks = jax.random.split(key, 12)

    def nrm(k, shape, scale):
        return scale * jax.random.normal(k, shape, dtype=jnp.float32)

    A_log = jnp.log(jnp.broadcast_to(
        jnp.arange(1, D_STATE + 1, dtype=jnp.float32)[None, :],
        (D_INNER, D_STATE)))

    return {
        "norm_w":      1.0 + nrm(ks[0], (1, INPUT_DIM), 0.05),
        "norm_b":      nrm(ks[1], (1, INPUT_DIM), 0.05),
        "in_proj_wT":  nrm(ks[2], (D_MODEL, 2 * D_INNER), D_MODEL ** -0.5),
        "conv_w":      nrm(ks[3], (D_CONV, D_INNER), 0.3),       # [tap, channel]
        "conv_b":      nrm(ks[4], (1, D_INNER), 0.05),
        "xproj_dt_w":  nrm(ks[5], (DT_RANK, D_INNER), D_INNER ** -0.5),
        "xproj_B_wT":  nrm(ks[6], (D_INNER, D_STATE), D_INNER ** -0.5),
        "xproj_C_wT":  nrm(ks[7], (D_INNER, D_STATE), D_INNER ** -0.5),
        "dt_proj_wT":  nrm(ks[8], (DT_RANK, D_INNER), DT_RANK ** -0.5),
        "dt_proj_b":   nrm(ks[9], (1, D_INNER), 0.2) - 2.0,
        "A_logT":      jnp.asarray(A_log.T),                     # (D_STATE, D_INNER)
        "D":           jnp.ones((1, D_INNER), jnp.float32),
        "out_proj_wT": nrm(ks[10], (D_INNER, D_MODEL), D_INNER ** -0.5),
        "proj_wT":     nrm(ks[11], (INPUT_DIM, OUTPUT_DIM), INPUT_DIM ** -0.5),
        "proj_b":      jnp.zeros((1, OUTPUT_DIM), jnp.float32),
    }


# -----------------------------------------------------------------------------
# Pure-JAX reference (same math, plain XLA, per-chunk serial scan) for sanity.
# -----------------------------------------------------------------------------
def pcvm_reference(x_nchw, params):
    x_nchw = x_nchw.astype(jnp.float32)
    B, C, H, W = x_nchw.shape
    L = H * W
    x = jnp.transpose(x_nchw.reshape(B, C, L), (0, 2, 1))            # (B, L, C)

    def ln(v):
        mu = jnp.mean(v, -1, keepdims=True)
        var = jnp.mean((v - mu) ** 2, -1, keepdims=True)
        return (v - mu) / jnp.sqrt(var + EPS) * params["norm_w"][0] + params["norm_b"][0]

    xn = ln(x)

    def mamba(u):                                                    # (B, L, D_MODEL)
        xz = u @ params["in_proj_wT"]
        xin, z = xz[..., :D_INNER], xz[..., D_INNER:]
        xpad = jnp.pad(xin, ((0, 0), (D_CONV - 1, 0), (0, 0)))
        conv = sum(xpad[:, k:k + L, :] * params["conv_w"][k] for k in range(D_CONV))
        conv = conv + params["conv_b"][0]
        xact = conv * jax.nn.sigmoid(conv)

        Bm = xact @ params["xproj_B_wT"]
        Cm = xact @ params["xproj_C_wT"]
        dt_low = xact @ params["xproj_dt_w"].T
        dt = dt_low @ params["dt_proj_wT"] + params["dt_proj_b"][0]
        delta = _softplus(dt)

        A_T = -jnp.exp(params["A_logT"])                             # (S, D)
        dA = jnp.exp(delta[:, :, None, :] * A_T[None, None])         # (B, L, S, D)
        dBu = delta[:, :, None, :] * Bm[:, :, :, None] * xact[:, :, None, :]

        def step(h, inp):
            dA_t, dBu_t, c_t = inp
            h = dA_t * h + dBu_t                                     # (B, S, D)
            y = jnp.sum(h * c_t[:, :, None], axis=1)                 # (B, D)
            return h, y

        xs = (jnp.transpose(dA, (1, 0, 2, 3)),
              jnp.transpose(dBu, (1, 0, 2, 3)),
              jnp.transpose(Cm, (1, 0, 2)))
        _, ys = lax.scan(step, jnp.zeros((B, D_STATE, D_INNER), jnp.float32), xs)
        ys = jnp.transpose(ys, (1, 0, 2))                            # (B, L, D)
        y = ys + xact * params["D"][0]
        y = y * (z * jax.nn.sigmoid(z))
        return y @ params["out_proj_wT"]

    m0 = mamba(xn[..., :D_MODEL])
    m1 = mamba(xn[..., D_MODEL:])
    xm = ln(jnp.concatenate([m0, m1], axis=-1))
    out = xm @ params["proj_wT"] + params["proj_b"][0]
    return jnp.transpose(out, (0, 2, 1)).reshape(B, OUTPUT_DIM, H, W)


if __name__ == "__main__":
    key = jax.random.PRNGKey(0)
    pkey, xkey = jax.random.split(key)
    params = init_params(pkey)

    # Fused weights built ONCE here (hoisted out of the per-call forward path).
    fused = jax.block_until_ready(prepare_params(params))

    # input like PyTorch NCHW: (B=2, C=32, H=8, W=8)
    x = jax.random.normal(xkey, (2, INPUT_DIM, 8, 8), dtype=jnp.float32)

    out = jax.block_until_ready(pcvm_forward(x, fused))
    assert out.shape == (2, OUTPUT_DIM, 8, 8)
    assert bool(jnp.all(jnp.isfinite(out)))

    ref = jax.block_until_ready(pcvm_reference(x, params))
    max_err = float(jnp.max(jnp.abs(out - ref)))
    scale = float(jnp.max(jnp.abs(ref)))
    rel_err = max_err / max(scale, 1e-6)
    assert max_err <= 5e-3 * max(scale, 1.0), (
        f"mismatch vs reference: abs={max_err:.3e} rel={rel_err:.3e}")

    print("KERNEL_OK")
</pallas_src>

<mosaic_0001>
module attributes {stable_mosaic.version = 11 : i64} {
  func.func @pcvm_kernel(%arg0: i32, %arg1: memref<1x64x32xf32, #tpu.memory_space<vmem>>, %arg2: memref<16x128xf32, #tpu.memory_space<vmem>>, %arg3: memref<1x1024xf32, #tpu.memory_space<vmem>>, %arg4: memref<32x128xf32, #tpu.memory_space<vmem>>, %arg5: memref<64x2112xf32, #tpu.memory_space<vmem>>, %arg6: memref<64x32xf32, #tpu.memory_space<vmem>>, %arg7: memref<32x32xf32, #tpu.memory_space<vmem>>, %arg8: memref<32x1xf32, #tpu.memory_space<vmem>>, %arg9: memref<1x32x64xf32, #tpu.memory_space<vmem>>) attributes {dimension_semantics = [#tpu.dimension_semantics<parallel>], iteration_bounds = array<i64: 2>, scalar_prefetch = 0 : i64, scratch_operands = 0 : i64, tpu.core_type = #tpu.core_type<tc>, window_params = [{transform_indices = @transform_0, window_bounds = array<i64: 1, 64, 32>}, {pipeline_mode = #tpu.pipeline_mode<synchronous>, transform_indices = @transform_1, window_bounds = array<i64: 16, 128>}, {pipeline_mode = #tpu.pipeline_mode<synchronous>, transform_indices = @transform_2, window_bounds = array<i64: 1, 1024>}, {pipeline_mode = #tpu.pipeline_mode<synchronous>, transform_indices = @transform_3, window_bounds = array<i64: 32, 128>}, {pipeline_mode = #tpu.pipeline_mode<synchronous>, transform_indices = @transform_4, window_bounds = array<i64: 64, 2112>}, {pipeline_mode = #tpu.pipeline_mode<synchronous>, transform_indices = @transform_5, window_bounds = array<i64: 64, 32>}, {pipeline_mode = #tpu.pipeline_mode<synchronous>, transform_indices = @transform_6, window_bounds = array<i64: 32, 32>}, {pipeline_mode = #tpu.pipeline_mode<synchronous>, transform_indices = @transform_7, window_bounds = array<i64: 32, 1>}, {transform_indices = @transform_8, window_bounds = array<i64: 1, 32, 64>}]} {
    %c0 = arith.constant 0 : index
    %c0_0 = arith.constant 0 : index
    %c0_1 = arith.constant 0 : index
    %0 = vector.load %arg1[%c0, %c0_0, %c0_1] : memref<1x64x32xf32, #tpu.memory_space<vmem>>, vector<1x64x32xf32>
    %1 = vector.shape_cast %0 : vector<1x64x32xf32> to vector<64x32xf32>
    %c0_2 = arith.constant 0 : index
    %c0_3 = arith.constant 0 : index
    %2 = vector.load %arg2[%c0_2, %c0_3] : memref<16x128xf32, #tpu.memory_space<vmem>>, vector<1x32xf32>
    %c1 = arith.constant 1 : index
    %c0_4 = arith.constant 0 : index
    %3 = vector.load %arg2[%c1, %c0_4] : memref<16x128xf32, #tpu.memory_space<vmem>>, vector<1x32xf32>
    %c2 = arith.constant 2 : index
    %c0_5 = arith.constant 0 : index
    %4 = vector.load %arg2[%c2, %c0_5] : memref<16x128xf32, #tpu.memory_space<vmem>>, vector<1x64xf32>
    %c3 = arith.constant 3 : index
    %c0_6 = arith.constant 0 : index
    %5 = vector.load %arg2[%c3, %c0_6] : memref<16x128xf32, #tpu.memory_space<vmem>>, vector<1x64xf32>
    %c4 = arith.constant 4 : index
    %c0_7 = arith.constant 0 : index
    %6 = vector.load %arg2[%c4, %c0_7] : memref<16x128xf32, #tpu.memory_space<vmem>>, vector<1x64xf32>
    %cst = arith.constant dense<0.000000e+00> : vector<64xf32>
    %7 = vector.multi_reduction <add>, %1, %cst [1] : vector<64x32xf32> to vector<64xf32>
    %8 = vector.shape_cast %7 : vector<64xf32> to vector<64x1xf32>
    %cst_8 = arith.constant 3.200000e+01 : f32
    %9 = vector.broadcast %cst_8 : f32 to vector<64x1xf32>
    %10 = arith.divf %8, %9 : vector<64x1xf32>
    %11 = vector.broadcast %10 : vector<64x1xf32> to vector<64x32xf32>
    %12 = arith.subf %1, %11 : vector<64x32xf32>
    %13 = arith.mulf %12, %12 : vector<64x32xf32>
    %cst_9 = arith.constant dense<0.000000e+00> : vector<64xf32>
    %14 = vector.multi_reduction <add>, %13, %cst_9 [1] : vector<64x32xf32> to vector<64xf32>
    %15 = vector.shape_cast %14 : vector<64xf32> to vector<64x1xf32>
    %cst_10 = arith.constant 3.200000e+01 : f32
    %16 = vector.broadcast %cst_10 : f32 to vector<64x1xf32>
    %17 = arith.divf %15, %16 : vector<64x1xf32>
    %18 = vector.broadcast %10 : vector<64x1xf32> to vector<64x32xf32>
    %19 = arith.subf %1, %18 : vector<64x32xf32>
    %cst_11 = arith.constant 9.99999974E-6 : f32
    %20 = vector.broadcast %cst_11 : f32 to vector<64x1xf32>
    %21 = arith.addf %17, %20 : vector<64x1xf32>
    %22 = math.rsqrt %21 : vector<64x1xf32>
    %23 = vector.broadcast %22 : vector<64x1xf32> to vector<64x32xf32>
    %24 = arith.mulf %19, %23 : vector<64x32xf32>
    %25 = vector.broadcast %2 : vector<1x32xf32> to vector<64x32xf32>
    %26 = arith.mulf %24, %25 : vector<64x32xf32>
    %27 = vector.broadcast %3 : vector<1x32xf32> to vector<64x32xf32>
    %28 = arith.addf %26, %27 : vector<64x32xf32>
    %c0_12 = arith.constant 0 : index
    %c0_13 = arith.constant 0 : index
    %29 = vector.load %arg4[%c0_12, %c0_13] : memref<32x128xf32, #tpu.memory_space<vmem>>, vector<32x128xf32>
    %cst_14 = arith.constant dense<0.000000e+00> : vector<64x128xf32>
    %30 = tpu.matmul %28, %29, %cst_14 {dimension_numbers = #tpu.dot_dimension_numbers<[1], [0], [0], [1], [0, 0, 1, 1], [], []>} : vector<64x32xf32>, vector<32x128xf32>, vector<64x128xf32> -> vector<64x128xf32>
    %31 = vector.extract_strided_slice %30 {offsets = [0, 0], sizes = [64, 64], strides = [1, 1]} : vector<64x128xf32> to vector<64x64xf32>
    %32 = vector.extract_strided_slice %30 {offsets = [0, 64], sizes = [64, 64], strides = [1, 1]} : vector<64x128xf32> to vector<64x64xf32>
    %33 = tpu.iota {dimensions = array<i32: 0>} : vector<64x64xi32>
    %c15 = arith.constant 15 : index
    %c0_15 = arith.constant 0 : index
    %34 = vector.load %arg2[%c15, %c0_15] : memref<16x128xf32, #tpu.memory_space<vmem>>, vector<1x64xf32>
    %35 = vector.broadcast %34 : vector<1x64xf32> to vector<64x64xf32>
    %36 = arith.mulf %31, %35 : vector<64x64xf32>
    %c7_i32 = arith.constant 7 : i32
    %37 = tpu.dynamic_rotate %31 by %c7_i32 dim 0 : vector<64x64xf32>, i32 -> vector<64x64xf32>
    %c7_i32_16 = arith.constant 7 : i32
    %38 = vector.broadcast %c7_i32_16 : i32 to vector<64x64xi32>
    %39 = arith.cmpi sge, %33, %38 : vector<64x64xi32>
    %cst_17 = arith.constant 0.000000e+00 : f32
    %40 = vector.broadcast %cst_17 : f32 to vector<64x64xf32>
    %41 = arith.select %39, %37, %40 : vector<64x64xi1>, vector<64x64xf32>
    %c8 = arith.constant 8 : index
    %c0_18 = arith.constant 0 : index
    %42 = vector.load %arg2[%c8, %c0_18] : memref<16x128xf32, #tpu.memory_space<vmem>>, vector<1x64xf32>
    %43 = vector.broadcast %42 : vector<1x64xf32> to vector<64x64xf32>
    %44 = arith.mulf %41, %43 : vector<64x64xf32>
    %45 = arith.addf %36, %44 : vector<64x64xf32>
    %c6_i32 = arith.constant 6 : i32
    %46 = tpu.dynamic_rotate %31 by %c6_i32 dim 0 : vector<64x64xf32>, i32 -> vector<64x64xf32>
    %c6_i32_19 = arith.constant 6 : i32
    %47 = vector.broadcast %c6_i32_19 : i32 to vector<64x64xi32>
    %48 = arith.cmpi sge, %33, %47 : vector<64x64xi32>
    %cst_20 = arith.constant 0.000000e+00 : f32
    %49 = vector.broadcast %cst_20 : f32 to vector<64x64xf32>
    %50 = arith.select %48, %46, %49 : vector<64x64xi1>, vector<64x64xf32>
    %c9 = arith.constant 9 : index
    %c0_21 = arith.constant 0 : index
    %51 = vector.load %arg2[%c9, %c0_21] : memref<16x128xf32, #tpu.memory_space<vmem>>, vector<1x64xf32>
    %52 = vector.broadcast %51 : vector<1x64xf32> to vector<64x64xf32>
    %53 = arith.mulf %50, %52 : vector<64x64xf32>
    %54 = arith.addf %45, %53 : vector<64x64xf32>
    %c5_i32 = arith.constant 5 : i32
    %55 = tpu.dynamic_rotate %31 by %c5_i32 dim 0 : vector<64x64xf32>, i32 -> vector<64x64xf32>
    %c5_i32_22 = arith.constant 5 : i32
    %56 = vector.broadcast %c5_i32_22 : i32 to vector<64x64xi32>
    %57 = arith.cmpi sge, %33, %56 : vector<64x64xi32>
    %cst_23 = arith.constant 0.000000e+00 : f32
    %58 = vector.broadcast %cst_23 : f32 to vector<64x64xf32>
    %59 = arith.select %57, %55, %58 : vector<64x64xi1>, vector<64x64xf32>
    %c10 = arith.constant 10 : index
    %c0_24 = arith.constant 0 : index
    %60 = vector.load %arg2[%c10, %c0_24] : memref<16x128xf32, #tpu.memory_space<vmem>>, vector<1x64xf32>
    %61 = vector.broadcast %60 : vector<1x64xf32> to vector<64x64xf32>
    %62 = arith.mulf %59, %61 : vector<64x64xf32>
    %63 = arith.addf %54, %62 : vector<64x64xf32>
    %c4_i32 = arith.constant 4 : i32
    %64 = tpu.dynamic_rotate %31 by %c4_i32 dim 0 : vector<64x64xf32>, i32 -> vector<64x64xf32>
    %c4_i32_25 = arith.constant 4 : i32
    %65 = vector.broadcast %c4_i32_25 : i32 to vector<64x64xi32>
    %66 = arith.cmpi sge, %33, %65 : vector<64x64xi32>
    %cst_26 = arith.constant 0.000000e+00 : f32
    %67 = vector.broadcast %cst_26 : f32 to vector<64x64xf32>
    %68 = arith.select %66, %64, %67 : vector<64x64xi1>, vector<64x64xf32>
    %c11 = arith.constant 11 : index
    %c0_27 = arith.constant 0 : index
    %69 = vector.load %arg2[%c11, %c0_27] : memref<16x128xf32, #tpu.memory_space<vmem>>, vector<1x64xf32>
    %70 = vector.broadcast %69 : vector<1x64xf32> to vector<64x64xf32>
    %71 = arith.mulf %68, %70 : vector<64x64xf32>
    %72 = arith.addf %63, %71 : vector<64x64xf32>
    %c3_i32 = arith.constant 3 : i32
    %73 = tpu.dynamic_rotate %31 by %c3_i32 dim 0 : vector<64x64xf32>, i32 -> vector<64x64xf32>
    %c3_i32_28 = arith.constant 3 : i32
    %74 = vector.broadcast %c3_i32_28 : i32 to vector<64x64xi32>
    %75 = arith.cmpi sge, %33, %74 : vector<64x64xi32>
    %cst_29 = arith.constant 0.000000e+00 : f32
    %76 = vector.broadcast %cst_29 : f32 to vector<64x64xf32>
    %77 = arith.select %75, %73, %76 : vector<64x64xi1>, vector<64x64xf32>
    %c12 = arith.constant 12 : index
    %c0_30 = arith.constant 0 : index
    %78 = vector.load %arg2[%c12, %c0_30] : memref<16x128xf32, #tpu.memory_space<vmem>>, vector<1x64xf32>
    %79 = vector.broadcast %78 : vector<1x64xf32> to vector<64x64xf32>
    %80 = arith.mulf %77, %79 : vector<64x64xf32>
    %81 = arith.addf %72, %80 : vector<64x64xf32>
    %c2_i32 = arith.constant 2 : i32
    %82 = tpu.dynamic_rotate %31 by %c2_i32 dim 0 : vector<64x64xf32>, i32 -> vector<64x64xf32>
    %c2_i32_31 = arith.constant 2 : i32
    %83 = vector.broadcast %c2_i32_31 : i32 to vector<64x64xi32>
    %84 = arith.cmpi sge, %33, %83 : vector<64x64xi32>
    %cst_32 = arith.constant 0.000000e+00 : f32
    %85 = vector.broadcast %cst_32 : f32 to vector<64x64xf32>
    %86 = arith.select %84, %82, %85 : vector<64x64xi1>, vector<64x64xf32>
    %c13 = arith.constant 13 : index
    %c0_33 = arith.constant 0 : index
    %87 = vector.load %arg2[%c13, %c0_33] : memref<16x128xf32, #tpu.memory_space<vmem>>, vector<1x64xf32>
    %88 = vector.broadcast %87 : vector<1x64xf32> to vector<64x64xf32>
    %89 = arith.mulf %86, %88 : vector<64x64xf32>
    %90 = arith.addf %81, %89 : vector<64x64xf32>
    %c1_i32 = arith.constant 1 : i32
    %91 = tpu.dynamic_rotate %31 by %c1_i32 dim 0 : vector<64x64xf32>, i32 -> vector<64x64xf32>
    %c1_i32_34 = arith.constant 1 : i32
    %92 = vector.broadcast %c1_i32_34 : i32 to vector<64x64xi32>
    %93 = arith.cmpi sge, %33, %92 : vector<64x64xi32>
    %cst_35 = arith.constant 0.000000e+00 : f32
    %94 = vector.broadcast %cst_35 : f32 to vector<64x64xf32>
    %95 = arith.select %93, %91, %94 : vector<64x64xi1>, vector<64x64xf32>
    %c14 = arith.constant 14 : index
    %c0_36 = arith.constant 0 : index
    %96 = vector.load %arg2[%c14, %c0_36] : memref<16x128xf32, #tpu.memory_space<vmem>>, vector<1x64xf32>
    %97 = vector.broadcast %96 : vector<1x64xf32> to vector<64x64xf32>
    %98 = arith.mulf %95, %97 : vector<64x64xf32>
    %99 = arith.addf %90, %98 : vector<64x64xf32>
    %100 = vector.broadcast %4 : vector<1x64xf32> to vector<64x64xf32>
    %101 = arith.addf %99, %100 : vector<64x64xf32>
    %102 = arith.negf %101 : vector<64x64xf32>
    %103 = math.exp %102 : vector<64x64xf32>
    %cst_37 = arith.constant 1.000000e+00 : f32
    %104 = vector.broadcast %cst_37 : f32 to vector<64x64xf32>
    %105 = arith.addf %104, %103 : vector<64x64xf32>
    %106 = arith.divf %104, %105 : vector<64x64xf32>
    %107 = arith.mulf %101, %106 : vector<64x64xf32>
    %c0_38 = arith.constant 0 : index
    %c0_39 = arith.constant 0 : index
    %108 = vector.load %arg5[%c0_38, %c0_39] : memref<64x2112xf32, #tpu.memory_space<vmem>>, vector<64x2112xf32>
    %cst_40 = arith.constant dense<0.000000e+00> : vector<64x2112xf32>
    %109 = tpu.matmul %107, %108, %cst_40 {dimension_numbers = #tpu.dot_dimension_numbers<[1], [0], [0], [1], [0, 0, 1, 1], [], []>} : vector<64x64xf32>, vector<64x2112xf32>, vector<64x2112xf32> -> vector<64x2112xf32>
    %110 = vector.extract_strided_slice %109 {offsets = [0, 0], sizes = [64, 1024], strides = [1, 1]} : vector<64x2112xf32> to vector<64x1024xf32>
    %111 = vector.extract_strided_slice %109 {offsets = [0, 1024], sizes = [64, 1024], strides = [1, 1]} : vector<64x2112xf32> to vector<64x1024xf32>
    %112 = vector.extract_strided_slice %109 {offsets = [0, 2048], sizes = [64, 64], strides = [1, 1]} : vector<64x2112xf32> to vector<64x64xf32>
    %113 = vector.broadcast %5 : vector<1x64xf32> to vector<64x64xf32>
    %114 = arith.addf %112, %113 : vector<64x64xf32>
    %cst_41 = arith.constant 0.000000e+00 : f32
    %115 = vector.broadcast %cst_41 : f32 to vector<64x64xf32>
    %116 = arith.maximumf %114, %115 : vector<64x64xf32>
    %117 = math.absf %114 : vector<64x64xf32>
    %cst_42 = arith.constant 0.000000e+00 : f32
    %118 = vector.broadcast %cst_42 : f32 to vector<64x64xf32>
    %119 = arith.subf %118, %117 : vector<64x64xf32>
    %120 = math.exp %119 : vector<64x64xf32>
    %cst_43 = arith.constant 1.000000e+00 : f32
    %121 = vector.broadcast %cst_43 : f32 to vector<64x64xf32>
    %122 = arith.addf %121, %120 : vector<64x64xf32>
    %123 = math.log %122 : vector<64x64xf32>
    %124 = arith.addf %116, %123 : vector<64x64xf32>
    %125 = tpu.concatenate %124, %124, %124, %124, %124, %124, %124, %124, %124, %124, %124, %124, %124, %124, %124, %124 in 1 : vector<64x64xf32>, vector<64x64xf32>, vector<64x64xf32>, vector<64x64xf32>, vector<64x64xf32>, vector<64x64xf32>, vector<64x64xf32>, vector<64x64xf32>, vector<64x64xf32>, vector<64x64xf32>, vector<64x64xf32>, vector<64x64xf32>, vector<64x64xf32>, vector<64x64xf32>, vector<64x64xf32>, vector<64x64xf32> -> vector<64x1024xf32>
    %126 = arith.mulf %124, %107 : vector<64x64xf32>
    %127 = tpu.concatenate %126, %126, %126, %126, %126, %126, %126, %126, %126, %126, %126, %126, %126, %126, %126, %126 in 1 : vector<64x64xf32>, vector<64x64xf32>, vector<64x64xf32>, vector<64x64xf32>, vector<64x64xf32>, vector<64x64xf32>, vector<64x64xf32>, vector<64x64xf32>, vector<64x64xf32>, vector<64x64xf32>, vector<64x64xf32>, vector<64x64xf32>, vector<64x64xf32>, vector<64x64xf32>, vector<64x64xf32>, vector<64x64xf32> -> vector<64x1024xf32>
    %c0_44 = arith.constant 0 : index
    %c0_45 = arith.constant 0 : index
    %128 = vector.load %arg3[%c0_44, %c0_45] : memref<1x1024xf32, #tpu.memory_space<vmem>>, vector<1x1024xf32>
    %129 = vector.broadcast %128 : vector<1x1024xf32> to vector<64x1024xf32>
    %130 = arith.mulf %125, %129 : vector<64x1024xf32>
    %131 = math.exp %130 : vector<64x1024xf32>
    %132 = arith.mulf %127, %110 : vector<64x1024xf32>
    %133 = tpu.iota {dimensions = array<i32: 0>} : vector<64x1024xi32>
    %c1_i32_46 = arith.constant 1 : i32
    %134 = vector.broadcast %c1_i32_46 : i32 to vector<64x1024xi32>
    %135 = arith.cmpi sge, %133, %134 : vector<64x1024xi32>
    %c1_i32_47 = arith.constant 1 : i32
    %136 = tpu.dynamic_rotate %132 by %c1_i32_47 dim 0 : vector<64x1024xf32>, i32 -> vector<64x1024xf32>
    %cst_48 = arith.constant 0.000000e+00 : f32
    %137 = vector.broadcast %cst_48 : f32 to vector<64x1024xf32>
    %138 = arith.select %135, %136, %137 : vector<64x1024xi1>, vector<64x1024xf32>
    %139 = arith.mulf %131, %138 : vector<64x1024xf32>
    %140 = arith.addf %139, %132 : vector<64x1024xf32>
    %c1_i32_49 = arith.constant 1 : i32
    %141 = tpu.dynamic_rotate %131 by %c1_i32_49 dim 0 : vector<64x1024xf32>, i32 -> vector<64x1024xf32>
    %cst_50 = arith.constant 1.000000e+00 : f32
    %142 = vector.broadcast %cst_50 : f32 to vector<64x1024xf32>
    %143 = arith.select %135, %141, %142 : vector<64x1024xi1>, vector<64x1024xf32>
    %144 = arith.mulf %131, %143 : vector<64x1024xf32>
    %c2_i32_51 = arith.constant 2 : i32
    %145 = vector.broadcast %c2_i32_51 : i32 to vector<64x1024xi32>
    %146 = arith.cmpi sge, %133, %145 : vector<64x1024xi32>
    %c2_i32_52 = arith.constant 2 : i32
    %147 = tpu.dynamic_rotate %140 by %c2_i32_52 dim 0 : vector<64x1024xf32>, i32 -> vector<64x1024xf32>
    %cst_53 = arith.constant 0.000000e+00 : f32
    %148 = vector.broadcast %cst_53 : f32 to vector<64x1024xf32>
    %149 = arith.select %146, %147, %148 : vector<64x1024xi1>, vector<64x1024xf32>
    %150 = arith.mulf %144, %149 : vector<64x1024xf32>
    %151 = arith.addf %150, %140 : vector<64x1024xf32>
    %c2_i32_54 = arith.constant 2 : i32
    %152 = tpu.dynamic_rotate %144 by %c2_i32_54 dim 0 : vector<64x1024xf32>, i32 -> vector<64x1024xf32>
    %cst_55 = arith.constant 1.000000e+00 : f32
    %153 = vector.broadcast %cst_55 : f32 to vector<64x1024xf32>
    %154 = arith.select %146, %152, %153 : vector<64x1024xi1>, vector<64x1024xf32>
    %155 = arith.mulf %144, %154 : vector<64x1024xf32>
    %c4_i32_56 = arith.constant 4 : i32
    %156 = vector.broadcast %c4_i32_56 : i32 to vector<64x1024xi32>
    %157 = arith.cmpi sge, %133, %156 : vector<64x1024xi32>
    %c4_i32_57 = arith.constant 4 : i32
    %158 = tpu.dynamic_rotate %151 by %c4_i32_57 dim 0 : vector<64x1024xf32>, i32 -> vector<64x1024xf32>
    %cst_58 = arith.constant 0.000000e+00 : f32
    %159 = vector.broadcast %cst_58 : f32 to vector<64x1024xf32>
    %160 = arith.select %157, %158, %159 : vector<64x1024xi1>, vector<64x1024xf32>
    %161 = arith.mulf %155, %160 : vector<64x1024xf32>
    %162 = arith.addf %161, %151 : vector<64x1024xf32>
    %c4_i32_59 = arith.constant 4 : i32
    %163 = tpu.dynamic_rotate %155 by %c4_i32_59 dim 0 : vector<64x1024xf32>, i32 -> vector<64x1024xf32>
    %cst_60 = arith.constant 1.000000e+00 : f32
    %164 = vector.broadcast %cst_60 : f32 to vector<64x1024xf32>
    %165 = arith.select %157, %163, %164 : vector<64x1024xi1>, vector<64x1024xf32>
    %166 = arith.mulf %155, %165 : vector<64x1024xf32>
    %c8_i32 = arith.constant 8 : i32
    %167 = vector.broadcast %c8_i32 : i32 to vector<64x1024xi32>
    %168 = arith.cmpi sge, %133, %167 : vector<64x1024xi32>
    %c8_i32_61 = arith.constant 8 : i32
    %169 = tpu.dynamic_rotate %162 by %c8_i32_61 dim 0 : vector<64x1024xf32>, i32 -> vector<64x1024xf32>
    %cst_62 = arith.constant 0.000000e+00 : f32
    %170 = vector.broadcast %cst_62 : f32 to vector<64x1024xf32>
    %171 = arith.select %168, %169, %170 : vector<64x1024xi1>, vector<64x1024xf32>
    %172 = arith.mulf %166, %171 : vector<64x1024xf32>
    %173 = arith.addf %172, %162 : vector<64x1024xf32>
    %c8_i32_63 = arith.constant 8 : i32
    %174 = tpu.dynamic_rotate %166 by %c8_i32_63 dim 0 : vector<64x1024xf32>, i32 -> vector<64x1024xf32>
    %cst_64 = arith.constant 1.000000e+00 : f32
    %175 = vector.broadcast %cst_64 : f32 to vector<64x1024xf32>
    %176 = arith.select %168, %174, %175 : vector<64x1024xi1>, vector<64x1024xf32>
    %177 = arith.mulf %166, %176 : vector<64x1024xf32>
    %c16_i32 = arith.constant 16 : i32
    %178 = vector.broadcast %c16_i32 : i32 to vector<64x1024xi32>
    %179 = arith.cmpi sge, %133, %178 : vector<64x1024xi32>
    %c16_i32_65 = arith.constant 16 : i32
    %180 = tpu.dynamic_rotate %173 by %c16_i32_65 dim 0 : vector<64x1024xf32>, i32 -> vector<64x1024xf32>
    %cst_66 = arith.constant 0.000000e+00 : f32
    %181 = vector.broadcast %cst_66 : f32 to vector<64x1024xf32>
    %182 = arith.select %179, %180, %181 : vector<64x1024xi1>, vector<64x1024xf32>
    %183 = arith.mulf %177, %182 : vector<64x1024xf32>
    %184 = arith.addf %183, %173 : vector<64x1024xf32>
    %c16_i32_67 = arith.constant 16 : i32
    %185 = tpu.dynamic_rotate %177 by %c16_i32_67 dim 0 : vector<64x1024xf32>, i32 -> vector<64x1024xf32>
    %cst_68 = arith.constant 1.000000e+00 : f32
    %186 = vector.broadcast %cst_68 : f32 to vector<64x1024xf32>
    %187 = arith.select %179, %185, %186 : vector<64x1024xi1>, vector<64x1024xf32>
    %188 = arith.mulf %177, %187 : vector<64x1024xf32>
    %c32_i32 = arith.constant 32 : i32
    %189 = vector.broadcast %c32_i32 : i32 to vector<64x1024xi32>
    %190 = arith.cmpi sge, %133, %189 : vector<64x1024xi32>
    %c32_i32_69 = arith.constant 32 : i32
    %191 = tpu.dynamic_rotate %184 by %c32_i32_69 dim 0 : vector<64x1024xf32>, i32 -> vector<64x1024xf32>
    %cst_70 = arith.constant 0.000000e+00 : f32
    %192 = vector.broadcast %cst_70 : f32 to vector<64x1024xf32>
    %193 = arith.select %190, %191, %192 : vector<64x1024xi1>, vector<64x1024xf32>
    %194 = arith.mulf %188, %193 : vector<64x1024xf32>
    %195 = arith.addf %194, %184 : vector<64x1024xf32>
    %196 = arith.mulf %195, %111 : vector<64x1024xf32>
    %197 = vector.extract_strided_slice %196 {offsets = [0, 0], sizes = [64, 512], strides = [1, 1]} : vector<64x1024xf32> to vector<64x512xf32>
    %198 = vector.extract_strided_slice %196 {offsets = [0, 512], sizes = [64, 512], strides = [1, 1]} : vector<64x1024xf32> to vector<64x512xf32>
    %199 = arith.addf %197, %198 : vector<64x512xf32>
    %200 = vector.extract_strided_slice %199 {offsets = [0, 0], sizes = [64, 256], strides = [1, 1]} : vector<64x512xf32> to vector<64x256xf32>
    %201 = vector.extract_strided_slice %199 {offsets = [0, 256], sizes = [64, 256], strides = [1, 1]} : vector<64x512xf32> to vector<64x256xf32>
    %202 = arith.addf %200, %201 : vector<64x256xf32>
    %203 = vector.extract_strided_slice %202 {offsets = [0, 0], sizes = [64, 128], strides = [1, 1]} : vector<64x256xf32> to vector<64x128xf32>
    %204 = vector.extract_strided_slice %202 {offsets = [0, 128], sizes = [64, 128], strides = [1, 1]} : vector<64x256xf32> to vector<64x128xf32>
    %205 = arith.addf %203, %204 : vector<64x128xf32>
    %206 = vector.extract_strided_slice %205 {offsets = [0, 0], sizes = [64, 64], strides = [1, 1]} : vector<64x128xf32> to vector<64x64xf32>
    %207 = vector.extract_strided_slice %205 {offsets = [0, 64], sizes = [64, 64], strides = [1, 1]} : vector<64x128xf32> to vector<64x64xf32>
    %208 = arith.addf %206, %207 : vector<64x64xf32>
    %209 = vector.broadcast %6 : vector<1x64xf32> to vector<64x64xf32>
    %210 = arith.mulf %107, %209 : vector<64x64xf32>
    %211 = arith.addf %208, %210 : vector<64x64xf32>
    %212 = arith.negf %32 : vector<64x64xf32>
    %213 = math.exp %212 : vector<64x64xf32>
    %cst_71 = arith.constant 1.000000e+00 : f32
    %214 = vector.broadcast %cst_71 : f32 to vector<64x64xf32>
    %215 = arith.addf %214, %213 : vector<64x64xf32>
    %216 = arith.divf %214, %215 : vector<64x64xf32>
    %217 = arith.mulf %32, %216 : vector<64x64xf32>
    %218 = arith.mulf %211, %217 : vector<64x64xf32>
    %c0_72 = arith.constant 0 : index
    %c0_73 = arith.constant 0 : index
    %219 = vector.load %arg6[%c0_72, %c0_73] : memref<64x32xf32, #tpu.memory_space<vmem>>, vector<64x32xf32>
    %cst_74 = arith.constant dense<0.000000e+00> : vector<64x32xf32>
    %220 = tpu.matmul %218, %219, %cst_74 {dimension_numbers = #tpu.dot_dimension_numbers<[1], [0], [0], [1], [0, 0, 1, 1], [], []>} : vector<64x64xf32>, vector<64x32xf32>, vector<64x32xf32> -> vector<64x32xf32>
    %cst_75 = arith.constant dense<0.000000e+00> : vector<64xf32>
    %221 = vector.multi_reduction <add>, %220, %cst_75 [1] : vector<64x32xf32> to vector<64xf32>
    %222 = vector.shape_cast %221 : vector<64xf32> to vector<64x1xf32>
    %cst_76 = arith.constant 3.200000e+01 : f32
    %223 = vector.broadcast %cst_76 : f32 to vector<64x1xf32>
    %224 = arith.divf %222, %223 : vector<64x1xf32>
    %225 = vector.broadcast %224 : vector<64x1xf32> to vector<64x32xf32>
    %226 = arith.subf %220, %225 : vector<64x32xf32>
    %227 = arith.mulf %226, %226 : vector<64x32xf32>
    %cst_77 = arith.constant dense<0.000000e+00> : vector<64xf32>
    %228 = vector.multi_reduction <add>, %227, %cst_77 [1] : vector<64x32xf32> to vector<64xf32>
    %229 = vector.shape_cast %228 : vector<64xf32> to vector<64x1xf32>
    %cst_78 = arith.constant 3.200000e+01 : f32
    %230 = vector.broadcast %cst_78 : f32 to vector<64x1xf32>
    %231 = arith.divf %229, %230 : vector<64x1xf32>
    %232 = vector.broadcast %224 : vector<64x1xf32> to vector<64x32xf32>
    %233 = arith.subf %220, %232 : vector<64x32xf32>
    %cst_79 = arith.constant 9.99999974E-6 : f32
    %234 = vector.broadcast %cst_79 : f32 to vector<64x1xf32>
    %235 = arith.addf %231, %234 : vector<64x1xf32>
    %236 = math.rsqrt %235 : vector<64x1xf32>
    %237 = vector.broadcast %236 : vector<64x1xf32> to vector<64x32xf32>
    %238 = arith.mulf %233, %237 : vector<64x32xf32>
    %239 = vector.broadcast %2 : vector<1x32xf32> to vector<64x32xf32>
    %240 = arith.mulf %238, %239 : vector<64x32xf32>
    %241 = vector.broadcast %3 : vector<1x32xf32> to vector<64x32xf32>
    %242 = arith.addf %240, %241 : vector<64x32xf32>
    %c0_80 = arith.constant 0 : index
    %c0_81 = arith.constant 0 : index
    %243 = vector.load %arg7[%c0_80, %c0_81] : memref<32x32xf32, #tpu.memory_space<vmem>>, vector<32x32xf32>
    %cst_82 = arith.constant dense<0.000000e+00> : vector<32x64xf32>
    %244 = tpu.matmul %243, %242, %cst_82 {dimension_numbers = #tpu.dot_dimension_numbers<[1], [1], [0], [0], [0, 0, 1, 0], [], []>} : vector<32x32xf32>, vector<64x32xf32>, vector<32x64xf32> -> vector<32x64xf32>
    %c0_83 = arith.constant 0 : index
    %c0_84 = arith.constant 0 : index
    %245 = vector.load %arg8[%c0_83, %c0_84] : memref<32x1xf32, #tpu.memory_space<vmem>>, vector<32x1xf32>
    %246 = vector.broadcast %245 : vector<32x1xf32> to vector<32x64xf32>
    %247 = arith.addf %244, %246 : vector<32x64xf32>
    %c0_85 = arith.constant 0 : index
    %c0_86 = arith.constant 0 : index
    %c0_87 = arith.constant 0 : index
    %248 = vector.load %arg9[%c0_85, %c0_86, %c0_87] : memref<1x32x64xf32, #tpu.memory_space<vmem>>, vector<1x32x64xf32>
    %249 = vector.shape_cast %248 : vector<1x32x64xf32> to vector<32x64xf32>
    %250 = vector.shape_cast %247 : vector<32x64xf32> to vector<1x32x64xf32>
    tpu.vector_store %arg9[%c0_85, %c0_86, %c0_87], %250 {strides = array<i32>} : memref<1x32x64xf32, #tpu.memory_space<vmem>>, vector<1x32x64xf32>,
    return
  }
  func.func @transform_0(%arg0: i32) -> (i32, i32, i32) {
    %c0_i32 = arith.constant 0 : i32
    %c0_i32_0 = arith.constant 0 : i32
    %c0_i32_1 = arith.constant 0 : i32
    return %arg0, %c0_i32, %c0_i32_0 : i32, i32, i32
  }
  func.func @transform_1(%arg0: i32) -> (i32, i32) {
    %c0_i32 = arith.constant 0 : i32
    %c0_i32_0 = arith.constant 0 : i32
    %c0_i32_1 = arith.constant 0 : i32
    return %c0_i32, %c0_i32_0 : i32, i32
  }
  func.func @transform_2(%arg0: i32) -> (i32, i32) {
    %c0_i32 = arith.constant 0 : i32
    %c0_i32_0 = arith.constant 0 : i32
    %c0_i32_1 = arith.constant 0 : i32
    return %c0_i32, %c0_i32_0 : i32, i32
  }
  func.func @transform_3(%arg0: i32) -> (i32, i32) {
    %c0_i32 = arith.constant 0 : i32
    %c0_i32_0 = arith.constant 0 : i32
    %c0_i32_1 = arith.constant 0 : i32
    return %c0_i32, %c0_i32_0 : i32, i32
  }
  func.func @transform_4(%arg0: i32) -> (i32, i32) {
    %c0_i32 = arith.constant 0 : i32
    %c0_i32_0 = arith.constant 0 : i32
    %c0_i32_1 = arith.constant 0 : i32
    return %c0_i32, %c0_i32_0 : i32, i32
  }
  func.func @transform_5(%arg0: i32) -> (i32, i32) {
    %c0_i32 = arith.constant 0 : i32
    %c0_i32_0 = arith.constant 0 : i32
    %c0_i32_1 = arith.constant 0 : i32
    return %c0_i32, %c0_i32_0 : i32, i32
  }
  func.func @transform_6(%arg0: i32) -> (i32, i32) {
    %c0_i32 = arith.constant 0 : i32
    %c0_i32_0 = arith.constant 0 : i32
    %c0_i32_1 = arith.constant 0 : i32
    return %c0_i32, %c0_i32_0 : i32, i32
  }
  func.func @transform_7(%arg0: i32) -> (i32, i32) {
    %c0_i32 = arith.constant 0 : i32
    %c0_i32_0 = arith.constant 0 : i32
    %c0_i32_1 = arith.constant 0 : i32
    return %c0_i32, %c0_i32_0 : i32, i32
  }
  func.func @transform_8(%arg0: i32) -> (i32, i32, i32) {
    %c0_i32 = arith.constant 0 : i32
    %c0_i32_0 = arith.constant 0 : i32
    %c0_i32_1 = arith.constant 0 : i32
    return %arg0, %c0_i32, %c0_i32_0 : i32, i32, i32
  }
}

</mosaic_0001>

<bundles_post_ra>
// kernel: pcvm_forward.1
= control target key start
LH: loop header
LB: loop body
LE: loop exit
PB: predicated region body
PF: predicated region fallthrough
CT: control target
= control target key end

     0   :  { %13 = vsyncpa [#allocation3], 0  ;;  %s13871_s0 = inlined_call_operand.vmem [shape: f32[2,64,32], index: 0, kind: input, shape index: {}]   ;;  %s13872_s1 = inlined_call_operand.hbm [shape: f32[16,128], index: 1, kind: input, shape index: {}]   ;;  %s13873_s2 = inlined_call_operand.vmem [shape: f32[1,1024], index: 2, kind: input, shape index: {}]   ;;  %s13874_s3 = inlined_call_operand.hbm [shape: f32[32,128], index: 3, kind: input, shape index: {}]   ;;  %s13875_s4 = inlined_call_operand.hbm [shape: f32[64,2112], index: 4, kind: input, shape index: {}]   ;;  %s13876_s5 = inlined_call_operand.vmem [shape: f32[64,32], index: 5, kind: input, shape index: {}]   ;;  %s13877_s6 = inlined_call_operand.hbm [shape: f32[32,32], index: 6, kind: input, shape index: {}]   ;;  %s13878_s7 = inlined_call_operand.vmem [shape: f32[32,1], index: 7, kind: input, shape index: {}]   ;;  %s13879_s8 = inlined_call_operand.vmem [shape: f32[2,32,64], index: 8, kind: output, shape index: {}]  }
   0x1   :  { %14 = vsyncpa [#allocation5], 0 }
   0x2   :  { %15 = vsyncpa [#allocation8], 0  ;;  %s7115_s27 = smov 0  }
   0x3 LB: > { %s7121_s28 = sadd.s32 4294967295, %s7057_s27   ;;  %p6117_p0 = scmp.ge.s32.totalorder %s7057_s27, 1  ;;  %s7057_s27 = sphi %s7115_s27, %s21_s27  }
   0x4   : > { %p225_p1 = scmp.lt.s32.totalorder %s7057_s27, 3  ;;  %p13880_p2 = scmp.eq.s32.totalorder %s7121_s28, 0 }
   0x5   : > { %s7059_s30 = smov [#allocation4]   ;;  %s7060_s10 = smov [#allocation2]  }
   0x6   : > { %p7126_p3 = pnand %p6117_p0, %p225_p1  ;;  %s253_s9 = sshll.u32 %s7059_s30, 4  ;;  %s7130_s9 = int_to_ptr.vmem [resolvable:$true] %s253_s9 }
   0x7   : > { %s237_s11 = sshll.u32 %s7060_s10, 4  ;;  %s7061_s13 = smov [#allocation6]   ;;  %s7134_s11 = int_to_ptr.vmem [resolvable:$true] %s237_s11 }
   0x8   : > { %s14639_s29 = scalar_select %p7126_p3, 1, 0 }
   0x9   : > { %p6627_p4 = pneg %p7126_p3  ;;  %s266_s14 = sshll.u32 %s7061_s13, 4  ;;  %s7142_s14 = int_to_ptr.vmem [resolvable:$true] %s266_s14 }
   0xa   : > { %s6927_s17 = scalar_lea.hbm %s13874_s3, 512 }
   0xb   : > { %p7138_p5 = pnand %p13880_p2, %p6627_p4  ;;  %p6928_p6 = scmp.ne.s32.totalorder %s13874_s3, %s6927_s17 }
   0xc   : > { %p6934_p10 = scmp.lt.u32.totalorder %s6927_s17, %s13874_s3 }
   0xd   : > { %p7152_p7 = pneg %p7138_p5 }
   0xf   : > { %p6930_p8 = pnand %p7152_p7, %p6928_p6 }
  0x11   : > { %p6931_p9 = pneg %p6930_p8 }
  0x13   : > { %p6936_p11 = pnand %p6934_p10, %p6931_p9 }
  0x15   : > { %6939 = shalt.err (!%p6936_p11)
}
  0x16   : > { %s6940_s23 = scalar_lea.vmem %s7130_s9, 512  ;;  %p6948_p1 = scmp.lt.s32.totalorder %s7130_s9, %s7130_s9 }
  0x17   : > { %p6941_p12 = scmp.ne.s32.totalorder %s7130_s9, %s6940_s23  ;;  %p6949_p4 = scmp.lt.s32.totalorder %s6940_s23, %s6940_s23 }
  0x19   : > { %p6943_p13 = pnand %p6941_p12, %p7152_p7  ;;  %p6950_p6 = por %p6949_p4, %p6948_p1 }
  0x1b   : > { %p6944_p0 = pneg %p6943_p13 }
  0x1d   : > { %p6951_p8 = pnand %p6950_p6, %p6944_p0 }
  0x1f   : > { %6954 = shalt.err (!%p6951_p8)
}
  0x20   : > { %s7062_s24 = smov 128   ;;  %s7063_s25 = smov 8  }
  0x21   : > { %6633 = dma.hbm_to_vmem [thread:$0]  (!%p7138_p5), %s13874_s3, 512, %s7130_s9, [#allocation5], %s7062_s24, %s7062_s24, %s7063_s25  }
  0x22   : > { %s6955_s15 = scalar_lea.hbm %s13872_s1, 256 }
  0x23   : > { %p6956_p9 = scmp.ne.s32.totalorder %s13872_s1, %s6955_s15  ;;  %p6962_p12 = scmp.lt.u32.totalorder %s6955_s15, %s13872_s1 }
  0x25   : > { %p6958_p10 = pnand %p6956_p9, %p7152_p7 }
  0x27   : > { %p6959_p11 = pneg %p6958_p10 }
  0x29   : > { %p6964_p13 = pnand %p6962_p12, %p6959_p11 }
  0x2b   : > { %6967 = shalt.err (!%p6964_p13)
}
  0x2c   : > { %s6968_s9 = scalar_lea.vmem %s7134_s11, 256  ;;  %p6976_p6 = scmp.lt.s32.totalorder %s7134_s11, %s7134_s11 }
  0x2d   : > { %p6969_p0 = scmp.ne.s32.totalorder %s7134_s11, %s6968_s9  ;;  %p6977_p8 = scmp.lt.s32.totalorder %s6968_s9, %s6968_s9 }
  0x2f   : > { %p6971_p1 = pnand %p6969_p0, %p7152_p7  ;;  %p6978_p9 = por %p6977_p8, %p6976_p6 }
  0x31   : > { %p6972_p4 = pneg %p6971_p1 }
  0x33   : > { %p6979_p10 = pnand %p6978_p9, %p6972_p4 }
  0x35   : > { %6982 = shalt.err (!%p6979_p10)
}
  0x36   : > { %6630 = dma.hbm_to_vmem [thread:$0]  (!%p7138_p5), %s13872_s1, 256, %s7134_s11, [#allocation3], %s7062_s24, %s7062_s24, %s7063_s25  }
  0x37   : > { %s6983_s30 = scalar_lea.hbm %s13875_s4, 17408 }
  0x38   : > { %p6984_p11 = scmp.ne.s32.totalorder %s13875_s4, %s6983_s30  ;;  %p6990_p0 = scmp.lt.u32.totalorder %s6983_s30, %s13875_s4 }
  0x3a   : > { %p6986_p12 = pnand %p6984_p11, %p7152_p7 }
  0x3c   : > { %p6987_p13 = pneg %p6986_p12 }
  0x3e   : > { %p6992_p1 = pnand %p6990_p0, %p6987_p13 }
  0x40   : > { %6995 = shalt.err (!%p6992_p1)
}
  0x41   : > { %s6996_s11 = scalar_lea.vmem %s7142_s14, 17408  ;;  %p7004_p9 = scmp.lt.s32.totalorder %s7142_s14, %s7142_s14 }
  0x42   : > { %p6997_p4 = scmp.ne.s32.totalorder %s7142_s14, %s6996_s11  ;;  %p7005_p10 = scmp.lt.s32.totalorder %s6996_s11, %s6996_s11 }
  0x44   : > { %p6999_p6 = pnand %p6997_p4, %p7152_p7  ;;  %p7006_p11 = por %p7005_p10, %p7004_p9 }
  0x46   : > { %p7000_p8 = pneg %p6999_p6 }
  0x48   : > { %p7007_p12 = pnand %p7006_p11, %p7000_p8 }
  0x4a   : > { %7010 = shalt.err (!%p7007_p12)
}
  0x4b   : > { %s7064_s17 = smov 2176   ;;  %s7065_s18 = smov 136  }
  0x4c   : > { %6636 = dma.hbm_to_vmem [thread:$0]  (!%p7138_p5), %s13875_s4, 17408, %s7142_s14, [#allocation5], %s7064_s17, %s7064_s17, %s7065_s18  }
  0x4d   : > { %s7066_s21 = smov [#allocation7]   ;;  %s7011_s30 = scalar_lea.hbm %s13877_s6, 512 }
  0x4e   : > { %s282_s22 = sshll.u32 %s7066_s21, 4  ;;  %p7012_p13 = scmp.ne.s32.totalorder %s13877_s6, %s7011_s30  ;;  %s283_s22 = int_to_ptr.vmem [resolvable:$true] %s282_s22 }
  0x4f   : > { %p7018_p4 = scmp.lt.u32.totalorder %s7011_s30, %s13877_s6 }
  0x50   : > { %p7014_p0 = pnand %p7012_p13, %p7152_p7 }
  0x52   : > { %p7015_p1 = pneg %p7014_p0 }
  0x54   : > { %p7020_p6 = pnand %p7018_p4, %p7015_p1 }
  0x56   : > { %7023 = shalt.err (!%p7020_p6)
}
  0x57   : > { %s7024_s14 = scalar_lea.vmem %s283_s22, 512  ;;  %p7032_p11 = scmp.lt.s32.totalorder %s283_s22, %s283_s22 }
  0x58   : > { %p7025_p8 = scmp.ne.s32.totalorder %s283_s22, %s7024_s14  ;;  %p7033_p12 = scmp.lt.s32.totalorder %s7024_s14, %s7024_s14 }
  0x5a   : > { %p7027_p9 = pnand %p7025_p8, %p7152_p7  ;;  %p7034_p2 = por %p7033_p12, %p7032_p11 }
  0x5c   : > { %p7028_p10 = pneg %p7027_p9 }
  0x5e   : > { %p7035_p3 = pnand %p7034_p2, %p7028_p10 }
  0x60   : > { %7038 = shalt.err (!%p7035_p3)
}
  0x61   : > { %6639 = dma.hbm_to_vmem [thread:$0]  (!%p7138_p5), %s13877_s6, 512, %s283_s22, [#allocation8], %s7062_s24, %s7062_s24, %s7063_s25  }
  0x62   : > { %p14642_p13 = scmp.ne.s32.totalorder %s14639_s29, 0 }
  0x64   : > { %309 = sbr.rel (%p14642_p13) target bundleno = 2795 (0xaeb), region = 52 }
  0x6b   : > { %p14643_p7 = scmp.eq.s32.totalorder %s7121_s28, 0 }
  0x6d   : > { %7044 = dma.done.wait (%p14643_p7), [#allocation3], 256   ;;  %p14644_p0 = pmov %p14643_p7 }
  0x6f   : > { %7046 = vsyncadd (%p14644_p0), [#allocation3], 4294967040  ;;  %p14645_p2 = pmov %p14644_p0 }
  0x70   : > { %p14646_p3 = pmov %p14644_p0 }
  0x71   : > { %7048 = dma.done.wait (%p14645_p2), [#allocation5], 17920  }
  0x72   : > { %7050 = vsyncadd (%p14646_p3), [#allocation5], 4294949376  ;;  %p14647_p1 = pmov %p14644_p0 }
  0x73   : > { %p14648_p5 = pmov %p14644_p0 }
  0x74   : > { %7052 = dma.done.wait (%p14647_p1), [#allocation8], 512  }
  0x75   : > { %7054 = vsyncadd (%p14648_p5), [#allocation8], 4294966784  ;;  %p355_p4 = scmp.lt.s32.totalorder %s7121_s28, 1  ;;  %vm378_vm0 = vcmask 261120   ;;  %v508_v56 = vld [vmem:[#allocation4] sm:$0xff]  ;;  %v509_v57 = vld [vmem:[#allocation4 + $0x8] sm:$0xff] }
  0x76   : > { %v6419_v58 = vpack.c.bf16 %v509_v57, %v508_v56  ;;  %v510_v59 = vld [vmem:[#allocation4 + $0x10] sm:$0xff]  ;;  %v511_v60 = vld [vmem:[#allocation4 + $0x18] sm:$0xff]  ;;  %vm1245_vm15 = vcmask 523264   ;;  %s7068_s25 = smov 64  }
  0x77   : > { %s16351_s28 = smov (!%p355_p4, %s7121_s28), 1  ;;  %v6423_v61 = vpack.c.bf16 %v511_v60, %v510_v59  ;;  %v1112_v59 = vld [vmem:[#allocation6 + $0x18] sm:$0xff] }
  0x78   : > { %s6263_s29 = sshll.u32 %s16351_s28, 6  ;;  %6420 = vmatprep.subr.bf16.mxu0 %v6419_v58  ;;  %s6264_s26 = sshll.u32 %s16351_s28, 5 }
  0x79   : > { %s359_s24 = scalar_lea.vmem %s13871_s0, %s6263_s29  ;;  %6422 = vmatpush3.bf16.msra.mxu0 %v6419_v58  ;;  %v1127_v58 = vld [vmem:[#allocation6 + $0x90] sm:$0xff]  ;;  %s364_s13 = scalar_lea.vmem %s13879_s8, %s6264_s26 }
  0x7a   : > { %v365_v0 = vld [vmem:[%s359_s24] sm:$0xff]  ;;  %v367_v1 = vld [vmem:[%s359_s24 + $0x10] sm:$0xff]  ;;  %v366_v2 = vld [vmem:[%s359_s24 + $0x8] sm:$0xff]  ;;  %6424 = vmatprep.subr.bf16.mxu0 %v6423_v61 }
  0x7b   : > { %v379_v3 = vsel %vm378_vm0, %v365_v0, 0.0  ;;  %v385_v4 = vsel %vm378_vm0, %v367_v1, 0.0  ;;  %v368_v5 = vld [vmem:[%s359_s24 + $0x18] sm:$0xff]  ;;  %v382_v6 = vsel %vm378_vm0, %v366_v2, 0.0  ;;  %v369_v8 = vld [vmem:[%s359_s24 + $0x20] sm:$0xff]  ;;  %v370_v9 = vld [vmem:[%s359_s24 + $0x28] sm:$0xff] }
  0x7c   : > { %380 = vadd.xlane.f32.xlu0 %v379_v3  ;;  %386 = vadd.xlane.f32.xlu1 %v385_v4  ;;  %v388_v7 = vsel %vm378_vm0, %v368_v5, 0.0  ;;  %v391_v10 = vsel %vm378_vm0, %v369_v8, 0.0  ;;  %v394_v11 = vsel %vm378_vm0, %v370_v9, 0.0  ;;  %v371_v12 = vld [vmem:[%s359_s24 + $0x30] sm:$0xff]  ;;  %v372_v13 = vld [vmem:[%s359_s24 + $0x38] sm:$0xff] }
  0x7d   : > { %v397_v14 = vsel %vm378_vm0, %v371_v12, 0.0  ;;  %v400_v15 = vsel %vm378_vm0, %v372_v13, 0.0  ;;  %6426 = vmatpush3.bf16.msra.mxu0 %v6423_v61  ;;  %v1109_v61 = vld [vmem:[#allocation6] sm:$0xff] }
  0x80   : > { %383 = vadd.xlane.f32.xlu0 %v382_v6  ;;  %389 = vadd.xlane.f32.xlu1 %v388_v7 }
  0x84   : > { %392 = vadd.xlane.f32.xlu0 %v391_v10  ;;  %395 = vadd.xlane.f32.xlu1 %v394_v11 }
  0x88   : > { %398 = vadd.xlane.f32.xlu0 %v397_v14  ;;  %401 = vadd.xlane.f32.xlu1 %v400_v15 }
 0x109   : > { %v381_v16 = vpop.xlane.xlu0 %380  ;;  %v387_v17 = vpop.xlane.xlu1 %386 }
 0x10a   : > { %v404_v18 = vmul.f32 0.03125, %v381_v16  ;;  %v406_v19 = vmul.f32 0.03125, %v387_v17 }
 0x10c   : > { %v7276_v20 = vsub.f32 %v365_v0, %v404_v18  ;;  %v7278_v21 = vsub.f32 %v367_v1, %v406_v19 }
 0x10d   : > { %v384_v22 = vpop.xlane.xlu0 %383  ;;  %v390_v23 = vpop.xlane.xlu1 %389 }
 0x10e   : > { %v405_v24 = vmul.f32 0.03125, %v384_v22  ;;  %v407_v25 = vmul.f32 0.03125, %v390_v23  ;;  %v420_v26 = vmul.f32 %v7276_v20, %v7276_v20  ;;  %v422_v27 = vmul.f32 %v7278_v21, %v7278_v21  ;;  %v6132_v22 = vld [vmem:[#allocation2] ss:$0 sm:$0xff] }
 0x110   : > { %v7284_v28 = vsub.f32 %v366_v2, %v405_v24  ;;  %v7286_v29 = vsub.f32 %v368_v5, %v407_v25  ;;  %v428_v30 = vsel %vm378_vm0, %v420_v26, 0.0  ;;  %v434_v33 = vsel %vm378_vm0, %v422_v27, 0.0  ;;  %v6133_v26 = vld [vmem:[#allocation2 + $0x1] ss:$0 sm:$0xff] }
 0x111   : > { %429 = vadd.xlane.f32.xlu0 %v428_v30  ;;  %v393_v31 = vpop.xlane.xlu0 %392  ;;  %v396_v32 = vpop.xlane.xlu1 %395 }
 0x112   : > { %v408_v34 = vmul.f32 0.03125, %v393_v31  ;;  %v409_v35 = vmul.f32 0.03125, %v396_v32  ;;  %v421_v36 = vmul.f32 %v7284_v28, %v7284_v28  ;;  %v423_v37 = vmul.f32 %v7286_v29, %v7286_v29 }
 0x114   : > { %v7294_v38 = vsub.f32 %v369_v8, %v408_v34  ;;  %v7296_v39 = vsub.f32 %v370_v9, %v409_v35  ;;  %v431_v40 = vsel %vm378_vm0, %v421_v36, 0.0  ;;  %v437_v43 = vsel %vm378_vm0, %v423_v37, 0.0 }
 0x115   : > { %435 = vadd.xlane.f32.xlu0 %v434_v33  ;;  %432 = vadd.xlane.f32.xlu1 %v431_v40  ;;  %v399_v41 = vpop.xlane.xlu0 %398  ;;  %v402_v42 = vpop.xlane.xlu1 %401 }
 0x116   : > { %v410_v44 = vmul.f32 0.03125, %v399_v41  ;;  %v411_v45 = vmul.f32 0.03125, %v402_v42  ;;  %v424_v46 = vmul.f32 %v7294_v38, %v7294_v38  ;;  %v425_v47 = vmul.f32 %v7296_v39, %v7296_v39 }
 0x118   : > { %v7304_v48 = vsub.f32 %v371_v12, %v410_v44  ;;  %v7306_v49 = vsub.f32 %v372_v13, %v411_v45  ;;  %v440_v50 = vsel %vm378_vm0, %v424_v46, 0.0  ;;  %v443_v51 = vsel %vm378_vm0, %v425_v47, 0.0 }
 0x119   : > { %438 = vadd.xlane.f32.xlu1 %v437_v43  ;;  %441 = vadd.xlane.f32.xlu0 %v440_v50 }
 0x11a   : > { %v426_v52 = vmul.f32 %v7304_v48, %v7304_v48  ;;  %v427_v53 = vmul.f32 %v7306_v49, %v7306_v49 }
 0x11c   : > { %v446_v54 = vsel %vm378_vm0, %v426_v52, 0.0  ;;  %v449_v55 = vsel %vm378_vm0, %v427_v53, 0.0 }
 0x11d   : > { %444 = vadd.xlane.f32.xlu1 %v443_v51  ;;  %447 = vadd.xlane.f32.xlu0 %v446_v54 }
 0x121   : > { %450 = vadd.xlane.f32.xlu1 %v449_v55 }
 0x19e   : > { %v430_v62 = vpop.xlane.xlu0 %429 }
 0x19f   : > { %v452_v63 = vmul.f32 0.03125, %v430_v62  ;;  %v1126_v62 = vld [vmem:[#allocation6 + $0x88] sm:$0xff] }
 0x1a1   : > { %v460_v0 = vadd.f32 1e-05, %v452_v63  ;;  %v1129_v63 = vld [vmem:[#allocation6 + $0xa0] sm:$0xff] }
 0x1a2   : > { %v433_v1 = vpop.xlane.xlu1 %432  ;;  %v436_v2 = vpop.xlane.xlu0 %435 }
 0x1a3   : > { %6669 = vrsqrt.f32 %v460_v0  ;;  %v453_v3 = vmul.f32 0.03125, %v433_v1  ;;  %v454_v4 = vmul.f32 0.03125, %v436_v2  ;;  %v6429_v0 = vpack.c.bf16 %v1126_v62, %v1109_v61  ;;  %v1111_v2 = vld [vmem:[#allocation6 + $0x10] sm:$0xff] }
 0x1a4   : > { %v6443_v1 = vpack.c.bf16 %v1129_v63, %v1112_v59 }
 0x1a5   : > { %v461_v5 = vadd.f32 1e-05, %v453_v3  ;;  %v462_v6 = vadd.f32 1e-05, %v454_v4  ;;  %v1144_v4 = vld [vmem:[#allocation6 + $0x118] sm:$0xff] }
 0x1a6   : > { %v439_v7 = vpop.xlane.xlu1 %438  ;;  %v442_v8 = vpop.xlane.xlu0 %441  ;;  %6444 = vmatprep.subr.bf16.mxu0 %v6443_v1  ;;  %v7363_v1 = vld [vmem:[#allocation2 + $0xa] ss:$0 sm:$0xff] }
 0x1a7   : > { %6671 = vrsqrt.f32 %v461_v5  ;;  %v455_v9 = vmul.f32 0.03125, %v439_v7  ;;  %v456_v10 = vmul.f32 0.03125, %v442_v8  ;;  %v1161_v5 = vld [vmem:[#allocation6 + $0x1a0] sm:$0xff]  ;;  %v1143_v8 = vld [vmem:[#allocation6 + $0x110] sm:$0xff] }
 0x1a8   : > { %6673 = vrsqrt.f32 %v462_v6  ;;  %v1146_v6 = vld [vmem:[#allocation6 + $0x128] sm:$0xff]  ;;  %v6431_v7 = vpack.c.bf16 %v1161_v5, %v1144_v4 }
 0x1a9   : > { %v463_v11 = vadd.f32 1e-05, %v455_v9  ;;  %v464_v12 = vadd.f32 1e-05, %v456_v10  ;;  %v1160_v9 = vld [vmem:[#allocation6 + $0x198] sm:$0xff]  ;;  %v1163_v10 = vld [vmem:[#allocation6 + $0x1b0] sm:$0xff] }
 0x1aa   : > { %v445_v13 = vpop.xlane.xlu1 %444  ;;  %v448_v14 = vpop.xlane.xlu0 %447 }
 0x1ab   : > { %6675 = vrsqrt.f32 %v463_v11  ;;  %v457_v15 = vmul.f32 0.03125, %v445_v13  ;;  %v458_v16 = vmul.f32 0.03125, %v448_v14  ;;  %v6433_v11 = vpack.c.bf16 %v1160_v9, %v1143_v8  ;;  %v1145_v13 = vld [vmem:[#allocation6 + $0x120] sm:$0xff]  ;;  %v1162_v14 = vld [vmem:[#allocation6 + $0x1a8] sm:$0xff]  ;;  %v7387_v9 = vld [vmem:[#allocation2 + $0xb] ss:$0 sm:$0xff] }
 0x1ac   : > { %6677 = vrsqrt.f32 %v464_v12  ;;  %v6447_v12 = vpack.c.bf16 %v1163_v10, %v1146_v6  ;;  %v7389_v10 = vld [vmem:[#allocation2 + $0xc] ss:$0 sm:$0xff] }
 0x1ad   : > { %v6670_v17 = vpop.eup %6669  ;;  %v465_v18 = vadd.f32 1e-05, %v457_v15  ;;  %v466_v19 = vadd.f32 1e-05, %v458_v16  ;;  %v1178_v15 = vld [vmem:[#allocation6 + $0x228] sm:$0xff]  ;;  %v6449_v16 = vpack.c.bf16 %v1162_v14, %v1145_v13 }
 0x1ae   : > { %v451_v23 = vpop.xlane.xlu1 %450  ;;  %v476_v24 = vmul.f32 %v6670_v17, %v7276_v20  ;;  %v1195_v17 = vld [vmem:[#allocation6 + $0x2b0] sm:$0xff] }
 0x1af   : > { %6679 = vrsqrt.f32 %v465_v18  ;;  %v459_v25 = vmul.f32 0.03125, %v451_v23  ;;  %v1177_v18 = vld [vmem:[#allocation6 + $0x220] sm:$0xff]  ;;  %v6435_v23 = vpack.c.bf16 %v1195_v17, %v1178_v15  ;;  %v7402_v15 = vld [vmem:[#allocation2 + $0xd] ss:$0 sm:$0xff] }
 0x1b0   : > { %6681 = vrsqrt.f32 %v466_v19  ;;  %v488_v27 = vmul.f32 %v6132_v22, %v476_v24  ;;  %v1194_v19 = vld [vmem:[#allocation6 + $0x2a8] sm:$0xff] }
 0x1b1   : > { %v6672_v30 = vpop.eup %6671  ;;  %v467_v31 = vadd.f32 1e-05, %v459_v25  ;;  %v6437_v24 = vpack.c.bf16 %v1194_v19, %v1177_v18  ;;  %v1180_v25 = vld [vmem:[#allocation6 + $0x238] sm:$0xff] }
 0x1b2   : > { %v6674_v32 = vpop.eup %6673  ;;  %v500_v33 = vadd.f32 %v6133_v26, %v488_v27  ;;  %v477_v34 = vmul.f32 %v6672_v30, %v7284_v28  ;;  %v1179_v27 = vld [vmem:[#allocation6 + $0x230] sm:$0xff] }
 0x1b3   : > { %6683 = vrsqrt.f32 %v467_v31  ;;  %v478_v35 = vmul.f32 %v6674_v32, %v7278_v21  ;;  %v1196_v31 = vld [vmem:[#allocation6 + $0x2b8] sm:$0xff] }
 0x1b4   : > { %6329 = vmatprep.mubr.msk.f32.mxu0 %vm378_vm0, %v500_v33  ;;  %v489_v36 = vmul.f32 %v6132_v22, %v477_v34  ;;  %v1212_v32 = vld [vmem:[#allocation6 + $0x338] sm:$0xff]  ;;  %v1229_v33 = vld [vmem:[#allocation6 + $0x3c0] sm:$0xff]  ;;  %v6453_v34 = vpack.c.bf16 %v1196_v31, %v1179_v27 }
 0x1b5   : > { %v6676_v37 = vpop.eup %6675  ;;  %v490_v40 = vmul.f32 %v6132_v22, %v478_v35  ;;  %v6439_v35 = vpack.c.bf16 %v1229_v33, %v1212_v32 }
 0x1b6   : > { %v6678_v20 = vpop.eup %6677  ;;  %v501_v41 = vadd.f32 %v6133_v26, %v489_v36  ;;  %v479_v42 = vmul.f32 %v6676_v37, %v7286_v29  ;;  %v1211_v36 = vld [vmem:[#allocation6 + $0x330] sm:$0xff]  ;;  %v1228_v37 = vld [vmem:[#allocation6 + $0x3b8] sm:$0xff] }
 0x1b7   : > { %v502_v43 = vadd.f32 %v6133_v26, %v490_v40  ;;  %v480_v44 = vmul.f32 %v6678_v20, %v7294_v38  ;;  %v1214_v40 = vld [vmem:[#allocation6 + $0x348] sm:$0xff]  ;;  %v1231_v20 = vld [vmem:[#allocation6 + $0x3d0] sm:$0xff] }
 0x1b8   : > { %6330 = vmatmul.mubr.msk.f32.vlgmr.msra.gmra.mrb[0].mxu0 %vm378_vm0, %v501_v41  ;;  %v491_v45 = vmul.f32 %v6132_v22, %v479_v42  ;;  %v1213_v41 = vld [vmem:[#allocation6 + $0x340] sm:$0xff]  ;;  %v1230_v42 = vld [vmem:[#allocation6 + $0x3c8] sm:$0xff] }
 0x1b9   : > { %v6680_v46 = vpop.eup %6679  ;;  %6332 = vmatprep.mubr.msk.f32.mxu0 %vm378_vm0, %v502_v43  ;;  %v492_v28 = vmul.f32 %v6132_v22, %v480_v44  ;;  %v6441_v43 = vpack.c.bf16 %v1228_v37, %v1211_v36  ;;  %v6455_v44 = vpack.c.bf16 %v1231_v20, %v1214_v40 }
 0x1ba   : > { %v6682_v21 = vpop.eup %6681  ;;  %v503_v47 = vadd.f32 %v6133_v26, %v491_v45  ;;  %v481_v50 = vmul.f32 %v6680_v46, %v7296_v39  ;;  %v1114_v45 = vld [vmem:[#allocation6 + $0x28] sm:$0xff]  ;;  %v1131_v46 = vld [vmem:[#allocation6 + $0xb0] sm:$0xff] }
 0x1bb   : > { %v504_v51 = vadd.f32 %v6133_v26, %v492_v28  ;;  %v482_v52 = vmul.f32 %v6682_v21, %v7304_v48  ;;  %v1110_v48 = vld [vmem:[#allocation6 + $0x8] sm:$0xff]  ;;  %v6457_v28 = vpack.c.bf16 %v1230_v42, %v1213_v41  ;;  %v6459_v21 = vpack.c.bf16 %v1131_v46, %v1114_v45 }
 0x1bc   : > { %6333 = vmatmul.mubr.msk.f32.gmra.mrb[2].mxu0 %vm378_vm0, %v503_v47  ;;  %v493_v29 = vmul.f32 %v6132_v22, %v481_v50  ;;  %v6427_v60 = vpack.c.bf16 %v1127_v58, %v1110_v48  ;;  %v1116_v47 = vld [vmem:[#allocation6 + $0x38] sm:$0xff]  ;;  %v1133_v50 = vld [vmem:[#allocation6 + $0xc0] sm:$0xff] }
 0x1bd   : > { %v6684_v53 = vpop.eup %6683  ;;  %6335 = vmatprep.mubr.msk.f32.mxu0 %vm378_vm0, %v504_v51  ;;  %v494_v38 = vmul.f32 %v6132_v22, %v482_v52  ;;  %v6475_v51 = vpack.c.bf16 %v1133_v50, %v1116_v47  ;;  %v641_v52 = vlaneseq }
 0x1be   : > { %v505_v54 = vadd.f32 %v6133_v26, %v493_v29  ;;  %v483_v55 = vmul.f32 %v6684_v53, %v7306_v49  ;;  %v1128_v49 = vld [vmem:[#allocation6 + $0x98] sm:$0xff]  ;;  %6428 = vmatprep.subr.bf16.mxu1 %v6427_v60 }
 0x1bf   : > { %v506_v56 = vadd.f32 %v6133_v26, %v494_v38  ;;  %v6445_v3 = vpack.c.bf16 %v1128_v49, %v1111_v2  ;;  %6430 = vmatpush1.bf16.msra.mxu1 %v6429_v0  ;;  %v7334_v29 = vshrl.u32 %v641_v52, 7  ;;  %v7343_v38 = vld [vmem:[#allocation2 + $0xf] ss:$0 sm:$0xff]  ;;  %v7356_v60 = vld [vmem:[#allocation2 + $0x9] ss:$0 sm:$0xff] }
 0x1c0   : > { %6336 = vmatmul.mubr.msk.f32.gmra.mrb[4].mxu0 %vm378_vm0, %v505_v54  ;;  %v495_v57 = vmul.f32 %v6132_v22, %v483_v55  ;;  %6432 = vmatprep.subr.bf16.mxu1 %v6431_v7  ;;  %v7067_v22 = vmov 0.0  }
 0x1c1   : > { %6338 = vmatprep.mubr.msk.f32.mxu0 %vm378_vm0, %v506_v56  ;;  %6446 = vmatpush1.bf16.msra.mxu0 %v6445_v3  ;;  %vm671_vm1 = vcmp.lt.s32.totalorder %v7334_v29, 7  ;;  %vm725_vm2 = vcmp.lt.s32.totalorder %v7334_v29, 6  ;;  %vm779_vm3 = vcmp.lt.s32.totalorder %v7334_v29, 5  ;;  %vm833_vm4 = vcmp.lt.s32.totalorder %v7334_v29, 4 }
 0x1c2   : > { %v507_v39 = vadd.f32 %v6133_v26, %v495_v57  ;;  %1334 = vmatprep.mubr.f32.mxu1 %v7067_v22  ;;  %6448 = vmatprep.subr.bf16.mxu0 %v6447_v12  ;;  %v1197_v26 = vld [vmem:[#allocation6 + $0x2c0] sm:$0xff]  ;;  %vm887_vm5 = vcmp.lt.s32.totalorder %v7334_v29, 3  ;;  %vm941_vm6 = vcmp.lt.s32.totalorder %v7334_v29, 2  ;;  %vm995_vm7 = vcmp.lt.s32.totalorder %v7334_v29, 1 }
 0x1c3   : > { %6434 = vmatpush1.bf16.msra.mxu1 %v6433_v11  ;;  %v6451_v30 = vpack.c.bf16 %v1197_v26, %v1180_v25  ;;  %vm680_vm8 = vcmp.ge.s32.totalorder %v7334_v29, 7  ;;  %vm734_vm9 = vcmp.ge.s32.totalorder %v7334_v29, 6  ;;  %vm788_vm10 = vcmp.ge.s32.totalorder %v7334_v29, 5 }
 0x1c4   : > { %6339 = vmatmul.mubr.msk.f32.gmra.mrb[6].mxu0 %vm378_vm0, %v507_v39  ;;  %6436 = vmatprep.subr.bf16.mxu1 %v6435_v23  ;;  %v7350_v39 = vld [vmem:[#allocation2 + $0x8] ss:$0 sm:$0xff]  ;;  %vm842_vm11 = vcmp.ge.s32.totalorder %v7334_v29, 4  ;;  %vm896_vm12 = vcmp.ge.s32.totalorder %v7334_v29, 3  ;;  %vm950_vm13 = vcmp.ge.s32.totalorder %v7334_v29, 2  ;;  %vm1004_vm14 = vcmp.ge.s32.totalorder %v7334_v29, 1 }
 0x1c5   : > { %6450 = vmatpush1.bf16.msra.mxu0 %v6449_v16  ;;  %1447 = vmatprep.mubr.f32.mxu0 %v7067_v22  ;;  %v7404_v16 = vld [vmem:[#allocation2 + $0xe] ss:$0 sm:$0xff] }
 0x1c6   : > { %6452 = vmatprep.subr.bf16.mxu0 %v6451_v30 }
 0x1c7   : > { %6438 = vmatpush1.bf16.msra.mxu1 %v6437_v24 }
 0x1c8   : > { %6440 = vmatprep.subr.bf16.mxu1 %v6439_v35 }
 0x1c9   : > { %6454 = vmatpush1.bf16.msra.mxu0 %v6453_v34 }
 0x1ca   : > { %6456 = vmatprep.subr.bf16.mxu0 %v6455_v44 }
 0x1cb   : > { %6442 = vmatpush1.bf16.msra.mxu1 %v6441_v43 }
 0x1cc   : > { %6460 = vmatprep.subr.bf16.mxu1 %v6459_v21 }
 0x1cd   : > { %6458 = vmatpush1.bf16.msra.mxu0 %v6457_v28 }
 0x1ce   : > { %6476 = vmatprep.subr.bf16.mxu0 %v6475_v51 }
 0x28b   : > { %v7337_v53 = vpop.f32.mrb[0].mxu0 }
 0x28c   : > { %v664_v54 = vrot.slane %v7337_v53, 1  ;;  %v718_v55 = vrot.slane %v7337_v53, 2  ;;  %v772_v56 = vrot.slane %v7337_v53, 3  ;;  %v7348_v57 = vpop.f32.mrb[1].mxu0  ;;  %v826_v48 = vrot.slane %v7337_v53, 4 }
 0x28d   : > { %v880_v58 = vrot.slane %v7337_v53, 5  ;;  %v934_v59 = vrot.slane %v7337_v53, 6  ;;  %v988_v61 = vrot.slane %v7337_v53, 7  ;;  %v663_v62 = vrot.slane %v7348_v57, 1 }
 0x28e   : > { %v717_v63 = vrot.slane %v7348_v57, 2  ;;  %v771_v0 = vrot.slane %v7348_v57, 3  ;;  %v825_v2 = vrot.slane %v7348_v57, 4  ;;  %v879_v49 = vrot.slane %v7348_v57, 5 }
 0x28f   : > { %v933_v3 = vrot.slane %v7348_v57, 6  ;;  %v987_v4 = vrot.slane %v7348_v57, 7  ;;  %v7369_v5 = vpop.f32.mrb[2].mxu0  ;;  %v678_v6 = vsel %vm671_vm1, %v663_v62, %v664_v54  ;;  %v656_v12 = vmul.f32 %v7337_v53, %v7343_v38 }
 0x290   : > { %v732_v7 = vsel %vm725_vm2, %v717_v63, %v718_v55  ;;  %v786_v8 = vsel %vm779_vm3, %v771_v0, %v772_v56  ;;  %v7391_v11 = vpop.f32.mrb[3].mxu0  ;;  %v702_v13 = vmul.f32 %v7350_v39, %v678_v6  ;;  %v840_v14 = vsel %vm833_vm4, %v825_v2, %v826_v48 }
 0x291   : > { %v658_v17 = vmul.f32 %v7369_v5, %v7343_v38  ;;  %v756_v18 = vmul.f32 %v7356_v60, %v732_v7  ;;  %v894_v19 = vsel %vm887_vm5, %v879_v49, %v880_v58  ;;  %v948_v23 = vsel %vm941_vm6, %v933_v3, %v934_v59 }
 0x292   : > { %v1002_v24 = vsel %vm995_vm7, %v987_v4, %v988_v61  ;;  %v710_v25 = vadd.f32 %v702_v13, %v656_v12  ;;  %v810_v26 = vmul.f32 %v7363_v1, %v786_v8  ;;  %v864_v27 = vmul.f32 %v7387_v9, %v840_v14 }
 0x293   : > { %v918_v30 = vmul.f32 %v7389_v10, %v894_v19  ;;  %v7430_v31 = vpop.f32.mrb[4].mxu0  ;;  %v972_v32 = vmul.f32 %v7402_v15, %v948_v23  ;;  %v1026_v33 = vmul.f32 %v7404_v16, %v1002_v24  ;;  %v666_v34 = vrot.slane %v7369_v5, 1 }
 0x294   : > { %v720_v35 = vrot.slane %v7369_v5, 2  ;;  %v7436_v36 = vpop.f32.mrb[5].mxu0  ;;  %v764_v37 = vadd.f32 %v756_v18, %v710_v25  ;;  %v774_v40 = vrot.slane %v7369_v5, 3  ;;  %v828_v20 = vrot.slane %v7369_v5, 4 }
 0x295   : > { %v882_v41 = vrot.slane %v7369_v5, 5  ;;  %v936_v42 = vrot.slane %v7369_v5, 6  ;;  %v665_v43 = vrot.slane %v7391_v11, 1  ;;  %v719_v44 = vrot.slane %v7391_v11, 2 }
 0x296   : > { %v773_v45 = vrot.slane %v7391_v11, 3  ;;  %v818_v46 = vadd.f32 %v810_v26, %v764_v37  ;;  %v657_v28 = vmul.f32 %v7343_v38, %v7391_v11  ;;  %v827_v21 = vrot.slane %v7391_v11, 4 }
 0x297   : > { %v881_v47 = vrot.slane %v7391_v11, 5  ;;  %v7449_v50 = vpop.f32.mrb[6].mxu0  ;;  %v676_v51 = vsel %vm671_vm1, %v665_v43, %v666_v34  ;;  %v677_v52 = vsel %vm671_vm1, %v664_v54, %v665_v43  ;;  %v730_v6 = vsel %vm725_vm2, %v719_v44, %v720_v35 }
 0x298   : > { %14649 = vst [vmem:[#allocation12_spill] sm:$0xff] %v7449_v50  ;;  %v731_v7 = vsel %vm725_vm2, %v718_v55, %v719_v44  ;;  %v7465_v8 = vpop.f32.mrb[7].mxu0  ;;  %v872_v12 = vadd.f32 %v864_v27, %v818_v46  ;;  %v703_v13 = vmul.f32 %v7350_v39, %v677_v52  ;;  %v704_v14 = vmul.f32 %v7350_v39, %v676_v51 }
 0x299   : > { %v935_v18 = vrot.slane %v7391_v11, 6  ;;  %v757_v54 = vmul.f32 %v7356_v60, %v731_v7  ;;  %v784_v19 = vsel %vm779_vm3, %v773_v45, %v774_v40  ;;  %v785_v55 = vsel %vm779_vm3, %v772_v56, %v773_v45 }
 0x29a   : > { %v838_v23 = vsel %vm833_vm4, %v827_v21, %v828_v20  ;;  %v926_v24 = vadd.f32 %v918_v30, %v872_v12  ;;  %v711_v25 = vadd.f32 %v703_v13, %v657_v28  ;;  %v712_v26 = vadd.f32 %v704_v14, %v658_v17 }
 0x29b   : > { %v758_v27 = vmul.f32 %v7356_v60, %v730_v6  ;;  %v990_v37 = vrot.slane %v7369_v5, 7  ;;  %v811_v43 = vmul.f32 %v7363_v1, %v785_v55  ;;  %v839_v44 = vsel %vm833_vm4, %v826_v48, %v827_v21 }
 0x29c   : > { %v892_v56 = vsel %vm887_vm5, %v881_v47, %v882_v41  ;;  %v980_v45 = vadd.f32 %v972_v32, %v926_v24  ;;  %v765_v30 = vadd.f32 %v757_v54, %v711_v25  ;;  %v812_v17 = vmul.f32 %v7363_v1, %v784_v19 }
 0x29d   : > { %v766_v46 = vadd.f32 %v758_v27, %v712_v26  ;;  %v866_v28 = vmul.f32 %v7387_v9, %v838_v23  ;;  %v893_v51 = vsel %vm887_vm5, %v880_v58, %v881_v47  ;;  %v946_v48 = vsel %vm941_vm6, %v935_v18, %v936_v42 }
 0x29e   : > { %v947_v32 = vsel %vm941_vm6, %v934_v59, %v935_v18  ;;  %v7508_v21 = vadd.f32 %v1026_v33, %v980_v45  ;;  %v819_v52 = vadd.f32 %v811_v43, %v765_v30  ;;  %v865_v7 = vmul.f32 %v7387_v9, %v839_v44 }
 0x29f   : > { %v820_v6 = vadd.f32 %v812_v17, %v766_v46  ;;  %v989_v12 = vrot.slane %v7391_v11, 7  ;;  %v919_v47 = vmul.f32 %v7389_v10, %v893_v51  ;;  %v920_v14 = vmul.f32 %v7389_v10, %v892_v56 }
 0x2a0   : > { %v873_v13 = vadd.f32 %v865_v7, %v819_v52  ;;  %v973_v19 = vmul.f32 %v7402_v15, %v947_v32  ;;  %v974_v55 = vmul.f32 %v7402_v15, %v946_v48  ;;  %v668_v23 = vrot.slane %v7430_v31, 1 }
 0x2a1   : > { %v874_v58 = vadd.f32 %v866_v28, %v820_v6  ;;  %v1000_v54 = vsel %vm995_vm7, %v989_v12, %v990_v37  ;;  %v1001_v59 = vsel %vm995_vm7, %v988_v61, %v989_v12  ;;  %v722_v24 = vrot.slane %v7430_v31, 2 }
 0x2a2   : > { %v927_v33 = vadd.f32 %v919_v47, %v873_v13  ;;  %v1027_v27 = vmul.f32 %v7404_v16, %v1001_v59  ;;  %v1028_v43 = vmul.f32 %v7404_v16, %v1000_v54  ;;  %v776_v44 = vrot.slane %v7430_v31, 3 }
 0x2a3   : > { %v928_v18 = vadd.f32 %v920_v14, %v874_v58  ;;  %v667_v61 = vrot.slane %v7436_v36, 1  ;;  %v721_v56 = vrot.slane %v7436_v36, 2  ;;  %v775_v45 = vrot.slane %v7436_v36, 3 }
 0x2a4   : > { %v981_v25 = vadd.f32 %v973_v19, %v927_v33  ;;  %v830_v17 = vrot.slane %v7430_v31, 4  ;;  %v829_v28 = vrot.slane %v7436_v36, 4  ;;  %v660_v6 = vmul.f32 %v7430_v31, %v7343_v38 }
 0x2a5   : > { %v982_v26 = vadd.f32 %v974_v55, %v928_v18  ;;  %v674_v51 = vsel %vm671_vm1, %v667_v61, %v668_v23  ;;  %v675_v48 = vsel %vm671_vm1, %v666_v34, %v667_v61  ;;  %v728_v32 = vsel %vm725_vm2, %v721_v56, %v722_v24 }
 0x2a6   : > { %v7532_v30 = vadd.f32 %v1027_v27, %v981_v25  ;;  %v729_v52 = vsel %vm725_vm2, %v720_v35, %v721_v56  ;;  %v659_v7 = vmul.f32 %v7343_v38, %v7436_v36  ;;  %v705_v12 = vmul.f32 %v7350_v39, %v675_v48 }
 0x2a7   : > { %v7534_v46 = vadd.f32 %v1028_v43, %v982_v26  ;;  %v706_v34 = vmul.f32 %v7350_v39, %v674_v51  ;;  %v884_v13 = vrot.slane %v7430_v31, 5  ;;  %v782_v58 = vsel %vm779_vm3, %v775_v45, %v776_v44 }
 0x2a8   : > { %v783_v35 = vsel %vm779_vm3, %v774_v40, %v775_v45  ;;  %v883_v47 = vrot.slane %v7436_v36, 5  ;;  %v713_v14 = vadd.f32 %v705_v12, %v659_v7  ;;  %v759_v59 = vmul.f32 %v7356_v60, %v729_v52 }
 0x2a9   : > { %v714_v54 = vadd.f32 %v706_v34, %v660_v6  ;;  %v760_v33 = vmul.f32 %v7356_v60, %v728_v32  ;;  %v836_v18 = vsel %vm833_vm4, %v829_v28, %v830_v17  ;;  %v837_v19 = vsel %vm833_vm4, %v828_v20, %v829_v28 }
 0x2aa   : > { %v767_v40 = vadd.f32 %v759_v59, %v713_v14  ;;  %v813_v25 = vmul.f32 %v7363_v1, %v783_v35  ;;  %v814_v26 = vmul.f32 %v7363_v1, %v782_v58  ;;  %v938_v27 = vrot.slane %v7430_v31, 6 }
 0x2ab   : > { %v768_v55 = vadd.f32 %v760_v33, %v714_v54  ;;  %v992_v43 = vrot.slane %v7430_v31, 7  ;;  %v890_v61 = vsel %vm887_vm5, %v883_v47, %v884_v13  ;;  %v891_v20 = vsel %vm887_vm5, %v882_v41, %v883_v47 }
 0x2ac   : > { %v821_v56 = vadd.f32 %v813_v25, %v767_v40  ;;  %v867_v28 = vmul.f32 %v7387_v9, %v837_v19  ;;  %v868_v51 = vmul.f32 %v7387_v9, %v836_v18  ;;  %v921_v48 = vmul.f32 %v7389_v10, %v891_v20 }
 0x2ad   : > { %v822_v45 = vadd.f32 %v814_v26, %v768_v55  ;;  %v922_v32 = vmul.f32 %v7389_v10, %v890_v61  ;;  %v937_v52 = vrot.slane %v7436_v36, 6  ;;  %v991_v6 = vrot.slane %v7436_v36, 7 }
 0x2ae   : > { %v875_v7 = vadd.f32 %v867_v28, %v821_v56  ;;  %v670_v41 = vrot.slane %v7449_v50, 1  ;;  %v724_v34 = vrot.slane %v7449_v50, 2  ;;  %v655_v58 = vmul.f32 %v7343_v38, %v7348_v57 }
 0x2af   : > { %v876_v12 = vadd.f32 %v868_v51, %v822_v45  ;;  %v944_v35 = vsel %vm941_vm6, %v937_v52, %v938_v27  ;;  %v945_v47 = vsel %vm941_vm6, %v936_v42, %v937_v52  ;;  %v998_v14 = vsel %vm995_vm7, %v991_v6, %v992_v43 }
 0x2b0   : > { %v929_v54 = vadd.f32 %v921_v48, %v875_v7  ;;  %v975_v33 = vmul.f32 %v7402_v15, %v945_v47  ;;  %v976_v18 = vmul.f32 %v7402_v15, %v944_v35  ;;  %v999_v19 = vsel %vm995_vm7, %v990_v37, %v991_v6 }
 0x2b1   : > { %v930_v59 = vadd.f32 %v922_v32, %v876_v12  ;;  %v1030_v40 = vmul.f32 %v7404_v16, %v998_v14  ;;  %v679_v42 = vsel %vm671_vm1, %v670_v41, %v663_v62  ;;  %v733_v55 = vsel %vm725_vm2, %v724_v34, %v717_v63  ;;  %v7657_v12 = vld [vmem:[#allocation2 + $0x2] ss:$0 sm:$0xff] }
 0x2b2   : > { %v983_v25 = vadd.f32 %v975_v33, %v929_v54  ;;  %v1029_v61 = vmul.f32 %v7404_v16, %v999_v19  ;;  %v688_v20 = vsel %vm680_vm8, %v679_v42, 0.0  ;;  %v742_v56 = vsel %vm734_vm9, %v733_v55, 0.0 }
 0x2b3   : > { %v984_v26 = vadd.f32 %v976_v18, %v930_v59  ;;  %v701_v37 = vmul.f32 %v7350_v39, %v688_v20  ;;  %v778_v45 = vrot.slane %v7449_v50, 3  ;;  %v832_v62 = vrot.slane %v7449_v50, 4 }
 0x2b4   : > { %v7640_v28 = vadd.f32 %v1029_v61, %v983_v25  ;;  %v755_v63 = vmul.f32 %v7356_v60, %v742_v56  ;;  %v886_v6 = vrot.slane %v7449_v50, 5  ;;  %v940_v54 = vrot.slane %v7449_v50, 6 }
 0x2b5   : > { %v7642_v51 = vadd.f32 %v1030_v40, %v984_v26  ;;  %v709_v48 = vadd.f32 %v701_v37, %v655_v58  ;;  %v787_v32 = vsel %vm779_vm3, %v778_v45, %v771_v0  ;;  %v841_v52 = vsel %vm833_vm4, %v832_v62, %v825_v2 }
 0x2b6   : > { %v796_v7 = vsel %vm788_vm10, %v787_v32, 0.0  ;;  %v850_v47 = vsel %vm842_vm11, %v841_v52, 0.0  ;;  %v895_v14 = vsel %vm887_vm5, %v886_v6, %v879_v49  ;;  %v994_v59 = vrot.slane %v7449_v50, 7 }
 0x2b7   : > { %v763_v35 = vadd.f32 %v755_v63, %v709_v48  ;;  %v809_v58 = vmul.f32 %v7363_v1, %v796_v7  ;;  %v863_v0 = vmul.f32 %v7387_v9, %v850_v47  ;;  %v7673_v33 = vadd.f32 %v7657_v12, %v7508_v21 }
 0x2b8   : > { %v662_v18 = vmul.f32 %v7449_v50, %v7343_v38  ;;  %v904_v19 = vsel %vm896_vm12, %v895_v14, 0.0  ;;  %v949_v49 = vsel %vm941_vm6, %v940_v54, %v933_v3  ;;  %v661_v55 = vmul.f32 %v7343_v38, %v7465_v8 }
 0x2b9   : > { %v817_v2 = vadd.f32 %v809_v58, %v763_v35  ;;  %v917_v42 = vmul.f32 %v7389_v10, %v904_v19  ;;  %v958_v21 = vsel %vm950_vm13, %v949_v49, 0.0  ;;  %v1003_v25 = vsel %vm995_vm7, %v994_v59, %v987_v4 }
 0x2ba   : > { %v669_v26 = vrot.slane %v7465_v8, 1  ;;  %v723_v61 = vrot.slane %v7465_v8, 2  ;;  %v971_v3 = vmul.f32 %v7402_v15, %v958_v21  ;;  %v1012_v38 = vsel %vm1004_vm14, %v1003_v25, 0.0 }
 0x2bb   : > { %v871_v40 = vadd.f32 %v863_v0, %v817_v2  ;;  %v777_v37 = vrot.slane %v7465_v8, 3  ;;  %v1025_v56 = vmul.f32 %v7404_v16, %v1012_v38  ;;  %v831_v19 = vrot.slane %v7465_v8, 4 }
 0x2bc   : > { %v672_v63 = vsel %vm671_vm1, %v669_v26, %v670_v41  ;;  %v673_v4 = vsel %vm671_vm1, %v668_v23, %v669_v26  ;;  %v726_v48 = vsel %vm725_vm2, %v723_v61, %v724_v34  ;;  %v727_v35 = vsel %vm725_vm2, %v722_v24, %v723_v61  ;;  %vm13820_vm1 = vmpackc.low %vm378_vm0, %vm378_vm0 }
 0x2bd   : > { %v925_v20 = vadd.f32 %v917_v42, %v871_v40  ;;  %v707_v52 = vmul.f32 %v7350_v39, %v673_v4  ;;  %v708_v7 = vmul.f32 %v7350_v39, %v672_v63  ;;  %v6152_v41 = vmul.f32 -1.442695, %v7673_v33 }
 0x2be   : > { %v761_v58 = vmul.f32 %v7356_v60, %v727_v35  ;;  %v780_v23 = vsel %vm779_vm3, %v777_v37, %v778_v45  ;;  %v781_v34 = vsel %vm779_vm3, %v776_v44, %v777_v37  ;;  %v762_v2 = vmul.f32 %v7356_v60, %v726_v48 }
 0x2bf   : > { %v979_v32 = vadd.f32 %v971_v3, %v925_v20  ;;  %v715_v0 = vadd.f32 %v707_v52, %v661_v55  ;;  %v716_v39 = vadd.f32 %v708_v7, %v662_v18  ;;  %v7725_v24 = vadd.f32 %v7657_v12, %v7532_v30 }
 0x2c0   : > { %v815_v14 = vmul.f32 %v7363_v1, %v781_v34  ;;  %v885_v45 = vrot.slane %v7465_v8, 5  ;;  %v816_v49 = vmul.f32 %v7363_v1, %v780_v23  ;;  %v834_v60 = vsel %vm833_vm4, %v831_v19, %v832_v62 }
 0x2c1   : > { %v1033_v47 = vadd.f32 %v1025_v56, %v979_v32  ;;  %v769_v42 = vadd.f32 %v761_v58, %v715_v0  ;;  %v770_v44 = vadd.f32 %v762_v2, %v716_v39  ;;  %v835_v30 = vsel %vm833_vm4, %v830_v17, %v831_v19 }
 0x2c2   : > { %v888_v18 = vsel %vm887_vm5, %v885_v45, %v886_v6  ;;  %v889_v55 = vsel %vm887_vm5, %v884_v13, %v885_v45  ;;  %6685 = vpow2.f32 %v6152_v41  ;;  %v869_v62 = vmul.f32 %v7387_v9, %v835_v30  ;;  %v1148_v30 = vld [vmem:[#allocation6 + $0x138] sm:$0xff] }
 0x2c3   : > { %v7731_v40 = vadd.f32 %v7657_v12, %v1033_v47  ;;  %v823_v25 = vadd.f32 %v815_v14, %v769_v42  ;;  %v824_v1 = vadd.f32 %v816_v49, %v770_v44  ;;  %v870_v26 = vmul.f32 %v7387_v9, %v834_v60  ;;  %v1113_v49 = vld [vmem:[#allocation6 + $0x20] sm:$0xff]  ;;  %v1130_v60 = vld [vmem:[#allocation6 + $0xa8] sm:$0xff] }
 0x2c4   : > { %v7751_v17 = vadd.f32 %v7657_v12, %v7534_v46  ;;  %v6153_v6 = vmul.f32 -1.442695, %v7725_v24  ;;  %v939_v61 = vrot.slane %v7465_v8, 6  ;;  %v993_v20 = vrot.slane %v7465_v8, 7 }
 0x2c5   : > { %v6151_v21 = vmul.f32 -1.442695, %v7731_v40  ;;  %v877_v13 = vadd.f32 %v869_v62, %v823_v25  ;;  %v878_v3 = vadd.f32 %v870_v26, %v824_v1  ;;  %v923_v38 = vmul.f32 %v7389_v10, %v889_v55  ;;  %v1115_v55 = vld [vmem:[#allocation6 + $0x30] sm:$0xff] }
 0x2c6   : > { %v924_v37 = vmul.f32 %v7389_v10, %v888_v18  ;;  %v942_v9 = vsel %vm941_vm6, %v939_v61, %v940_v54  ;;  %v943_v46 = vsel %vm941_vm6, %v938_v27, %v939_v61  ;;  %v996_v56 = vsel %vm995_vm7, %v993_v20, %v994_v59  ;;  %v1165_v18 = vld [vmem:[#allocation6 + $0x1c0] sm:$0xff]  ;;  %v1147_v61 = vld [vmem:[#allocation6 + $0x130] sm:$0xff] }
 0x2c7   : > { %6687 = vpow2.f32 %v6151_v21  ;;  %v931_v63 = vadd.f32 %v923_v38, %v877_v13  ;;  %v977_v48 = vmul.f32 %v7402_v15, %v943_v46  ;;  %v978_v10 = vmul.f32 %v7402_v15, %v942_v9  ;;  %v1132_v21 = vld [vmem:[#allocation6 + $0xb8] sm:$0xff]  ;;  %v1167_v9 = vld [vmem:[#allocation6 + $0x1d0] sm:$0xff] }
 0x2c8   : > { %v932_v4 = vadd.f32 %v924_v37, %v878_v3  ;;  %6689 = vpow2.f32 %v6153_v6  ;;  %v6154_v32 = vmul.f32 -1.442695, %v7751_v17  ;;  %v7773_v54 = vadd.f32 %v7657_v12, %v7640_v28  ;;  %v1182_v3 = vld [vmem:[#allocation6 + $0x248] sm:$0xff]  ;;  %v1199_v46 = vld [vmem:[#allocation6 + $0x2d0] sm:$0xff] }
 0x2c9   : > { %v997_v27 = vsel %vm995_vm7, %v992_v43, %v993_v20  ;;  %v985_v52 = vadd.f32 %v977_v48, %v931_v63  ;;  %v1032_v35 = vmul.f32 %v7404_v16, %v996_v56  ;;  %v7783_v58 = vadd.f32 %v7657_v12, %v7642_v51  ;;  %v1164_v20 = vld [vmem:[#allocation6 + $0x1b8] sm:$0xff]  ;;  %v1150_v37 = vld [vmem:[#allocation6 + $0x148] sm:$0xff]  ;;  %v1149_v56 = vld [vmem:[#allocation6 + $0x140] sm:$0xff] }
 0x2ca   : > { %v986_v59 = vadd.f32 %v978_v10, %v932_v4  ;;  %v1031_v7 = vmul.f32 %v7404_v16, %v997_v27  ;;  %6691 = vpow2.f32 %v6154_v32  ;;  %v6155_v28 = vmul.f32 -1.442695, %v7773_v54  ;;  %v1166_v63 = vld [vmem:[#allocation6 + $0x1c8] sm:$0xff]  ;;  %v1181_v32 = vld [vmem:[#allocation6 + $0x240] sm:$0xff] }
 0x2cb   : > { %v6156_v43 = vmul.f32 -1.442695, %v7783_v58  ;;  %v6461_v1 = vpack.c.bf16 %v1130_v60, %v1113_v49  ;;  %v6463_v6 = vpack.c.bf16 %v1165_v18, %v1148_v30  ;;  %v6477_v38 = vpack.c.bf16 %v1132_v21, %v1115_v55  ;;  %v1198_v27 = vld [vmem:[#allocation6 + $0x2c8] sm:$0xff]  ;;  %v1235_v60 = vld [vmem:[#allocation6 + $0x3f0] sm:$0xff]  ;;  %v1217_v30 = vld [vmem:[#allocation6 + $0x360] sm:$0xff] }
 0x2cc   : > { %v1039_v41 = vadd.f32 %v1031_v7, %v985_v52  ;;  %v1040_v15 = vadd.f32 %v1032_v35, %v986_v59  ;;  %v6686_v23 = vpop.eup %6685  ;;  %6693 = vpow2.f32 %v6155_v28  ;;  %v6465_v10 = vpack.c.bf16 %v1164_v20, %v1147_v61  ;;  %v1201_v28 = vld [vmem:[#allocation6 + $0x2e0] sm:$0xff]  ;;  %v1218_v49 = vld [vmem:[#allocation6 + $0x368] sm:$0xff]  ;;  %v1135_v55 = vld [vmem:[#allocation6 + $0xd0] sm:$0xff] }
 0x2cd   : > { %v1078_v0 = vadd.f32 1.0, %v6686_v23  ;;  %v6479_v52 = vpack.c.bf16 %v1167_v9, %v1150_v37  ;;  %v6467_v7 = vpack.c.bf16 %v1199_v46, %v1182_v3  ;;  %v6481_v35 = vpack.c.bf16 %v1166_v63, %v1149_v56  ;;  %v1183_v23 = vld [vmem:[#allocation6 + $0x250] sm:$0xff]  ;;  %v1118_v18 = vld [vmem:[#allocation6 + $0x48] sm:$0xff]  ;;  %v1120_v20 = vld [vmem:[#allocation6 + $0x58] sm:$0xff] }
 0x2ce   : > { %v7788_v47 = vadd.f32 %v7657_v12, %v1039_v41  ;;  %v7791_v2 = vadd.f32 %v7657_v12, %v1040_v15  ;;  %v1216_v41 = vld [vmem:[#allocation6 + $0x358] sm:$0xff]  ;;  %v6491_v61 = vpack.c.bf16 %v1135_v55, %v1118_v18  ;;  %v1117_v56 = vld [vmem:[#allocation6 + $0x40] sm:$0xff]  ;;  %v1134_v63 = vld [vmem:[#allocation6 + $0xc8] sm:$0xff] }
 0x2cf   : > { %v1184_v15 = vld [vmem:[#allocation6 + $0x258] sm:$0xff] }
 0x2d0   : > { %v6157_v51 = vmul.f32 -1.442695, %v7788_v47  ;;  %v6158_v45 = vmul.f32 -1.442695, %v7791_v2 }
 0x2d1   : > { %v6688_v34 = vpop.eup %6687 }
 0x2d2   : > { %v1077_v39 = vadd.f32 1.0, %v6688_v34  ;;  %v6690_v16 = vpop.eup %6689  ;;  %v1200_v34 = vld [vmem:[#allocation6 + $0x2d8] sm:$0xff] }
 0x2d3   : > { %v1079_v14 = vadd.f32 1.0, %v6690_v16  ;;  %v6469_v16 = vpack.c.bf16 %v1198_v27, %v1181_v32  ;;  %v6493_v32 = vpack.c.bf16 %v1134_v63, %v1117_v56  ;;  %v1141_v56 = vld [vmem:[#allocation6 + $0x100] sm:$0xff] }
 0x2d4   : > { %6695 = vrcp.f32 %v1077_v39  ;;  %v6692_v19 = vpop.eup %6691 }
 0x2d5   : > { %6697 = vpow2.f32 %v6156_v43  ;;  %v1080_v42 = vadd.f32 1.0, %v6692_v19  ;;  %v6483_v19 = vpack.c.bf16 %v1201_v28, %v1184_v15  ;;  %v1203_v15 = vld [vmem:[#allocation6 + $0x2f0] sm:$0xff]  ;;  %v1153_v28 = vld [vmem:[#allocation6 + $0x160] sm:$0xff] }
 0x2d6   : > { %6699 = vrcp.f32 %v1078_v0  ;;  %v6694_v44 = vpop.eup %6693 }
 0x2d7   : > { %6701 = vpow2.f32 %v6157_v51  ;;  %v1081_v25 = vadd.f32 1.0, %v6694_v44  ;;  %v1215_v51 = vld [vmem:[#allocation6 + $0x350] sm:$0xff]  ;;  %v6485_v44 = vpack.c.bf16 %v1200_v34, %v1183_v23  ;;  %v1185_v34 = vld [vmem:[#allocation6 + $0x260] sm:$0xff] }
 0x2d8   : > { %6703 = vrcp.f32 %v1079_v14  ;;  %v1232_v14 = vld [vmem:[#allocation6 + $0x3d8] sm:$0xff] }
 0x2d9   : > { %6705 = vpow2.f32 %v6158_v45 }
 0x2da   : > { %6707 = vrcp.f32 %v1080_v42 }
 0x2db   : > { %6709 = vrcp.f32 %v1081_v25  ;;  %v6473_v25 = vpack.c.bf16 %v1232_v14, %v1215_v51  ;;  %v1220_v14 = vld [vmem:[#allocation6 + $0x378] sm:$0xff] }
 0x2de   : > { %v6696_v12 = vpop.eup %6695 }
 0x2df   : > { %v6698_v62 = vpop.eup %6697  ;;  %v7796_v26 = vmul.f32 %v6696_v12, %v7731_v40 }
 0x2e0   : > { %v6700_v13 = vpop.eup %6699  ;;  %v1082_v4 = vadd.f32 1.0, %v6698_v62 }
 0x2e1   : > { %14650 = vst [vmem:[#allocation13_spill] sm:$0xff] %v7796_v26  ;;  %6159 = vmatmul.mubr.msk.f32.vlgmr.msra.gmra.mrb[0].mxu1 %vm1245_vm15, %v7796_v26  ;;  %6167 = vmatmul.mubr.msk.f32.vlgmr.msra.gmra.mrb[8].mxu0 %vm1245_vm15, %v7796_v26  ;;  %v6702_v40 = vpop.eup %6701  ;;  %v7804_v48 = vmul.f32 %v6700_v13, %v7673_v33  ;;  %v1233_v33 = vld [vmem:[#allocation6 + $0x3e0] sm:$0xff] }
 0x2e2   : > { %6462 = vmatpush1.bf16.msra.mxu1 %v6461_v1  ;;  %1340 = vmatprep.mubr.f32.mxu1 %v7067_v22  ;;  %v6704_v59 = vpop.eup %6703  ;;  %6711 = vrcp.f32 %v1082_v4  ;;  %v1083_v43 = vadd.f32 1.0, %v6702_v40  ;;  %v6471_v42 = vpack.c.bf16 %v1233_v33, %v1216_v41  ;;  %v6487_v1 = vpack.c.bf16 %v1235_v60, %v1218_v49  ;;  %v1137_v13 = vld [vmem:[#allocation6 + $0xe0] sm:$0xff]  ;;  %v1152_v4 = vld [vmem:[#allocation6 + $0x158] sm:$0xff]  ;;  %v1171_v41 = vld [vmem:[#allocation6 + $0x1f0] sm:$0xff] }
 0x2e3   : > { %14651 = vst [vmem:[#allocation14_spill] sm:$0xff] %v7804_v48  ;;  %1453 = vmatprep.mubr.f32.mxu0 %v7067_v22  ;;  %6464 = vmatprep.subr.bf16.mxu1 %v6463_v6  ;;  %v6706_v0 = vpop.eup %6705  ;;  %v7814_v39 = vmul.f32 %v6704_v59, %v7725_v24  ;;  %v1234_v24 = vld [vmem:[#allocation6 + $0x3e8] sm:$0xff]  ;;  %v6507_v3 = vpack.c.bf16 %v1137_v13, %v1120_v20  ;;  %v1169_v40 = vld [vmem:[#allocation6 + $0x1e0] sm:$0xff]  ;;  %v1204_v49 = vld [vmem:[#allocation6 + $0x2f8] sm:$0xff] }
 0x2e4   : > { %6478 = vmatpush1.bf16.msra.mxu0 %v6477_v38  ;;  %v6708_v45 = vpop.eup %6707  ;;  %v1084_v21 = vadd.f32 1.0, %v6706_v0  ;;  %6713 = vrcp.f32 %v1083_v43  ;;  %v6489_v6 = vpack.c.bf16 %v1234_v24, %v1217_v30  ;;  %v6495_v27 = vpack.c.bf16 %v1169_v40, %v1152_v4  ;;  %v1186_v59 = vld [vmem:[#allocation6 + $0x268] sm:$0xff]  ;;  %v1219_v30 = vld [vmem:[#allocation6 + $0x370] sm:$0xff]  ;;  %v1236_v24 = vld [vmem:[#allocation6 + $0x3f8] sm:$0xff] }
 0x2e5   : > { %6160 = vmatmul.mubr.msk.f32.gmra.mrb[2].mxu1 %vm1245_vm15, %v7804_v48  ;;  %6168 = vmatmul.mubr.msk.f32.gmra.mrb[10].mxu0 %vm1245_vm15, %v7804_v48  ;;  %14652 = vst [vmem:[#allocation15_spill] sm:$0xff] %v7814_v39  ;;  %v7823_v12 = vmul.f32 %v6708_v45, %v7751_v17  ;;  %v6710_v62 = vpop.eup %6709  ;;  %v1170_v33 = vld [vmem:[#allocation6 + $0x1e8] sm:$0xff]  ;;  %v1205_v45 = vld [vmem:[#allocation6 + $0x300] sm:$0xff]  ;;  %v1139_v20 = vld [vmem:[#allocation6 + $0xf0] sm:$0xff]  ;;  %v6505_v13 = vpack.c.bf16 %v1236_v24, %v1219_v30 }
 0x2e6   : > { %1346 = vmatprep.mubr.f32.mxu1 %v7067_v22  ;;  %1459 = vmatprep.mubr.f32.mxu0 %v7067_v22  ;;  %6715 = vrcp.f32 %v1084_v21  ;;  %v7832_v17 = vmul.f32 %v6710_v62, %v7773_v54  ;;  %v1202_v43 = vld [vmem:[#allocation6 + $0x2e8] sm:$0xff]  ;;  %v6513_v51 = vpack.c.bf16 %v1170_v33, %v1153_v28  ;;  %v1221_v62 = vld [vmem:[#allocation6 + $0x380] sm:$0xff]  ;;  %v1175_v28 = vld [vmem:[#allocation6 + $0x210] sm:$0xff] }
 0x2e7   : > { %6466 = vmatpush1.bf16.msra.mxu1 %v6465_v10  ;;  %6480 = vmatprep.subr.bf16.mxu0 %v6479_v52  ;;  %14653 = vst [vmem:[#allocation16_spill] sm:$0xff] %v7823_v12  ;;  %v1136_v10 = vld [vmem:[#allocation6 + $0xd8] sm:$0xff]  ;;  %v6501_v60 = vpack.c.bf16 %v1202_v43, %v1185_v34  ;;  %v1121_v4 = vld [vmem:[#allocation6 + $0x60] sm:$0xff]  ;;  %v1138_v40 = vld [vmem:[#allocation6 + $0xe8] sm:$0xff] }
 0x2e8   : > { %6468 = vmatprep.subr.bf16.mxu1 %v6467_v7  ;;  %6482 = vmatpush1.bf16.msra.mxu0 %v6481_v35  ;;  %14654 = vst [vmem:[#allocation17_spill] sm:$0xff] %v7832_v17  ;;  %v1168_v52 = vld [vmem:[#allocation6 + $0x1d8] sm:$0xff]  ;;  %v1154_v35 = vld [vmem:[#allocation6 + $0x168] sm:$0xff]  ;;  %v1207_v33 = vld [vmem:[#allocation6 + $0x310] sm:$0xff] }
 0x2e9   : > { %6161 = vmatmul.mubr.msk.f32.gmra.mrb[4].mxu1 %vm1245_vm15, %v7814_v39  ;;  %6169 = vmatmul.mubr.msk.f32.gmra.mrb[12].mxu0 %vm1245_vm15, %v7814_v39  ;;  %v6511_v0 = vpack.c.bf16 %v1171_v41, %v1154_v35  ;;  %v1190_v35 = vld [vmem:[#allocation6 + $0x288] sm:$0xff]  ;;  %v1208_v30 = vld [vmem:[#allocation6 + $0x318] sm:$0xff] }
 0x2ea   : > { %1352 = vmatprep.mubr.f32.mxu1 %v7067_v22  ;;  %1465 = vmatprep.mubr.f32.mxu0 %v7067_v22  ;;  %v1174_v34 = vld [vmem:[#allocation6 + $0x208] sm:$0xff] }
 0x2eb   : > { %6470 = vmatpush1.bf16.msra.mxu1 %v6469_v16  ;;  %6484 = vmatprep.subr.bf16.mxu0 %v6483_v19  ;;  %v6499_v16 = vpack.c.bf16 %v1203_v15, %v1186_v59  ;;  %v1188_v19 = vld [vmem:[#allocation6 + $0x278] sm:$0xff]  ;;  %v1155_v59 = vld [vmem:[#allocation6 + $0x170] sm:$0xff]  ;;  %v1158_v15 = vld [vmem:[#allocation6 + $0x188] sm:$0xff] }
 0x2ec   : > { %6472 = vmatprep.subr.bf16.mxu1 %v6471_v42  ;;  %6486 = vmatpush1.bf16.msra.mxu0 %v6485_v44  ;;  %v6712_v38 = vpop.eup %6711  ;;  %v1237_v42 = vld [vmem:[#allocation6 + $0x400] sm:$0xff]  ;;  %v1187_v44 = vld [vmem:[#allocation6 + $0x270] sm:$0xff]  ;;  %v6515_v18 = vpack.c.bf16 %v1205_v45, %v1188_v19  ;;  %v1224_v45 = vld [vmem:[#allocation6 + $0x398] sm:$0xff] }
 0x2ed   : > { %6162 = vmatmul.mubr.msk.f32.gmra.mrb[6].mxu1 %vm1245_vm15, %v7823_v12  ;;  %6170 = vmatmul.mubr.msk.f32.gmra.mrb[14].mxu0 %vm1245_vm15, %v7823_v12  ;;  %v7841_v37 = vmul.f32 %v6712_v38, %v7783_v58  ;;  %v6503_v55 = vpack.c.bf16 %v1237_v42, %v1220_v14  ;;  %v6517_v21 = vpack.c.bf16 %v1204_v49, %v1187_v44  ;;  %v1192_v42 = vld [vmem:[#allocation6 + $0x298] sm:$0xff]  ;;  %v1209_v44 = vld [vmem:[#allocation6 + $0x320] sm:$0xff] }
 0x2ee   : > { %1358 = vmatprep.mubr.f32.mxu1 %v7067_v22  ;;  %1471 = vmatprep.mubr.f32.mxu0 %v7067_v22  ;;  %v6714_v54 = vpop.eup %6713  ;;  %v6531_v14 = vpack.c.bf16 %v1207_v33, %v1190_v35  ;;  %v1241_v49 = vld [vmem:[#allocation6 + $0x420] sm:$0xff] }
 0x2ef   : > { %6474 = vmatpush1.bf16.msra.mxu1 %v6473_v25  ;;  %6488 = vmatprep.subr.bf16.mxu0 %v6487_v1  ;;  %14655 = vst [vmem:[#allocation18_spill] sm:$0xff] %v7841_v37  ;;  %v7850_v9 = vmul.f32 %v6714_v54, %v7788_v47  ;;  %v1119_v47 = vld [vmem:[#allocation6 + $0x50] sm:$0xff]  ;;  %v1222_v25 = vld [vmem:[#allocation6 + $0x388] sm:$0xff] }
 0x2f0   : > { %6490 = vmatpush1.bf16.msra.mxu0 %v6489_v6  ;;  %6492 = vmatprep.subr.bf16.mxu1 %v6491_v61  ;;  %v6716_v46 = vpop.eup %6715  ;;  %v6509_v7 = vpack.c.bf16 %v1136_v10, %v1119_v47  ;;  %v1239_v1 = vld [vmem:[#allocation6 + $0x410] sm:$0xff]  ;;  %v1238_v6 = vld [vmem:[#allocation6 + $0x408] sm:$0xff]  ;;  %v1156_v47 = vld [vmem:[#allocation6 + $0x178] sm:$0xff] }
 0x2f1   : > { %6163 = vmatmul.mubr.msk.f32.gmra.mrb[8].mxu1 %vm1245_vm15, %v7832_v17  ;;  %6171 = vmatmul.mubr.msk.f32.gmra.mrb[16].mxu0 %vm1245_vm15, %v7832_v17  ;;  %14656 = vst [vmem:[#allocation19_spill] sm:$0xff] %v7850_v9  ;;  %v7859_v58 = vmul.f32 %v6716_v46, %v7791_v2  ;;  %v1151_v2 = vld [vmem:[#allocation6 + $0x150] sm:$0xff]  ;;  %v1122_v61 = vld [vmem:[#allocation6 + $0x68] sm:$0xff]  ;;  %v6521_v38 = vpack.c.bf16 %v1238_v6, %v1221_v62  ;;  %v1124_v46 = vld [vmem:[#allocation6 + $0x78] sm:$0xff] }
 0x2f2   : > { %1364 = vmatprep.mubr.f32.mxu1 %v7067_v22  ;;  %1477 = vmatprep.mubr.f32.mxu0 %v7067_v22  ;;  %v6497_v23 = vpack.c.bf16 %v1168_v52, %v1151_v2  ;;  %v6523_v54 = vpack.c.bf16 %v1139_v20, %v1122_v61  ;;  %v6539_v63 = vpack.c.bf16 %v1141_v56, %v1124_v46  ;;  %v1173_v10 = vld [vmem:[#allocation6 + $0x200] sm:$0xff]  ;;  %v1226_v62 = vld [vmem:[#allocation6 + $0x3a8] sm:$0xff]  ;;  %v1243_v6 = vld [vmem:[#allocation6 + $0x430] sm:$0xff] }
 0x2f3   : > { %6508 = vmatprep.subr.bf16.mxu0 %v6507_v3  ;;  %14657 = vst [vmem:[#allocation20_spill] sm:$0xff] %v7859_v58  ;;  %v6519_v3 = vpack.c.bf16 %v1239_v1, %v1222_v25  ;;  %v6525_v2 = vpack.c.bf16 %v1138_v40, %v1121_v4  ;;  %v6527_v52 = vpack.c.bf16 %v1173_v10, %v1156_v47  ;;  %v1225_v61 = vld [vmem:[#allocation6 + $0x3a0] sm:$0xff]  ;;  %v1242_v20 = vld [vmem:[#allocation6 + $0x428] sm:$0xff]  ;;  %v1176_v4 = vld [vmem:[#allocation6 + $0x218] sm:$0xff] }
 0x2f4   : > { %v6535_v25 = vpack.c.bf16 %v1241_v49, %v1224_v45  ;;  %v6553_v46 = vpack.c.bf16 %v1242_v20, %v1225_v61  ;;  %v1193_v47 = vld [vmem:[#allocation6 + $0x2a0] sm:$0xff]  ;;  %v1210_v10 = vld [vmem:[#allocation6 + $0x328] sm:$0xff] }
 0x2f5   : > { %6164 = vmatmul.mubr.msk.f32.gmra.mrb[10].mxu1 %vm1245_vm15, %v7841_v37  ;;  %6172 = vmatmul.mubr.msk.f32.gmra.mrb[18].mxu0 %vm1245_vm15, %v7841_v37 }
 0x2f6   : > { %1370 = vmatprep.mubr.f32.mxu1 %v7067_v22  ;;  %1483 = vmatprep.mubr.f32.mxu0 %v7067_v22 }
 0x2f9   : > { %6165 = vmatmul.mubr.msk.f32.gmra.mrb[12].mxu1 %vm1245_vm15, %v7850_v9  ;;  %6173 = vmatmul.mubr.msk.f32.gmra.mrb[20].mxu0 %vm1245_vm15, %v7850_v9 }
 0x2fa   : > { %1376 = vmatprep.mubr.f32.mxu1 %v7067_v22  ;;  %1489 = vmatprep.mubr.f32.mxu0 %v7067_v22 }
 0x2fd   : > { %6166 = vmatmul.mubr.msk.f32.gmra.mrb[14].mxu1 %vm1245_vm15, %v7859_v58  ;;  %6174 = vmatmul.mubr.msk.f32.gmra.mrb[22].mxu0 %vm1245_vm15, %v7859_v58 }
 0x2fe   : > { %1560 = vmatprep.mubr.f32.mxu1 %v7067_v22  ;;  %1673 = vmatprep.mubr.f32.mxu0 %v7067_v22 }
 0x301   : > { %6175 = vmatmul.mubr.msk.f32.vlgmr.msra.gmra.mrb[16].mxu1 %vm1245_vm15, %v7796_v26  ;;  %6183 = vmatmul.mubr.msk.f32.vlgmr.msra.gmra.mrb[24].mxu0 %vm1245_vm15, %v7796_v26 }
 0x302   : > { %6494 = vmatpush1.bf16.msra.mxu1 %v6493_v32  ;;  %1566 = vmatprep.mubr.f32.mxu1 %v7067_v22  ;;  %v1123_v32 = vld [vmem:[#allocation6 + $0x70] sm:$0xff] }
 0x303   : > { %1679 = vmatprep.mubr.f32.mxu0 %v7067_v22  ;;  %6496 = vmatprep.subr.bf16.mxu1 %v6495_v27  ;;  %v1140_v27 = vld [vmem:[#allocation6 + $0xf8] sm:$0xff] }
 0x304   : > { %6510 = vmatpush1.bf16.msra.mxu0 %v6509_v7  ;;  %v1172_v7 = vld [vmem:[#allocation6 + $0x1f8] sm:$0xff]  ;;  %v6541_v41 = vpack.c.bf16 %v1140_v27, %v1123_v32  ;;  %v6563_v32 = vpack.c.bf16 %v1210_v10, %v1193_v47  ;;  %v1227_v27 = vld [vmem:[#allocation6 + $0x3b0] sm:$0xff] }
 0x305   : > { %6176 = vmatmul.mubr.msk.f32.gmra.mrb[18].mxu1 %vm1245_vm15, %v7804_v48  ;;  %6184 = vmatmul.mubr.msk.f32.gmra.mrb[26].mxu0 %vm1245_vm15, %v7804_v48  ;;  %v6529_v43 = vpack.c.bf16 %v1172_v7, %v1155_v59 }
 0x306   : > { %1572 = vmatprep.mubr.f32.mxu1 %v7067_v22  ;;  %1685 = vmatprep.mubr.f32.mxu0 %v7067_v22 }
 0x307   : > { %6498 = vmatpush1.bf16.msra.mxu1 %v6497_v23  ;;  %6512 = vmatprep.subr.bf16.mxu0 %v6511_v0  ;;  %v1157_v23 = vld [vmem:[#allocation6 + $0x180] sm:$0xff] }
 0x308   : > { %6500 = vmatprep.subr.bf16.mxu1 %v6499_v16  ;;  %6514 = vmatpush1.bf16.msra.mxu0 %v6513_v51  ;;  %v1189_v0 = vld [vmem:[#allocation6 + $0x280] sm:$0xff]  ;;  %v1206_v16 = vld [vmem:[#allocation6 + $0x308] sm:$0xff]  ;;  %v6543_v51 = vpack.c.bf16 %v1175_v28, %v1158_v15  ;;  %v6545_v19 = vpack.c.bf16 %v1174_v34, %v1157_v23 }
 0x309   : > { %6177 = vmatmul.mubr.msk.f32.gmra.mrb[20].mxu1 %vm1245_vm15, %v7814_v39  ;;  %6185 = vmatmul.mubr.msk.f32.gmra.mrb[28].mxu0 %vm1245_vm15, %v7814_v39  ;;  %v6533_v24 = vpack.c.bf16 %v1206_v16, %v1189_v0 }
 0x30a   : > { %1578 = vmatprep.mubr.f32.mxu1 %v7067_v22  ;;  %1691 = vmatprep.mubr.f32.mxu0 %v7067_v22 }
 0x30b   : > { %6502 = vmatpush1.bf16.msra.mxu1 %v6501_v60  ;;  %6516 = vmatprep.subr.bf16.mxu0 %v6515_v18  ;;  %v1191_v60 = vld [vmem:[#allocation6 + $0x290] sm:$0xff] }
 0x30c   : > { %6504 = vmatprep.subr.bf16.mxu1 %v6503_v55  ;;  %6518 = vmatpush1.bf16.msra.mxu0 %v6517_v21  ;;  %v1223_v18 = vld [vmem:[#allocation6 + $0x390] sm:$0xff]  ;;  %v1240_v55 = vld [vmem:[#allocation6 + $0x418] sm:$0xff]  ;;  %v6547_v21 = vpack.c.bf16 %v1209_v44, %v1192_v42  ;;  %v6549_v1 = vpack.c.bf16 %v1208_v30, %v1191_v60 }
 0x30d   : > { %6178 = vmatmul.mubr.msk.f32.gmra.mrb[22].mxu1 %vm1245_vm15, %v7823_v12  ;;  %6186 = vmatmul.mubr.msk.f32.gmra.mrb[30].mxu0 %vm1245_vm15, %v7823_v12 }
 0x30e   : > { %1584 = vmatprep.mubr.f32.mxu1 %v7067_v22  ;;  %1697 = vmatprep.mubr.f32.mxu0 %v7067_v22 }
 0x30f   : > { %6506 = vmatpush1.bf16.msra.mxu1 %v6505_v13  ;;  %6520 = vmatprep.subr.bf16.mxu0 %v6519_v3  ;;  %v1125_v13 = vld [vmem:[#allocation6 + $0x80] sm:$0xff]  ;;  %v1142_v3 = vld [vmem:[#allocation6 + $0x108] sm:$0xff] }
 0x310   : > { %6522 = vmatpush1.bf16.msra.mxu0 %v6521_v38  ;;  %6524 = vmatprep.subr.bf16.mxu1 %v6523_v54  ;;  %v6537_v38 = vpack.c.bf16 %v1240_v55, %v1223_v18  ;;  %v6551_v54 = vpack.c.bf16 %v1243_v6, %v1226_v62  ;;  %v6555_v56 = vpack.c.bf16 %v1142_v3, %v1125_v13 }
 0x311   : > { %6179 = vmatmul.mubr.msk.f32.gmra.mrb[24].mxu1 %vm1245_vm15, %v7832_v17  ;;  %6187 = vmatmul.mubr.msk.f32.gmra.mrb[32].mxu0 %vm1245_vm15, %v7832_v17 }
 0x312   : > { %1590 = vmatprep.mubr.f32.mxu1 %v7067_v22  ;;  %1703 = vmatprep.mubr.f32.mxu0 %v7067_v22 }
 0x313   : > { %6540 = vmatprep.subr.bf16.mxu0 %v6539_v63  ;;  %v1159_v63 = vld [vmem:[#allocation6 + $0x190] sm:$0xff] }
 0x314   : > { %v6559_v40 = vpack.c.bf16 %v1176_v4, %v1159_v63 }
 0x315   : > { %6180 = vmatmul.mubr.msk.f32.gmra.mrb[26].mxu1 %vm1245_vm15, %v7841_v37  ;;  %6188 = vmatmul.mubr.msk.f32.gmra.mrb[34].mxu0 %vm1245_vm15, %v7841_v37 }
 0x316   : > { %1596 = vmatprep.mubr.f32.mxu1 %v7067_v22  ;;  %1709 = vmatprep.mubr.f32.mxu0 %v7067_v22 }
 0x319   : > { %6181 = vmatmul.mubr.msk.f32.gmra.mrb[28].mxu1 %vm1245_vm15, %v7850_v9  ;;  %6189 = vmatmul.mubr.msk.f32.gmra.mrb[36].mxu0 %vm1245_vm15, %v7850_v9 }
 0x31a   : > { %1602 = vmatprep.mubr.f32.mxu1 %v7067_v22  ;;  %1715 = vmatprep.mubr.f32.mxu0 %v7067_v22 }
 0x31d   : > { %6182 = vmatmul.mubr.msk.f32.gmra.mrb[30].mxu1 %vm1245_vm15, %v7859_v58  ;;  %6190 = vmatmul.mubr.msk.f32.gmra.mrb[38].mxu0 %vm1245_vm15, %v7859_v58 }
 0x31e   : > { %1786 = vmatprep.mubr.f32.mxu1 %v7067_v22  ;;  %1899 = vmatprep.mubr.f32.mxu0 %v7067_v22 }
 0x321   : > { %6191 = vmatmul.mubr.msk.f32.vlgmr.msra.gmra.mrb[32].mxu1 %vm1245_vm15, %v7796_v26  ;;  %6199 = vmatmul.mubr.msk.f32.vlgmr.msra.gmra.mrb[40].mxu0 %vm1245_vm15, %v7796_v26 }
 0x322   : > { %6526 = vmatpush1.bf16.msra.mxu1 %v6525_v2  ;;  %1792 = vmatprep.mubr.f32.mxu1 %v7067_v22  ;;  %v1244_v2 = vld [vmem:[#allocation6 + $0x438] sm:$0xff] }
 0x323   : > { %1905 = vmatprep.mubr.f32.mxu0 %v7067_v22  ;;  %6528 = vmatprep.subr.bf16.mxu1 %v6527_v52  ;;  %v6567_v52 = vpack.c.bf16 %v1244_v2, %v1227_v27 }
 0x324   : > { %6542 = vmatpush1.bf16.msra.mxu0 %v6541_v41 }
 0x325   : > { %6192 = vmatmul.mubr.msk.f32.gmra.mrb[34].mxu1 %vm1245_vm15, %v7804_v48  ;;  %6200 = vmatmul.mubr.msk.f32.gmra.mrb[42].mxu0 %vm1245_vm15, %v7804_v48 }
 0x326   : > { %1798 = vmatprep.mubr.f32.mxu1 %v7067_v22  ;;  %1911 = vmatprep.mubr.f32.mxu0 %v7067_v22 }
 0x327   : > { %6530 = vmatpush1.bf16.msra.mxu1 %v6529_v43  ;;  %6544 = vmatprep.subr.bf16.mxu0 %v6543_v51 }
 0x328   : > { %6532 = vmatprep.subr.bf16.mxu1 %v6531_v14  ;;  %6546 = vmatpush1.bf16.msra.mxu0 %v6545_v19 }
 0x329   : > { %6193 = vmatmul.mubr.msk.f32.gmra.mrb[36].mxu1 %vm1245_vm15, %v7814_v39  ;;  %6201 = vmatmul.mubr.msk.f32.gmra.mrb[44].mxu0 %vm1245_vm15, %v7814_v39 }
 0x32a   : > { %1804 = vmatprep.mubr.f32.mxu1 %v7067_v22  ;;  %1917 = vmatprep.mubr.f32.mxu0 %v7067_v22 }
 0x32b   : > { %6534 = vmatpush1.bf16.msra.mxu1 %v6533_v24  ;;  %6548 = vmatprep.subr.bf16.mxu0 %v6547_v21 }
 0x32c   : > { %6536 = vmatprep.subr.bf16.mxu1 %v6535_v25  ;;  %6550 = vmatpush1.bf16.msra.mxu0 %v6549_v1 }
 0x32d   : > { %6194 = vmatmul.mubr.msk.f32.gmra.mrb[38].mxu1 %vm1245_vm15, %v7823_v12  ;;  %6202 = vmatmul.mubr.msk.f32.gmra.mrb[46].mxu0 %vm1245_vm15, %v7823_v12 }
 0x32e   : > { %1810 = vmatprep.mubr.f32.mxu1 %v7067_v22  ;;  %1923 = vmatprep.mubr.f32.mxu0 %v7067_v22 }
 0x32f   : > { %6538 = vmatpush1.bf16.msra.mxu1 %v6537_v38  ;;  %6552 = vmatprep.subr.bf16.mxu0 %v6551_v54 }
 0x330   : > { %6554 = vmatpush1.bf16.msra.mxu0 %v6553_v46  ;;  %6556 = vmatprep.subr.bf16.mxu1 %v6555_v56 }
 0x331   : > { %6195 = vmatmul.mubr.msk.f32.gmra.mrb[40].mxu1 %vm1245_vm15, %v7832_v17  ;;  %6203 = vmatmul.mubr.msk.f32.gmra.mrb[48].mxu0 %vm1245_vm15, %v7832_v17 }
 0x332   : > { %1816 = vmatprep.mubr.f32.mxu1 %v7067_v22  ;;  %1929 = vmatprep.mubr.f32.mxu0 %v7067_v22 }
 0x335   : > { %6196 = vmatmul.mubr.msk.f32.gmra.mrb[42].mxu1 %vm1245_vm15, %v7841_v37  ;;  %6204 = vmatmul.mubr.msk.f32.gmra.mrb[50].mxu0 %vm1245_vm15, %v7841_v37 }
 0x336   : > { %1822 = vmatprep.mubr.f32.mxu1 %v7067_v22  ;;  %1935 = vmatprep.mubr.f32.mxu0 %v7067_v22 }
 0x339   : > { %6197 = vmatmul.mubr.msk.f32.gmra.mrb[44].mxu1 %vm1245_vm15, %v7850_v9  ;;  %6205 = vmatmul.mubr.msk.f32.gmra.mrb[52].mxu0 %vm1245_vm15, %v7850_v9 }
 0x33a   : > { %1828 = vmatprep.mubr.f32.mxu1 %v7067_v22  ;;  %1941 = vmatprep.mubr.f32.mxu0 %v7067_v22 }
 0x33d   : > { %6198 = vmatmul.mubr.msk.f32.gmra.mrb[46].mxu1 %vm1245_vm15, %v7859_v58  ;;  %6206 = vmatmul.mubr.msk.f32.gmra.mrb[54].mxu0 %vm1245_vm15, %v7859_v58 }
 0x33e   : > { %2012 = vmatprep.mubr.f32.mxu1 %v7067_v22  ;;  %2125 = vmatprep.mubr.f32.mxu0 %v7067_v22 }
 0x341   : > { %6207 = vmatmul.mubr.msk.f32.vlgmr.msra.gmra.mrb[48].mxu1 %vm1245_vm15, %v7796_v26  ;;  %6215 = vmatmul.mubr.msk.f32.vlgmr.msra.gmra.mrb[56].mxu0 %vm1245_vm15, %v7796_v26 }
 0x342   : > { %6558 = vmatpush3.bf16.msra.mxu1 %v6555_v56  ;;  %2018 = vmatprep.mubr.f32.mxu1 %v7067_v22 }
 0x343   : > { %2131 = vmatprep.mubr.f32.mxu0 %v7067_v22  ;;  %6560 = vmatprep.subr.bf16.mxu1 %v6559_v40 }
 0x345   : > { %6208 = vmatmul.mubr.msk.f32.gmra.mrb[50].mxu1 %vm1245_vm15, %v7804_v48  ;;  %6216 = vmatmul.mubr.msk.f32.gmra.mrb[58].mxu0 %vm1245_vm15, %v7804_v48 }
 0x346   : > { %2024 = vmatprep.mubr.f32.mxu1 %v7067_v22  ;;  %2137 = vmatprep.mubr.f32.mxu0 %v7067_v22 }
 0x347   : > { %6562 = vmatpush3.bf16.msra.mxu1 %v6559_v40 }
 0x348   : > { %6564 = vmatprep.subr.bf16.mxu1 %v6563_v32 }
 0x349   : > { %6209 = vmatmul.mubr.msk.f32.gmra.mrb[52].mxu1 %vm1245_vm15, %v7814_v39  ;;  %6217 = vmatmul.mubr.msk.f32.gmra.mrb[60].mxu0 %vm1245_vm15, %v7814_v39 }
 0x34a   : > { %2030 = vmatprep.mubr.f32.mxu1 %v7067_v22  ;;  %2143 = vmatprep.mubr.f32.mxu0 %v7067_v22 }
 0x34b   : > { %6566 = vmatpush3.bf16.msra.mxu1 %v6563_v32 }
 0x34c   : > { %6568 = vmatprep.subr.bf16.mxu1 %v6567_v52 }
 0x34d   : > { %6210 = vmatmul.mubr.msk.f32.gmra.mrb[54].mxu1 %vm1245_vm15, %v7823_v12  ;;  %6218 = vmatmul.mubr.msk.f32.gmra.mrb[62].mxu0 %vm1245_vm15, %v7823_v12 }
 0x34e   : > { %2036 = vmatprep.mubr.f32.mxu1 %v7067_v22  ;;  %2149 = vmatprep.mubr.f32.mxu0 %v7067_v22 }
 0x34f   : > { %6570 = vmatpush3.bf16.msra.mxu1 %v6567_v52 }
 0x351   : > { %6211 = vmatmul.mubr.msk.f32.gmra.mrb[56].mxu1 %vm1245_vm15, %v7832_v17  ;;  %6219 = vmatmul.mubr.msk.f32.gmra.mrb[64].mxu0 %vm1245_vm15, %v7832_v17 }
 0x352   : > { %2042 = vmatprep.mubr.f32.mxu1 %v7067_v22  ;;  %2155 = vmatprep.mubr.f32.mxu0 %v7067_v22 }
 0x355   : > { %6212 = vmatmul.mubr.msk.f32.gmra.mrb[58].mxu1 %vm1245_vm15, %v7841_v37  ;;  %6220 = vmatmul.mubr.msk.f32.gmra.mrb[66].mxu0 %vm1245_vm15, %v7841_v37 }
 0x356   : > { %2048 = vmatprep.mubr.f32.mxu1 %v7067_v22  ;;  %2161 = vmatprep.mubr.f32.mxu0 %v7067_v22 }
 0x359   : > { %6213 = vmatmul.mubr.msk.f32.gmra.mrb[60].mxu1 %vm1245_vm15, %v7850_v9  ;;  %6221 = vmatmul.mubr.msk.f32.gmra.mrb[68].mxu0 %vm1245_vm15, %v7850_v9 }
 0x35a   : > { %2054 = vmatprep.mubr.f32.mxu1 %v7067_v22  ;;  %2167 = vmatprep.mubr.f32.mxu0 %v7067_v22 }
 0x35d   : > { %6214 = vmatmul.mubr.msk.f32.gmra.mrb[62].mxu1 %vm1245_vm15, %v7859_v58  ;;  %6222 = vmatmul.mubr.msk.f32.gmra.mrb[70].mxu0 %vm1245_vm15, %v7859_v58 }
 0x35e   : > { %6357 = vmatprep.mubr.msk.f32.mxu1 %vm1245_vm15, %v7796_v26 }
 0x361   : > { %6358 = vmatmul.mubr.msk.f32.vlgmr.msra.gmra.mrb[64].mxu1 %vm1245_vm15, %v7804_v48 }
 0x362   : > { %6360 = vmatprep.mubr.msk.f32.mxu1 %vm1245_vm15, %v7814_v39 }
 0x365   : > { %6361 = vmatmul.mubr.msk.f32.gmra.mrb[66].mxu1 %vm1245_vm15, %v7823_v12 }
 0x366   : > { %6363 = vmatprep.mubr.msk.f32.mxu1 %vm1245_vm15, %v7832_v17 }
 0x369   : > { %6364 = vmatmul.mubr.msk.f32.gmra.mrb[68].mxu1 %vm1245_vm15, %v7841_v37 }
 0x36a   : > { %6366 = vmatprep.mubr.msk.f32.mxu1 %vm1245_vm15, %v7850_v9 }
 0x36d   : > { %6367 = vmatmul.mubr.msk.f32.gmra.mrb[70].mxu1 %vm1245_vm15, %v7859_v58 }
 0x3b4   : > { %v8025_v22 = vpop.f32.mrb[0].mxu1  ;;  %v8027_v59 = vpop.f32.mrb[8].mxu0 }
 0x3b5   : > { %v8029_v7 = vpop.f32.mrb[1].mxu1  ;;  %v8031_v35 = vpop.f32.mrb[9].mxu0 }
 0x3b8   : > { %v8033_v41 = vpop.f32.mrb[2].mxu1  ;;  %v8035_v15 = vpop.f32.mrb[10].mxu0 }
 0x3b9   : > { %14658 = vst [vmem:[#allocation21_spill] sm:$0xff] %v8033_v41  ;;  %14659 = vst [vmem:[#allocation22_spill] sm:$0xff] %v8035_v15  ;;  %v8037_v28 = vpop.f32.mrb[3].mxu1  ;;  %v8039_v33 = vpop.f32.mrb[11].mxu0 }
 0x3ba   : > { %14660 = vst [vmem:[#allocation23_spill] sm:$0xff] %v8037_v28  ;;  %14661 = vst [vmem:[#allocation24_spill] sm:$0xff] %v8039_v33 }
 0x3bc   : > { %v8041_v23 = vpop.f32.mrb[4].mxu1  ;;  %v8043_v34 = vpop.f32.mrb[12].mxu0 }
 0x3bd   : > { %14662 = vst [vmem:[#allocation25_spill] sm:$0xff] %v8041_v23  ;;  %14663 = vst [vmem:[#allocation26_spill] sm:$0xff] %v8043_v34  ;;  %v8045_v43 = vpop.f32.mrb[5].mxu1  ;;  %v8047_v0 = vpop.f32.mrb[13].mxu0 }
 0x3be   : > { %14664 = vst [vmem:[#allocation27_spill] sm:$0xff] %v8045_v43  ;;  %14665 = vst [vmem:[#allocation28_spill] sm:$0xff] %v8047_v0 }
 0x3c0   : > { %v8049_v16 = vpop.f32.mrb[6].mxu1  ;;  %v8051_v51 = vpop.f32.mrb[14].mxu0 }
 0x3c1   : > { %14666 = vst [vmem:[#allocation29_spill] sm:$0xff] %v8049_v16  ;;  %14667 = vst [vmem:[#allocation30_spill] sm:$0xff] %v8051_v51  ;;  %v8053_v14 = vpop.f32.mrb[7].mxu1  ;;  %v8055_v19 = vpop.f32.mrb[15].mxu0 }
 0x3c2   : > { %14668 = vst [vmem:[#allocation31_spill] sm:$0xff] %v8053_v14  ;;  %14669 = vst [vmem:[#allocation32_spill] sm:$0xff] %v8055_v19 }
 0x3c4   : > { %v8057_v45 = vpop.f32.mrb[8].mxu1  ;;  %v8059_v42 = vpop.f32.mrb[16].mxu0 }
 0x3c5   : > { %14670 = vst [vmem:[#allocation33_spill] sm:$0xff] %v8057_v45  ;;  %14671 = vst [vmem:[#allocation34_spill] sm:$0xff] %v8059_v42  ;;  %v8061_v44 = vpop.f32.mrb[9].mxu1  ;;  %v8063_v49 = vpop.f32.mrb[17].mxu0 }
 0x3c6   : > { %14672 = vst [vmem:[#allocation35_spill] sm:$0xff] %v8061_v44  ;;  %14673 = vst [vmem:[#allocation36_spill] sm:$0xff] %v8063_v49 }
 0x3c8   : > { %v8065_v60 = vpop.f32.mrb[10].mxu1  ;;  %v8067_v30 = vpop.f32.mrb[18].mxu0 }
 0x3c9   : > { %14674 = vst [vmem:[#allocation37_spill] sm:$0xff] %v8065_v60  ;;  %14675 = vst [vmem:[#allocation38_spill] sm:$0xff] %v8067_v30  ;;  %v8069_v24 = vpop.f32.mrb[11].mxu1  ;;  %v8071_v18 = vpop.f32.mrb[19].mxu0 }
 0x3ca   : > { %14676 = vst [vmem:[#allocation39_spill] sm:$0xff] %v8069_v24  ;;  %14677 = vst [vmem:[#allocation40_spill] sm:$0xff] %v8071_v18 }
 0x3cc   : > { %v8073_v55 = vpop.f32.mrb[12].mxu1  ;;  %v8075_v21 = vpop.f32.mrb[20].mxu0 }
 0x3cd   : > { %v8077_v25 = vpop.f32.mrb[13].mxu1  ;;  %v8079_v1 = vpop.f32.mrb[21].mxu0 }
 0x3d0   : > { %v8081_v62 = vpop.f32.mrb[14].mxu1  ;;  %v8083_v6 = vpop.f32.mrb[22].mxu0 }
 0x3d1   : > { %v8085_v61 = vpop.f32.mrb[15].mxu1  ;;  %v8087_v20 = vpop.f32.mrb[23].mxu0 }
 0x3d4   : > { %v8089_v13 = vpop.f32.mrb[16].mxu1  ;;  %v8091_v3 = vpop.f32.mrb[24].mxu0 }
 0x3d5   : > { %14678 = vst [vmem:[#allocation41_spill] sm:$0xff] %v8089_v13  ;;  %14679 = vst [vmem:[#allocation42_spill] sm:$0xff] %v8091_v3  ;;  %v8093_v38 = vpop.f32.mrb[17].mxu1  ;;  %v8095_v54 = vpop.f32.mrb[25].mxu0 }
 0x3d6   : > { %14680 = vst [vmem:[#allocation43_spill] sm:$0xff] %v8093_v38  ;;  %14681 = vst [vmem:[#allocation44_spill] sm:$0xff] %v8095_v54 }
 0x3d8   : > { %v8097_v46 = vpop.f32.mrb[18].mxu1  ;;  %v8099_v56 = vpop.f32.mrb[26].mxu0 }
 0x3d9   : > { %14682 = vst [vmem:[#allocation45_spill] sm:$0xff] %v8097_v46  ;;  %14683 = vst [vmem:[#allocation46_spill] sm:$0xff] %v8099_v56  ;;  %v8101_v63 = vpop.f32.mrb[19].mxu1  ;;  %v8103_v4 = vpop.f32.mrb[27].mxu0 }
 0x3da   : > { %14684 = vst [vmem:[#allocation47_spill] sm:$0xff] %v8101_v63  ;;  %14685 = vst [vmem:[#allocation48_spill] sm:$0xff] %v8103_v4 }
 0x3dc   : > { %v8105_v40 = vpop.f32.mrb[20].mxu1  ;;  %v8107_v47 = vpop.f32.mrb[28].mxu0 }
 0x3dd   : > { %14686 = vst [vmem:[#allocation49_spill] sm:$0xff] %v8105_v40  ;;  %14687 = vst [vmem:[#allocation50_spill] sm:$0xff] %v8107_v47  ;;  %v8109_v10 = vpop.f32.mrb[21].mxu1  ;;  %v8111_v32 = vpop.f32.mrb[29].mxu0 }
 0x3de   : > { %14688 = vst [vmem:[#allocation51_spill] sm:$0xff] %v8109_v10  ;;  %14689 = vst [vmem:[#allocation52_spill] sm:$0xff] %v8111_v32 }
 0x3e0   : > { %v8113_v27 = vpop.f32.mrb[22].mxu1  ;;  %v8115_v2 = vpop.f32.mrb[30].mxu0 }
 0x3e1   : > { %14690 = vst [vmem:[#allocation53_spill] sm:$0xff] %v8113_v27  ;;  %14691 = vst [vmem:[#allocation54_spill] sm:$0xff] %v8115_v2  ;;  %v8117_v52 = vpop.f32.mrb[23].mxu1  ;;  %v8119_v49 = vpop.f32.mrb[31].mxu0 }
 0x3e2   : > { %14692 = vst [vmem:[#allocation55_spill] sm:$0xff] %v8117_v52  ;;  %14693 = vst [vmem:[#allocation56_spill] sm:$0xff] %v8119_v49 }
 0x3e4   : > { %v8121_v42 = vpop.f32.mrb[24].mxu1  ;;  %v8123_v44 = vpop.f32.mrb[32].mxu0 }
 0x3e5   : > { %14694 = vst [vmem:[#allocation57_spill] sm:$0xff] %v8121_v42  ;;  %14695 = vst [vmem:[#allocation58_spill] sm:$0xff] %v8123_v44  ;;  %v8125_v45 = vpop.f32.mrb[25].mxu1  ;;  %v8127_v40 = vpop.f32.mrb[33].mxu0 }
 0x3e6   : > { %14696 = vst [vmem:[#allocation59_spill] sm:$0xff] %v8125_v45  ;;  %14697 = vst [vmem:[#allocation60_spill] sm:$0xff] %v8127_v40 }
 0x3e8   : > { %v8129_v47 = vpop.f32.mrb[26].mxu1  ;;  %v8131_v10 = vpop.f32.mrb[34].mxu0 }
 0x3e9   : > { %14698 = vst [vmem:[#allocation61_spill] sm:$0xff] %v8129_v47  ;;  %14699 = vst [vmem:[#allocation62_spill] sm:$0xff] %v8131_v10  ;;  %v8133_v32 = vpop.f32.mrb[27].mxu1  ;;  %v8135_v0 = vpop.f32.mrb[35].mxu0 }
 0x3ea   : > { %14700 = vst [vmem:[#allocation63_spill] sm:$0xff] %v8133_v32  ;;  %14701 = vst [vmem:[#allocation64_spill] sm:$0xff] %v8135_v0 }
 0x3ec   : > { %v8137_v34 = vpop.f32.mrb[28].mxu1  ;;  %v8139_v43 = vpop.f32.mrb[36].mxu0 }
 0x3ed   : > { %v8141_v23 = vpop.f32.mrb[29].mxu1  ;;  %v8143_v42 = vpop.f32.mrb[37].mxu0 }
 0x3f0   : > { %v8145_v44 = vpop.f32.mrb[30].mxu1  ;;  %v8147_v45 = vpop.f32.mrb[38].mxu0 }
 0x3f1   : > { %v8149_v40 = vpop.f32.mrb[31].mxu1  ;;  %v8151_v4 = vpop.f32.mrb[39].mxu0 }
 0x3f4   : > { %v8153_v56 = vpop.f32.mrb[32].mxu1  ;;  %v8155_v63 = vpop.f32.mrb[40].mxu0 }
 0x3f5   : > { %14702 = vst [vmem:[#allocation65_spill] sm:$0xff] %v8153_v56  ;;  %14703 = vst [vmem:[#allocation66_spill] sm:$0xff] %v8155_v63  ;;  %v8157_v46 = vpop.f32.mrb[33].mxu1  ;;  %v8159_v33 = vpop.f32.mrb[41].mxu0 }
 0x3f6   : > { %14704 = vst [vmem:[#allocation67_spill] sm:$0xff] %v8157_v46  ;;  %14705 = vst [vmem:[#allocation68_spill] sm:$0xff] %v8159_v33 }
 0x3f8   : > { %v8161_v15 = vpop.f32.mrb[34].mxu1  ;;  %v8163_v28 = vpop.f32.mrb[42].mxu0 }
 0x3f9   : > { %14706 = vst [vmem:[#allocation69_spill] sm:$0xff] %v8161_v15  ;;  %14707 = vst [vmem:[#allocation70_spill] sm:$0xff] %v8163_v28  ;;  %v8165_v41 = vpop.f32.mrb[35].mxu1  ;;  %v8167_v49 = vpop.f32.mrb[43].mxu0 }
 0x3fa   : > { %14708 = vst [vmem:[#allocation71_spill] sm:$0xff] %v8165_v41  ;;  %14709 = vst [vmem:[#allocation72_spill] sm:$0xff] %v8167_v49 }
 0x3fc   : > { %v8169_v2 = vpop.f32.mrb[36].mxu1  ;;  %v8171_v52 = vpop.f32.mrb[44].mxu0 }
 0x3fd   : > { %14710 = vst [vmem:[#allocation73_spill] sm:$0xff] %v8169_v2  ;;  %14711 = vst [vmem:[#allocation74_spill] sm:$0xff] %v8171_v52  ;;  %v8173_v27 = vpop.f32.mrb[37].mxu1  ;;  %v8175_v56 = vpop.f32.mrb[45].mxu0 }
 0x3fe   : > { %14712 = vst [vmem:[#allocation75_spill] sm:$0xff] %v8173_v27  ;;  %14713 = vst [vmem:[#allocation76_spill] sm:$0xff] %v8175_v56 }
 0x400   : > { %v8177_v63 = vpop.f32.mrb[38].mxu1  ;;  %v8179_v46 = vpop.f32.mrb[46].mxu0 }
 0x401   : > { %14714 = vst [vmem:[#allocation77_spill] sm:$0xff] %v8177_v63  ;;  %14715 = vst [vmem:[#allocation78_spill] sm:$0xff] %v8179_v46  ;;  %v8181_v33 = vpop.f32.mrb[39].mxu1  ;;  %v8183_v15 = vpop.f32.mrb[47].mxu0 }
 0x402   : > { %14716 = vst [vmem:[#allocation79_spill] sm:$0xff] %v8181_v33  ;;  %14717 = vst [vmem:[#allocation80_spill] sm:$0xff] %v8183_v15 }
 0x404   : > { %v8185_v28 = vpop.f32.mrb[40].mxu1  ;;  %v8187_v41 = vpop.f32.mrb[48].mxu0 }
 0x405   : > { %14718 = vst [vmem:[#allocation81_spill] sm:$0xff] %v8185_v28  ;;  %14719 = vst [vmem:[#allocation82_spill] sm:$0xff] %v8187_v41  ;;  %v8189_v49 = vpop.f32.mrb[41].mxu1  ;;  %v8191_v2 = vpop.f32.mrb[49].mxu0 }
 0x406   : > { %14720 = vst [vmem:[#allocation83_spill] sm:$0xff] %v8189_v49  ;;  %14721 = vst [vmem:[#allocation84_spill] sm:$0xff] %v8191_v2 }
 0x408   : > { %v8193_v52 = vpop.f32.mrb[42].mxu1  ;;  %v8195_v27 = vpop.f32.mrb[50].mxu0 }
 0x409   : > { %14722 = vst [vmem:[#allocation85_spill] sm:$0xff] %v8193_v52  ;;  %14723 = vst [vmem:[#allocation86_spill] sm:$0xff] %v8195_v27  ;;  %v8197_v56 = vpop.f32.mrb[43].mxu1  ;;  %v8199_v63 = vpop.f32.mrb[51].mxu0 }
 0x40a   : > { %14724 = vst [vmem:[#allocation87_spill] sm:$0xff] %v8197_v56  ;;  %14725 = vst [vmem:[#allocation88_spill] sm:$0xff] %v8199_v63 }
 0x40c   : > { %v8201_v46 = vpop.f32.mrb[44].mxu1  ;;  %v8203_v33 = vpop.f32.mrb[52].mxu0 }
 0x40d   : > { %14726 = vst [vmem:[#allocation89_spill] sm:$0xff] %v8201_v46  ;;  %14727 = vst [vmem:[#allocation90_spill] sm:$0xff] %v8203_v33  ;;  %v8205_v15 = vpop.f32.mrb[45].mxu1  ;;  %v8207_v28 = vpop.f32.mrb[53].mxu0 }
 0x40e   : > { %14728 = vst [vmem:[#allocation91_spill] sm:$0xff] %v8205_v15  ;;  %14729 = vst [vmem:[#allocation92_spill] sm:$0xff] %v8207_v28 }
 0x410   : > { %v8209_v41 = vpop.f32.mrb[46].mxu1  ;;  %v8211_v49 = vpop.f32.mrb[54].mxu0 }
 0x411   : > { %14730 = vst [vmem:[#allocation93_spill] sm:$0xff] %v8209_v41  ;;  %14731 = vst [vmem:[#allocation94_spill] sm:$0xff] %v8211_v49  ;;  %v8213_v2 = vpop.f32.mrb[47].mxu1  ;;  %v8215_v52 = vpop.f32.mrb[55].mxu0 }
 0x412   : > { %14732 = vst [vmem:[#allocation95_spill] sm:$0xff] %v8213_v2  ;;  %14733 = vst [vmem:[#allocation96_spill] sm:$0xff] %v8215_v52 }
 0x414   : > { %v8217_v27 = vpop.f32.mrb[48].mxu1  ;;  %v8219_v56 = vpop.f32.mrb[56].mxu0 }
 0x415   : > { %14734 = vst [vmem:[#allocation97_spill] sm:$0xff] %v8217_v27  ;;  %14735 = vst [vmem:[#allocation98_spill] sm:$0xff] %v8219_v56  ;;  %v8221_v63 = vpop.f32.mrb[49].mxu1  ;;  %v8223_v46 = vpop.f32.mrb[57].mxu0 }
 0x416   : > { %14736 = vst [vmem:[#allocation99_spill] sm:$0xff] %v8221_v63  ;;  %14737 = vst [vmem:[#allocation100_spill] sm:$0xff] %v8223_v46 }
 0x418   : > { %v8225_v33 = vpop.f32.mrb[50].mxu1  ;;  %v8227_v15 = vpop.f32.mrb[58].mxu0 }
 0x419   : > { %14738 = vst [vmem:[#allocation101_spill] sm:$0xff] %v8225_v33  ;;  %14739 = vst [vmem:[#allocation102_spill] sm:$0xff] %v8227_v15  ;;  %v8229_v28 = vpop.f32.mrb[51].mxu1  ;;  %v8231_v41 = vpop.f32.mrb[59].mxu0 }
 0x41a   : > { %14740 = vst [vmem:[#allocation103_spill] sm:$0xff] %v8229_v28  ;;  %14741 = vst [vmem:[#allocation104_spill] sm:$0xff] %v8231_v41 }
 0x41c   : > { %v8233_v49 = vpop.f32.mrb[52].mxu1  ;;  %v8235_v2 = vpop.f32.mrb[60].mxu0 }
 0x41d   : > { %14742 = vst [vmem:[#allocation105_spill] sm:$0xff] %v8233_v49  ;;  %14743 = vst [vmem:[#allocation106_spill] sm:$0xff] %v8235_v2  ;;  %v8237_v52 = vpop.f32.mrb[53].mxu1  ;;  %v8239_v27 = vpop.f32.mrb[61].mxu0 }
 0x41e   : > { %14744 = vst [vmem:[#allocation107_spill] sm:$0xff] %v8237_v52  ;;  %14745 = vst [vmem:[#allocation108_spill] sm:$0xff] %v8239_v27 }
 0x420   : > { %v8241_v56 = vpop.f32.mrb[54].mxu1  ;;  %v8243_v63 = vpop.f32.mrb[62].mxu0 }
 0x421   : > { %14746 = vst [vmem:[#allocation109_spill] sm:$0xff] %v8241_v56  ;;  %14747 = vst [vmem:[#allocation110_spill] sm:$0xff] %v8243_v63  ;;  %v8245_v46 = vpop.f32.mrb[55].mxu1  ;;  %v8247_v33 = vpop.f32.mrb[63].mxu0 }
 0x422   : > { %14748 = vst [vmem:[#allocation111_spill] sm:$0xff] %v8245_v46  ;;  %14749 = vst [vmem:[#allocation112_spill] sm:$0xff] %v8247_v33 }
 0x424   : > { %v8249_v15 = vpop.f32.mrb[56].mxu1  ;;  %v8251_v28 = vpop.f32.mrb[64].mxu0 }
 0x425   : > { %14750 = vst [vmem:[#allocation113_spill] sm:$0xff] %v8249_v15  ;;  %14751 = vst [vmem:[#allocation114_spill] sm:$0xff] %v8251_v28  ;;  %v8253_v41 = vpop.f32.mrb[57].mxu1  ;;  %v8255_v49 = vpop.f32.mrb[65].mxu0 }
 0x426   : > { %14752 = vst [vmem:[#allocation115_spill] sm:$0xff] %v8253_v41  ;;  %14753 = vst [vmem:[#allocation116_spill] sm:$0xff] %v8255_v49 }
 0x428   : > { %v8257_v2 = vpop.f32.mrb[58].mxu1  ;;  %v8259_v52 = vpop.f32.mrb[66].mxu0 }
 0x429   : > { %14754 = vst [vmem:[#allocation117_spill] sm:$0xff] %v8257_v2  ;;  %14755 = vst [vmem:[#allocation118_spill] sm:$0xff] %v8259_v52  ;;  %v8261_v27 = vpop.f32.mrb[59].mxu1  ;;  %v8263_v56 = vpop.f32.mrb[67].mxu0  ;;  %v6231_v52 = vld [vmem:[#allocation2 + $0x3] ss:$0 sm:$0xff] }
 0x42a   : > { %14756 = vst [vmem:[#allocation119_spill] sm:$0xff] %v8261_v27  ;;  %14757 = vst [vmem:[#allocation120_spill] sm:$0xff] %v8263_v56 }
 0x42c   : > { %v8265_v63 = vpop.f32.mrb[60].mxu1  ;;  %v8267_v46 = vpop.f32.mrb[68].mxu0 }
 0x42d   : > { %14758 = vst [vmem:[#allocation121_spill] sm:$0xff] %v8265_v63  ;;  %14759 = vst [vmem:[#allocation122_spill] sm:$0xff] %v8267_v46  ;;  %v8269_v33 = vpop.f32.mrb[61].mxu1  ;;  %v8271_v15 = vpop.f32.mrb[69].mxu0 }
 0x42e   : > { %14760 = vst [vmem:[#allocation123_spill] sm:$0xff] %v8269_v33  ;;  %14761 = vst [vmem:[#allocation124_spill] sm:$0xff] %v8271_v15 }
 0x430   : > { %v8273_v28 = vpop.f32.mrb[62].mxu1  ;;  %v8275_v41 = vpop.f32.mrb[70].mxu0 }
 0x431   : > { %14762 = vst [vmem:[#allocation125_spill] sm:$0xff] %v8273_v28  ;;  %14763 = vst [vmem:[#allocation126_spill] sm:$0xff] %v8275_v41  ;;  %v8277_v49 = vpop.f32.mrb[63].mxu1  ;;  %v8279_v2 = vpop.f32.mrb[71].mxu0 }
 0x432   : > { %14764 = vst [vmem:[#allocation127_spill] sm:$0xff] %v8277_v49  ;;  %14765 = vst [vmem:[#allocation128_spill] sm:$0xff] %v8279_v2 }
 0x434   : > { %v6359_v27 = vpop.f32.mrb[64].mxu1 }
 0x435   : > { %v8281_v19 = vadd.f32 %v6359_v27, %v6231_v52  ;;  %v2240_v56 = vpop.f32.mrb[65].mxu1 }
 0x436   : > { %v8283_v63 = vadd.f32 %v6231_v52, %v2240_v56 }
 0x437   : > { %v2300_v46 = vand.u32 2147483647, %v8281_v19 }
 0x438   : > { %v2299_v33 = vand.u32 2147483647, %v8283_v63  ;;  %v6362_v15 = vpop.f32.mrb[66].mxu1 }
 0x439   : > { %v2308_v51 = vsub.f32 0.0, %v2300_v46  ;;  %v8287_v28 = vadd.f32 %v6362_v15, %v6231_v52  ;;  %v2250_v41 = vpop.f32.mrb[67].mxu1 }
 0x43a   : > { %v2307_v14 = vsub.f32 0.0, %v2299_v33  ;;  %v8290_v27 = vadd.f32 %v6231_v52, %v2250_v41 }
 0x43b   : > { %v2317_v49 = vmul.f32 1.442695, %v2308_v51  ;;  %v2302_v2 = vand.u32 2147483647, %v8287_v28 }
 0x43c   : > { %v2315_v16 = vmul.f32 1.442695, %v2307_v14  ;;  %v6365_v0 = vpop.f32.mrb[68].mxu1  ;;  %v2301_v33 = vand.u32 2147483647, %v8290_v27 }
 0x43d   : > { %6717 = vpow2.f32 %v2317_v49  ;;  %v8292_v56 = vadd.f32 %v6365_v0, %v6231_v52  ;;  %v2260_v10 = vpop.f32.mrb[69].mxu1  ;;  %v2310_v15 = vsub.f32 0.0, %v2302_v2 }
 0x43e   : > { %6719 = vpow2.f32 %v2315_v16  ;;  %v8295_v47 = vadd.f32 %v6231_v52, %v2260_v10  ;;  %v2309_v10 = vsub.f32 0.0, %v2301_v33 }
 0x43f   : > { %v2304_v32 = vand.u32 2147483647, %v8292_v56  ;;  %v2321_v16 = vmul.f32 1.442695, %v2310_v15 }
 0x440   : > { %v6368_v46 = vpop.f32.mrb[70].mxu1  ;;  %v2303_v0 = vand.u32 2147483647, %v8295_v47 }
 0x441   : > { %v2312_v51 = vsub.f32 0.0, %v2304_v32  ;;  %v8298_v14 = vadd.f32 %v6368_v46, %v6231_v52  ;;  %v2270_v18 = vpop.f32.mrb[71].mxu1 }
 0x442   : > { %v8300_v30 = vadd.f32 %v6231_v52, %v2270_v18  ;;  %v2311_v3 = vsub.f32 0.0, %v2303_v0 }
 0x443   : > { %v2325_v41 = vmul.f32 1.442695, %v2312_v51  ;;  %v2306_v49 = vand.u32 2147483647, %v8298_v14  ;;  %v2319_v51 = vmul.f32 1.442695, %v2309_v10 }
 0x444   : > { %v2305_v24 = vand.u32 2147483647, %v8300_v30  ;;  %v2323_v13 = vmul.f32 1.442695, %v2311_v3 }
 0x445   : > { %6721 = vpow2.f32 %v2325_v41  ;;  %v2314_v2 = vsub.f32 0.0, %v2306_v49 }
 0x446   : > { %v2313_v60 = vsub.f32 0.0, %v2305_v24  ;;  %6723 = vpow2.f32 %v2321_v16 }
 0x447   : > { %v6718_v54 = vpop.eup %6717  ;;  %v2329_v32 = vmul.f32 1.442695, %v2314_v2 }
 0x448   : > { %v6720_v46 = vpop.eup %6719  ;;  %v2332_v38 = vadd.f32 1.0, %v6718_v54  ;;  %v2327_v18 = vmul.f32 1.442695, %v2313_v60  ;;  %v2292_v54 = vmax.f32 %v8281_v19, 0.0 }
 0x449   : > { %v2331_v52 = vadd.f32 1.0, %v6720_v46  ;;  %6725 = vpow2.f32 %v2329_v32 }
 0x44a   : > { %6727 = vlog2.f32 %v2332_v38 }
 0x44b   : > { %6729 = vlog2.f32 %v2331_v52 }
 0x44c   : > { %6731 = vpow2.f32 %v2327_v18 }
 0x44d   : > { %6733 = vpow2.f32 %v2319_v51 }
 0x44e   : > { %6735 = vpow2.f32 %v2323_v13  ;;  %v2291_v13 = vmax.f32 %v8283_v63, 0.0 }
 0x44f   : > { %v6722_v15 = vpop.eup %6721 }
 0x450   : > { %v2336_v33 = vadd.f32 1.0, %v6722_v15  ;;  %v6724_v41 = vpop.eup %6723 }
 0x451   : > { %v2334_v46 = vadd.f32 1.0, %v6724_v41 }
 0x452   : > { %6737 = vlog2.f32 %v2336_v33  ;;  %v2296_v33 = vmax.f32 %v8292_v56, 0.0  ;;  %v2297_v56 = vmax.f32 %v8300_v30, 0.0 }
 0x453   : > { %v6726_v24 = vpop.eup %6725 }
 0x454   : > { %v6728_v0 = vpop.eup %6727  ;;  %v2338_v49 = vadd.f32 1.0, %v6726_v24 }
 0x455   : > { %v6730_v2 = vpop.eup %6729  ;;  %v2342_v60 = vmul.f32 0.6931472, %v6728_v0  ;;  %v2298_v0 = vmax.f32 %v8298_v14, 0.0 }
 0x456   : > { %v6732_v16 = vpop.eup %6731  ;;  %6739 = vlog2.f32 %v2338_v49  ;;  %v2340_v3 = vmul.f32 0.6931472, %v6730_v2 }
 0x457   : > { %v6734_v10 = vpop.eup %6733  ;;  %v2337_v38 = vadd.f32 1.0, %v6732_v16  ;;  %v8306_v32 = vadd.f32 %v2342_v60, %v2292_v54 }
 0x458   : > { %v6736_v18 = vpop.eup %6735  ;;  %v2333_v52 = vadd.f32 1.0, %v6734_v10  ;;  %v8311_v51 = vadd.f32 %v2340_v3, %v2291_v13 }
 0x459   : > { %6741 = vlog2.f32 %v2337_v38  ;;  %2373 = vrot.lane.b32.xlu0 %v8306_v32, %s7068_s25  ;;  %v2335_v15 = vadd.f32 1.0, %v6736_v18  ;;  %v2294_v18 = vmax.f32 %v8287_v28, 0.0 }
 0x45a   : > { %6743 = vlog2.f32 %v2334_v46  ;;  %v8345_v13 = vmul.f32 %v8311_v51, %v7796_v26 }
 0x45b   : > { %6745 = vlog2.f32 %v2333_v52 }
 0x45c   : > { %v6738_v19 = vpop.eup %6737  ;;  %6747 = vlog2.f32 %v2335_v15 }
 0x45d   : > { %2371 = vrot.lane.b32.xlu0 %v8311_v51, %s7068_s25  ;;  %v2350_v41 = vmul.f32 0.6931472, %v6738_v19  ;;  %v2293_v19 = vmax.f32 %v8290_v27, 0.0 }
 0x45f   : > { %v8316_v24 = vadd.f32 %v2350_v41, %v2296_v33  ;;  %v2295_v41 = vmax.f32 %v8295_v47, 0.0 }
 0x460   : > { %v6740_v63 = vpop.eup %6739 }
 0x461   : > { %2381 = vrot.lane.b32.xlu1 %v8316_v24, %s7068_s25  ;;  %v2354_v49 = vmul.f32 0.6931472, %v6740_v63  ;;  %v8365_v27 = vmul.f32 %v8316_v24, %v7841_v37 }
 0x463   : > { %v6742_v2 = vpop.eup %6741  ;;  %v8321_v54 = vadd.f32 %v2354_v49, %v2298_v0  ;;  %14767 = vst [vmem:[#allocation130_spill] sm:$0xff] %v8365_v27  ;;  %v8377_v0 = vmul.f32 %v8306_v32, %v7804_v48 }
 0x464   : > { %v2352_v60 = vmul.f32 0.6931472, %v6742_v2  ;;  %v6744_v10 = vpop.eup %6743 }
 0x465   : > { %2385 = vrot.lane.b32.xlu1 %v8321_v54, %s7068_s25  ;;  %v8328_v16 = vmul.f32 %v8321_v54, %v7859_v58  ;;  %v6746_v14 = vpop.eup %6745  ;;  %v2346_v3 = vmul.f32 0.6931472, %v6744_v10  ;;  %14769 = vst [vmem:[#allocation132_spill] sm:$0xff] %v8377_v0  ;;  %v6236_v10 = vmul.f32 -1.442695, %v7369_v5 }
 0x466   : > { %v8330_v38 = vadd.f32 %v2352_v60, %v2297_v56  ;;  %v6748_v46 = vpop.eup %6747  ;;  %v2344_v52 = vmul.f32 0.6931472, %v6746_v14  ;;  %v6234_v56 = vmul.f32 -1.442695, %v7337_v53  ;;  %v6233_v60 = vmul.f32 -1.442695, %v7348_v57 }
 0x467   : > { %2433 = vrot.lane.b32.xlu0 %v8328_v16, %s7068_s25  ;;  %v8350_v15 = vadd.f32 %v2346_v3, %v2294_v18  ;;  %v2348_v33 = vmul.f32 0.6931472, %v6748_v46  ;;  %v6235_v14 = vmul.f32 -1.442695, %v7391_v11  ;;  %v6238_v3 = vmul.f32 -1.442695, %v7430_v31 }
 0x468   : > { %v8338_v30 = vmul.f32 %v8330_v38, %v7850_v9  ;;  %v8355_v28 = vadd.f32 %v2344_v52, %v2293_v19  ;;  %6749 = vpow2.f32 %v6234_v56  ;;  %v6237_v46 = vmul.f32 -1.442695, %v7436_v36 }
 0x469   : > { %2383 = vrot.lane.b32.xlu1 %v8330_v38, %s7068_s25  ;;  %v8359_v63 = vadd.f32 %v2348_v33, %v2295_v41  ;;  %v8371_v47 = vmul.f32 %v8350_v15, %v7823_v12  ;;  %6751 = vpow2.f32 %v6233_v60  ;;  %v6239_v18 = vmul.f32 -1.442695, %v7465_v8 }
 0x46a   : > { %v8383_v49 = vmul.f32 %v8355_v28, %v7814_v39  ;;  %6753 = vpow2.f32 %v6236_v10  ;;  %v6240_v10 = vmul.f32 -1.442695, %v7449_v50 }
 0x46b   : > { %2431 = vrot.lane.b32.xlu0 %v8338_v30, %s7068_s25  ;;  %14766 = vst [vmem:[#allocation129_spill] sm:$0xff] %v8359_v63  ;;  %14768 = vst [vmem:[#allocation131_spill] sm:$0xff] %v8371_v47  ;;  %v8389_v2 = vmul.f32 %v8359_v63, %v7832_v17  ;;  %6755 = vpow2.f32 %v6235_v14 }
 0x46c   : > { %14770 = vst [vmem:[#allocation133_spill] sm:$0xff] %v8383_v49  ;;  %6757 = vpow2.f32 %v6238_v3 }
 0x46d   : > { %2419 = vrot.lane.b32.xlu1 %v8345_v13, %s7068_s25  ;;  %14771 = vst [vmem:[#allocation134_spill] sm:$0xff] %v8389_v2  ;;  %6759 = vpow2.f32 %v6237_v46 }
 0x46e   : > { %6761 = vpow2.f32 %v6239_v18 }
 0x46f   : > { %2377 = vrot.lane.b32.xlu0 %v8350_v15, %s7068_s25 }
 0x471   : > { %2375 = vrot.lane.b32.xlu1 %v8355_v28, %s7068_s25 }
 0x472   : > { %v6750_v52 = vpop.eup %6749 }
 0x473   : > { %2379 = vrot.lane.b32.xlu0 %v8359_v63, %s7068_s25  ;;  %v6752_v19 = vpop.eup %6751  ;;  %v5538_v58 = vadd.f32 1.0, %v6750_v52 }
 0x474   : > { %v6754_v33 = vpop.eup %6753  ;;  %v5537_v9 = vadd.f32 1.0, %v6752_v19  ;;  %v2455_v19 = vsub.s32 0, %v7334_v29 }
 0x475   : > { %2429 = vrot.lane.b32.xlu1 %v8365_v27, %s7068_s25  ;;  %v6756_v41 = vpop.eup %6755  ;;  %v5540_v56 = vadd.f32 1.0, %v6754_v33  ;;  %6763 = vrcp.f32 %v5538_v58  ;;  %v2459_v33 = vsub.s32 1, %v7334_v29  ;;  %v2463_v58 = vsub.s32 2, %v7334_v29 }
 0x476   : > { %v6758_v37 = vpop.eup %6757  ;;  %v5539_v60 = vadd.f32 1.0, %v6756_v41  ;;  %6765 = vrcp.f32 %v5537_v9  ;;  %v2467_v41 = vsub.s32 3, %v7334_v29 }
 0x477   : > { %2425 = vrot.lane.b32.xlu0 %v8371_v47, %s7068_s25  ;;  %v6760_v17 = vpop.eup %6759  ;;  %v5542_v14 = vadd.f32 1.0, %v6758_v37  ;;  %6767 = vrcp.f32 %v5540_v56  ;;  %v2471_v37 = vsub.s32 4, %v7334_v29  ;;  %v2475_v56 = vsub.s32 5, %v7334_v29 }
 0x478   : > { %6769 = vrcp.f32 %v5539_v60  ;;  %v5541_v3 = vadd.f32 1.0, %v6760_v17  ;;  %v6762_v46 = vpop.eup %6761  ;;  %v2451_v17 = vld [vmem:[%s13873_s2] sm:$0xff]  ;;  %v2479_v60 = vsub.s32 6, %v7334_v29 }
 0x479   : > { %2421 = vrot.lane.b32.xlu1 %v8377_v0, %s7068_s25  ;;  %6771 = vpow2.f32 %v6240_v10  ;;  %v5543_v12 = vadd.f32 1.0, %v6762_v46  ;;  %v8412_v50 = vrot.slane %v2451_v17, %v2455_v19  ;;  %v8414_v39 = vrot.slane %v2451_v17, %v2459_v33 }
 0x47a   : > { %6773 = vrcp.f32 %v5542_v14  ;;  %v8416_v48 = vrot.slane %v2451_v17, %v2463_v58  ;;  %v8418_v26 = vrot.slane %v2451_v17, %v2467_v41  ;;  %v8424_v0 = vrot.slane %v2451_v17, %v2479_v60 }
 0x47b   : > { %6775 = vrcp.f32 %v5541_v3  ;;  %v2483_v3 = vsub.s32 7, %v7334_v29 }
 0x47c   : > { %6777 = vrcp.f32 %v5543_v12  ;;  %14772 = vst [vmem:[#allocation135_spill] sm:$0xff] %v8418_v26  ;;  %14775 = vst [vmem:[#allocation138_spill] sm:$0xff] %v8424_v0 }
 0x47d   : > { %2423 = vrot.lane.b32.xlu1 %v8383_v49, %s7068_s25  ;;  %v8422_v49 = vrot.slane %v2451_v17, %v2475_v56  ;;  %v8435_v41 = vrot.slane %v2451_v17, %v2483_v3 }
 0x47f   : > { %v6764_v52 = vpop.eup %6763  ;;  %14774 = vst [vmem:[#allocation137_spill] sm:$0xff] %v8422_v49  ;;  %14779 = vst [vmem:[#allocation142_spill] sm:$0xff] %v8435_v41 }
 0x480   : > { %v6766_v18 = vpop.eup %6765  ;;  %v8430_v19 = vmul.f32 %v6764_v52, %v7337_v53 }
 0x481   : > { %2427 = vrot.lane.b32.xlu1 %v8389_v2, %s7068_s25  ;;  %v6768_v9 = vpop.eup %6767  ;;  %v8420_v2 = vrot.slane %v2451_v17, %v2471_v37  ;;  %v8427_v27 = vmul.f32 %v6766_v18, %v7348_v57 }
 0x482   : > { %v6770_v10 = vpop.eup %6769  ;;  %14777 = vst [vmem:[#allocation140_spill] sm:$0xff] %v8430_v19  ;;  %v8433_v33 = vmul.f32 %v6768_v9, %v7369_v5 }
 0x483   : > { %v6772_v14 = vpop.eup %6771  ;;  %14773 = vst [vmem:[#allocation136_spill] sm:$0xff] %v8420_v2  ;;  %14776 = vst [vmem:[#allocation139_spill] sm:$0xff] %v8427_v27  ;;  %v8440_v56 = vmul.f32 %v6770_v10, %v7391_v11 }
 0x484   : > { %v6774_v46 = vpop.eup %6773  ;;  %14778 = vst [vmem:[#allocation141_spill] sm:$0xff] %v8433_v33  ;;  %v5544_v58 = vadd.f32 1.0, %v6772_v14 }
 0x485   : > { %v6776_v47 = vpop.eup %6775  ;;  %14780 = vst [vmem:[#allocation143_spill] sm:$0xff] %v8440_v56  ;;  %v8443_v60 = vmul.f32 %v6774_v46, %v7430_v31 }
 0x486   : > { %v8453_v11 = vmul.f32 %v6776_v47, %v7436_v36  ;;  %6779 = vrcp.f32 %v5544_v58  ;;  %v6778_v33 = vpop.eup %6777 }
 0x487   : > { %14781 = vst [vmem:[#allocation144_spill] sm:$0xff] %v8443_v60 }
 0x488   : > { %14782 = vst [vmem:[#allocation145_spill] sm:$0xff] %v8453_v11 }
 0x4cb   : > { %v2374_v12 = vpop.permute.xlu0 %2373 }
 0x4cc   : > { %v2396_v37 = vsel %vm1245_vm15, %v8306_v32, %v2374_v12 }
 0x4cd   : > { %v2501_v57 = vmul.f32 %v8412_v50, %v2396_v37  ;;  %v2502_v53 = vmul.f32 %v8414_v39, %v2396_v37  ;;  %v2503_v52 = vmul.f32 %v8416_v48, %v2396_v37  ;;  %v2504_v5 = vmul.f32 %v8418_v26, %v2396_v37 }
 0x4ce   : > { %v2505_v18 = vmul.f32 %v8420_v2, %v2396_v37  ;;  %v2506_v9 = vmul.f32 %v8422_v49, %v2396_v37  ;;  %v2507_v32 = vmul.f32 %v8424_v0, %v2396_v37  ;;  %v2508_v3 = vmul.f32 %v8435_v41, %v2396_v37 }
 0x4cf   : > { %v2573_v17 = vmul.f32 1.442695, %v2501_v57  ;;  %v2575_v31 = vmul.f32 1.442695, %v2502_v53  ;;  %v2577_v10 = vmul.f32 1.442695, %v2503_v52  ;;  %v2372_v14 = vpop.permute.xlu0 %2371 }
 0x4d0   : > { %v2579_v46 = vmul.f32 1.442695, %v2504_v5  ;;  %v2581_v12 = vmul.f32 1.442695, %v2505_v18  ;;  %v2395_v60 = vsel %vm1245_vm15, %v8311_v51, %v2372_v14  ;;  %v2583_v56 = vmul.f32 1.442695, %v2506_v9 }
 0x4d1   : > { %6781 = vpow2.f32 %v2573_v17  ;;  %v2585_v19 = vmul.f32 1.442695, %v2507_v32  ;;  %v2493_v27 = vmul.f32 %v8412_v50, %v2395_v60  ;;  %v2494_v36 = vmul.f32 %v8414_v39, %v2395_v60 }
 0x4d2   : > { %6783 = vpow2.f32 %v2575_v31  ;;  %v2495_v47 = vmul.f32 %v8416_v48, %v2395_v60  ;;  %v2496_v58 = vmul.f32 %v8418_v26, %v2395_v60  ;;  %v2497_v37 = vmul.f32 %v8420_v2, %v2395_v60 }
 0x4d3   : > { %6785 = vpow2.f32 %v2577_v10  ;;  %v2498_v57 = vmul.f32 %v8422_v49, %v2395_v60  ;;  %v2499_v51 = vmul.f32 %v8424_v0, %v2395_v60  ;;  %v2587_v53 = vmul.f32 1.442695, %v2508_v3  ;;  %v2382_v5 = vpop.permute.xlu1 %2381 }
 0x4d4   : > { %6787 = vpow2.f32 %v2579_v46  ;;  %v2500_v52 = vmul.f32 %v8435_v41, %v2395_v60  ;;  %v8467_v18 = vmul.f32 %v6778_v33, %v7465_v8  ;;  %v2557_v9 = vmul.f32 1.442695, %v2493_v27  ;;  %v8474_v27 = vpop.eup %6779 }
 0x4d5   : > { %6789 = vpow2.f32 %v2581_v12  ;;  %v2559_v32 = vmul.f32 1.442695, %v2494_v36  ;;  %v2561_v17 = vmul.f32 1.442695, %v2495_v47  ;;  %v2563_v31 = vmul.f32 1.442695, %v2496_v58 }
 0x4d6   : > { %14783 = vst [vmem:[#allocation146_spill] sm:$0xff] %v8467_v18  ;;  %6791 = vpow2.f32 %v2583_v56  ;;  %v2565_v10 = vmul.f32 1.442695, %v2497_v37  ;;  %v2567_v14 = vmul.f32 1.442695, %v2498_v57  ;;  %v2400_v3 = vsel %vm1245_vm15, %v8316_v24, %v2382_v5  ;;  %14784 = vst [vmem:[#allocation147_spill] sm:$0xff] %v8474_v27 }
 0x4d7   : > { %6793 = vpow2.f32 %v2585_v19  ;;  %v2569_v11 = vmul.f32 1.442695, %v2499_v51  ;;  %v2571_v63 = vmul.f32 1.442695, %v2500_v52  ;;  %v2533_v60 = vmul.f32 %v8412_v50, %v2400_v3  ;;  %v2386_v47 = vpop.permute.xlu1 %2385 }
 0x4d8   : > { %6795 = vpow2.f32 %v2587_v53  ;;  %v2534_v8 = vmul.f32 %v8414_v39, %v2400_v3  ;;  %v2535_v33 = vmul.f32 %v8416_v48, %v2400_v3  ;;  %v2536_v56 = vmul.f32 %v8418_v26, %v2400_v3 }
 0x4d9   : > { %6797 = vpow2.f32 %v2557_v9  ;;  %v2537_v46 = vmul.f32 %v8420_v2, %v2400_v3  ;;  %v2538_v19 = vmul.f32 %v8422_v49, %v2400_v3  ;;  %v2539_v12 = vmul.f32 %v8424_v0, %v2400_v3  ;;  %v2434_v58 = vpop.permute.xlu0 %2433 }
 0x4da   : > { %6799 = vpow2.f32 %v2559_v32  ;;  %v2540_v24 = vmul.f32 %v8435_v41, %v2400_v3  ;;  %v2637_v36 = vmul.f32 1.442695, %v2533_v60  ;;  %v2639_v57 = vmul.f32 1.442695, %v2534_v8 }
 0x4db   : > { %v8481_v37 = vpop.eup %6781  ;;  %6801 = vpow2.f32 %v2561_v17  ;;  %v2641_v51 = vmul.f32 1.442695, %v2535_v33  ;;  %v2643_v53 = vmul.f32 1.442695, %v2536_v56  ;;  %v2645_v5 = vmul.f32 1.442695, %v2537_v46 }
 0x4dc   : > { %14785 = vst [vmem:[#allocation148_spill] sm:$0xff] %v8481_v37  ;;  %v8483_v52 = vpop.eup %6783  ;;  %6803 = vpow2.f32 %v2563_v31  ;;  %v2647_v9 = vmul.f32 1.442695, %v2538_v19  ;;  %v2649_v27 = vmul.f32 1.442695, %v2539_v12  ;;  %v2402_v3 = vsel %vm1245_vm15, %v8321_v54, %v2386_v47 }
 0x4dd   : > { %14786 = vst [vmem:[#allocation149_spill] sm:$0xff] %v8483_v52  ;;  %v8485_v32 = vpop.eup %6785  ;;  %6805 = vpow2.f32 %v2565_v10  ;;  %v2651_v18 = vmul.f32 1.442695, %v2540_v24  ;;  %v2450_v60 = vsel %vm1245_vm15, %v8328_v16, %v2434_v58  ;;  %v2549_v8 = vmul.f32 %v8412_v50, %v2402_v3  ;;  %v16286_v29 = vld [vmem:[#allocation146_spill] sm:$0xff] }
 0x4de   : > { %14787 = vst [vmem:[#allocation150_spill] sm:$0xff] %v8485_v32  ;;  %v8491_v17 = vpop.eup %6787  ;;  %6807 = vpow2.f32 %v2567_v14  ;;  %v2550_v31 = vmul.f32 %v8414_v39, %v2402_v3  ;;  %v2551_v33 = vmul.f32 %v8416_v48, %v2402_v3  ;;  %v2552_v10 = vmul.f32 %v8418_v26, %v2402_v3 }
 0x4df   : > { %14788 = vst [vmem:[#allocation151_spill] sm:$0xff] %v8491_v17  ;;  %v8496_v56 = vpop.eup %6789  ;;  %6809 = vpow2.f32 %v2569_v11  ;;  %v2553_v46 = vmul.f32 %v8420_v2, %v2402_v3  ;;  %v2554_v54 = vmul.f32 %v8422_v49, %v2402_v3  ;;  %v2555_v16 = vmul.f32 %v8424_v0, %v2402_v3 }
 0x4e0   : > { %14789 = vst [vmem:[#allocation152_spill] sm:$0xff] %v8496_v56  ;;  %v8501_v19 = vpop.eup %6791  ;;  %6811 = vpow2.f32 %v2571_v63  ;;  %v2556_v14 = vmul.f32 %v8435_v41, %v2402_v3  ;;  %v2669_v12 = vmul.f32 1.442695, %v2549_v8  ;;  %v2671_v47 = vmul.f32 1.442695, %v2550_v31 }
 0x4e1   : > { %14790 = vst [vmem:[#allocation153_spill] sm:$0xff] %v8501_v19  ;;  %v8505_v24 = vpop.eup %6793  ;;  %6813 = vpow2.f32 %v2637_v36  ;;  %v2673_v58 = vmul.f32 1.442695, %v2551_v33  ;;  %v2675_v11 = vmul.f32 1.442695, %v2552_v10  ;;  %v8516_v3 = vmul.f32 %v2450_v60, %v8081_v62 }
 0x4e2   : > { %14791 = vst [vmem:[#allocation154_spill] sm:$0xff] %v8505_v24  ;;  %v8507_v56 = vpop.eup %6795  ;;  %6815 = vpow2.f32 %v2639_v57  ;;  %v2677_v17 = vmul.f32 1.442695, %v2553_v46  ;;  %v2679_v32 = vmul.f32 1.442695, %v2554_v54  ;;  %v8519_v36 = vmul.f32 %v2450_v60, %v8085_v61  ;;  %v2432_v24 = vpop.permute.xlu0 %2431 }
 0x4e3   : > { %14792 = vst [vmem:[#allocation155_spill] sm:$0xff] %v8507_v56  ;;  %v8509_v52 = vmul.f32 1.442695, %v2555_v16  ;;  %v8511_v19 = vpop.eup %6797  ;;  %6817 = vpow2.f32 %v2641_v51  ;;  %v8513_v63 = vmul.f32 1.442695, %v2556_v14  ;;  %v8524_v57 = vmul.f32 %v2450_v60, %v8083_v6  ;;  %v2384_v6 = vpop.permute.xlu1 %2383 }
 0x4e4   : > { %14793 = vst [vmem:[#allocation156_spill] sm:$0xff] %v8511_v19  ;;  %v8521_v8 = vpop.eup %6799  ;;  %6819 = vpow2.f32 %v2643_v53  ;;  %v8527_v31 = vmul.f32 %v2450_v60, %v8087_v20  ;;  %v8530_v33 = vmul.f32 %v2450_v60, %v8145_v44  ;;  %v8535_v62 = vmul.f32 %v2450_v60, %v8149_v40 }
 0x4e5   : > { %14794 = vst [vmem:[#allocation157_spill] sm:$0xff] %v8521_v8  ;;  %v8532_v51 = vpop.eup %6801  ;;  %6821 = vpow2.f32 %v2645_v5  ;;  %v8538_v61 = vmul.f32 %v2450_v60, %v8147_v45  ;;  %v8541_v53 = vmul.f32 %v2450_v60, %v8151_v4  ;;  %v2401_v16 = vsel %vm1245_vm15, %v8330_v38, %v2384_v6 }
 0x4e6   : > { %14795 = vst [vmem:[#allocation158_spill] sm:$0xff] %v8532_v51  ;;  %v8543_v10 = vpop.eup %6803  ;;  %6823 = vpow2.f32 %v2647_v9  ;;  %v2542_v40 = vmul.f32 %v8414_v39, %v2401_v16  ;;  %v2543_v45 = vmul.f32 %v8416_v48, %v2401_v16  ;;  %v2545_v9 = vmul.f32 %v8420_v2, %v2401_v16 }
 0x4e7   : > { %14796 = vst [vmem:[#allocation159_spill] sm:$0xff] %v8543_v10  ;;  %v8548_v5 = vpop.eup %6805  ;;  %6825 = vpow2.f32 %v2649_v27  ;;  %v2541_v27 = vmul.f32 %v8412_v50, %v2401_v16  ;;  %v2546_v54 = vmul.f32 %v8422_v49, %v2401_v16  ;;  %v2547_v38 = vmul.f32 %v8424_v0, %v2401_v16 }
 0x4e8   : > { %14797 = vst [vmem:[#allocation160_spill] sm:$0xff] %v8548_v5  ;;  %v8553_v60 = vpop.eup %6807  ;;  %6827 = vpow2.f32 %v2651_v18  ;;  %v2544_v18 = vmul.f32 %v8418_v26, %v2401_v16  ;;  %v2657_v56 = vmul.f32 1.442695, %v2543_v45  ;;  %v2449_v45 = vsel %vm1245_vm15, %v8338_v30, %v2432_v24 }
 0x4e9   : > { %14798 = vst [vmem:[#allocation161_spill] sm:$0xff] %v8553_v60  ;;  %v8559_v14 = vpop.eup %6809  ;;  %6829 = vpow2.f32 %v2669_v12  ;;  %v2548_v12 = vmul.f32 %v8435_v41, %v2401_v16  ;;  %v2653_v6 = vmul.f32 1.442695, %v2541_v27  ;;  %v2663_v27 = vmul.f32 1.442695, %v2546_v54 }
 0x4ea   : > { %14799 = vst [vmem:[#allocation162_spill] sm:$0xff] %v8559_v14  ;;  %v8564_v4 = vpop.eup %6811  ;;  %6831 = vpow2.f32 %v2671_v47  ;;  %v2655_v47 = vmul.f32 1.442695, %v2542_v40  ;;  %v2659_v2 = vmul.f32 1.442695, %v2544_v18  ;;  %v8596_v54 = vmul.f32 %v2449_v45, %v8077_v25 }
 0x4eb   : > { %14800 = vst [vmem:[#allocation163_spill] sm:$0xff] %v8564_v4  ;;  %v8569_v46 = vpop.eup %6813  ;;  %6833 = vpow2.f32 %v2673_v58  ;;  %v2661_v58 = vmul.f32 1.442695, %v2545_v9  ;;  %v2665_v41 = vmul.f32 1.442695, %v2547_v38  ;;  %v8602_v38 = vmul.f32 %v2449_v45, %v8075_v21 }
 0x4ec   : > { %14801 = vst [vmem:[#allocation164_spill] sm:$0xff] %v8569_v46  ;;  %v8573_v44 = vpop.eup %6815  ;;  %6835 = vpow2.f32 %v2675_v11  ;;  %v2667_v40 = vmul.f32 1.442695, %v2548_v12  ;;  %v8605_v30 = vmul.f32 %v2449_v45, %v8079_v1  ;;  %v8614_v25 = vmul.f32 %v2449_v45, %v8141_v23 }
 0x4ed   : > { %14802 = vst [vmem:[#allocation165_spill] sm:$0xff] %v8573_v44  ;;  %v8576_v37 = vpop.eup %6817  ;;  %6837 = vpow2.f32 %v2677_v17  ;;  %v8620_v21 = vmul.f32 %v2449_v45, %v8139_v43  ;;  %v8623_v1 = vmul.f32 %v2449_v45, %v8143_v42  ;;  %v13917_v23 = vrot.slane %v8602_v38, 7 }
 0x4ee   : > { %14803 = vst [vmem:[#allocation166_spill] sm:$0xff] %v8576_v37  ;;  %v8579_v26 = vpop.eup %6819  ;;  %6839 = vpow2.f32 %v2679_v32  ;;  %v8593_v32 = vmul.f32 %v2449_v45, %v8073_v55  ;;  %v8611_v55 = vmul.f32 %v2449_v45, %v8137_v34  ;;  %v13924_v42 = vrot.slane %v8614_v25, 7  ;;  %v2378_v37 = vpop.permute.xlu0 %2377 }
 0x4ef   : > { %14804 = vst [vmem:[#allocation167_spill] sm:$0xff] %v8579_v26  ;;  %v8582_v0 = vpop.eup %6821  ;;  %6841 = vpow2.f32 %v8509_v52  ;;  %v14813_v11 = vrot.slane %v8516_v3, 7  ;;  %v14815_v49 = vrot.slane %v8519_v36, 7  ;;  %v14816_v20 = vrot.slane %v8524_v57, 7 }
 0x4f0   : > { %14805 = vst [vmem:[#allocation168_spill] sm:$0xff] %v8582_v0  ;;  %v8588_v17 = vpop.eup %6823  ;;  %6843 = vpow2.f32 %v8513_v63  ;;  %v13915_v34 = vrot.slane %v8593_v32, 7  ;;  %v2420_v63 = vpop.permute.xlu1 %2419  ;;  %v13921_v43 = vrot.slane %v8611_v55, 7 }
 0x4f1   : > { %14806 = vst [vmem:[#allocation169_spill] sm:$0xff] %v8588_v17  ;;  %v8598_v18 = vpop.eup %6825  ;;  %6845 = vpow2.f32 %v2653_v6  ;;  %v2815_v6 = vsel %vm995_vm7, %v13917_v23, %v14816_v20  ;;  %v14821_v23 = vrot.slane %v8538_v61, 7 }
 0x4f2   : > { %14807 = vst [vmem:[#allocation170_spill] sm:$0xff] %v8598_v18  ;;  %v8607_v24 = vpop.eup %6827  ;;  %6847 = vpow2.f32 %v2655_v47  ;;  %v13916_v47 = vrot.slane %v8596_v54, 7 }
 0x4f3   : > { %14808 = vst [vmem:[#allocation171_spill] sm:$0xff] %v8607_v24  ;;  %v8616_v12 = vpop.eup %6829  ;;  %6849 = vpow2.f32 %v2657_v56  ;;  %v13918_v56 = vrot.slane %v8605_v30, 7  ;;  %v14824_v24 = vrot.slane %v8541_v53, 7 }
 0x4f4   : > { %14809 = vst [vmem:[#allocation172_spill] sm:$0xff] %v8616_v12  ;;  %v8625_v52 = vpop.eup %6831  ;;  %6851 = vpow2.f32 %v2659_v2  ;;  %v14817_v2 = vrot.slane %v8527_v31, 7  ;;  %v2376_v44 = vpop.permute.xlu1 %2375 }
 0x4f5   : > { %14810 = vst [vmem:[#allocation173_spill] sm:$0xff] %v8625_v52  ;;  %v8630_v9 = vpop.eup %6833  ;;  %6853 = vpow2.f32 %v2661_v58  ;;  %v2813_v58 = vsel %vm995_vm7, %v13915_v34, %v14813_v11  ;;  %v14819_v34 = vrot.slane %v8530_v33, 7 }
 0x4f6   : > { %14811 = vst [vmem:[#allocation174_spill] sm:$0xff] %v8630_v9  ;;  %v8635_v45 = vpop.eup %6835  ;;  %6855 = vpow2.f32 %v2663_v27  ;;  %v2814_v27 = vsel %vm995_vm7, %v13916_v47, %v14815_v49  ;;  %v14820_v47 = vrot.slane %v8535_v62, 7  ;;  %v2997_v18 = vmul.f32 %v8616_v12, %v2813_v58 }
 0x4f7   : > { %14812 = vst [vmem:[#allocation175_spill] sm:$0xff] %v8635_v45  ;;  %v8645_v16 = vpop.eup %6837  ;;  %6857 = vpow2.f32 %v2665_v41  ;;  %v2816_v41 = vsel %vm995_vm7, %v13918_v56, %v14817_v2  ;;  %v2817_v49 = vsel %vm995_vm7, %v13921_v43, %v14819_v34  ;;  %v14822_v2 = vrot.slane %v8620_v21, 7 }
 0x4f8   : > { %14814 = vst [vmem:[#allocation176_spill] sm:$0xff] %v8645_v16  ;;  %v8665_v11 = vpop.eup %6839  ;;  %6859 = vpow2.f32 %v2667_v40  ;;  %v2818_v20 = vsel %vm995_vm7, %v13924_v42, %v14820_v47  ;;  %v14825_v34 = vrot.slane %v8623_v1, 7  ;;  %v2998_v47 = vmul.f32 %v8625_v52, %v2814_v27 }
 0x4f9   : > { %14818 = vst [vmem:[#allocation177_spill] sm:$0xff] %v8665_v11  ;;  %v2819_v40 = vsel %vm995_vm7, %v14822_v2, %v14821_v23  ;;  %v8685_v56 = vpop.eup %6841  ;;  %v2999_v42 = vmul.f32 %v8630_v9, %v2815_v6  ;;  %v3000_v0 = vmul.f32 %v8635_v45, %v2816_v41  ;;  %v3001_v23 = vmul.f32 %v8645_v16, %v2817_v49 }
 0x4fa   : > { %14823 = vst [vmem:[#allocation178_spill] sm:$0xff] %v8685_v56  ;;  %v2820_v43 = vsel %vm995_vm7, %v14825_v34, %v14824_v24  ;;  %v8696_v17 = vpop.eup %6843  ;;  %v3002_v2 = vmul.f32 %v8665_v11, %v2818_v20  ;;  %v3003_v26 = vmul.f32 %v8685_v56, %v2819_v40  ;;  %v8706_v58 = vadd.f32 %v2997_v18, %v8516_v3 }
 0x4fb   : > { %14826 = vst [vmem:[#allocation179_spill] sm:$0xff] %v8696_v17  ;;  %v8702_v46 = vpop.eup %6845  ;;  %v3004_v24 = vmul.f32 %v8696_v17, %v2820_v43  ;;  %v8709_v6 = vadd.f32 %v2998_v47, %v8519_v36  ;;  %v8712_v27 = vadd.f32 %v2999_v42, %v8524_v57  ;;  %v8717_v49 = vadd.f32 %v3000_v0, %v8527_v31 }
 0x4fc   : > { %14827 = vst [vmem:[#allocation180_spill] sm:$0xff] %v8702_v46  ;;  %14828 = vst [vmem:[#allocation181_spill] sm:$0xff] %v8706_v58  ;;  %v8714_v41 = vpop.eup %6847  ;;  %v8720_v20 = vadd.f32 %v3001_v23, %v8530_v33  ;;  %v8723_v40 = vadd.f32 %v3002_v2, %v8535_v62  ;;  %v8726_v18 = vadd.f32 %v3003_v26, %v8538_v61 }
 0x4fd   : > { %14829 = vst [vmem:[#allocation182_spill] sm:$0xff] %v8709_v6  ;;  %14830 = vst [vmem:[#allocation183_spill] sm:$0xff] %v8712_v27  ;;  %v8728_v43 = vpop.eup %6849  ;;  %v8731_v34 = vadd.f32 %v3004_v24, %v8541_v53  ;;  %v2443_v42 = vsel %vm1245_vm15, %v8345_v13, %v2420_v63  ;;  %v8737_v0 = vsel %vm1245_vm15, %v8350_v15, %v2378_v37  ;;  %v14840_v37 = vld [vmem:[#allocation41_spill] sm:$0xff]  ;;  %v14849_v6 = vrot.slane %v8519_v36, 7 }
 0x4fe   : > { %14831 = vst [vmem:[#allocation184_spill] sm:$0xff] %v8714_v41  ;;  %14832 = vst [vmem:[#allocation185_spill] sm:$0xff] %v8717_v49  ;;  %v8741_v47 = vsel %vm1245_vm15, %v8355_v28, %v2376_v44  ;;  %v8743_v23 = vpop.eup %6851  ;;  %v8746_v26 = vmul.f32 %v2443_v42, %v8025_v22  ;;  %v8749_v2 = vmul.f32 %v2443_v42, %v8029_v7  ;;  %v14841_v28 = vld [vmem:[#allocation43_spill] sm:$0xff]  ;;  %v14855_v36 = vrot.slane %v8530_v33, 7 }
 0x4ff   : > { %14833 = vst [vmem:[#allocation186_spill] sm:$0xff] %v8720_v20  ;;  %14834 = vst [vmem:[#allocation187_spill] sm:$0xff] %v8723_v40  ;;  %v8752_v24 = vmul.f32 %v2443_v42, %v8027_v59  ;;  %v8755_v13 = vmul.f32 %v2443_v42, %v8031_v35  ;;  %v8757_v15 = vpop.eup %6853  ;;  %v8760_v63 = vmul.f32 %v2443_v42, %v14840_v37  ;;  %v14847_v35 = vrot.slane %v8516_v3, 7 }
 0x500   : > { %14835 = vst [vmem:[#allocation188_spill] sm:$0xff] %v8726_v18  ;;  %14836 = vst [vmem:[#allocation189_spill] sm:$0xff] %v8728_v43  ;;  %v8763_v44 = vmul.f32 %v2443_v42, %v14841_v28  ;;  %v14843_v18 = vld [vmem:[#allocation44_spill] sm:$0xff]  ;;  %v8771_v40 = vpop.eup %6855  ;;  %v13945_v59 = vrot.slane %v8746_v26, 7  ;;  %v14848_v37 = vrot.slane %v8749_v2, 7  ;;  %v14853_v3 = vrot.slane %v8527_v31, 7 }
 0x501   : > { %14837 = vst [vmem:[#allocation190_spill] sm:$0xff] %v8731_v34  ;;  %14838 = vst [vmem:[#allocation191_spill] sm:$0xff] %v8743_v23  ;;  %v14842_v34 = vld [vmem:[#allocation42_spill] sm:$0xff]  ;;  %v8769_v7 = vmul.f32 %v2443_v42, %v14843_v18  ;;  %v8777_v49 = vpop.eup %6857  ;;  %v14850_v27 = vrot.slane %v8752_v24, 7  ;;  %v14851_v18 = vrot.slane %v8524_v57, 7  ;;  %v14852_v58 = vrot.slane %v8755_v13, 7 }
 0x502   : > { %14839 = vst [vmem:[#allocation192_spill] sm:$0xff] %v8757_v15  ;;  %v8766_v22 = vmul.f32 %v2443_v42, %v14842_v34  ;;  %14844 = vst [vmem:[#allocation41_spill] sm:$0xff] %v8771_v40  ;;  %v8783_v42 = vpop.eup %6859  ;;  %v2869_v20 = vsel %vm995_vm7, %v14847_v35, %v13945_v59  ;;  %v2870_v34 = vsel %vm995_vm7, %v14849_v6, %v14848_v37  ;;  %v14854_v59 = vrot.slane %v8760_v63, 7 }
 0x503   : > { %14845 = vst [vmem:[#allocation43_spill] sm:$0xff] %v8777_v49  ;;  %14846 = vst [vmem:[#allocation42_spill] sm:$0xff] %v8783_v42  ;;  %v2871_v28 = vsel %vm995_vm7, %v14851_v18, %v14850_v27  ;;  %v2872_v35 = vsel %vm995_vm7, %v14853_v3, %v14852_v58  ;;  %v14856_v37 = vrot.slane %v8763_v44, 7  ;;  %v14857_v57 = vrot.slane %v8535_v62, 7 }
 0x504   : > { %v2873_v6 = vsel %vm995_vm7, %v14855_v36, %v14854_v59  ;;  %v14858_v18 = vrot.slane %v8766_v22, 7  ;;  %v14859_v31 = vrot.slane %v8538_v61, 7  ;;  %v14860_v3 = vrot.slane %v8769_v7, 7 }
 0x505   : > { %v2874_v27 = vsel %vm995_vm7, %v14857_v57, %v14856_v37  ;;  %v14861_v33 = vrot.slane %v8541_v53, 7  ;;  %v2877_v62 = vsel %vm1004_vm14, %v2869_v20, 0.0  ;;  %v2878_v36 = vsel %vm1004_vm14, %v2870_v34, 0.0 }
 0x506   : > { %v2875_v58 = vsel %vm995_vm7, %v14859_v31, %v14858_v18  ;;  %v2879_v37 = vsel %vm1004_vm14, %v2871_v28, 0.0  ;;  %v2880_v61 = vsel %vm1004_vm14, %v2872_v35, 0.0  ;;  %v2881_v57 = vsel %vm1004_vm14, %v2873_v6, 0.0 }
 0x507   : > { %v2876_v59 = vsel %vm995_vm7, %v14861_v33, %v14860_v3  ;;  %v2882_v53 = vsel %vm1004_vm14, %v2874_v27, 0.0  ;;  %v2883_v18 = vsel %vm1004_vm14, %v2875_v58, 0.0  ;;  %v2941_v34 = vmul.f32 %v8511_v19, %v2877_v62 }
 0x508   : > { %v2884_v20 = vsel %vm1004_vm14, %v2876_v59, 0.0  ;;  %v2942_v31 = vmul.f32 %v8521_v8, %v2878_v36  ;;  %v2943_v28 = vmul.f32 %v8532_v51, %v2879_v37  ;;  %v2944_v35 = vmul.f32 %v8543_v10, %v2880_v61 }
 0x509   : > { %v2945_v3 = vmul.f32 %v8548_v5, %v2881_v57  ;;  %v2946_v6 = vmul.f32 %v8553_v60, %v2882_v53  ;;  %v2947_v27 = vmul.f32 %v8559_v14, %v2883_v18  ;;  %v2948_v33 = vmul.f32 %v8564_v4, %v2884_v20  ;;  %v14876_v5 = vld [vmem:[#allocation130_spill] sm:$0xff] }
 0x50a   : > { %v8858_v58 = vadd.f32 %v2941_v34, %v8746_v26  ;;  %v8861_v59 = vadd.f32 %v2942_v31, %v8749_v2  ;;  %v8864_v62 = vadd.f32 %v2943_v28, %v8752_v24  ;;  %v8867_v36 = vadd.f32 %v2944_v35, %v8755_v13  ;;  %v14870_v34 = vld [vmem:[#allocation135_spill] sm:$0xff]  ;;  %v14871_v28 = vld [vmem:[#allocation136_spill] sm:$0xff]  ;;  %v14872_v35 = vld [vmem:[#allocation137_spill] sm:$0xff] }
 0x50b   : > { %v8870_v37 = vadd.f32 %v2945_v3, %v8760_v63  ;;  %v8873_v61 = vadd.f32 %v2946_v6, %v8763_v44  ;;  %v8876_v57 = vadd.f32 %v2947_v27, %v8766_v22  ;;  %v8879_v53 = vadd.f32 %v2948_v33, %v8769_v7  ;;  %v14873_v6 = vld [vmem:[#allocation138_spill] sm:$0xff] }
 0x50c   : > { %14862 = vst [vmem:[#allocation44_spill] sm:$0xff] %v8858_v58  ;;  %14863 = vst [vmem:[#allocation193_spill] sm:$0xff] %v8861_v59  ;;  %v2517_v27 = vmul.f32 %v8412_v50, %v8737_v0  ;;  %v2518_v33 = vmul.f32 %v8414_v39, %v8737_v0  ;;  %v2519_v20 = vmul.f32 %v8416_v48, %v8737_v0 }
 0x50d   : > { %14864 = vst [vmem:[#allocation194_spill] sm:$0xff] %v8864_v62  ;;  %14865 = vst [vmem:[#allocation195_spill] sm:$0xff] %v8867_v36  ;;  %v2520_v31 = vmul.f32 %v14870_v34, %v8737_v0  ;;  %v2521_v18 = vmul.f32 %v14871_v28, %v8737_v0  ;;  %v2522_v3 = vmul.f32 %v14872_v35, %v8737_v0 }
 0x50e   : > { %14866 = vst [vmem:[#allocation196_spill] sm:$0xff] %v8870_v37  ;;  %14867 = vst [vmem:[#allocation197_spill] sm:$0xff] %v8873_v61  ;;  %v2605_v37 = vmul.f32 1.442695, %v2517_v27  ;;  %v2607_v36 = vmul.f32 1.442695, %v2518_v33  ;;  %v2509_v59 = vmul.f32 %v8412_v50, %v8741_v47  ;;  %v2510_v11 = vmul.f32 %v8414_v39, %v8741_v47 }
 0x50f   : > { %14868 = vst [vmem:[#allocation198_spill] sm:$0xff] %v8876_v57  ;;  %14869 = vst [vmem:[#allocation199_spill] sm:$0xff] %v8879_v53  ;;  %v2523_v53 = vmul.f32 %v14873_v6, %v8737_v0  ;;  %v14874_v57 = vld [vmem:[#allocation142_spill] sm:$0xff]  ;;  %v2609_v62 = vmul.f32 1.442695, %v2519_v20  ;;  %v2511_v9 = vmul.f32 %v8416_v48, %v8741_v47  ;;  %v2513_v20 = vmul.f32 %v14871_v28, %v8741_v47 }
 0x510   : > { %v2524_v61 = vmul.f32 %v14874_v57, %v8737_v0  ;;  %v2611_v58 = vmul.f32 1.442695, %v2520_v31  ;;  %v2613_v17 = vmul.f32 1.442695, %v2521_v18  ;;  %v2615_v56 = vmul.f32 1.442695, %v2522_v3  ;;  %v2430_v3 = vpop.permute.xlu1 %2429 }
 0x511   : > { %6861 = vpow2.f32 %v2605_v37  ;;  %v2617_v16 = vmul.f32 1.442695, %v2523_v53  ;;  %v2512_v0 = vmul.f32 %v14870_v34, %v8741_v47  ;;  %v2514_v18 = vmul.f32 %v14872_v35, %v8741_v47  ;;  %v2380_v53 = vpop.permute.xlu0 %2379 }
 0x512   : > { %v2619_v45 = vmul.f32 1.442695, %v2524_v61  ;;  %6863 = vpow2.f32 %v2607_v36  ;;  %v2515_v31 = vmul.f32 %v14873_v6, %v8741_v47  ;;  %v2516_v37 = vmul.f32 %v14874_v57, %v8741_v47 }
 0x513   : > { %6865 = vpow2.f32 %v2609_v62  ;;  %v2589_v61 = vmul.f32 1.442695, %v2509_v59  ;;  %v2591_v36 = vmul.f32 1.442695, %v2510_v11  ;;  %v2593_v27 = vmul.f32 1.442695, %v2511_v9 }
 0x514   : > { %6867 = vpow2.f32 %v2611_v58  ;;  %v2595_v33 = vmul.f32 1.442695, %v2512_v0  ;;  %v2597_v52 = vmul.f32 1.442695, %v2513_v20  ;;  %v2599_v12 = vmul.f32 1.442695, %v2514_v18 }
 0x515   : > { %6869 = vpow2.f32 %v2613_v17  ;;  %v2601_v4 = vmul.f32 1.442695, %v2515_v31  ;;  %v2603_v14 = vmul.f32 1.442695, %v2516_v37  ;;  %v14875_v62 = vld [vmem:[#allocation129_spill] sm:$0xff]  ;;  %v2448_v10 = vsel %vm1245_vm15, %v14876_v5, %v2430_v3  ;;  %v14884_v37 = vld [vmem:[#allocation38_spill] sm:$0xff] }
 0x516   : > { %6871 = vpow2.f32 %v2615_v56  ;;  %v2399_v60 = vsel %vm1245_vm15, %v14875_v62, %v2380_v53  ;;  %v14886_v53 = vld [vmem:[#allocation40_spill] sm:$0xff]  ;;  %v14891_v62 = vld [vmem:[#allocation63_spill] sm:$0xff] }
 0x517   : > { %6873 = vpow2.f32 %v2617_v16  ;;  %v2525_v47 = vmul.f32 %v8412_v50, %v2399_v60  ;;  %v2526_v58 = vmul.f32 %v8414_v39, %v2399_v60  ;;  %v2527_v9 = vmul.f32 %v8416_v48, %v2399_v60 }
 0x518   : > { %6875 = vpow2.f32 %v2619_v45  ;;  %v2528_v17 = vmul.f32 %v14870_v34, %v2399_v60  ;;  %v2529_v11 = vmul.f32 %v14871_v28, %v2399_v60  ;;  %v2530_v56 = vmul.f32 %v14872_v35, %v2399_v60  ;;  %v14879_v35 = vld [vmem:[#allocation37_spill] sm:$0xff] }
 0x519   : > { %6877 = vpow2.f32 %v2589_v61  ;;  %v2531_v59 = vmul.f32 %v14873_v6, %v2399_v60  ;;  %v2532_v0 = vmul.f32 %v14874_v57, %v2399_v60  ;;  %v2621_v5 = vmul.f32 1.442695, %v2525_v47  ;;  %v14881_v6 = vld [vmem:[#allocation39_spill] sm:$0xff] }
 0x51a   : > { %6879 = vpow2.f32 %v2591_v36  ;;  %v2623_v16 = vmul.f32 1.442695, %v2526_v58  ;;  %v2625_v50 = vmul.f32 1.442695, %v2527_v9  ;;  %v2627_v20 = vmul.f32 1.442695, %v2528_v17 }
 0x51b   : > { %v8933_v39 = vpop.eup %6861  ;;  %6881 = vpow2.f32 %v2593_v27  ;;  %v2629_v48 = vmul.f32 1.442695, %v2529_v11  ;;  %v2631_v45 = vmul.f32 1.442695, %v2530_v56  ;;  %v2633_v34 = vmul.f32 1.442695, %v2531_v59 }
 0x51c   : > { %14877 = vst [vmem:[#allocation135_spill] sm:$0xff] %v8933_v39  ;;  %v8935_v18 = vpop.eup %6863  ;;  %6883 = vpow2.f32 %v2595_v33  ;;  %v2635_v28 = vmul.f32 1.442695, %v2532_v0  ;;  %v8938_v31 = vmul.f32 %v2448_v10, %v14879_v35  ;;  %v8941_v60 = vmul.f32 %v2448_v10, %v14881_v6  ;;  %v14888_v36 = vld [vmem:[#allocation61_spill] sm:$0xff]  ;;  %v14893_v58 = vld [vmem:[#allocation62_spill] sm:$0xff]  ;;  %v14895_v17 = vld [vmem:[#allocation64_spill] sm:$0xff] }
 0x51d   : > { %14878 = vst [vmem:[#allocation136_spill] sm:$0xff] %v8935_v18  ;;  %v8943_v57 = vpop.eup %6865  ;;  %6885 = vpow2.f32 %v2597_v52  ;;  %v8946_v61 = vmul.f32 %v2448_v10, %v14884_v37  ;;  %v8949_v3 = vmul.f32 %v2448_v10, %v14886_v53  ;;  %v8952_v27 = vmul.f32 %v2448_v10, %v14888_v36  ;;  %v14946_v18 = vld [vmem:[#allocation56_spill] sm:$0xff] }
 0x51e   : > { %14880 = vst [vmem:[#allocation137_spill] sm:$0xff] %v8938_v31  ;;  %14882 = vst [vmem:[#allocation138_spill] sm:$0xff] %v8941_v60  ;;  %v8954_v33 = vpop.eup %6867  ;;  %6887 = vpow2.f32 %v2599_v12  ;;  %v8957_v47 = vmul.f32 %v2448_v10, %v14891_v62  ;;  %v8960_v9 = vmul.f32 %v2448_v10, %v14893_v58  ;;  %v8963_v52 = vmul.f32 %v2448_v10, %v14895_v17 }
 0x51f   : > { %14883 = vst [vmem:[#allocation142_spill] sm:$0xff] %v8943_v57  ;;  %14885 = vst [vmem:[#allocation129_spill] sm:$0xff] %v8946_v61  ;;  %v8965_v11 = vpop.eup %6869  ;;  %6889 = vpow2.f32 %v2601_v4  ;;  %v13988_v56 = vrot.slane %v8938_v31, 7  ;;  %v13989_v59 = vrot.slane %v8941_v60, 7  ;;  %v13990_v0 = vrot.slane %v8946_v61, 7  ;;  %v14944_v57 = vld [vmem:[#allocation54_spill] sm:$0xff] }
 0x520   : > { %14887 = vst [vmem:[#allocation130_spill] sm:$0xff] %v8949_v3  ;;  %14889 = vst [vmem:[#allocation37_spill] sm:$0xff] %v8952_v27  ;;  %v8970_v35 = vpop.eup %6871  ;;  %6891 = vpow2.f32 %v2603_v14  ;;  %v13991_v12 = vrot.slane %v8949_v3, 7  ;;  %v13993_v6 = vrot.slane %v8952_v27, 7  ;;  %v13995_v37 = vrot.slane %v8957_v47, 7 }
 0x521   : > { %14890 = vst [vmem:[#allocation39_spill] sm:$0xff] %v8954_v33  ;;  %14892 = vst [vmem:[#allocation38_spill] sm:$0xff] %v8957_v47  ;;  %v8975_v10 = vpop.eup %6873  ;;  %6893 = vpow2.f32 %v2621_v5  ;;  %v14900_v36 = vrot.slane %v8593_v32, 7  ;;  %v14902_v58 = vrot.slane %v8596_v54, 7  ;;  %v14903_v17 = vrot.slane %v8602_v38, 7 }
 0x522   : > { %14894 = vst [vmem:[#allocation40_spill] sm:$0xff] %v8960_v9  ;;  %14896 = vst [vmem:[#allocation61_spill] sm:$0xff] %v8963_v52  ;;  %v8985_v62 = vpop.eup %6875  ;;  %6895 = vpow2.f32 %v2623_v16  ;;  %v14904_v4 = vrot.slane %v8605_v30, 7 }
 0x523   : > { %14897 = vst [vmem:[#allocation63_spill] sm:$0xff] %v8965_v11  ;;  %14898 = vst [vmem:[#allocation62_spill] sm:$0xff] %v8970_v35  ;;  %v2821_v14 = vsel %vm995_vm7, %v13988_v56, %v14900_v36  ;;  %v2822_v5 = vsel %vm995_vm7, %v13989_v59, %v14902_v58  ;;  %v2823_v53 = vsel %vm995_vm7, %v13990_v0, %v14903_v17  ;;  %v9005_v36 = vpop.eup %6877  ;;  %6897 = vpow2.f32 %v2625_v50 }
 0x524   : > { %14899 = vst [vmem:[#allocation64_spill] sm:$0xff] %v8975_v10  ;;  %14901 = vst [vmem:[#allocation200_spill] sm:$0xff] %v8985_v62  ;;  %v2824_v16 = vsel %vm995_vm7, %v13991_v12, %v14904_v4  ;;  %v14906_v56 = vrot.slane %v8611_v55, 7  ;;  %v14907_v59 = vrot.slane %v8614_v25, 7  ;;  %v14908_v0 = vrot.slane %v8620_v21, 7  ;;  %v9025_v12 = vpop.eup %6879 }
 0x525   : > { %14905 = vst [vmem:[#allocation201_spill] sm:$0xff] %v9005_v36  ;;  %v14909_v4 = vrot.slane %v8960_v9, 7  ;;  %14910 = vst [vmem:[#allocation202_spill] sm:$0xff] %v9025_v12  ;;  %6899 = vpow2.f32 %v2627_v20  ;;  %v14911_v62 = vrot.slane %v8623_v1, 7  ;;  %v2989_v10 = vmul.f32 %v8702_v46, %v2821_v14 }
 0x526   : > { %v2825_v58 = vsel %vm995_vm7, %v13993_v6, %v14906_v56  ;;  %v2826_v17 = vsel %vm995_vm7, %v13995_v37, %v14907_v59  ;;  %v14912_v56 = vrot.slane %v8963_v52, 7  ;;  %v2990_v59 = vmul.f32 %v8714_v41, %v2822_v5  ;;  %v9035_v37 = vpop.eup %6881 }
 0x527   : > { %v2827_v50 = vsel %vm995_vm7, %v14909_v4, %v14908_v0  ;;  %14913 = vst [vmem:[#allocation203_spill] sm:$0xff] %v9035_v37  ;;  %6901 = vpow2.f32 %v2629_v48  ;;  %v2991_v35 = vmul.f32 %v8728_v43, %v2823_v53  ;;  %v2992_v0 = vmul.f32 %v8743_v23, %v2824_v16  ;;  %v9040_v4 = vpop.eup %6883 }
 0x528   : > { %v2828_v6 = vsel %vm995_vm7, %v14912_v56, %v14911_v62  ;;  %v2993_v20 = vmul.f32 %v8757_v15, %v2825_v58  ;;  %14914 = vst [vmem:[#allocation204_spill] sm:$0xff] %v9040_v4  ;;  %6903 = vpow2.f32 %v2631_v45  ;;  %v2994_v11 = vmul.f32 %v8771_v40, %v2826_v17  ;;  %v9045_v56 = vpop.eup %6885  ;;  %v14935_v17 = vld [vmem:[#allocation30_spill] sm:$0xff] }
 0x529   : > { %v2995_v62 = vmul.f32 %v8777_v49, %v2827_v50  ;;  %v2996_v14 = vmul.f32 %v8783_v42, %v2828_v6  ;;  %14915 = vst [vmem:[#allocation205_spill] sm:$0xff] %v9045_v56  ;;  %6905 = vpow2.f32 %v2633_v34  ;;  %v9048_v48 = vadd.f32 %v2989_v10, %v8593_v32  ;;  %v9056_v16 = vpop.eup %6887  ;;  %v2426_v32 = vpop.permute.xlu0 %2425  ;;  %v14958_v42 = vld [vmem:[#allocation46_spill] sm:$0xff]  ;;  %v14959_v49 = vld [vmem:[#allocation48_spill] sm:$0xff] }
 0x52a   : > { %v9051_v53 = vadd.f32 %v2990_v59, %v8596_v54  ;;  %v9054_v5 = vadd.f32 %v2991_v35, %v8602_v38  ;;  %14919 = vst [vmem:[#allocation209_spill] sm:$0xff] %v9056_v16  ;;  %6907 = vpow2.f32 %v2635_v28  ;;  %v9059_v45 = vadd.f32 %v2992_v0, %v8605_v30  ;;  %v2422_v10 = vpop.permute.xlu1 %2421  ;;  %v9067_v58 = vpop.eup %6889  ;;  %v14928_v59 = vld [vmem:[#allocation131_spill] sm:$0xff] }
 0x52b   : > { %14916 = vst [vmem:[#allocation206_spill] sm:$0xff] %v9048_v48  ;;  %v9062_v6 = vadd.f32 %v2993_v20, %v8611_v55  ;;  %v9065_v34 = vadd.f32 %v2994_v11, %v8614_v25  ;;  %14923 = vst [vmem:[#allocation213_spill] sm:$0xff] %v9067_v58  ;;  %v9070_v54 = vadd.f32 %v2995_v62, %v8620_v21  ;;  %v9077_v35 = vpop.eup %6891  ;;  %v14929_v20 = vld [vmem:[#allocation132_spill] sm:$0xff]  ;;  %v14931_v55 = vld [vmem:[#allocation29_spill] sm:$0xff] }
 0x52c   : > { %14917 = vst [vmem:[#allocation207_spill] sm:$0xff] %v9051_v53  ;;  %14918 = vst [vmem:[#allocation208_spill] sm:$0xff] %v9054_v5  ;;  %v9073_v38 = vadd.f32 %v2996_v14, %v8623_v1  ;;  %v9083_v50 = vpop.eup %6893  ;;  %v2446_v0 = vsel %vm1245_vm15, %v14928_v59, %v2426_v32  ;;  %v2444_v62 = vsel %vm1245_vm15, %v14929_v20, %v2422_v10  ;;  %v14933_v11 = vld [vmem:[#allocation31_spill] sm:$0xff]  ;;  %v14937_v21 = vld [vmem:[#allocation32_spill] sm:$0xff] }
 0x52d   : > { %14920 = vst [vmem:[#allocation210_spill] sm:$0xff] %v9059_v45  ;;  %14921 = vst [vmem:[#allocation211_spill] sm:$0xff] %v9062_v6  ;;  %v9091_v14 = vpop.eup %6895  ;;  %v9094_v25 = vmul.f32 %v2446_v0, %v14931_v55  ;;  %v9097_v30 = vmul.f32 %v2446_v0, %v14933_v11  ;;  %v9100_v28 = vmul.f32 %v2446_v0, %v14935_v17  ;;  %v14940_v32 = vld [vmem:[#allocation53_spill] sm:$0xff]  ;;  %v14942_v10 = vld [vmem:[#allocation55_spill] sm:$0xff] }
 0x52e   : > { %14922 = vst [vmem:[#allocation212_spill] sm:$0xff] %v9065_v34  ;;  %14924 = vst [vmem:[#allocation214_spill] sm:$0xff] %v9070_v54  ;;  %v9103_v33 = vmul.f32 %v2446_v0, %v14937_v21  ;;  %v9105_v1 = vpop.eup %6897  ;;  %v9108_v59 = vmul.f32 %v2446_v0, %v14940_v32  ;;  %v9111_v20 = vmul.f32 %v2446_v0, %v14942_v10  ;;  %v14951_v6 = vld [vmem:[#allocation21_spill] sm:$0xff]  ;;  %v14952_v21 = vld [vmem:[#allocation23_spill] sm:$0xff] }
 0x52f   : > { %14925 = vst [vmem:[#allocation215_spill] sm:$0xff] %v9073_v38  ;;  %14926 = vst [vmem:[#allocation216_spill] sm:$0xff] %v9077_v35  ;;  %v9114_v55 = vmul.f32 %v2446_v0, %v14944_v57  ;;  %v9117_v11 = vmul.f32 %v2446_v0, %v14946_v18  ;;  %v9119_v39 = vpop.eup %6899  ;;  %v9134_v17 = vmul.f32 %v2444_v62, %v14951_v6  ;;  %v14953_v38 = vld [vmem:[#allocation22_spill] sm:$0xff]  ;;  %v14954_v5 = vld [vmem:[#allocation24_spill] sm:$0xff] }
 0x530   : > { %14927 = vst [vmem:[#allocation217_spill] sm:$0xff] %v9083_v50  ;;  %14930 = vst [vmem:[#allocation131_spill] sm:$0xff] %v9091_v14  ;;  %v9137_v45 = vmul.f32 %v2444_v62, %v14952_v21  ;;  %v9140_v32 = vmul.f32 %v2444_v62, %v14953_v38  ;;  %v9143_v53 = vmul.f32 %v2444_v62, %v14954_v5  ;;  %v14956_v57 = vld [vmem:[#allocation45_spill] sm:$0xff]  ;;  %v14957_v18 = vld [vmem:[#allocation47_spill] sm:$0xff] }
 0x531   : > { %14932 = vst [vmem:[#allocation132_spill] sm:$0xff] %v9094_v25  ;;  %14934 = vst [vmem:[#allocation29_spill] sm:$0xff] %v9097_v30  ;;  %v9125_v54 = vpop.eup %6901  ;;  %v9148_v34 = vmul.f32 %v2444_v62, %v14956_v57  ;;  %v9151_v48 = vmul.f32 %v2444_v62, %v14957_v18  ;;  %v9154_v6 = vmul.f32 %v2444_v62, %v14958_v42  ;;  %v14032_v38 = vrot.slane %v9134_v17, 7 }
 0x532   : > { %14936 = vst [vmem:[#allocation31_spill] sm:$0xff] %v9100_v28  ;;  %14938 = vst [vmem:[#allocation30_spill] sm:$0xff] %v9103_v33  ;;  %v9131_v0 = vpop.eup %6903  ;;  %v9157_v21 = vmul.f32 %v2444_v62, %v14959_v49  ;;  %v2424_v49 = vpop.permute.xlu1 %2423  ;;  %v14961_v62 = vrot.slane %v8746_v26, 7  ;;  %v14962_v15 = vrot.slane %v9137_v45, 7  ;;  %v14963_v57 = vrot.slane %v8749_v2, 7 }
 0x533   : > { %14939 = vst [vmem:[#allocation32_spill] sm:$0xff] %v9105_v1  ;;  %14941 = vst [vmem:[#allocation53_spill] sm:$0xff] %v9108_v59  ;;  %v9145_v10 = vpop.eup %6905  ;;  %v14964_v18 = vrot.slane %v9140_v32, 7  ;;  %v14965_v42 = vrot.slane %v8752_v24, 7  ;;  %v14966_v41 = vrot.slane %v9143_v53, 7  ;;  %v14967_v26 = vrot.slane %v8755_v13, 7 }
 0x534   : > { %14943 = vst [vmem:[#allocation55_spill] sm:$0xff] %v9111_v20  ;;  %14945 = vst [vmem:[#allocation54_spill] sm:$0xff] %v9114_v55  ;;  %v9159_v40 = vpop.eup %6907  ;;  %v2861_v5 = vsel %vm995_vm7, %v14961_v62, %v14032_v38  ;;  %v2862_v23 = vsel %vm995_vm7, %v14963_v57, %v14962_v15  ;;  %v14968_v38 = vrot.slane %v9148_v34, 7  ;;  %v14969_v2 = vrot.slane %v8760_v63, 7  ;;  %v14983_v1 = vld [vmem:[#allocation155_spill] sm:$0xff] }
 0x535   : > { %14947 = vst [vmem:[#allocation56_spill] sm:$0xff] %v9117_v11  ;;  %14948 = vst [vmem:[#allocation218_spill] sm:$0xff] %v9119_v39  ;;  %v2863_v43 = vsel %vm995_vm7, %v14965_v42, %v14964_v18  ;;  %v2864_v62 = vsel %vm995_vm7, %v14967_v26, %v14966_v41  ;;  %v14970_v57 = vrot.slane %v9151_v48, 7  ;;  %v14971_v24 = vrot.slane %v8763_v44, 7  ;;  %v14977_v44 = vld [vmem:[#allocation149_spill] sm:$0xff] }
 0x536   : > { %14949 = vst [vmem:[#allocation219_spill] sm:$0xff] %v9125_v54  ;;  %14950 = vst [vmem:[#allocation220_spill] sm:$0xff] %v9131_v0  ;;  %v2865_v15 = vsel %vm995_vm7, %v14969_v2, %v14968_v38  ;;  %v14972_v42 = vrot.slane %v9154_v6, 7  ;;  %v14973_v13 = vrot.slane %v8766_v22, 7  ;;  %v14974_v26 = vrot.slane %v9157_v21, 7  ;;  %v14976_v2 = vld [vmem:[#allocation148_spill] sm:$0xff] }
 0x537   : > { %14955 = vst [vmem:[#allocation21_spill] sm:$0xff] %v9145_v10  ;;  %14960 = vst [vmem:[#allocation23_spill] sm:$0xff] %v9159_v40  ;;  %v2866_v18 = vsel %vm995_vm7, %v14971_v24, %v14970_v57  ;;  %v14975_v63 = vrot.slane %v8769_v7, 7  ;;  %v2949_v46 = vmul.f32 %v14976_v2, %v2861_v5  ;;  %v2950_v51 = vmul.f32 %v14977_v44, %v2862_v23  ;;  %v14978_v40 = vld [vmem:[#allocation150_spill] sm:$0xff]  ;;  %v14979_v24 = vld [vmem:[#allocation151_spill] sm:$0xff] }
 0x538   : > { %v2867_v41 = vsel %vm995_vm7, %v14973_v13, %v14972_v42  ;;  %v2951_v57 = vmul.f32 %v14978_v40, %v2863_v43  ;;  %v2952_v10 = vmul.f32 %v14979_v24, %v2864_v62  ;;  %v14980_v0 = vld [vmem:[#allocation152_spill] sm:$0xff]  ;;  %v14981_v54 = vld [vmem:[#allocation153_spill] sm:$0xff]  ;;  %v14982_v42 = vld [vmem:[#allocation154_spill] sm:$0xff]  ;;  %v15020_v40 = vrot.slane %v9140_v32, 7 }
 0x539   : > { %v2868_v38 = vsel %vm995_vm7, %v14975_v63, %v14974_v26  ;;  %v2953_v22 = vmul.f32 %v14980_v0, %v2865_v15  ;;  %v2954_v39 = vmul.f32 %v14981_v54, %v2866_v18  ;;  %v2955_v13 = vmul.f32 %v14982_v42, %v2867_v41  ;;  %v14994_v63 = vld [vmem:[#allocation25_spill] sm:$0xff] }
 0x53a   : > { %v2956_v14 = vmul.f32 %v14983_v1, %v2868_v38  ;;  %v9226_v7 = vadd.f32 %v2949_v46, %v9134_v17  ;;  %v9229_v26 = vadd.f32 %v2950_v51, %v9137_v45  ;;  %v9232_v23 = vadd.f32 %v2951_v57, %v9140_v32  ;;  %v2428_v51 = vpop.permute.xlu1 %2427  ;;  %v14993_v1 = vld [vmem:[#allocation134_spill] sm:$0xff]  ;;  %v14995_v38 = vld [vmem:[#allocation27_spill] sm:$0xff]  ;;  %v14997_v57 = vld [vmem:[#allocation28_spill] sm:$0xff] }
 0x53b   : > { %v9235_v43 = vadd.f32 %v2952_v10, %v9143_v53  ;;  %v9238_v5 = vadd.f32 %v2953_v22, %v9148_v34  ;;  %v9241_v62 = vadd.f32 %v2954_v39, %v9151_v48  ;;  %v9244_v15 = vadd.f32 %v2955_v13, %v9154_v6  ;;  %v14992_v13 = vld [vmem:[#allocation133_spill] sm:$0xff]  ;;  %v14996_v39 = vld [vmem:[#allocation26_spill] sm:$0xff] }
 0x53c   : > { %14984 = vst [vmem:[#allocation22_spill] sm:$0xff] %v9226_v7  ;;  %14985 = vst [vmem:[#allocation24_spill] sm:$0xff] %v9229_v26  ;;  %v9247_v46 = vadd.f32 %v2956_v14, %v9157_v21  ;;  %v2445_v14 = vsel %vm1245_vm15, %v14992_v13, %v2424_v49  ;;  %v9261_v18 = vsel %vm1245_vm15, %v14993_v1, %v2428_v51  ;;  %v14998_v22 = vld [vmem:[#allocation49_spill] sm:$0xff]  ;;  %v15000_v13 = vld [vmem:[#allocation50_spill] sm:$0xff]  ;;  %v15024_v32 = vrot.slane %v9154_v6, 7 }
 0x53d   : > { %14986 = vst [vmem:[#allocation45_spill] sm:$0xff] %v9232_v23  ;;  %14987 = vst [vmem:[#allocation47_spill] sm:$0xff] %v9235_v43  ;;  %v2701_v43 = vmul.f32 %v2445_v14, %v14994_v63  ;;  %v14999_v23 = vld [vmem:[#allocation51_spill] sm:$0xff]  ;;  %v2707_v26 = vmul.f32 %v2445_v14, %v15000_v13  ;;  %v15001_v1 = vld [vmem:[#allocation52_spill] sm:$0xff] }
 0x53e   : > { %14988 = vst [vmem:[#allocation46_spill] sm:$0xff] %v9238_v5  ;;  %14989 = vst [vmem:[#allocation48_spill] sm:$0xff] %v9241_v62  ;;  %v2702_v5 = vmul.f32 %v2445_v14, %v14995_v38  ;;  %v2703_v62 = vmul.f32 %v2445_v14, %v14996_v39  ;;  %v2706_v49 = vmul.f32 %v2445_v14, %v14999_v23  ;;  %v15002_v39 = vrot.slane %v9094_v25, 7 }
 0x53f   : > { %14990 = vst [vmem:[#allocation221_spill] sm:$0xff] %v9244_v15  ;;  %14991 = vst [vmem:[#allocation222_spill] sm:$0xff] %v9247_v46  ;;  %v2704_v15 = vmul.f32 %v2445_v14, %v14997_v57  ;;  %v2705_v46 = vmul.f32 %v2445_v14, %v14998_v22  ;;  %v2708_v51 = vmul.f32 %v2445_v14, %v15001_v1  ;;  %v2765_v7 = vrot.slane %v2701_v43, 7 }
 0x540   : > { %v2766_v41 = vrot.slane %v2702_v5, 7  ;;  %v2767_v42 = vrot.slane %v2703_v62, 7  ;;  %v2770_v63 = vrot.slane %v2706_v49, 7  ;;  %v2771_v0 = vrot.slane %v2707_v26, 7 }
 0x541   : > { %v2768_v10 = vrot.slane %v2704_v15, 7  ;;  %v2769_v54 = vrot.slane %v2705_v46, 7  ;;  %v2772_v38 = vrot.slane %v2708_v51, 7  ;;  %v9277_v57 = vsel %vm995_vm7, %v2765_v7, %v15002_v39 }
 0x542   : > { %15003 = vst [vmem:[#allocation133_spill] sm:$0xff] %v9277_v57  ;;  %v15004_v23 = vrot.slane %v9097_v30, 7  ;;  %v15006_v14 = vrot.slane %v9100_v28, 7  ;;  %v15008_v1 = vrot.slane %v9103_v33, 7  ;;  %v15010_v39 = vrot.slane %v9108_v59, 7 }
 0x544   : > { %v9283_v22 = vsel %vm995_vm7, %v2766_v41, %v15004_v23  ;;  %v9289_v13 = vsel %vm995_vm7, %v2767_v42, %v15006_v14  ;;  %v9295_v24 = vsel %vm995_vm7, %v2768_v10, %v15008_v1  ;;  %v9301_v57 = vsel %vm995_vm7, %v2769_v54, %v15010_v39 }
 0x545   : > { %15005 = vst [vmem:[#allocation134_spill] sm:$0xff] %v9283_v22  ;;  %15007 = vst [vmem:[#allocation25_spill] sm:$0xff] %v9289_v13  ;;  %v15012_v23 = vrot.slane %v9111_v20, 7  ;;  %v15014_v14 = vrot.slane %v9114_v55, 7  ;;  %v15016_v1 = vrot.slane %v9117_v11, 7  ;;  %v15018_v39 = vrot.slane %v9134_v17, 7 }
 0x546   : > { %15009 = vst [vmem:[#allocation27_spill] sm:$0xff] %v9295_v24  ;;  %15011 = vst [vmem:[#allocation26_spill] sm:$0xff] %v9301_v57  ;;  %v15022_v17 = vrot.slane %v9148_v34, 7 }
 0x547   : > { %v9307_v22 = vsel %vm995_vm7, %v2770_v63, %v15012_v23  ;;  %v9313_v13 = vsel %vm995_vm7, %v2771_v0, %v15014_v14  ;;  %v9319_v24 = vsel %vm995_vm7, %v2772_v38, %v15016_v1  ;;  %v2853_v57 = vsel %vm995_vm7, %v15018_v39, %v2765_v7 }
 0x548   : > { %15013 = vst [vmem:[#allocation28_spill] sm:$0xff] %v9307_v22  ;;  %15015 = vst [vmem:[#allocation49_spill] sm:$0xff] %v9313_v13  ;;  %v15019_v23 = vrot.slane %v9137_v45, 7  ;;  %v2855_v14 = vsel %vm995_vm7, %v15020_v40, %v2767_v42  ;;  %v15021_v13 = vrot.slane %v9143_v53, 7  ;;  %v2857_v7 = vsel %vm995_vm7, %v15022_v17, %v2769_v54 }
 0x549   : > { %15017 = vst [vmem:[#allocation51_spill] sm:$0xff] %v9319_v24  ;;  %v15023_v45 = vrot.slane %v9151_v48, 7  ;;  %v2859_v40 = vsel %vm995_vm7, %v15024_v32, %v2771_v0  ;;  %v15025_v53 = vrot.slane %v9157_v21, 7  ;;  %v2957_v34 = vmul.f32 %v9005_v36, %v2853_v57  ;;  %v15036_v32 = vld [vmem:[#allocation34_spill] sm:$0xff]  ;;  %v15111_v36 = vld [vmem:[#allocation168_spill] sm:$0xff] }
 0x54a   : > { %v2854_v22 = vsel %vm995_vm7, %v15019_v23, %v2766_v41  ;;  %v2856_v1 = vsel %vm995_vm7, %v15021_v13, %v2768_v10  ;;  %v2959_v54 = vmul.f32 %v9035_v37, %v2855_v14  ;;  %v2963_v13 = vmul.f32 %v9067_v58, %v2859_v40  ;;  %v15107_v58 = vld [vmem:[#allocation166_spill] sm:$0xff] }
 0x54b   : > { %v2858_v41 = vsel %vm995_vm7, %v15023_v45, %v2770_v63  ;;  %v2860_v42 = vsel %vm995_vm7, %v15025_v53, %v2772_v38  ;;  %v2958_v10 = vmul.f32 %v9025_v12, %v2854_v22  ;;  %v2960_v48 = vmul.f32 %v9040_v4, %v2856_v1  ;;  %v15035_v45 = vld [vmem:[#allocation35_spill] sm:$0xff]  ;;  %v15037_v53 = vld [vmem:[#allocation36_spill] sm:$0xff] }
 0x54c   : > { %v2961_v63 = vmul.f32 %v9045_v56, %v2857_v7  ;;  %v2962_v6 = vmul.f32 %v9056_v16, %v2858_v41  ;;  %v2964_v0 = vmul.f32 %v9077_v35, %v2860_v42  ;;  %v9361_v21 = vadd.f32 %v2957_v34, %v2701_v43  ;;  %v15038_v34 = vld [vmem:[#allocation57_spill] sm:$0xff]  ;;  %v15109_v4 = vld [vmem:[#allocation167_spill] sm:$0xff] }
 0x54d   : > { %v9363_v39 = vadd.f32 %v2958_v10, %v2702_v5  ;;  %v9365_v38 = vadd.f32 %v2959_v54, %v2703_v62  ;;  %v9367_v57 = vadd.f32 %v2960_v48, %v2704_v15  ;;  %v9373_v14 = vadd.f32 %v2963_v13, %v2707_v26  ;;  %v15034_v26 = vld [vmem:[#allocation33_spill] sm:$0xff]  ;;  %v15039_v54 = vld [vmem:[#allocation59_spill] sm:$0xff]  ;;  %v15041_v13 = vld [vmem:[#allocation60_spill] sm:$0xff] }
 0x54e   : > { %15026 = vst [vmem:[#allocation50_spill] sm:$0xff] %v9361_v21  ;;  %v9369_v22 = vadd.f32 %v2961_v63, %v2705_v46  ;;  %v9371_v23 = vadd.f32 %v2962_v6, %v2706_v49  ;;  %v9375_v1 = vadd.f32 %v2964_v0, %v2708_v51  ;;  %v2717_v51 = vmul.f32 %v9261_v18, %v15034_v26  ;;  %v15040_v63 = vld [vmem:[#allocation58_spill] sm:$0xff] }
 0x54f   : > { %15027 = vst [vmem:[#allocation52_spill] sm:$0xff] %v9363_v39  ;;  %15028 = vst [vmem:[#allocation223_spill] sm:$0xff] %v9365_v38  ;;  %v2718_v41 = vmul.f32 %v9261_v18, %v15035_v45  ;;  %v2719_v40 = vmul.f32 %v9261_v18, %v15036_v32  ;;  %v2720_v42 = vmul.f32 %v9261_v18, %v15037_v53  ;;  %v15042_v5 = vrot.slane %v8938_v31, 7  ;;  %v15105_v39 = vld [vmem:[#allocation165_spill] sm:$0xff] }
 0x550   : > { %15029 = vst [vmem:[#allocation224_spill] sm:$0xff] %v9367_v57  ;;  %15030 = vst [vmem:[#allocation225_spill] sm:$0xff] %v9369_v22  ;;  %v2721_v10 = vmul.f32 %v9261_v18, %v15038_v34  ;;  %v2722_v48 = vmul.f32 %v9261_v18, %v15039_v54  ;;  %v2723_v6 = vmul.f32 %v9261_v18, %v15040_v63  ;;  %v2781_v26 = vrot.slane %v2717_v51, 7  ;;  %v15103_v22 = vld [vmem:[#allocation164_spill] sm:$0xff] }
 0x551   : > { %15031 = vst [vmem:[#allocation226_spill] sm:$0xff] %v9371_v23  ;;  %15032 = vst [vmem:[#allocation227_spill] sm:$0xff] %v9373_v14  ;;  %v2724_v0 = vmul.f32 %v9261_v18, %v15041_v13  ;;  %v2782_v45 = vrot.slane %v2718_v41, 7  ;;  %v2783_v49 = vrot.slane %v2719_v40, 7  ;;  %v2784_v46 = vrot.slane %v2720_v42, 7 }
 0x552   : > { %15033 = vst [vmem:[#allocation228_spill] sm:$0xff] %v9375_v1  ;;  %v2785_v32 = vrot.slane %v2721_v10, 7  ;;  %v2786_v15 = vrot.slane %v2722_v48, 7  ;;  %v2787_v62 = vrot.slane %v2723_v6, 7  ;;  %v9405_v34 = vsel %vm995_vm7, %v2781_v26, %v15042_v5 }
 0x553   : > { %v2788_v53 = vrot.slane %v2724_v0, 7  ;;  %15043 = vst [vmem:[#allocation33_spill] sm:$0xff] %v9405_v34  ;;  %v15044_v54 = vrot.slane %v8941_v60, 7  ;;  %v15046_v18 = vrot.slane %v8946_v61, 7  ;;  %v15048_v43 = vrot.slane %v8949_v3, 7 }
 0x554   : > { %v15050_v5 = vrot.slane %v8952_v27, 7  ;;  %v15060_v60 = vrot.slane %v9100_v28, 7  ;;  %v15062_v31 = vrot.slane %v9108_v59, 7  ;;  %v15104_v57 = vrot.slane %v15103_v22, 7 }
 0x555   : > { %v9411_v63 = vsel %vm995_vm7, %v2782_v45, %v15044_v54  ;;  %v9417_v13 = vsel %vm995_vm7, %v2783_v49, %v15046_v18  ;;  %v9423_v7 = vsel %vm995_vm7, %v2784_v46, %v15048_v43  ;;  %v15052_v54 = vrot.slane %v8957_v47, 7 }
 0x556   : > { %15045 = vst [vmem:[#allocation35_spill] sm:$0xff] %v9411_v63  ;;  %15047 = vst [vmem:[#allocation34_spill] sm:$0xff] %v9417_v13  ;;  %v9429_v17 = vsel %vm995_vm7, %v2785_v32, %v15050_v5  ;;  %v15054_v18 = vrot.slane %v8960_v9, 7  ;;  %v15056_v43 = vrot.slane %v8963_v52, 7  ;;  %v15058_v5 = vrot.slane %v9094_v25, 7  ;;  %v15071_v63 = vld [vmem:[#allocation21_spill] sm:$0xff] }
 0x557   : > { %15049 = vst [vmem:[#allocation36_spill] sm:$0xff] %v9423_v7  ;;  %15051 = vst [vmem:[#allocation57_spill] sm:$0xff] %v9429_v17  ;;  %v9435_v61 = vsel %vm995_vm7, %v2786_v15, %v15052_v54  ;;  %v15059_v54 = vrot.slane %v9097_v30, 7  ;;  %v15061_v52 = vrot.slane %v9103_v33, 7  ;;  %v15069_v7 = vld [vmem:[#allocation219_spill] sm:$0xff]  ;;  %v15106_v21 = vrot.slane %v15105_v39, 7 }
 0x558   : > { %15053 = vst [vmem:[#allocation59_spill] sm:$0xff] %v9435_v61  ;;  %v9441_v3 = vsel %vm995_vm7, %v2787_v62, %v15054_v18  ;;  %v9447_v27 = vsel %vm995_vm7, %v2788_v53, %v15056_v43  ;;  %v2837_v47 = vsel %vm995_vm7, %v15058_v5, %v2781_v26  ;;  %v2839_v18 = vsel %vm995_vm7, %v15060_v60, %v2783_v49  ;;  %v15068_v61 = vld [vmem:[#allocation218_spill] sm:$0xff] }
 0x559   : > { %15055 = vst [vmem:[#allocation58_spill] sm:$0xff] %v9441_v3  ;;  %15057 = vst [vmem:[#allocation60_spill] sm:$0xff] %v9447_v27  ;;  %v2838_v9 = vsel %vm995_vm7, %v15059_v54, %v2782_v45  ;;  %v2840_v43 = vsel %vm995_vm7, %v15061_v52, %v2784_v46  ;;  %v2841_v26 = vsel %vm995_vm7, %v15062_v31, %v2785_v32  ;;  %v15063_v5 = vrot.slane %v9111_v20, 7  ;;  %v15066_v27 = vld [vmem:[#allocation131_spill] sm:$0xff]  ;;  %v15067_v31 = vld [vmem:[#allocation32_spill] sm:$0xff] }
 0x55a   : > { %v15064_v54 = vrot.slane %v9114_v55, 7  ;;  %v15065_v49 = vrot.slane %v9117_v11, 7  ;;  %v2973_v46 = vmul.f32 %v9083_v50, %v2837_v47  ;;  %v2974_v3 = vmul.f32 %v15066_v27, %v2838_v9  ;;  %v15101_v27 = vld [vmem:[#allocation178_spill] sm:$0xff]  ;;  %v15102_v20 = vld [vmem:[#allocation179_spill] sm:$0xff] }
 0x55b   : > { %v2842_v45 = vsel %vm995_vm7, %v15063_v5, %v2786_v15  ;;  %v2975_v32 = vmul.f32 %v15067_v31, %v2839_v18  ;;  %v2976_v17 = vmul.f32 %v15068_v61, %v2840_v43  ;;  %v2977_v15 = vmul.f32 %v15069_v7, %v2841_v26  ;;  %v15070_v5 = vld [vmem:[#allocation220_spill] sm:$0xff]  ;;  %v15100_v61 = vld [vmem:[#allocation177_spill] sm:$0xff] }
 0x55c   : > { %v2843_v60 = vsel %vm995_vm7, %v15064_v54, %v2787_v62  ;;  %v2844_v52 = vsel %vm995_vm7, %v15065_v49, %v2788_v53  ;;  %v2978_v13 = vmul.f32 %v15070_v5, %v2842_v45  ;;  %v15072_v62 = vld [vmem:[#allocation23_spill] sm:$0xff]  ;;  %v9489_v11 = vadd.f32 %v2973_v46, %v2717_v51  ;;  %v15084_v49 = vld [vmem:[#allocation161_spill] sm:$0xff]  ;;  %v15085_v46 = vld [vmem:[#allocation162_spill] sm:$0xff] }
 0x55d   : > { %v2979_v34 = vmul.f32 %v15071_v63, %v2843_v60  ;;  %v2980_v54 = vmul.f32 %v15072_v62, %v2844_v52  ;;  %v9491_v55 = vadd.f32 %v2974_v3, %v2718_v41  ;;  %v9493_v53 = vadd.f32 %v2975_v32, %v2719_v40  ;;  %v15087_v3 = vld [vmem:[#allocation180_spill] sm:$0xff]  ;;  %v15089_v60 = vld [vmem:[#allocation189_spill] sm:$0xff]  ;;  %v15090_v45 = vld [vmem:[#allocation191_spill] sm:$0xff] }
 0x55e   : > { %15073 = vst [vmem:[#allocation229_spill] sm:$0xff] %v9489_v11  ;;  %v9495_v47 = vadd.f32 %v2976_v17, %v2720_v42  ;;  %v9497_v9 = vadd.f32 %v2977_v15, %v2721_v10  ;;  %v9499_v18 = vadd.f32 %v2978_v13, %v2722_v48  ;;  %v15081_v10 = vld [vmem:[#allocation158_spill] sm:$0xff]  ;;  %v15086_v15 = vld [vmem:[#allocation163_spill] sm:$0xff]  ;;  %v3117_v41 = vrot.slane %v15087_v3, 7  ;;  %v15088_v51 = vld [vmem:[#allocation184_spill] sm:$0xff] }
 0x55f   : > { %15074 = vst [vmem:[#allocation230_spill] sm:$0xff] %v9491_v55  ;;  %15075 = vst [vmem:[#allocation231_spill] sm:$0xff] %v9493_v53  ;;  %v9501_v43 = vadd.f32 %v2979_v34, %v2723_v6  ;;  %v9503_v26 = vadd.f32 %v2980_v54, %v2724_v0  ;;  %v15082_v6 = vld [vmem:[#allocation159_spill] sm:$0xff]  ;;  %v15083_v34 = vld [vmem:[#allocation160_spill] sm:$0xff]  ;;  %v3118_v17 = vrot.slane %v15088_v51, 7  ;;  %v3119_v40 = vrot.slane %v15089_v60, 7 }
 0x560   : > { %15076 = vst [vmem:[#allocation232_spill] sm:$0xff] %v9495_v47  ;;  %15077 = vst [vmem:[#allocation233_spill] sm:$0xff] %v9497_v9  ;;  %v3120_v42 = vrot.slane %v15090_v45, 7  ;;  %v15094_v9 = vld [vmem:[#allocation42_spill] sm:$0xff]  ;;  %v15095_v47 = vld [vmem:[#allocation172_spill] sm:$0xff]  ;;  %v3130_v31 = vrot.slane %v15100_v61, 7  ;;  %v3141_v38 = vsel %vm995_vm7, %v15104_v57, %v3117_v41 }
 0x561   : > { %15078 = vst [vmem:[#allocation234_spill] sm:$0xff] %v9499_v18  ;;  %15079 = vst [vmem:[#allocation235_spill] sm:$0xff] %v9501_v43  ;;  %v15092_v43 = vld [vmem:[#allocation41_spill] sm:$0xff]  ;;  %v15093_v18 = vld [vmem:[#allocation43_spill] sm:$0xff]  ;;  %v3124_v52 = vrot.slane %v15094_v9, 7  ;;  %v3125_v32 = vrot.slane %v15095_v47, 7  ;;  %v3142_v35 = vsel %vm995_vm7, %v15106_v21, %v3118_v17 }
 0x562   : > { %15080 = vst [vmem:[#allocation236_spill] sm:$0xff] %v9503_v26  ;;  %v15091_v26 = vld [vmem:[#allocation192_spill] sm:$0xff]  ;;  %v3122_v0 = vrot.slane %v15092_v43, 7  ;;  %v3123_v13 = vrot.slane %v15093_v18, 7  ;;  %v15096_v53 = vld [vmem:[#allocation173_spill] sm:$0xff]  ;;  %v15097_v55 = vld [vmem:[#allocation174_spill] sm:$0xff] }
 0x563   : > { %v3121_v48 = vrot.slane %v15091_v26, 7  ;;  %v3126_v54 = vrot.slane %v15096_v53, 7  ;;  %v3127_v11 = vrot.slane %v15097_v55, 7  ;;  %v15098_v62 = vld [vmem:[#allocation175_spill] sm:$0xff]  ;;  %v15099_v5 = vld [vmem:[#allocation176_spill] sm:$0xff]  ;;  %v3131_v50 = vrot.slane %v15101_v27, 7 }
 0x564   : > { %v3128_v63 = vrot.slane %v15098_v62, 7  ;;  %v3129_v7 = vrot.slane %v15099_v5, 7  ;;  %v3132_v59 = vrot.slane %v15102_v20, 7  ;;  %v3133_v33 = vsel %vm995_vm7, %v3117_v41, %v3125_v32  ;;  %v15113_v41 = vld [vmem:[#allocation169_spill] sm:$0xff] }
 0x565   : > { %v3134_v28 = vsel %vm995_vm7, %v3118_v17, %v3126_v54  ;;  %v3135_v30 = vsel %vm995_vm7, %v3119_v40, %v3127_v11  ;;  %v3138_v1 = vsel %vm995_vm7, %v3122_v0, %v3130_v31  ;;  %v3139_v14 = vsel %vm995_vm7, %v3123_v13, %v3131_v50  ;;  %v15115_v17 = vld [vmem:[#allocation170_spill] sm:$0xff] }
 0x566   : > { %v3136_v25 = vsel %vm995_vm7, %v3120_v42, %v3128_v63  ;;  %v3137_v24 = vsel %vm995_vm7, %v3121_v48, %v3129_v7  ;;  %v3140_v23 = vsel %vm995_vm7, %v3124_v52, %v3132_v59  ;;  %v15108_v16 = vrot.slane %v15107_v58, 7 }
 0x567   : > { %v15110_v37 = vrot.slane %v15109_v4, 7  ;;  %v15112_v22 = vrot.slane %v15111_v36, 7  ;;  %v15114_v39 = vrot.slane %v15113_v41, 7  ;;  %v15116_v58 = vrot.slane %v15115_v17, 7  ;;  %v15151_v36 = vld [vmem:[#allocation211_spill] sm:$0xff] }
 0x568   : > { %v3143_v56 = vsel %vm995_vm7, %v15108_v16, %v3119_v40  ;;  %v15117_v40 = vld [vmem:[#allocation171_spill] sm:$0xff] }
 0x569   : > { %v3144_v12 = vsel %vm995_vm7, %v15110_v37, %v3120_v42  ;;  %v3145_v57 = vsel %vm995_vm7, %v15112_v22, %v3121_v48  ;;  %v3146_v21 = vsel %vm995_vm7, %v15114_v39, %v3122_v0  ;;  %v3147_v16 = vsel %vm995_vm7, %v15116_v58, %v3123_v13 }
 0x56a   : > { %v15118_v4 = vrot.slane %v15117_v40, 7  ;;  %v15119_v42 = vrot.slane %v8511_v19, 7  ;;  %v15120_v48 = vrot.slane %v8521_v8, 7  ;;  %v15121_v0 = vrot.slane %v15081_v10, 7  ;;  %v15149_v40 = vld [vmem:[#allocation210_spill] sm:$0xff] }
 0x56b   : > { %v15122_v13 = vrot.slane %v15082_v6, 7  ;;  %v15150_v17 = vrot.slane %v15149_v40, 6 }
 0x56c   : > { %v3148_v37 = vsel %vm995_vm7, %v15118_v4, %v3124_v52  ;;  %v3189_v22 = vsel %vm995_vm7, %v3125_v32, %v15119_v42  ;;  %v3190_v39 = vsel %vm995_vm7, %v3126_v54, %v15120_v48  ;;  %v3191_v58 = vsel %vm995_vm7, %v3127_v11, %v15121_v0 }
 0x56d   : > { %v3192_v4 = vsel %vm995_vm7, %v3128_v63, %v15122_v13  ;;  %v15123_v52 = vrot.slane %v15083_v34, 7  ;;  %v15124_v42 = vrot.slane %v15084_v49, 7  ;;  %v15125_v48 = vrot.slane %v15085_v46, 7 }
 0x56e   : > { %v15126_v0 = vrot.slane %v15086_v15, 7  ;;  %v3197_v13 = vsel %vm1004_vm14, %v3189_v22, 1.0 }
 0x56f   : > { %v3193_v32 = vsel %vm995_vm7, %v3129_v7, %v15123_v52  ;;  %v3194_v54 = vsel %vm995_vm7, %v3130_v31, %v15124_v42  ;;  %v3195_v11 = vsel %vm995_vm7, %v3131_v50, %v15125_v48  ;;  %v3198_v7 = vsel %vm1004_vm14, %v3190_v39, 1.0 }
 0x570   : > { %v3196_v63 = vsel %vm995_vm7, %v3132_v59, %v15126_v0  ;;  %v3199_v52 = vsel %vm1004_vm14, %v3191_v58, 1.0  ;;  %v3200_v31 = vsel %vm1004_vm14, %v3192_v4, 1.0  ;;  %v3201_v50 = vsel %vm1004_vm14, %v3193_v32, 1.0 }
 0x571   : > { %v3202_v42 = vsel %vm1004_vm14, %v3194_v54, 1.0  ;;  %v3203_v59 = vsel %vm1004_vm14, %v3195_v11, 1.0  ;;  %v3204_v22 = vsel %vm1004_vm14, %v3196_v63, 1.0  ;;  %v9632_v39 = vmul.f32 %v8511_v19, %v3197_v13  ;;  %v15167_v19 = vld [vmem:[#allocation196_spill] sm:$0xff] }
 0x572   : > { %v9635_v58 = vmul.f32 %v8521_v8, %v3198_v7  ;;  %v9638_v4 = vmul.f32 %v15081_v10, %v3199_v52  ;;  %v9641_v32 = vmul.f32 %v15082_v6, %v3200_v31  ;;  %v9644_v54 = vmul.f32 %v15083_v34, %v3201_v50  ;;  %v15159_v34 = vld [vmem:[#allocation44_spill] sm:$0xff]  ;;  %v15161_v6 = vld [vmem:[#allocation193_spill] sm:$0xff]  ;;  %v15163_v10 = vld [vmem:[#allocation194_spill] sm:$0xff] }
 0x573   : > { %v9647_v48 = vmul.f32 %v15084_v49, %v3202_v42  ;;  %v9650_v11 = vmul.f32 %v15085_v46, %v3203_v59  ;;  %v9653_v0 = vmul.f32 %v15086_v15, %v3204_v22  ;;  %v9656_v63 = vmul.f32 %v15087_v3, %v3141_v38  ;;  %v15142_v3 = vld [vmem:[#allocation190_spill] sm:$0xff]  ;;  %v15153_v15 = vld [vmem:[#allocation212_spill] sm:$0xff]  ;;  %v15157_v49 = vld [vmem:[#allocation215_spill] sm:$0xff] }
 0x574   : > { %v9659_v13 = vmul.f32 %v15088_v51, %v3142_v35  ;;  %v9662_v7 = vmul.f32 %v15089_v60, %v3143_v56  ;;  %v9665_v52 = vmul.f32 %v15090_v45, %v3144_v12  ;;  %v9668_v31 = vmul.f32 %v15091_v26, %v3145_v57  ;;  %v15139_v60 = vld [vmem:[#allocation186_spill] sm:$0xff]  ;;  %v15165_v8 = vld [vmem:[#allocation195_spill] sm:$0xff] }
 0x575   : > { %15127 = vst [vmem:[#allocation180_spill] sm:$0xff] %v9656_v63  ;;  %v9671_v50 = vmul.f32 %v15092_v43, %v3146_v21  ;;  %v9674_v42 = vmul.f32 %v15093_v18, %v3147_v16  ;;  %v9677_v38 = vmul.f32 %v15094_v9, %v3148_v37  ;;  %v9680_v35 = vmul.f32 %v15095_v47, %v3133_v33  ;;  %v15136_v47 = vld [vmem:[#allocation182_spill] sm:$0xff]  ;;  %v15147_v37 = vld [vmem:[#allocation208_spill] sm:$0xff] }
 0x576   : > { %15128 = vst [vmem:[#allocation184_spill] sm:$0xff] %v9659_v13  ;;  %15129 = vst [vmem:[#allocation189_spill] sm:$0xff] %v9662_v7  ;;  %v9683_v56 = vmul.f32 %v15096_v53, %v3134_v28  ;;  %v9686_v12 = vmul.f32 %v15097_v55, %v3135_v30  ;;  %v9689_v26 = vmul.f32 %v15098_v62, %v3136_v25  ;;  %v15135_v28 = vld [vmem:[#allocation181_spill] sm:$0xff]  ;;  %v3382_v30 = vrot.slane %v15136_v47, 6  ;;  %v15137_v55 = vld [vmem:[#allocation183_spill] sm:$0xff] }
 0x577   : > { %15130 = vst [vmem:[#allocation191_spill] sm:$0xff] %v9665_v52  ;;  %15131 = vst [vmem:[#allocation192_spill] sm:$0xff] %v9668_v31  ;;  %v9692_v43 = vmul.f32 %v15099_v5, %v3137_v24  ;;  %v9695_v18 = vmul.f32 %v15100_v61, %v3138_v1  ;;  %v9698_v9 = vmul.f32 %v15101_v27, %v3139_v14  ;;  %v3381_v53 = vrot.slane %v15135_v28, 6  ;;  %v15138_v25 = vld [vmem:[#allocation185_spill] sm:$0xff]  ;;  %v15140_v5 = vld [vmem:[#allocation187_spill] sm:$0xff] }
 0x578   : > { %15132 = vst [vmem:[#allocation41_spill] sm:$0xff] %v9671_v50  ;;  %15133 = vst [vmem:[#allocation43_spill] sm:$0xff] %v9674_v42  ;;  %v9701_v33 = vmul.f32 %v15102_v20, %v3140_v23  ;;  %v3383_v45 = vrot.slane %v15137_v55, 6  ;;  %v3384_v62 = vrot.slane %v15138_v25, 6  ;;  %v3385_v24 = vrot.slane %v15139_v60, 6  ;;  %v15141_v61 = vld [vmem:[#allocation188_spill] sm:$0xff] }
 0x579   : > { %15134 = vst [vmem:[#allocation42_spill] sm:$0xff] %v9677_v38  ;;  %v3386_v51 = vrot.slane %v15140_v5, 6  ;;  %v3387_v1 = vrot.slane %v15141_v61, 6  ;;  %v3388_v27 = vrot.slane %v15142_v3, 6  ;;  %v15143_v14 = vld [vmem:[#allocation206_spill] sm:$0xff]  ;;  %v15145_v23 = vld [vmem:[#allocation207_spill] sm:$0xff] }
 0x57a   : > { %v15144_v57 = vrot.slane %v15143_v14, 6  ;;  %v15146_v21 = vrot.slane %v15145_v23, 6  ;;  %v15148_v59 = vrot.slane %v15147_v37, 6  ;;  %v3392_v41 = vsel %vm941_vm6, %v15150_v17, %v3384_v62  ;;  %v15155_v46 = vld [vmem:[#allocation214_spill] sm:$0xff] }
 0x57b   : > { %v15152_v14 = vrot.slane %v15151_v36, 6  ;;  %v15154_v23 = vrot.slane %v15153_v15, 6  ;;  %v15156_v37 = vrot.slane %v15155_v46, 6  ;;  %v15158_v40 = vrot.slane %v15157_v49, 6 }
 0x57c   : > { %v3389_v20 = vsel %vm941_vm6, %v15144_v57, %v3381_v53  ;;  %v3390_v16 = vsel %vm941_vm6, %v15146_v21, %v3382_v30  ;;  %v3391_v22 = vsel %vm941_vm6, %v15148_v59, %v3383_v45  ;;  %v15160_v36 = vrot.slane %v15159_v34, 6 }
 0x57d   : > { %v3393_v57 = vsel %vm941_vm6, %v15152_v14, %v3385_v24  ;;  %v3394_v21 = vsel %vm941_vm6, %v15154_v23, %v3386_v51  ;;  %v3395_v59 = vsel %vm941_vm6, %v15156_v37, %v3387_v1  ;;  %v3396_v17 = vsel %vm941_vm6, %v15158_v40, %v3388_v27 }
 0x57e   : > { %v3445_v14 = vsel %vm941_vm6, %v3381_v53, %v15160_v36  ;;  %v15162_v15 = vrot.slane %v15161_v6, 6  ;;  %v15164_v46 = vrot.slane %v15163_v10, 6  ;;  %v15166_v49 = vrot.slane %v15165_v8, 6  ;;  %v15169_v53 = vld [vmem:[#allocation197_spill] sm:$0xff] }
 0x57f   : > { %v15168_v44 = vrot.slane %v15167_v19, 6  ;;  %v15170_v2 = vrot.slane %v15169_v53, 6 }
 0x580   : > { %v3446_v23 = vsel %vm941_vm6, %v3382_v30, %v15162_v15  ;;  %v3447_v37 = vsel %vm941_vm6, %v3383_v45, %v15164_v46  ;;  %v3448_v40 = vsel %vm941_vm6, %v3384_v62, %v15166_v49  ;;  %v15171_v30 = vld [vmem:[#allocation198_spill] sm:$0xff]  ;;  %v15173_v45 = vld [vmem:[#allocation199_spill] sm:$0xff]  ;;  %v3453_v62 = vsel %vm950_vm13, %v3445_v14, 0.0 }
 0x581   : > { %v3449_v36 = vsel %vm941_vm6, %v3385_v24, %v15168_v44  ;;  %v3450_v15 = vsel %vm941_vm6, %v3386_v51, %v15170_v2  ;;  %v15172_v38 = vrot.slane %v15171_v30, 6  ;;  %v15174_v42 = vrot.slane %v15173_v45, 6 }
 0x582   : > { %v3454_v44 = vsel %vm950_vm13, %v3446_v23, 0.0  ;;  %v3455_v24 = vsel %vm950_vm13, %v3447_v37, 0.0  ;;  %v3456_v2 = vsel %vm950_vm13, %v3448_v40, 0.0  ;;  %v3458_v51 = vsel %vm950_vm13, %v3450_v15, 0.0 }
 0x583   : > { %v3451_v46 = vsel %vm941_vm6, %v3387_v1, %v15172_v38  ;;  %v3452_v49 = vsel %vm941_vm6, %v3388_v27, %v15174_v42  ;;  %v3457_v38 = vsel %vm950_vm13, %v3449_v36, 0.0  ;;  %v3517_v27 = vmul.f32 %v3453_v62, %v9632_v39 }
 0x584   : > { %v3459_v42 = vsel %vm950_vm13, %v3451_v46, 0.0  ;;  %v3460_v1 = vsel %vm950_vm13, %v3452_v49, 0.0  ;;  %v3518_v14 = vmul.f32 %v3454_v44, %v9635_v58  ;;  %v3519_v23 = vmul.f32 %v3455_v24, %v9638_v4 }
 0x585   : > { %v3520_v37 = vmul.f32 %v3456_v2, %v9641_v32  ;;  %v3521_v40 = vmul.f32 %v3457_v38, %v9644_v54  ;;  %v3522_v36 = vmul.f32 %v3458_v51, %v9647_v48  ;;  %v3523_v15 = vmul.f32 %v3459_v42, %v9650_v11 }
 0x586   : > { %v3524_v50 = vmul.f32 %v3460_v1, %v9653_v0  ;;  %v3573_v46 = vmul.f32 %v3389_v20, %v9680_v35  ;;  %v3574_v49 = vmul.f32 %v3390_v16, %v9683_v56  ;;  %v3575_v62 = vmul.f32 %v3391_v22, %v9686_v12 }
 0x587   : > { %v3576_v44 = vmul.f32 %v3392_v41, %v9689_v26  ;;  %v3577_v24 = vmul.f32 %v3393_v57, %v9692_v43  ;;  %v3578_v2 = vmul.f32 %v3394_v21, %v9695_v18  ;;  %v3579_v38 = vmul.f32 %v3395_v59, %v9698_v9 }
 0x588   : > { %v3580_v51 = vmul.f32 %v3396_v17, %v9701_v33  ;;  %v9808_v42 = vadd.f32 %v3517_v27, %v15159_v34  ;;  %v9811_v1 = vadd.f32 %v3518_v14, %v15161_v6  ;;  %v9814_v20 = vadd.f32 %v3519_v23, %v15163_v10 }
 0x589   : > { %v9817_v16 = vadd.f32 %v3520_v37, %v15165_v8  ;;  %v9820_v41 = vadd.f32 %v3521_v40, %v15167_v19  ;;  %v9823_v22 = vadd.f32 %v3522_v36, %v15169_v53  ;;  %v9826_v57 = vadd.f32 %v3523_v15, %v15171_v30 }
 0x58a   : > { %v9829_v21 = vadd.f32 %v3524_v50, %v15173_v45  ;;  %v9832_v59 = vadd.f32 %v3573_v46, %v15135_v28  ;;  %v9835_v17 = vadd.f32 %v3574_v49, %v15136_v47  ;;  %v9838_v27 = vadd.f32 %v3575_v62, %v15137_v55 }
 0x58b   : > { %v9841_v14 = vadd.f32 %v3576_v44, %v15138_v25  ;;  %v9844_v23 = vadd.f32 %v3577_v24, %v15139_v60  ;;  %v9847_v37 = vadd.f32 %v3578_v2, %v15140_v5  ;;  %v9850_v50 = vadd.f32 %v3579_v38, %v15141_v61  ;;  %v15183_v44 = vld [vmem:[#allocation41_spill] sm:$0xff]  ;;  %v15184_v2 = vld [vmem:[#allocation43_spill] sm:$0xff] }
 0x58c   : > { %15175 = vst [vmem:[#allocation172_spill] sm:$0xff] %v9832_v59  ;;  %15176 = vst [vmem:[#allocation173_spill] sm:$0xff] %v9835_v17  ;;  %v9853_v28 = vadd.f32 %v3580_v51, %v15142_v3  ;;  %v14140_v15 = vrot.slane %v9656_v63, 6  ;;  %v14143_v3 = vrot.slane %v9659_v13, 6  ;;  %v14146_v46 = vrot.slane %v9662_v7, 6  ;;  %v15185_v51 = vld [vmem:[#allocation42_spill] sm:$0xff] }
 0x58d   : > { %15177 = vst [vmem:[#allocation174_spill] sm:$0xff] %v9838_v27  ;;  %15178 = vst [vmem:[#allocation175_spill] sm:$0xff] %v9841_v14  ;;  %v14149_v49 = vrot.slane %v9665_v52, 6  ;;  %v3701_v5 = vrot.slane %v9680_v35, 6  ;;  %v3702_v61 = vrot.slane %v9683_v56, 6  ;;  %v3703_v60 = vrot.slane %v9686_v12, 6 }
 0x58e   : > { %15179 = vst [vmem:[#allocation176_spill] sm:$0xff] %v9844_v23  ;;  %15180 = vst [vmem:[#allocation177_spill] sm:$0xff] %v9847_v37  ;;  %v3704_v25 = vrot.slane %v9689_v26, 6  ;;  %v3705_v40 = vrot.slane %v9692_v43, 6  ;;  %v3706_v55 = vrot.slane %v9695_v18, 6  ;;  %v3707_v47 = vrot.slane %v9698_v9, 6 }
 0x58f   : > { %15181 = vst [vmem:[#allocation178_spill] sm:$0xff] %v9850_v50  ;;  %15182 = vst [vmem:[#allocation179_spill] sm:$0xff] %v9853_v28  ;;  %v3708_v24 = vrot.slane %v9701_v33, 6  ;;  %v3709_v36 = vsel %vm941_vm6, %v14140_v15, %v3701_v5  ;;  %v3710_v38 = vsel %vm941_vm6, %v14143_v3, %v3702_v61  ;;  %v3711_v62 = vsel %vm941_vm6, %v14146_v46, %v3703_v60 }
 0x590   : > { %v3712_v45 = vsel %vm941_vm6, %v14149_v49, %v3704_v25  ;;  %v15186_v63 = vrot.slane %v9668_v31, 6  ;;  %v15187_v13 = vrot.slane %v15183_v44, 6  ;;  %v15188_v7 = vrot.slane %v15184_v2, 6 }
 0x591   : > { %v15189_v52 = vrot.slane %v15185_v51, 6  ;;  %v15190_v31 = vrot.slane %v9632_v39, 6  ;;  %v15191_v44 = vrot.slane %v9635_v58, 6  ;;  %v15192_v2 = vrot.slane %v9638_v4, 6 }
 0x592   : > { %v3713_v15 = vsel %vm941_vm6, %v15186_v63, %v3705_v40  ;;  %v3714_v3 = vsel %vm941_vm6, %v15187_v13, %v3706_v55  ;;  %v3715_v46 = vsel %vm941_vm6, %v15188_v7, %v3707_v47  ;;  %v15193_v51 = vrot.slane %v9641_v32, 6 }
 0x593   : > { %v3716_v49 = vsel %vm941_vm6, %v15189_v52, %v3708_v24  ;;  %v3765_v63 = vsel %vm941_vm6, %v3701_v5, %v15190_v31  ;;  %v3766_v13 = vsel %vm941_vm6, %v3702_v61, %v15191_v44  ;;  %v3767_v7 = vsel %vm941_vm6, %v3703_v60, %v15192_v2 }
 0x594   : > { %v3768_v52 = vsel %vm941_vm6, %v3704_v25, %v15193_v51  ;;  %v15194_v30 = vrot.slane %v9644_v54, 6  ;;  %v15195_v5 = vrot.slane %v9647_v48, 6  ;;  %v15196_v44 = vrot.slane %v9650_v11, 6 }
 0x595   : > { %v15197_v2 = vrot.slane %v9653_v0, 6  ;;  %v3773_v51 = vsel %vm950_vm13, %v3765_v63, 1.0 }
 0x596   : > { %v3769_v31 = vsel %vm941_vm6, %v3705_v40, %v15194_v30  ;;  %v3770_v61 = vsel %vm941_vm6, %v3706_v55, %v15195_v5  ;;  %v3771_v60 = vsel %vm941_vm6, %v3707_v47, %v15196_v44  ;;  %v3774_v30 = vsel %vm950_vm13, %v3766_v13, 1.0 }
 0x597   : > { %v3772_v25 = vsel %vm941_vm6, %v3708_v24, %v15197_v2  ;;  %v3775_v40 = vsel %vm950_vm13, %v3767_v7, 1.0  ;;  %v3776_v55 = vsel %vm950_vm13, %v3768_v52, 1.0  ;;  %v3777_v47 = vsel %vm950_vm13, %v3769_v31, 1.0 }
 0x598   : > { %v3778_v5 = vsel %vm950_vm13, %v3770_v61, 1.0  ;;  %v3779_v24 = vsel %vm950_vm13, %v3771_v60, 1.0  ;;  %v3780_v63 = vsel %vm950_vm13, %v3772_v25, 1.0  ;;  %v9960_v13 = vmul.f32 %v3773_v51, %v9632_v39 }
 0x599   : > { %v9963_v7 = vmul.f32 %v3774_v30, %v9635_v58  ;;  %v9966_v52 = vmul.f32 %v3775_v40, %v9638_v4  ;;  %v9969_v31 = vmul.f32 %v3776_v55, %v9641_v32  ;;  %v9972_v61 = vmul.f32 %v3777_v47, %v9644_v54 }
 0x59a   : > { %v9975_v44 = vmul.f32 %v3778_v5, %v9647_v48  ;;  %v9978_v60 = vmul.f32 %v3779_v24, %v9650_v11  ;;  %v9981_v2 = vmul.f32 %v3780_v63, %v9653_v0  ;;  %v9984_v25 = vmul.f32 %v3709_v36, %v9680_v35 }
 0x59b   : > { %v9987_v51 = vmul.f32 %v3710_v38, %v9683_v56  ;;  %v9990_v30 = vmul.f32 %v3711_v62, %v9686_v12  ;;  %v9993_v40 = vmul.f32 %v3712_v45, %v9689_v26  ;;  %v9996_v55 = vmul.f32 %v3713_v15, %v9692_v43 }
 0x59c   : > { %15198 = vst [vmem:[#allocation181_spill] sm:$0xff] %v9984_v25  ;;  %v9999_v47 = vmul.f32 %v3714_v3, %v9695_v18  ;;  %v10002_v5 = vmul.f32 %v3715_v46, %v9698_v9  ;;  %v10005_v35 = vmul.f32 %v3716_v49, %v9701_v33  ;;  %v14169_v56 = vrot.slane %v9808_v42, 4 }
 0x59d   : > { %15199 = vst [vmem:[#allocation182_spill] sm:$0xff] %v9987_v51  ;;  %15200 = vst [vmem:[#allocation183_spill] sm:$0xff] %v9990_v30  ;;  %v14166_v12 = vrot.slane %v9811_v1, 4  ;;  %v14161_v36 = vrot.slane %v9814_v20, 4  ;;  %v14160_v26 = vrot.slane %v9817_v16, 4  ;;  %v14163_v43 = vrot.slane %v9820_v41, 4 }
 0x59e   : > { %15201 = vst [vmem:[#allocation185_spill] sm:$0xff] %v9993_v40  ;;  %15202 = vst [vmem:[#allocation186_spill] sm:$0xff] %v9996_v55  ;;  %v14165_v45 = vrot.slane %v9823_v22, 4  ;;  %v14168_v18 = vrot.slane %v9826_v57, 4  ;;  %v14156_v15 = vrot.slane %v9832_v59, 4  ;;  %v14157_v33 = vrot.slane %v9835_v17, 4 }
 0x59f   : > { %15203 = vst [vmem:[#allocation187_spill] sm:$0xff] %v9999_v47  ;;  %15204 = vst [vmem:[#allocation188_spill] sm:$0xff] %v10002_v5  ;;  %v14158_v3 = vrot.slane %v9838_v27, 4  ;;  %v14159_v46 = vrot.slane %v9841_v14, 4  ;;  %v14162_v49 = vrot.slane %v9844_v23, 4  ;;  %v14164_v62 = vrot.slane %v9847_v37, 4 }
 0x5a0   : > { %15205 = vst [vmem:[#allocation190_spill] sm:$0xff] %v10005_v35  ;;  %v14167_v38 = vrot.slane %v9850_v50, 4  ;;  %v4021_v63 = vsel %vm833_vm4, %v14156_v15, %v14169_v56  ;;  %v4022_v9 = vsel %vm833_vm4, %v14157_v33, %v14166_v12 }
 0x5a1   : > { %v4023_v24 = vsel %vm833_vm4, %v14158_v3, %v14161_v36  ;;  %v4024_v15 = vsel %vm833_vm4, %v14159_v46, %v14160_v26  ;;  %v4025_v33 = vsel %vm833_vm4, %v14162_v49, %v14163_v43  ;;  %v4026_v3 = vsel %vm833_vm4, %v14164_v62, %v14165_v45 }
 0x5a2   : > { %v4027_v46 = vsel %vm833_vm4, %v14167_v38, %v14168_v18  ;;  %v15206_v26 = vrot.slane %v9829_v21, 4  ;;  %v15207_v36 = vrot.slane %v9853_v28, 4  ;;  %v4029_v43 = vsel %vm842_vm11, %v4021_v63, 0.0 }
 0x5a3   : > { %v4030_v62 = vsel %vm842_vm11, %v4022_v9, 0.0  ;;  %v4031_v45 = vsel %vm842_vm11, %v4023_v24, 0.0  ;;  %v4032_v12 = vsel %vm842_vm11, %v4024_v15, 0.0  ;;  %v4033_v38 = vsel %vm842_vm11, %v4025_v33, 0.0 }
 0x5a4   : > { %v4028_v49 = vsel %vm833_vm4, %v15207_v36, %v15206_v26  ;;  %v4034_v18 = vsel %vm842_vm11, %v4026_v3, 0.0  ;;  %v4035_v36 = vsel %vm842_vm11, %v4027_v46, 0.0  ;;  %v4093_v9 = vmul.f32 %v4029_v43, %v9960_v13 }
 0x5a5   : > { %v4036_v26 = vsel %vm842_vm11, %v4028_v49, 0.0  ;;  %v4094_v63 = vmul.f32 %v4030_v62, %v9963_v7  ;;  %v4095_v24 = vmul.f32 %v4031_v45, %v9966_v52  ;;  %v4096_v15 = vmul.f32 %v4032_v12, %v9969_v31 }
 0x5a6   : > { %v4097_v56 = vmul.f32 %v4033_v38, %v9972_v61  ;;  %v4098_v33 = vmul.f32 %v4034_v18, %v9975_v44  ;;  %v4099_v3 = vmul.f32 %v4035_v36, %v9978_v60  ;;  %v4100_v28 = vmul.f32 %v4036_v26, %v9981_v2 }
 0x5a7   : > { %v10096_v46 = vadd.f32 %v4093_v9, %v9808_v42  ;;  %v10099_v49 = vadd.f32 %v4094_v63, %v9811_v1  ;;  %v10102_v43 = vadd.f32 %v4095_v24, %v9814_v20  ;;  %v10105_v45 = vadd.f32 %v4096_v15, %v9817_v16 }
 0x5a8   : > { %v10108_v12 = vadd.f32 %v4097_v56, %v9820_v41  ;;  %v10111_v18 = vadd.f32 %v4098_v33, %v9823_v22  ;;  %v10114_v62 = vadd.f32 %v4099_v3, %v9826_v57  ;;  %v10117_v38 = vadd.f32 %v4100_v28, %v9829_v21 }
 0x5a9   : > { %v14174_v3 = vrot.slane %v9984_v25, 4  ;;  %v15212_v15 = vrot.slane %v9960_v13, 4  ;;  %v15213_v28 = vrot.slane %v9963_v7, 4  ;;  %v15214_v36 = vrot.slane %v9987_v51, 4 }
 0x5aa   : > { %15208 = vst [vmem:[#allocation44_spill] sm:$0xff] %v10108_v12  ;;  %15209 = vst [vmem:[#allocation193_spill] sm:$0xff] %v10111_v18  ;;  %v15215_v63 = vrot.slane %v9966_v52, 4  ;;  %v15216_v56 = vrot.slane %v9990_v30, 4  ;;  %v15217_v26 = vrot.slane %v9969_v31, 4  ;;  %v15218_v25 = vrot.slane %v9993_v40, 4 }
 0x5ab   : > { %15210 = vst [vmem:[#allocation194_spill] sm:$0xff] %v10114_v62  ;;  %15211 = vst [vmem:[#allocation195_spill] sm:$0xff] %v10117_v38  ;;  %v4341_v33 = vsel %vm833_vm4, %v14174_v3, %v15212_v15  ;;  %v4342_v9 = vsel %vm833_vm4, %v15214_v36, %v15213_v28  ;;  %v15219_v3 = vrot.slane %v9972_v61, 4  ;;  %v15220_v51 = vrot.slane %v9996_v55, 4 }
 0x5ac   : > { %v4343_v24 = vsel %vm833_vm4, %v15216_v56, %v15215_v63  ;;  %v4344_v15 = vsel %vm833_vm4, %v15218_v25, %v15217_v26  ;;  %v15221_v28 = vrot.slane %v9975_v44, 4  ;;  %v15222_v30 = vrot.slane %v9999_v47, 4 }
 0x5ad   : > { %v4345_v36 = vsel %vm833_vm4, %v15220_v51, %v15219_v3  ;;  %v15223_v56 = vrot.slane %v9978_v60, 4  ;;  %v15224_v40 = vrot.slane %v10002_v5, 4  ;;  %v15225_v26 = vrot.slane %v9981_v2, 4 }
 0x5ae   : > { %v4346_v63 = vsel %vm833_vm4, %v15222_v30, %v15221_v28  ;;  %v15226_v55 = vrot.slane %v10005_v35, 4  ;;  %v4349_v3 = vsel %vm842_vm11, %v4341_v33, 1.0  ;;  %v4350_v30 = vsel %vm842_vm11, %v4342_v9, 1.0 }
 0x5af   : > { %v4347_v25 = vsel %vm833_vm4, %v15224_v40, %v15223_v56  ;;  %v4351_v28 = vsel %vm842_vm11, %v4343_v24, 1.0  ;;  %v4352_v5 = vsel %vm842_vm11, %v4344_v15, 1.0  ;;  %v4353_v40 = vsel %vm842_vm11, %v4345_v36, 1.0 }
 0x5b0   : > { %v4348_v51 = vsel %vm833_vm4, %v15226_v55, %v15225_v26  ;;  %v4354_v56 = vsel %vm842_vm11, %v4346_v63, 1.0  ;;  %v4355_v55 = vsel %vm842_vm11, %v4347_v25, 1.0  ;;  %v10200_v9 = vmul.f32 %v4349_v3, %v9960_v13 }
 0x5b1   : > { %v4356_v33 = vsel %vm842_vm11, %v4348_v51, 1.0  ;;  %v10203_v24 = vmul.f32 %v4350_v30, %v9963_v7  ;;  %v10206_v15 = vmul.f32 %v4351_v28, %v9966_v52  ;;  %v10209_v36 = vmul.f32 %v4352_v5, %v9969_v31 }
 0x5b2   : > { %15227 = vst [vmem:[#allocation196_spill] sm:$0xff] %v10200_v9  ;;  %v10212_v63 = vmul.f32 %v4353_v40, %v9972_v61  ;;  %v10215_v25 = vmul.f32 %v4354_v56, %v9975_v44  ;;  %v10218_v26 = vmul.f32 %v4355_v55, %v9978_v60  ;;  %v10221_v51 = vmul.f32 %v4356_v33, %v9981_v2 }
 0x5b3   : > { %15228 = vst [vmem:[#allocation197_spill] sm:$0xff] %v10203_v24  ;;  %15229 = vst [vmem:[#allocation237_spill] sm:$0xff] %v10206_v15  ;;  %v4549_v3 = vmul.f32 0.0, %v10200_v9  ;;  %v4550_v30 = vmul.f32 0.0, %v10203_v24  ;;  %v4551_v28 = vmul.f32 0.0, %v10206_v15  ;;  %v4552_v5 = vmul.f32 0.0, %v10209_v36 }
 0x5b4   : > { %15230 = vst [vmem:[#allocation238_spill] sm:$0xff] %v10209_v36  ;;  %15231 = vst [vmem:[#allocation239_spill] sm:$0xff] %v10212_v63  ;;  %v4553_v40 = vmul.f32 0.0, %v10212_v63  ;;  %v4554_v35 = vmul.f32 0.0, %v10215_v25  ;;  %v4555_v56 = vmul.f32 0.0, %v10218_v26  ;;  %v4556_v55 = vmul.f32 0.0, %v10221_v51 }
 0x5b5   : > { %15232 = vst [vmem:[#allocation240_spill] sm:$0xff] %v10215_v25  ;;  %15233 = vst [vmem:[#allocation241_spill] sm:$0xff] %v10218_v26  ;;  %v10232_v47 = vadd.f32 %v4549_v3, %v10096_v46  ;;  %v10235_v33 = vadd.f32 %v4550_v30, %v10099_v49  ;;  %v10238_v50 = vadd.f32 %v4551_v28, %v10102_v43 }
 0x5b6   : > { %15234 = vst [vmem:[#allocation242_spill] sm:$0xff] %v10221_v51  ;;  %v10241_v37 = vadd.f32 %v4552_v5, %v10105_v45  ;;  %v10244_v23 = vadd.f32 %v4553_v40, %v10108_v12  ;;  %v10247_v14 = vadd.f32 %v4554_v35, %v10111_v18  ;;  %v10250_v27 = vadd.f32 %v4555_v56, %v10114_v62  ;;  %v15253_v12 = vld [vmem:[#allocation66_spill] sm:$0xff] }
 0x5b7   : > { %15235 = vst [vmem:[#allocation243_spill] sm:$0xff] %v10232_v47  ;;  %15236 = vst [vmem:[#allocation244_spill] sm:$0xff] %v10235_v33  ;;  %v10253_v17 = vadd.f32 %v4556_v55, %v10117_v38  ;;  %v10256_v59 = vadd.f32 %v10232_v47, %v4549_v3  ;;  %v10259_v51 = vadd.f32 %v10235_v33, %v4550_v30  ;;  %v15251_v38 = vld [vmem:[#allocation65_spill] sm:$0xff] }
 0x5b8   : > { %15237 = vst [vmem:[#allocation245_spill] sm:$0xff] %v10238_v50  ;;  %15238 = vst [vmem:[#allocation246_spill] sm:$0xff] %v10241_v37  ;;  %v10262_v26 = vadd.f32 %v10238_v50, %v4551_v28  ;;  %v10265_v25 = vadd.f32 %v10241_v37, %v4552_v5  ;;  %v10268_v63 = vadd.f32 %v10244_v23, %v4553_v40 }
 0x5b9   : > { %15239 = vst [vmem:[#allocation247_spill] sm:$0xff] %v10244_v23  ;;  %15240 = vst [vmem:[#allocation248_spill] sm:$0xff] %v10247_v14  ;;  %v10271_v36 = vadd.f32 %v10247_v14, %v4554_v35  ;;  %v10274_v15 = vadd.f32 %v10250_v27, %v4555_v56  ;;  %v10277_v47 = vadd.f32 %v10253_v17, %v4556_v55 }
 0x5ba   : > { %15241 = vst [vmem:[#allocation249_spill] sm:$0xff] %v10250_v27  ;;  %15242 = vst [vmem:[#allocation250_spill] sm:$0xff] %v10253_v17  ;;  %v5269_v33 = vadd.f32 %v10256_v59, %v4549_v3  ;;  %v5270_v50 = vadd.f32 %v10259_v51, %v4550_v30  ;;  %v5271_v24 = vadd.f32 %v10262_v26, %v4551_v28  ;;  %v15252_v17 = vld [vmem:[#allocation67_spill] sm:$0xff] }
 0x5bb   : > { %15243 = vst [vmem:[#allocation251_spill] sm:$0xff] %v10256_v59  ;;  %15244 = vst [vmem:[#allocation252_spill] sm:$0xff] %v10259_v51  ;;  %v5272_v37 = vadd.f32 %v10265_v25, %v4552_v5  ;;  %v5273_v23 = vadd.f32 %v10268_v63, %v4553_v40  ;;  %v5274_v9 = vadd.f32 %v10271_v36, %v4554_v35  ;;  %v15254_v59 = vld [vmem:[#allocation68_spill] sm:$0xff]  ;;  %v15255_v51 = vld [vmem:[#allocation97_spill] sm:$0xff] }
 0x5bc   : > { %15245 = vst [vmem:[#allocation253_spill] sm:$0xff] %v10262_v26  ;;  %15246 = vst [vmem:[#allocation254_spill] sm:$0xff] %v10265_v25  ;;  %v5275_v14 = vadd.f32 %v10274_v15, %v4555_v56  ;;  %v5276_v27 = vadd.f32 %v10277_v47, %v4556_v55  ;;  %v5333_v62 = vmul.f32 %v5269_v33, %v15251_v38  ;;  %v15256_v26 = vld [vmem:[#allocation99_spill] sm:$0xff]  ;;  %v15257_v25 = vld [vmem:[#allocation98_spill] sm:$0xff] }
 0x5bd   : > { %15247 = vst [vmem:[#allocation255_spill] sm:$0xff] %v10268_v63  ;;  %15248 = vst [vmem:[#allocation256_spill] sm:$0xff] %v10271_v36  ;;  %v5334_v18 = vmul.f32 %v5270_v50, %v15252_v17  ;;  %v5335_v3 = vmul.f32 %v5271_v24, %v15253_v12  ;;  %v5336_v30 = vmul.f32 %v5272_v37, %v15254_v59  ;;  %v15258_v63 = vld [vmem:[#allocation100_spill] sm:$0xff]  ;;  %v15261_v33 = vld [vmem:[#allocation150_spill] sm:$0xff] }
 0x5be   : > { %15249 = vst [vmem:[#allocation257_spill] sm:$0xff] %v10274_v15  ;;  %15250 = vst [vmem:[#allocation258_spill] sm:$0xff] %v10277_v47  ;;  %v5337_v28 = vmul.f32 %v5273_v23, %v15255_v51  ;;  %v5338_v5 = vmul.f32 %v5274_v9, %v15256_v26  ;;  %v5339_v40 = vmul.f32 %v5275_v14, %v15257_v25  ;;  %v15259_v36 = vld [vmem:[#allocation148_spill] sm:$0xff]  ;;  %v15260_v15 = vld [vmem:[#allocation149_spill] sm:$0xff]  ;;  %v14243_v17 = vrot.slane %v15261_v33, 7 }
 0x5bf   : > { %v5340_v35 = vmul.f32 %v5276_v27, %v15258_v63  ;;  %v14239_v56 = vrot.slane %v15259_v36, 7  ;;  %v15262_v50 = vld [vmem:[#allocation151_spill] sm:$0xff]  ;;  %v15263_v37 = vld [vmem:[#allocation152_spill] sm:$0xff]  ;;  %v15264_v51 = vld [vmem:[#allocation153_spill] sm:$0xff] }
 0x5c0   : > { %v5397_v47 = vadd.f32 %v5337_v28, %v5333_v62  ;;  %v5398_v38 = vadd.f32 %v5338_v5, %v5334_v18  ;;  %v14240_v12 = vrot.slane %v15262_v50, 7  ;;  %v5399_v24 = vadd.f32 %v5339_v40, %v5335_v3  ;;  %v15265_v26 = vld [vmem:[#allocation154_spill] sm:$0xff]  ;;  %v15266_v25 = vld [vmem:[#allocation155_spill] sm:$0xff]  ;;  %v15267_v63 = vld [vmem:[#allocation156_spill] sm:$0xff] }
 0x5c1   : > { %v5400_v59 = vadd.f32 %v5340_v35, %v5336_v30  ;;  %v14241_v23 = vrot.slane %v15263_v37, 7  ;;  %v14242_v9 = vrot.slane %v15264_v51, 7  ;;  %v15268_v55 = vrot.slane %v15267_v63, 7  ;;  %v15270_v28 = vld [vmem:[#allocation157_spill] sm:$0xff]  ;;  %v15272_v35 = vld [vmem:[#allocation158_spill] sm:$0xff]  ;;  %v15274_v63 = vld [vmem:[#allocation159_spill] sm:$0xff] }
 0x5c2   : > { %v15269_v62 = vrot.slane %v15260_v15, 7  ;;  %v15271_v3 = vrot.slane %v15270_v28, 7  ;;  %v5429_v5 = vadd.f32 %v5399_v24, %v5397_v47  ;;  %v15273_v27 = vrot.slane %v15272_v35, 7  ;;  %v15276_v28 = vld [vmem:[#allocation160_spill] sm:$0xff] }
 0x5c3   : > { %v3181_v18 = vsel %vm995_vm7, %v15268_v55, %v14239_v56  ;;  %v5430_v40 = vadd.f32 %v5400_v59, %v5398_v38  ;;  %v15275_v55 = vrot.slane %v15274_v63, 7  ;;  %v15278_v38 = vld [vmem:[#allocation161_spill] sm:$0xff] }
 0x5c4   : > { %v3182_v30 = vsel %vm995_vm7, %v15271_v3, %v15269_v62  ;;  %v3183_v14 = vsel %vm995_vm7, %v15273_v27, %v14243_v17  ;;  %v15277_v62 = vrot.slane %v15276_v28, 7  ;;  %v15279_v24 = vrot.slane %v15278_v38, 7  ;;  %v15281_v3 = vld [vmem:[#allocation162_spill] sm:$0xff]  ;;  %v15284_v28 = vld [vmem:[#allocation163_spill] sm:$0xff] }
 0x5c5   : > { %v3184_v56 = vsel %vm995_vm7, %v15275_v55, %v14240_v12  ;;  %v15280_v27 = vrot.slane %v15265_v26, 7  ;;  %v15282_v35 = vrot.slane %v15281_v3, 7  ;;  %v15283_v55 = vrot.slane %v15266_v25, 7 }
 0x5c6   : > { %v3185_v47 = vsel %vm995_vm7, %v15277_v62, %v14241_v23  ;;  %v3186_v59 = vsel %vm995_vm7, %v15279_v24, %v14242_v9  ;;  %v15285_v12 = vrot.slane %v15284_v28, 7  ;;  %v10351_v23 = vadd.f32 %v5430_v40, %v5429_v5  ;;  %v15290_v40 = vld [vmem:[#allocation24_spill] sm:$0xff] }
 0x5c7   : > { %v3187_v63 = vsel %vm995_vm7, %v15282_v35, %v15280_v27  ;;  %v10354_v38 = vmul.f32 %v15259_v36, %v3181_v18  ;;  %v10357_v24 = vmul.f32 %v15260_v15, %v3182_v30  ;;  %v10360_v3 = vmul.f32 %v15261_v33, %v3183_v14  ;;  %v15287_v14 = vld [vmem:[#allocation22_spill] sm:$0xff] }
 0x5c8   : > { %v3188_v62 = vsel %vm995_vm7, %v15285_v12, %v15283_v55  ;;  %15286 = vst [vmem:[#allocation65_spill] sm:$0xff] %v10351_v23  ;;  %v10363_v27 = vmul.f32 %v15262_v50, %v3184_v56  ;;  %v10366_v35 = vmul.f32 %v15263_v37, %v3185_v47  ;;  %v10369_v28 = vmul.f32 %v15264_v51, %v3186_v59  ;;  %v15293_v55 = vld [vmem:[#allocation45_spill] sm:$0xff] }
 0x5c9   : > { %v10372_v12 = vmul.f32 %v15265_v26, %v3187_v63  ;;  %5461 = vrot.lane.b32.xlu0 %v10351_v23, %s7068_s25  ;;  %v10377_v18 = vmul.f32 %v15266_v25, %v3188_v62  ;;  %v15288_v30 = vrot.slane %v15287_v14, 6  ;;  %v15289_v56 = vrot.slane %v15159_v34, 6  ;;  %v15296_v23 = vld [vmem:[#allocation47_spill] sm:$0xff] }
 0x5ca   : > { %v15291_v47 = vrot.slane %v15290_v40, 6  ;;  %v15292_v59 = vrot.slane %v15161_v6, 6  ;;  %v15294_v9 = vrot.slane %v15293_v55, 6  ;;  %v15295_v17 = vrot.slane %v15163_v10, 6 }
 0x5cb   : > { %v3437_v5 = vsel %vm941_vm6, %v15289_v56, %v15288_v30  ;;  %v15297_v25 = vrot.slane %v15296_v23, 6  ;;  %v15298_v34 = vrot.slane %v15165_v8, 6  ;;  %v15299_v56 = vld [vmem:[#allocation46_spill] sm:$0xff]  ;;  %v15301_v6 = vrot.slane %v15167_v19, 6  ;;  %v15311_v19 = vld [vmem:[#allocation199_spill] sm:$0xff] }
 0x5cc   : > { %v3438_v63 = vsel %vm941_vm6, %v15292_v59, %v15291_v47  ;;  %v3439_v62 = vsel %vm941_vm6, %v15295_v17, %v15294_v9  ;;  %v15300_v26 = vrot.slane %v15299_v56, 6  ;;  %v15302_v59 = vld [vmem:[#allocation48_spill] sm:$0xff]  ;;  %v15304_v10 = vrot.slane %v15169_v53, 6  ;;  %v15305_v9 = vld [vmem:[#allocation221_spill] sm:$0xff]  ;;  %v15307_v8 = vld [vmem:[#allocation198_spill] sm:$0xff] }
 0x5cd   : > { %v3440_v30 = vsel %vm941_vm6, %v15298_v34, %v15297_v25  ;;  %v15303_v51 = vrot.slane %v15302_v59, 6  ;;  %v15306_v37 = vrot.slane %v15305_v9, 6  ;;  %v15308_v50 = vrot.slane %v15307_v8, 6  ;;  %v15309_v34 = vld [vmem:[#allocation222_spill] sm:$0xff] }
 0x5ce   : > { %v3441_v47 = vsel %vm941_vm6, %v15301_v6, %v15300_v26  ;;  %v15310_v33 = vrot.slane %v15309_v34, 6  ;;  %v15312_v15 = vrot.slane %v15311_v19, 6  ;;  %v3525_v6 = vmul.f32 %v3437_v5, %v10354_v38  ;;  %v15313_v5 = vld [vmem:[#allocation139_spill] sm:$0xff] }
 0x5cf   : > { %v3442_v17 = vsel %vm941_vm6, %v15304_v10, %v15303_v51  ;;  %v3443_v25 = vsel %vm941_vm6, %v15308_v50, %v15306_v37  ;;  %v3526_v53 = vmul.f32 %v3438_v63, %v10357_v24  ;;  %v3527_v51 = vmul.f32 %v3439_v62, %v10360_v3  ;;  %5577 = vrot.lane.b32.xlu0 %v15313_v5, %s7068_s25 }
 0x5d0   : > { %v3444_v26 = vsel %vm941_vm6, %v15312_v15, %v15310_v33  ;;  %v3528_v10 = vmul.f32 %v3440_v30, %v10363_v27  ;;  %v3529_v8 = vmul.f32 %v3441_v47, %v10366_v35  ;;  %v3530_v36 = vmul.f32 %v3442_v17, %v10369_v28 }
 0x5d1   : > { %v3531_v50 = vmul.f32 %v3443_v25, %v10372_v12  ;;  %v3532_v37 = vmul.f32 %v3444_v26, %v10377_v18  ;;  %v10436_v19 = vadd.f32 %v3525_v6, %v15287_v14  ;;  %v10439_v15 = vadd.f32 %v3526_v53, %v15290_v40 }
 0x5d2   : > { %v10442_v33 = vadd.f32 %v3527_v51, %v15293_v55  ;;  %v10447_v63 = vadd.f32 %v3528_v10, %v15296_v23  ;;  %v10450_v62 = vadd.f32 %v3529_v8, %v15299_v56  ;;  %v10453_v30 = vadd.f32 %v3530_v36, %v15302_v59 }
 0x5d3   : > { %v10456_v47 = vadd.f32 %v3531_v50, %v15305_v9  ;;  %v10459_v17 = vadd.f32 %v3532_v37, %v15309_v34  ;;  %v14253_v25 = vrot.slane %v10354_v38, 6  ;;  %v14257_v26 = vrot.slane %v10357_v24, 6 }
 0x5d4   : > { %v14254_v6 = vrot.slane %v10360_v3, 6  ;;  %v14255_v53 = vrot.slane %v10363_v27, 6  ;;  %v14256_v10 = vrot.slane %v10369_v28, 6  ;;  %v15314_v50 = vrot.slane %v9632_v39, 6 }
 0x5d5   : > { %v15315_v5 = vrot.slane %v9635_v58, 6  ;;  %v15316_v36 = vrot.slane %v9638_v4, 6  ;;  %v15317_v39 = vrot.slane %v9641_v32, 6  ;;  %v15319_v58 = vrot.slane %v9644_v54, 6 }
 0x5d6   : > { %v3757_v37 = vsel %vm941_vm6, %v15314_v50, %v14253_v25  ;;  %v15318_v25 = vrot.slane %v10366_v35, 6  ;;  %v15320_v4 = vrot.slane %v9647_v48, 6  ;;  %v15322_v32 = vrot.slane %v9650_v11, 6 }
 0x5d7   : > { %v3758_v51 = vsel %vm941_vm6, %v15315_v5, %v14257_v26  ;;  %v3759_v8 = vsel %vm941_vm6, %v15316_v36, %v14254_v6  ;;  %v3760_v50 = vsel %vm941_vm6, %v15317_v39, %v14255_v53  ;;  %v15321_v6 = vrot.slane %v10372_v12, 6 }
 0x5d8   : > { %v3761_v5 = vsel %vm941_vm6, %v15319_v58, %v15318_v25  ;;  %v3762_v36 = vsel %vm941_vm6, %v15320_v4, %v14256_v10  ;;  %v15323_v53 = vrot.slane %v10377_v18, 6  ;;  %v15324_v54 = vrot.slane %v9653_v0, 6 }
 0x5d9   : > { %v3763_v39 = vsel %vm941_vm6, %v15322_v32, %v15321_v6  ;;  %v10518_v58 = vmul.f32 %v3757_v37, %v10354_v38  ;;  %v10521_v48 = vmul.f32 %v3758_v51, %v10357_v24  ;;  %v10524_v4 = vmul.f32 %v3759_v8, %v10360_v3 }
 0x5da   : > { %v3764_v25 = vsel %vm941_vm6, %v15324_v54, %v15323_v53  ;;  %v10527_v11 = vmul.f32 %v3760_v50, %v10363_v27  ;;  %v10530_v6 = vmul.f32 %v3761_v5, %v10366_v35  ;;  %v10533_v0 = vmul.f32 %v3762_v36, %v10369_v28 }
 0x5db   : > { %v10536_v53 = vmul.f32 %v3763_v39, %v10372_v12  ;;  %v10539_v37 = vmul.f32 %v3764_v25, %v10377_v18  ;;  %v14258_v51 = vrot.slane %v10436_v19, 4  ;;  %v14262_v8 = vrot.slane %v10439_v15, 4 }
 0x5dc   : > { %v14259_v32 = vrot.slane %v10442_v33, 4  ;;  %v14260_v50 = vrot.slane %v10447_v63, 4  ;;  %v14261_v54 = vrot.slane %v10453_v30, 4  ;;  %v15325_v25 = vrot.slane %v9808_v42, 4 }
 0x5dd   : > { %v15326_v26 = vrot.slane %v9811_v1, 4  ;;  %v15327_v36 = vrot.slane %v9814_v20, 4  ;;  %v15328_v42 = vrot.slane %v9817_v16, 4  ;;  %v15330_v1 = vrot.slane %v9820_v41, 4 }
 0x5de   : > { %v4013_v10 = vsel %vm833_vm4, %v15325_v25, %v14258_v51  ;;  %v15329_v51 = vrot.slane %v10450_v62, 4  ;;  %v15331_v20 = vrot.slane %v9823_v22, 4  ;;  %v15333_v16 = vrot.slane %v9826_v57, 4 }
 0x5df   : > { %v4014_v5 = vsel %vm833_vm4, %v15326_v26, %v14262_v8  ;;  %v4015_v39 = vsel %vm833_vm4, %v15327_v36, %v14259_v32  ;;  %v4016_v25 = vsel %vm833_vm4, %v15328_v42, %v14260_v50  ;;  %v15332_v32 = vrot.slane %v10456_v47, 4 }
 0x5e0   : > { %v4017_v26 = vsel %vm833_vm4, %v15330_v1, %v15329_v51  ;;  %v4018_v36 = vsel %vm833_vm4, %v15331_v20, %v14261_v54  ;;  %v15334_v50 = vrot.slane %v10459_v17, 4  ;;  %v15335_v41 = vrot.slane %v9829_v21, 4 }
 0x5e1   : > { %v4019_v42 = vsel %vm833_vm4, %v15333_v16, %v15332_v32  ;;  %v4101_v1 = vmul.f32 %v4013_v10, %v10518_v58  ;;  %v4102_v22 = vmul.f32 %v4014_v5, %v10521_v48  ;;  %v4103_v20 = vmul.f32 %v4015_v39, %v10524_v4 }
 0x5e2   : > { %v4020_v51 = vsel %vm833_vm4, %v15335_v41, %v15334_v50  ;;  %v4104_v54 = vmul.f32 %v4016_v25, %v10527_v11  ;;  %v4105_v57 = vmul.f32 %v4017_v26, %v10530_v6  ;;  %v4106_v8 = vmul.f32 %v4018_v36, %v10533_v0 }
 0x5e3   : > { %v4107_v32 = vmul.f32 %v4019_v42, %v10536_v53  ;;  %v4108_v16 = vmul.f32 %v4020_v51, %v10539_v37  ;;  %v10606_v21 = vadd.f32 %v4101_v1, %v10436_v19  ;;  %v10609_v50 = vadd.f32 %v4102_v22, %v10439_v15 }
 0x5e4   : > { %v10612_v10 = vadd.f32 %v4103_v20, %v10442_v33  ;;  %v10615_v5 = vadd.f32 %v4104_v54, %v10447_v63  ;;  %v10618_v39 = vadd.f32 %v4105_v57, %v10450_v62  ;;  %v10621_v25 = vadd.f32 %v4106_v8, %v10453_v30 }
 0x5e5   : > { %15336 = vst [vmem:[#allocation67_spill] sm:$0xff] %v10609_v50  ;;  %v10624_v26 = vadd.f32 %v4107_v32, %v10456_v47  ;;  %v10627_v36 = vadd.f32 %v4108_v16, %v10459_v17  ;;  %v14263_v42 = vrot.slane %v10518_v58, 4  ;;  %v14267_v41 = vrot.slane %v10521_v48, 4 }
 0x5e6   : > { %15337 = vst [vmem:[#allocation66_spill] sm:$0xff] %v10612_v10  ;;  %15338 = vst [vmem:[#allocation68_spill] sm:$0xff] %v10615_v5  ;;  %v14264_v51 = vrot.slane %v10524_v4, 4  ;;  %v14265_v54 = vrot.slane %v10527_v11, 4  ;;  %v14266_v22 = vrot.slane %v10533_v0, 4  ;;  %v15343_v57 = vrot.slane %v9960_v13, 4 }
 0x5e7   : > { %15339 = vst [vmem:[#allocation97_spill] sm:$0xff] %v10618_v39  ;;  %15340 = vst [vmem:[#allocation99_spill] sm:$0xff] %v10621_v25  ;;  %v15344_v16 = vrot.slane %v9963_v7, 4  ;;  %v15345_v8 = vrot.slane %v9966_v52, 4  ;;  %v15346_v13 = vrot.slane %v9969_v31, 4  ;;  %v15348_v7 = vrot.slane %v9972_v61, 4 }
 0x5e8   : > { %15341 = vst [vmem:[#allocation98_spill] sm:$0xff] %v10624_v26  ;;  %15342 = vst [vmem:[#allocation100_spill] sm:$0xff] %v10627_v36  ;;  %v4333_v32 = vsel %vm833_vm4, %v15343_v57, %v14263_v42  ;;  %v15347_v42 = vrot.slane %v10530_v6, 4  ;;  %v15349_v52 = vrot.slane %v9975_v44, 4  ;;  %v15351_v31 = vrot.slane %v9978_v60, 4 }
 0x5e9   : > { %v4334_v1 = vsel %vm833_vm4, %v15344_v16, %v14267_v41  ;;  %v4335_v20 = vsel %vm833_vm4, %v15345_v8, %v14264_v51  ;;  %v4336_v57 = vsel %vm833_vm4, %v15346_v13, %v14265_v54  ;;  %v15350_v51 = vrot.slane %v10536_v53, 4  ;;  %v15365_v41 = vld [vmem:[#allocation195_spill] sm:$0xff] }
 0x5ea   : > { %v4337_v16 = vsel %vm833_vm4, %v15348_v7, %v15347_v42  ;;  %v4338_v8 = vsel %vm833_vm4, %v15349_v52, %v14266_v22  ;;  %v15352_v54 = vrot.slane %v10539_v37, 4  ;;  %v15353_v61 = vrot.slane %v9981_v2, 4 }
 0x5eb   : > { %v4339_v13 = vsel %vm833_vm4, %v15351_v31, %v15350_v51  ;;  %v10686_v7 = vmul.f32 %v4333_v32, %v10518_v58  ;;  %v10689_v44 = vmul.f32 %v4334_v1, %v10521_v48  ;;  %v10692_v52 = vmul.f32 %v4335_v20, %v10524_v4 }
 0x5ec   : > { %v4340_v42 = vsel %vm833_vm4, %v15353_v61, %v15352_v54  ;;  %v10695_v60 = vmul.f32 %v4336_v57, %v10527_v11  ;;  %v10698_v51 = vmul.f32 %v4337_v16, %v10530_v6  ;;  %v10701_v2 = vmul.f32 %v4338_v8, %v10533_v0  ;;  %v15362_v8 = vld [vmem:[#allocation44_spill] sm:$0xff] }
 0x5ed   : > { %15354 = vst [vmem:[#allocation156_spill] sm:$0xff] %v10686_v7  ;;  %15355 = vst [vmem:[#allocation157_spill] sm:$0xff] %v10689_v44  ;;  %v10704_v54 = vmul.f32 %v4339_v13, %v10536_v53  ;;  %v10707_v32 = vmul.f32 %v4340_v42, %v10539_v37  ;;  %v4557_v1 = vmul.f32 %v10686_v7, %v10096_v46  ;;  %v15363_v13 = vld [vmem:[#allocation193_spill] sm:$0xff]  ;;  %v15364_v42 = vld [vmem:[#allocation194_spill] sm:$0xff] }
 0x5ee   : > { %15356 = vst [vmem:[#allocation158_spill] sm:$0xff] %v10692_v52  ;;  %15357 = vst [vmem:[#allocation159_spill] sm:$0xff] %v10695_v60  ;;  %v4558_v20 = vmul.f32 %v10689_v44, %v10099_v49  ;;  %v4559_v57 = vmul.f32 %v10692_v52, %v10102_v43  ;;  %v4560_v16 = vmul.f32 %v10695_v60, %v10105_v45 }
 0x5ef   : > { %15358 = vst [vmem:[#allocation160_spill] sm:$0xff] %v10698_v51  ;;  %15359 = vst [vmem:[#allocation161_spill] sm:$0xff] %v10701_v2  ;;  %v4561_v31 = vmul.f32 %v10698_v51, %v15362_v8  ;;  %v4562_v61 = vmul.f32 %v10701_v2, %v15363_v13  ;;  %v4563_v22 = vmul.f32 %v10704_v54, %v15364_v42 }
 0x5f0   : > { %15360 = vst [vmem:[#allocation162_spill] sm:$0xff] %v10704_v54  ;;  %15361 = vst [vmem:[#allocation163_spill] sm:$0xff] %v10707_v32  ;;  %v4564_v46 = vmul.f32 %v10707_v32, %v15365_v41  ;;  %v10726_v49 = vadd.f32 %v4557_v1, %v10606_v21  ;;  %v10729_v43 = vadd.f32 %v4558_v20, %v10609_v50  ;;  %v15374_v20 = vld [vmem:[#allocation196_spill] sm:$0xff] }
 0x5f1   : > { %v10732_v45 = vadd.f32 %v4559_v57, %v10612_v10  ;;  %v10735_v8 = vadd.f32 %v4560_v16, %v10615_v5  ;;  %v10738_v13 = vadd.f32 %v4561_v31, %v10618_v39  ;;  %v10741_v42 = vadd.f32 %v4562_v61, %v10621_v25  ;;  %v15376_v57 = vld [vmem:[#allocation197_spill] sm:$0xff]  ;;  %v15380_v61 = vld [vmem:[#allocation238_spill] sm:$0xff] }
 0x5f2   : > { %15366 = vst [vmem:[#allocation22_spill] sm:$0xff] %v10726_v49  ;;  %15367 = vst [vmem:[#allocation24_spill] sm:$0xff] %v10729_v43  ;;  %v10744_v41 = vadd.f32 %v4563_v22, %v10624_v26  ;;  %v10747_v1 = vadd.f32 %v4564_v46, %v10627_v36  ;;  %v10751_v50 = vmul.f32 %v10686_v7, %v15374_v20  ;;  %v15378_v5 = vld [vmem:[#allocation237_spill] sm:$0xff]  ;;  %v15382_v22 = vld [vmem:[#allocation239_spill] sm:$0xff] }
 0x5f3   : > { %15368 = vst [vmem:[#allocation45_spill] sm:$0xff] %v10732_v45  ;;  %15369 = vst [vmem:[#allocation47_spill] sm:$0xff] %v10735_v8  ;;  %v10755_v16 = vmul.f32 %v10689_v44, %v15376_v57  ;;  %v10759_v31 = vmul.f32 %v10692_v52, %v15378_v5  ;;  %v10763_v25 = vmul.f32 %v10695_v60, %v15380_v61  ;;  %v15384_v36 = vld [vmem:[#allocation240_spill] sm:$0xff]  ;;  %v15386_v7 = vld [vmem:[#allocation241_spill] sm:$0xff] }
 0x5f4   : > { %15370 = vst [vmem:[#allocation46_spill] sm:$0xff] %v10738_v13  ;;  %15371 = vst [vmem:[#allocation48_spill] sm:$0xff] %v10741_v42  ;;  %v10767_v46 = vmul.f32 %v10698_v51, %v15382_v22  ;;  %v10771_v20 = vmul.f32 %v10701_v2, %v15384_v36  ;;  %v10775_v57 = vmul.f32 %v10704_v54, %v15386_v7  ;;  %v15388_v44 = vld [vmem:[#allocation242_spill] sm:$0xff]  ;;  %v4885_v52 = vmul.f32 0.0, %v10751_v50 }
 0x5f5   : > { %15372 = vst [vmem:[#allocation221_spill] sm:$0xff] %v10744_v41  ;;  %15373 = vst [vmem:[#allocation198_spill] sm:$0xff] %v10747_v1  ;;  %v10779_v5 = vmul.f32 %v10707_v32, %v15388_v44  ;;  %v4886_v61 = vmul.f32 0.0, %v10755_v16  ;;  %v4887_v60 = vmul.f32 0.0, %v10759_v31  ;;  %v4888_v22 = vmul.f32 0.0, %v10763_v25  ;;  %v15400_v39 = vld [vmem:[#allocation70_spill] sm:$0xff] }
 0x5f6   : > { %15375 = vst [vmem:[#allocation222_spill] sm:$0xff] %v10751_v50  ;;  %15377 = vst [vmem:[#allocation199_spill] sm:$0xff] %v10755_v16  ;;  %v4889_v51 = vmul.f32 0.0, %v10767_v46  ;;  %v4890_v36 = vmul.f32 0.0, %v10771_v20  ;;  %v4891_v2 = vmul.f32 0.0, %v10775_v57  ;;  %v10790_v54 = vadd.f32 %v4885_v52, %v10726_v49  ;;  %v15398_v49 = vld [vmem:[#allocation69_spill] sm:$0xff] }
 0x5f7   : > { %15379 = vst [vmem:[#allocation139_spill] sm:$0xff] %v10759_v31  ;;  %15381 = vst [vmem:[#allocation44_spill] sm:$0xff] %v10763_v25  ;;  %v4892_v7 = vmul.f32 0.0, %v10779_v5  ;;  %v10793_v44 = vadd.f32 %v4886_v61, %v10729_v43  ;;  %v10796_v16 = vadd.f32 %v4887_v60, %v10732_v45  ;;  %v10799_v31 = vadd.f32 %v4888_v22, %v10735_v8 }
 0x5f8   : > { %15383 = vst [vmem:[#allocation193_spill] sm:$0xff] %v10767_v46  ;;  %15385 = vst [vmem:[#allocation194_spill] sm:$0xff] %v10771_v20  ;;  %v10802_v46 = vadd.f32 %v4889_v51, %v10738_v13  ;;  %v10805_v20 = vadd.f32 %v4890_v36, %v10741_v42  ;;  %v5277_v25 = vadd.f32 %v10790_v54, %v4885_v52 }
 0x5f9   : > { %15387 = vst [vmem:[#allocation195_spill] sm:$0xff] %v10775_v57  ;;  %15389 = vst [vmem:[#allocation259_spill] sm:$0xff] %v10779_v5  ;;  %v10808_v5 = vadd.f32 %v4891_v2, %v10744_v41  ;;  %v10811_v57 = vadd.f32 %v4892_v7, %v10747_v1  ;;  %v5278_v50 = vadd.f32 %v10793_v44, %v4886_v61  ;;  %v15399_v1 = vld [vmem:[#allocation71_spill] sm:$0xff] }
 0x5fa   : > { %15390 = vst [vmem:[#allocation260_spill] sm:$0xff] %v10790_v54  ;;  %15391 = vst [vmem:[#allocation261_spill] sm:$0xff] %v10793_v44  ;;  %v5279_v45 = vadd.f32 %v10796_v16, %v4887_v60  ;;  %v5280_v8 = vadd.f32 %v10799_v31, %v4888_v22  ;;  %v5281_v13 = vadd.f32 %v10802_v46, %v4889_v51  ;;  %v15401_v54 = vld [vmem:[#allocation72_spill] sm:$0xff]  ;;  %v15402_v44 = vld [vmem:[#allocation101_spill] sm:$0xff] }
 0x5fb   : > { %15392 = vst [vmem:[#allocation262_spill] sm:$0xff] %v10796_v16  ;;  %15393 = vst [vmem:[#allocation263_spill] sm:$0xff] %v10799_v31  ;;  %v5282_v43 = vadd.f32 %v10805_v20, %v4890_v36  ;;  %v5283_v42 = vadd.f32 %v10808_v5, %v4891_v2  ;;  %v5284_v41 = vadd.f32 %v10811_v57, %v4892_v7  ;;  %v15403_v16 = vld [vmem:[#allocation103_spill] sm:$0xff]  ;;  %v15404_v31 = vld [vmem:[#allocation102_spill] sm:$0xff] }
 0x5fc   : > { %15394 = vst [vmem:[#allocation264_spill] sm:$0xff] %v10802_v46  ;;  %15395 = vst [vmem:[#allocation265_spill] sm:$0xff] %v10805_v20  ;;  %v5341_v32 = vmul.f32 %v5277_v25, %v15398_v49  ;;  %v5342_v26 = vmul.f32 %v5278_v50, %v15399_v1  ;;  %v5343_v52 = vmul.f32 %v5279_v45, %v15400_v39  ;;  %v15405_v46 = vld [vmem:[#allocation104_spill] sm:$0xff]  ;;  %v15406_v20 = vld [vmem:[#allocation201_spill] sm:$0xff] }
 0x5fd   : > { %15396 = vst [vmem:[#allocation266_spill] sm:$0xff] %v10808_v5  ;;  %15397 = vst [vmem:[#allocation267_spill] sm:$0xff] %v10811_v57  ;;  %v5344_v61 = vmul.f32 %v5280_v8, %v15401_v54  ;;  %v5345_v60 = vmul.f32 %v5281_v13, %v15402_v44  ;;  %v5346_v22 = vmul.f32 %v5282_v43, %v15403_v16  ;;  %v14307_v2 = vrot.slane %v15406_v20, 7  ;;  %v15407_v5 = vld [vmem:[#allocation202_spill] sm:$0xff]  ;;  %v15408_v57 = vld [vmem:[#allocation203_spill] sm:$0xff] }
 0x5fe   : > { %v5347_v51 = vmul.f32 %v5283_v42, %v15404_v31  ;;  %v5348_v36 = vmul.f32 %v5284_v41, %v15405_v46  ;;  %v14313_v25 = vrot.slane %v15408_v57, 7  ;;  %v15409_v39 = vld [vmem:[#allocation204_spill] sm:$0xff]  ;;  %v15410_v8 = vld [vmem:[#allocation205_spill] sm:$0xff] }
 0x5ff   : > { %v5401_v49 = vadd.f32 %v5345_v60, %v5341_v32  ;;  %v5402_v50 = vadd.f32 %v5346_v22, %v5342_v26  ;;  %v14312_v45 = vrot.slane %v15409_v39, 7  ;;  %v14308_v44 = vrot.slane %v15410_v8, 7  ;;  %v15411_v13 = vld [vmem:[#allocation209_spill] sm:$0xff]  ;;  %v15413_v41 = vld [vmem:[#allocation216_spill] sm:$0xff] }
 0x600   : > { %v5403_v1 = vadd.f32 %v5347_v51, %v5343_v52  ;;  %v5404_v54 = vadd.f32 %v5348_v36, %v5344_v61  ;;  %v14311_v43 = vrot.slane %v15411_v13, 7  ;;  %v15412_v16 = vld [vmem:[#allocation213_spill] sm:$0xff]  ;;  %v14310_v46 = vrot.slane %v15413_v41, 7  ;;  %v15414_v7 = vld [vmem:[#allocation148_spill] sm:$0xff]  ;;  %v15419_v51 = vld [vmem:[#allocation150_spill] sm:$0xff] }
 0x601   : > { %v14309_v42 = vrot.slane %v15412_v16, 7  ;;  %v15415_v10 = vrot.slane %v15414_v7, 7  ;;  %v15416_v32 = vrot.slane %v15407_v5, 7  ;;  %v15417_v52 = vld [vmem:[#allocation149_spill] sm:$0xff]  ;;  %v15420_v36 = vrot.slane %v15419_v51, 7  ;;  %v15421_v7 = vld [vmem:[#allocation151_spill] sm:$0xff] }
 0x602   : > { %v5431_v31 = vadd.f32 %v5403_v1, %v5401_v49  ;;  %v15418_v61 = vrot.slane %v15417_v52, 7  ;;  %v5432_v22 = vadd.f32 %v5404_v54, %v5402_v50  ;;  %v15422_v1 = vrot.slane %v15421_v7, 7  ;;  %v15423_v52 = vld [vmem:[#allocation152_spill] sm:$0xff]  ;;  %v15425_v54 = vld [vmem:[#allocation153_spill] sm:$0xff]  ;;  %v15427_v51 = vld [vmem:[#allocation154_spill] sm:$0xff] }
 0x603   : > { %v3173_v26 = vsel %vm995_vm7, %v15415_v10, %v14307_v2  ;;  %v3175_v49 = vsel %vm995_vm7, %v15420_v36, %v14313_v25  ;;  %v15424_v2 = vrot.slane %v15423_v52, 7  ;;  %v15428_v36 = vrot.slane %v15427_v51, 7  ;;  %v15441_v25 = vld [vmem:[#allocation224_spill] sm:$0xff] }
 0x604   : > { %v3174_v60 = vsel %vm995_vm7, %v15418_v61, %v15416_v32  ;;  %v3176_v10 = vsel %vm995_vm7, %v15422_v1, %v14312_v45  ;;  %v15426_v32 = vrot.slane %v15425_v54, 7  ;;  %v15429_v1 = vld [vmem:[#allocation155_spill] sm:$0xff]  ;;  %v10888_v54 = vadd.f32 %v5432_v22, %v5431_v31 }
 0x605   : > { %v3177_v50 = vsel %vm995_vm7, %v15424_v2, %v14308_v44  ;;  %v3179_v7 = vsel %vm995_vm7, %v15428_v36, %v14309_v42  ;;  %v15430_v52 = vrot.slane %v15429_v1, 7  ;;  %v10886_v44 = vmul.f32 %v15406_v20, %v3173_v26 }
 0x606   : > { %v3178_v61 = vsel %vm995_vm7, %v15426_v32, %v14311_v43  ;;  %15431 = vst [vmem:[#allocation69_spill] sm:$0xff] %v10888_v54  ;;  %v10891_v32 = vmul.f32 %v15407_v5, %v3174_v60  ;;  %v10894_v51 = vmul.f32 %v15408_v57, %v3175_v49  ;;  %v10897_v36 = vmul.f32 %v15409_v39, %v3176_v10  ;;  %v15432_v60 = vld [vmem:[#allocation50_spill] sm:$0xff] }
 0x607   : > { %v3180_v2 = vsel %vm995_vm7, %v15430_v52, %v14310_v46  ;;  %v10900_v42 = vmul.f32 %v15410_v8, %v3177_v50  ;;  %v10903_v1 = vmul.f32 %v15411_v13, %v3178_v61  ;;  %v10906_v26 = vmul.f32 %v15412_v16, %v3179_v7  ;;  %5463 = vrot.lane.b32.xlu1 %v10888_v54, %s7068_s25  ;;  %v15435_v50 = vld [vmem:[#allocation52_spill] sm:$0xff]  ;;  %v15438_v46 = vld [vmem:[#allocation223_spill] sm:$0xff] }
 0x608   : > { %v10909_v31 = vmul.f32 %v15413_v41, %v3180_v2  ;;  %v15433_v22 = vrot.slane %v15432_v60, 6  ;;  %v15434_v49 = vrot.slane %v15287_v14, 6  ;;  %v15436_v52 = vrot.slane %v15435_v50, 6 }
 0x609   : > { %v15437_v61 = vrot.slane %v15290_v40, 6  ;;  %v15439_v2 = vrot.slane %v15438_v46, 6  ;;  %v15440_v43 = vrot.slane %v15293_v55, 6  ;;  %v15442_v54 = vrot.slane %v15441_v25, 6 }
 0x60a   : > { %v3429_v10 = vsel %vm941_vm6, %v15434_v49, %v15433_v22  ;;  %v15443_v14 = vrot.slane %v15296_v23, 6  ;;  %v15444_v49 = vld [vmem:[#allocation225_spill] sm:$0xff]  ;;  %v15446_v40 = vrot.slane %v15299_v56, 6  ;;  %v15449_v55 = vrot.slane %v15302_v59, 6 }
 0x60b   : > { %v3430_v7 = vsel %vm941_vm6, %v15437_v61, %v15436_v52  ;;  %v3431_v45 = vsel %vm941_vm6, %v15440_v43, %v15439_v2  ;;  %v15445_v41 = vrot.slane %v15444_v49, 6  ;;  %v15447_v61 = vld [vmem:[#allocation226_spill] sm:$0xff]  ;;  %v15450_v2 = vld [vmem:[#allocation227_spill] sm:$0xff]  ;;  %v15452_v23 = vrot.slane %v15305_v9, 6 }
 0x60c   : > { %v3432_v22 = vsel %vm941_vm6, %v15443_v14, %v15442_v54  ;;  %v15448_v16 = vrot.slane %v15447_v61, 6  ;;  %v15451_v13 = vrot.slane %v15450_v2, 6  ;;  %v15453_v14 = vld [vmem:[#allocation228_spill] sm:$0xff]  ;;  %v15455_v56 = vrot.slane %v15309_v34, 6 }
 0x60d   : > { %v3433_v52 = vsel %vm941_vm6, %v15446_v40, %v15445_v41  ;;  %v15454_v8 = vrot.slane %v15453_v14, 6  ;;  %v3533_v40 = vmul.f32 %v3429_v10, %v10886_v44  ;;  %v3534_v59 = vmul.f32 %v3430_v7, %v10891_v32  ;;  %v15456_v34 = vld [vmem:[#allocation140_spill] sm:$0xff] }
 0x60e   : > { %v3434_v43 = vsel %vm941_vm6, %v15449_v55, %v15448_v16  ;;  %v3435_v54 = vsel %vm941_vm6, %v15452_v23, %v15451_v13  ;;  %v3535_v16 = vmul.f32 %v3431_v45, %v10894_v51  ;;  %v3536_v55 = vmul.f32 %v3432_v22, %v10897_v36  ;;  %5579 = vrot.lane.b32.xlu1 %v15456_v34, %s7068_s25 }
 0x60f   : > { %v3436_v41 = vsel %vm941_vm6, %v15455_v56, %v15454_v8  ;;  %v3537_v9 = vmul.f32 %v3433_v52, %v10900_v42  ;;  %v3538_v39 = vmul.f32 %v3434_v43, %v10903_v1  ;;  %v3539_v13 = vmul.f32 %v3435_v54, %v10906_v26 }
 0x610   : > { %v3540_v23 = vmul.f32 %v3436_v41, %v10909_v31  ;;  %v10972_v8 = vadd.f32 %v3533_v40, %v15432_v60  ;;  %v10975_v10 = vadd.f32 %v3534_v59, %v15435_v50  ;;  %v10978_v45 = vadd.f32 %v3535_v16, %v15438_v46 }
 0x611   : > { %v10981_v7 = vadd.f32 %v3536_v55, %v15441_v25  ;;  %v10984_v22 = vadd.f32 %v3537_v9, %v15444_v49  ;;  %v10987_v52 = vadd.f32 %v3538_v39, %v15447_v61  ;;  %v10990_v43 = vadd.f32 %v3539_v13, %v15450_v2 }
 0x612   : > { %v10993_v54 = vadd.f32 %v3540_v23, %v15453_v14  ;;  %v14320_v56 = vrot.slane %v10886_v44, 6  ;;  %v14324_v41 = vrot.slane %v10891_v32, 6  ;;  %v14321_v40 = vrot.slane %v10894_v51, 6 }
 0x613   : > { %v14322_v59 = vrot.slane %v10897_v36, 6  ;;  %v14323_v55 = vrot.slane %v10903_v1, 6  ;;  %v15457_v13 = vrot.slane %v10354_v38, 6  ;;  %v15458_v34 = vrot.slane %v10357_v24, 6 }
 0x614   : > { %v15459_v39 = vrot.slane %v10360_v3, 6  ;;  %v15460_v38 = vrot.slane %v10363_v27, 6  ;;  %v15462_v24 = vrot.slane %v10366_v35, 6  ;;  %v15463_v3 = vrot.slane %v10369_v28, 6 }
 0x615   : > { %v3749_v23 = vsel %vm941_vm6, %v15457_v13, %v14320_v56  ;;  %v3750_v16 = vsel %vm941_vm6, %v15458_v34, %v14324_v41  ;;  %v15461_v56 = vrot.slane %v10900_v42, 6  ;;  %v15465_v27 = vrot.slane %v10372_v12, 6 }
 0x616   : > { %v3751_v9 = vsel %vm941_vm6, %v15459_v39, %v14321_v40  ;;  %v3752_v13 = vsel %vm941_vm6, %v15460_v38, %v14322_v59  ;;  %v3754_v39 = vsel %vm941_vm6, %v15463_v3, %v14323_v55  ;;  %v15464_v40 = vrot.slane %v10906_v26, 6 }
 0x617   : > { %v3753_v34 = vsel %vm941_vm6, %v15462_v24, %v15461_v56  ;;  %v15466_v59 = vrot.slane %v10909_v31, 6  ;;  %v15467_v35 = vrot.slane %v10377_v18, 6  ;;  %v11052_v24 = vmul.f32 %v3749_v23, %v10886_v44 }
 0x618   : > { %v3755_v38 = vsel %vm941_vm6, %v15465_v27, %v15464_v40  ;;  %v11055_v28 = vmul.f32 %v3750_v16, %v10891_v32  ;;  %v11058_v3 = vmul.f32 %v3751_v9, %v10894_v51  ;;  %v11061_v12 = vmul.f32 %v3752_v13, %v10897_v36 }
 0x619   : > { %v3756_v56 = vsel %vm941_vm6, %v15467_v35, %v15466_v59  ;;  %15468 = vst [vmem:[#allocation71_spill] sm:$0xff] %v11052_v24  ;;  %v11064_v40 = vmul.f32 %v3753_v34, %v10900_v42  ;;  %v11067_v18 = vmul.f32 %v3754_v39, %v10903_v1  ;;  %v11070_v59 = vmul.f32 %v3755_v38, %v10906_v26 }
 0x61a   : > { %15469 = vst [vmem:[#allocation70_spill] sm:$0xff] %v11055_v28  ;;  %15470 = vst [vmem:[#allocation72_spill] sm:$0xff] %v11058_v3  ;;  %v11073_v23 = vmul.f32 %v3756_v56, %v10909_v31  ;;  %v14325_v16 = vrot.slane %v10972_v8, 4  ;;  %v14329_v9 = vrot.slane %v10975_v10, 4  ;;  %v14326_v27 = vrot.slane %v10978_v45, 4 }
 0x61b   : > { %15471 = vst [vmem:[#allocation101_spill] sm:$0xff] %v11061_v12  ;;  %15472 = vst [vmem:[#allocation103_spill] sm:$0xff] %v11064_v40  ;;  %v14327_v13 = vrot.slane %v10981_v7, 4  ;;  %v14328_v35 = vrot.slane %v10987_v52, 4  ;;  %v15476_v56 = vrot.slane %v10436_v19, 4  ;;  %v15477_v41 = vrot.slane %v10439_v15, 4 }
 0x61c   : > { %15473 = vst [vmem:[#allocation102_spill] sm:$0xff] %v11067_v18  ;;  %15474 = vst [vmem:[#allocation104_spill] sm:$0xff] %v11070_v59  ;;  %v15478_v39 = vrot.slane %v10442_v33, 4  ;;  %v15479_v19 = vrot.slane %v10447_v63, 4  ;;  %v15481_v15 = vrot.slane %v10450_v62, 4  ;;  %v15482_v33 = vrot.slane %v10453_v30, 4 }
 0x61d   : > { %15475 = vst [vmem:[#allocation201_spill] sm:$0xff] %v11073_v23  ;;  %v4005_v55 = vsel %vm833_vm4, %v15476_v56, %v14325_v16  ;;  %v4006_v34 = vsel %vm833_vm4, %v15477_v41, %v14329_v9  ;;  %v15480_v16 = vrot.slane %v10984_v22, 4  ;;  %v15484_v63 = vrot.slane %v10456_v47, 4 }
 0x61e   : > { %v4007_v38 = vsel %vm833_vm4, %v15478_v39, %v14326_v27  ;;  %v4008_v56 = vsel %vm833_vm4, %v15479_v19, %v14327_v13  ;;  %v4010_v39 = vsel %vm833_vm4, %v15482_v33, %v14328_v35  ;;  %v15483_v27 = vrot.slane %v10990_v43, 4 }
 0x61f   : > { %v4009_v41 = vsel %vm833_vm4, %v15481_v15, %v15480_v16  ;;  %v15485_v13 = vrot.slane %v10993_v54, 4  ;;  %v15486_v62 = vrot.slane %v10459_v17, 4  ;;  %v4109_v15 = vmul.f32 %v4005_v55, %v11052_v24 }
 0x620   : > { %v4011_v19 = vsel %vm833_vm4, %v15484_v63, %v15483_v27  ;;  %v4110_v30 = vmul.f32 %v4006_v34, %v11055_v28  ;;  %v4111_v33 = vmul.f32 %v4007_v38, %v11058_v3  ;;  %v4112_v35 = vmul.f32 %v4008_v56, %v11061_v12 }
 0x621   : > { %v4012_v16 = vsel %vm833_vm4, %v15486_v62, %v15485_v13  ;;  %v4113_v47 = vmul.f32 %v4009_v41, %v11064_v40  ;;  %v4114_v9 = vmul.f32 %v4010_v39, %v11067_v18  ;;  %v4115_v27 = vmul.f32 %v4011_v19, %v11070_v59 }
 0x622   : > { %v4116_v63 = vmul.f32 %v4012_v16, %v11073_v23  ;;  %v11140_v17 = vadd.f32 %v4109_v15, %v10972_v8  ;;  %v11143_v13 = vadd.f32 %v4110_v30, %v10975_v10  ;;  %v11146_v55 = vadd.f32 %v4111_v33, %v10978_v45 }
 0x623   : > { %v11149_v34 = vadd.f32 %v4112_v35, %v10981_v7  ;;  %v11152_v38 = vadd.f32 %v4113_v47, %v10984_v22  ;;  %v11155_v56 = vadd.f32 %v4114_v9, %v10987_v52  ;;  %v11158_v41 = vadd.f32 %v4115_v27, %v10990_v43 }
 0x624   : > { %15487 = vst [vmem:[#allocation202_spill] sm:$0xff] %v11140_v17  ;;  %15488 = vst [vmem:[#allocation203_spill] sm:$0xff] %v11143_v13  ;;  %v11161_v39 = vadd.f32 %v4116_v63, %v10993_v54  ;;  %v14330_v19 = vrot.slane %v11052_v24, 4  ;;  %v14334_v62 = vrot.slane %v11055_v28, 4  ;;  %v14331_v16 = vrot.slane %v11058_v3, 4 }
 0x625   : > { %15489 = vst [vmem:[#allocation148_spill] sm:$0xff] %v11146_v55  ;;  %15490 = vst [vmem:[#allocation149_spill] sm:$0xff] %v11149_v34  ;;  %v14332_v35 = vrot.slane %v11061_v12, 4  ;;  %v14333_v30 = vrot.slane %v11067_v18, 4  ;;  %v15495_v47 = vrot.slane %v10518_v58, 4  ;;  %v15496_v63 = vrot.slane %v10521_v48, 4 }
 0x626   : > { %15491 = vst [vmem:[#allocation150_spill] sm:$0xff] %v11152_v38  ;;  %15492 = vst [vmem:[#allocation151_spill] sm:$0xff] %v11155_v56  ;;  %v15497_v9 = vrot.slane %v10524_v4, 4  ;;  %v15498_v58 = vrot.slane %v10527_v11, 4  ;;  %v15500_v48 = vrot.slane %v10530_v6, 4  ;;  %v15501_v4 = vrot.slane %v10533_v0, 4 }
 0x627   : > { %15493 = vst [vmem:[#allocation152_spill] sm:$0xff] %v11158_v41  ;;  %15494 = vst [vmem:[#allocation153_spill] sm:$0xff] %v11161_v39  ;;  %v4325_v27 = vsel %vm833_vm4, %v15495_v47, %v14330_v19  ;;  %v4326_v15 = vsel %vm833_vm4, %v15496_v63, %v14334_v62  ;;  %v15499_v19 = vrot.slane %v11064_v40, 4  ;;  %v15503_v11 = vrot.slane %v10536_v53, 4 }
 0x628   : > { %v4327_v33 = vsel %vm833_vm4, %v15497_v9, %v14331_v16  ;;  %v4328_v47 = vsel %vm833_vm4, %v15498_v58, %v14332_v35  ;;  %v4330_v9 = vsel %vm833_vm4, %v15501_v4, %v14333_v30  ;;  %v15502_v16 = vrot.slane %v11070_v59, 4 }
 0x629   : > { %v4329_v63 = vsel %vm833_vm4, %v15500_v48, %v15499_v19  ;;  %v15504_v35 = vrot.slane %v11073_v23, 4  ;;  %v15505_v6 = vrot.slane %v10539_v37, 4  ;;  %v11220_v48 = vmul.f32 %v4325_v27, %v11052_v24  ;;  %v15593_v24 = vld [vmem:[#allocation132_spill] sm:$0xff] }
 0x62a   : > { %v4331_v58 = vsel %vm833_vm4, %v15503_v11, %v15502_v16  ;;  %v11223_v0 = vmul.f32 %v4326_v15, %v11055_v28  ;;  %v11226_v4 = vmul.f32 %v4327_v33, %v11058_v3  ;;  %v11229_v53 = vmul.f32 %v4328_v47, %v11061_v12  ;;  %v15514_v33 = vld [vmem:[#allocation67_spill] sm:$0xff]  ;;  %v15515_v47 = vld [vmem:[#allocation66_spill] sm:$0xff] }
 0x62b   : > { %v4332_v19 = vsel %vm833_vm4, %v15505_v6, %v15504_v35  ;;  %15506 = vst [vmem:[#allocation154_spill] sm:$0xff] %v11220_v48  ;;  %v11232_v16 = vmul.f32 %v4329_v63, %v11064_v40  ;;  %v11235_v37 = vmul.f32 %v4330_v9, %v11067_v18  ;;  %v11238_v35 = vmul.f32 %v4331_v58, %v11070_v59  ;;  %v15516_v63 = vld [vmem:[#allocation68_spill] sm:$0xff]  ;;  %v15517_v9 = vld [vmem:[#allocation97_spill] sm:$0xff]  ;;  %v15518_v58 = vld [vmem:[#allocation99_spill] sm:$0xff] }
 0x62c   : > { %15507 = vst [vmem:[#allocation155_spill] sm:$0xff] %v11223_v0  ;;  %15508 = vst [vmem:[#allocation50_spill] sm:$0xff] %v11226_v4  ;;  %v11241_v27 = vmul.f32 %v4332_v19, %v11073_v23  ;;  %v4565_v15 = vmul.f32 %v11220_v48, %v10606_v21  ;;  %v4566_v11 = vmul.f32 %v11223_v0, %v15514_v33  ;;  %v15519_v19 = vld [vmem:[#allocation98_spill] sm:$0xff]  ;;  %v15520_v18 = vld [vmem:[#allocation100_spill] sm:$0xff] }
 0x62d   : > { %15509 = vst [vmem:[#allocation52_spill] sm:$0xff] %v11229_v53  ;;  %15510 = vst [vmem:[#allocation223_spill] sm:$0xff] %v11232_v16  ;;  %v4567_v6 = vmul.f32 %v11226_v4, %v15515_v47  ;;  %v4568_v30 = vmul.f32 %v11229_v53, %v15516_v63  ;;  %v4569_v62 = vmul.f32 %v11232_v16, %v15517_v9 }
 0x62e   : > { %15511 = vst [vmem:[#allocation224_spill] sm:$0xff] %v11235_v37  ;;  %15512 = vst [vmem:[#allocation225_spill] sm:$0xff] %v11238_v35  ;;  %v4570_v59 = vmul.f32 %v11235_v37, %v15518_v58  ;;  %v4571_v23 = vmul.f32 %v11238_v35, %v15519_v19  ;;  %v4572_v21 = vmul.f32 %v11241_v27, %v15520_v18 }
 0x62f   : > { %15513 = vst [vmem:[#allocation226_spill] sm:$0xff] %v11241_v27  ;;  %v11260_v33 = vadd.f32 %v4565_v15, %v11140_v17  ;;  %v11263_v47 = vadd.f32 %v4566_v11, %v11143_v13  ;;  %v11266_v63 = vadd.f32 %v4567_v6, %v11146_v55  ;;  %v11269_v9 = vadd.f32 %v4568_v30, %v11149_v34  ;;  %v15529_v11 = vld [vmem:[#allocation156_spill] sm:$0xff]  ;;  %v15531_v6 = vld [vmem:[#allocation157_spill] sm:$0xff]  ;;  %v15533_v34 = vld [vmem:[#allocation158_spill] sm:$0xff] }
 0x630   : > { %v11272_v58 = vadd.f32 %v4569_v62, %v11152_v38  ;;  %v11275_v19 = vadd.f32 %v4570_v59, %v11155_v56  ;;  %v11278_v18 = vadd.f32 %v4571_v23, %v11158_v41  ;;  %v11281_v15 = vadd.f32 %v4572_v21, %v11161_v39  ;;  %v15535_v59 = vld [vmem:[#allocation159_spill] sm:$0xff]  ;;  %v15537_v23 = vld [vmem:[#allocation160_spill] sm:$0xff]  ;;  %v15539_v39 = vld [vmem:[#allocation161_spill] sm:$0xff] }
 0x631   : > { %15521 = vst [vmem:[#allocation227_spill] sm:$0xff] %v11260_v33  ;;  %15522 = vst [vmem:[#allocation228_spill] sm:$0xff] %v11263_v47  ;;  %v11285_v13 = vmul.f32 %v11220_v48, %v15529_v11  ;;  %v11289_v30 = vmul.f32 %v11223_v0, %v15531_v6  ;;  %v11293_v62 = vmul.f32 %v11226_v4, %v15533_v34  ;;  %v15541_v48 = vld [vmem:[#allocation162_spill] sm:$0xff]  ;;  %v15543_v0 = vld [vmem:[#allocation163_spill] sm:$0xff] }
 0x632   : > { %15523 = vst [vmem:[#allocation140_spill] sm:$0xff] %v11266_v63  ;;  %15524 = vst [vmem:[#allocation67_spill] sm:$0xff] %v11269_v9  ;;  %v11297_v56 = vmul.f32 %v11229_v53, %v15535_v59  ;;  %v11301_v21 = vmul.f32 %v11232_v16, %v15537_v23  ;;  %v11305_v11 = vmul.f32 %v11235_v37, %v15539_v39  ;;  %v15545_v4 = vld [vmem:[#allocation243_spill] sm:$0xff]  ;;  %v15546_v53 = vld [vmem:[#allocation244_spill] sm:$0xff] }
 0x633   : > { %15525 = vst [vmem:[#allocation66_spill] sm:$0xff] %v11272_v58  ;;  %15526 = vst [vmem:[#allocation68_spill] sm:$0xff] %v11275_v19  ;;  %v11309_v6 = vmul.f32 %v11238_v35, %v15541_v48  ;;  %v11313_v34 = vmul.f32 %v11241_v27, %v15543_v0  ;;  %v4893_v59 = vmul.f32 %v11285_v13, %v15545_v4  ;;  %v15547_v23 = vld [vmem:[#allocation245_spill] sm:$0xff]  ;;  %v15548_v38 = vld [vmem:[#allocation246_spill] sm:$0xff] }
 0x634   : > { %15527 = vst [vmem:[#allocation97_spill] sm:$0xff] %v11278_v18  ;;  %15528 = vst [vmem:[#allocation99_spill] sm:$0xff] %v11281_v15  ;;  %v4894_v41 = vmul.f32 %v11289_v30, %v15546_v53  ;;  %v4895_v16 = vmul.f32 %v11293_v62, %v15547_v23  ;;  %v4896_v39 = vmul.f32 %v11297_v56, %v15548_v38  ;;  %v15549_v37 = vld [vmem:[#allocation247_spill] sm:$0xff]  ;;  %v15550_v35 = vld [vmem:[#allocation248_spill] sm:$0xff] }
 0x635   : > { %15530 = vst [vmem:[#allocation98_spill] sm:$0xff] %v11285_v13  ;;  %15532 = vst [vmem:[#allocation100_spill] sm:$0xff] %v11289_v30  ;;  %v4897_v48 = vmul.f32 %v11301_v21, %v15549_v37  ;;  %v4898_v55 = vmul.f32 %v11305_v11, %v15550_v35  ;;  %v15551_v0 = vld [vmem:[#allocation249_spill] sm:$0xff]  ;;  %v15552_v17 = vld [vmem:[#allocation250_spill] sm:$0xff]  ;;  %v11332_v53 = vadd.f32 %v4893_v59, %v11260_v33 }
 0x636   : > { %15534 = vst [vmem:[#allocation156_spill] sm:$0xff] %v11293_v62  ;;  %15536 = vst [vmem:[#allocation157_spill] sm:$0xff] %v11297_v56  ;;  %v4899_v27 = vmul.f32 %v11309_v6, %v15551_v0  ;;  %v4900_v4 = vmul.f32 %v11313_v34, %v15552_v17  ;;  %v11335_v23 = vadd.f32 %v4894_v41, %v11263_v47  ;;  %v15561_v41 = vld [vmem:[#allocation196_spill] sm:$0xff]  ;;  %v15568_v33 = vld [vmem:[#allocation242_spill] sm:$0xff] }
 0x637   : > { %15538 = vst [vmem:[#allocation158_spill] sm:$0xff] %v11301_v21  ;;  %15540 = vst [vmem:[#allocation159_spill] sm:$0xff] %v11305_v11  ;;  %v11338_v38 = vadd.f32 %v4895_v16, %v11266_v63  ;;  %v11341_v37 = vadd.f32 %v4896_v39, %v11269_v9  ;;  %v11344_v35 = vadd.f32 %v4897_v48, %v11272_v58  ;;  %v15562_v16 = vld [vmem:[#allocation197_spill] sm:$0xff]  ;;  %v15564_v48 = vld [vmem:[#allocation238_spill] sm:$0xff] }
 0x638   : > { %15542 = vst [vmem:[#allocation160_spill] sm:$0xff] %v11309_v6  ;;  %15544 = vst [vmem:[#allocation161_spill] sm:$0xff] %v11313_v34  ;;  %v11347_v0 = vadd.f32 %v4898_v55, %v11275_v19  ;;  %v11350_v17 = vadd.f32 %v4899_v27, %v11278_v18  ;;  %v11353_v59 = vadd.f32 %v4900_v4, %v11281_v15  ;;  %v15563_v39 = vld [vmem:[#allocation237_spill] sm:$0xff]  ;;  %v15565_v55 = vld [vmem:[#allocation239_spill] sm:$0xff] }
 0x639   : > { %15553 = vst [vmem:[#allocation162_spill] sm:$0xff] %v11332_v53  ;;  %15554 = vst [vmem:[#allocation163_spill] sm:$0xff] %v11335_v23  ;;  %v5085_v47 = vmul.f32 %v11285_v13, %v15561_v41  ;;  %v5086_v63 = vmul.f32 %v11289_v30, %v15562_v16  ;;  %v5087_v9 = vmul.f32 %v11293_v62, %v15563_v39  ;;  %v15566_v27 = vld [vmem:[#allocation240_spill] sm:$0xff]  ;;  %v15567_v4 = vld [vmem:[#allocation241_spill] sm:$0xff] }
 0x63a   : > { %15555 = vst [vmem:[#allocation243_spill] sm:$0xff] %v11338_v38  ;;  %15556 = vst [vmem:[#allocation244_spill] sm:$0xff] %v11341_v37  ;;  %v5088_v58 = vmul.f32 %v11297_v56, %v15564_v48  ;;  %v5089_v19 = vmul.f32 %v11301_v21, %v15565_v55  ;;  %v5090_v18 = vmul.f32 %v11305_v11, %v15566_v27  ;;  %v15592_v21 = vld [vmem:[#allocation200_spill] sm:$0xff] }
 0x63b   : > { %15557 = vst [vmem:[#allocation245_spill] sm:$0xff] %v11344_v35  ;;  %15558 = vst [vmem:[#allocation246_spill] sm:$0xff] %v11347_v0  ;;  %v5091_v15 = vmul.f32 %v11309_v6, %v15567_v4  ;;  %v5092_v41 = vmul.f32 %v11313_v34, %v15568_v33  ;;  %v5221_v13 = vmul.f32 0.0, %v5085_v47  ;;  %v5222_v16 = vmul.f32 0.0, %v5086_v63  ;;  %v15590_v34 = vld [vmem:[#allocation64_spill] sm:$0xff] }
 0x63c   : > { %15559 = vst [vmem:[#allocation247_spill] sm:$0xff] %v11350_v17  ;;  %15560 = vst [vmem:[#allocation248_spill] sm:$0xff] %v11353_v59  ;;  %v5223_v30 = vmul.f32 0.0, %v5087_v9  ;;  %v5224_v40 = vmul.f32 0.0, %v5088_v58  ;;  %v5225_v39 = vmul.f32 0.0, %v5089_v19  ;;  %v5226_v62 = vmul.f32 0.0, %v5090_v18 }
 0x63d   : > { %v5227_v12 = vmul.f32 0.0, %v5091_v15  ;;  %v5228_v48 = vmul.f32 0.0, %v5092_v41  ;;  %v5285_v56 = vadd.f32 %v5221_v13, %v11332_v53  ;;  %v5286_v55 = vadd.f32 %v5222_v16, %v11335_v23  ;;  %v15569_v9 = vld [vmem:[#allocation73_spill] sm:$0xff]  ;;  %v15570_v19 = vld [vmem:[#allocation75_spill] sm:$0xff]  ;;  %v15571_v15 = vld [vmem:[#allocation74_spill] sm:$0xff] }
 0x63e   : > { %v5287_v27 = vadd.f32 %v5223_v30, %v11338_v38  ;;  %v5288_v11 = vadd.f32 %v5224_v40, %v11341_v37  ;;  %v5289_v4 = vadd.f32 %v5225_v39, %v11344_v35  ;;  %v5290_v33 = vadd.f32 %v5226_v62, %v11347_v0  ;;  %v15572_v41 = vld [vmem:[#allocation76_spill] sm:$0xff]  ;;  %v15573_v23 = vld [vmem:[#allocation105_spill] sm:$0xff]  ;;  %v15574_v38 = vld [vmem:[#allocation107_spill] sm:$0xff] }
 0x63f   : > { %v5291_v47 = vadd.f32 %v5227_v12, %v11350_v17  ;;  %v5292_v63 = vadd.f32 %v5228_v48, %v11353_v59  ;;  %v5349_v58 = vmul.f32 %v5285_v56, %v15569_v9  ;;  %v5350_v18 = vmul.f32 %v5286_v55, %v15570_v19  ;;  %v15575_v37 = vld [vmem:[#allocation106_spill] sm:$0xff]  ;;  %v15576_v35 = vld [vmem:[#allocation108_spill] sm:$0xff]  ;;  %v15577_v0 = vld [vmem:[#allocation133_spill] sm:$0xff] }
 0x640   : > { %v5351_v13 = vmul.f32 %v5287_v27, %v15571_v15  ;;  %v5352_v16 = vmul.f32 %v5288_v11, %v15572_v41  ;;  %v5353_v30 = vmul.f32 %v5289_v4, %v15573_v23  ;;  %v5354_v40 = vmul.f32 %v5290_v33, %v15574_v38  ;;  %v15578_v12 = vld [vmem:[#allocation135_spill] sm:$0xff]  ;;  %v15579_v48 = vld [vmem:[#allocation134_spill] sm:$0xff]  ;;  %v15580_v59 = vld [vmem:[#allocation136_spill] sm:$0xff] }
 0x641   : > { %v5355_v39 = vmul.f32 %v5291_v47, %v15575_v37  ;;  %v5356_v62 = vmul.f32 %v5292_v63, %v15576_v35  ;;  %v2965_v17 = vmul.f32 %v15578_v12, %v15577_v0  ;;  %v2966_v56 = vmul.f32 %v15580_v59, %v15579_v48  ;;  %v15581_v9 = vld [vmem:[#allocation25_spill] sm:$0xff]  ;;  %v15582_v55 = vld [vmem:[#allocation142_spill] sm:$0xff]  ;;  %v15583_v27 = vld [vmem:[#allocation27_spill] sm:$0xff] }
 0x642   : > { %v2967_v19 = vmul.f32 %v15582_v55, %v15581_v9  ;;  %v15584_v15 = vld [vmem:[#allocation39_spill] sm:$0xff]  ;;  %v5405_v41 = vadd.f32 %v5353_v30, %v5349_v58  ;;  %v5406_v23 = vadd.f32 %v5354_v40, %v5350_v18  ;;  %v15585_v33 = vld [vmem:[#allocation26_spill] sm:$0xff]  ;;  %v15587_v35 = vld [vmem:[#allocation28_spill] sm:$0xff] }
 0x643   : > { %v2968_v11 = vmul.f32 %v15584_v15, %v15583_v27  ;;  %v5407_v4 = vadd.f32 %v5355_v39, %v5351_v13  ;;  %v5408_v38 = vadd.f32 %v5356_v62, %v5352_v16  ;;  %v15586_v37 = vld [vmem:[#allocation63_spill] sm:$0xff]  ;;  %v15588_v63 = vld [vmem:[#allocation62_spill] sm:$0xff]  ;;  %v15589_v0 = vld [vmem:[#allocation49_spill] sm:$0xff]  ;;  %v11404_v27 = vadd.f32 %v2965_v17, %v15593_v24 }
 0x644   : > { %v2969_v47 = vmul.f32 %v15586_v37, %v15585_v33  ;;  %v2970_v53 = vmul.f32 %v15588_v63, %v15587_v35  ;;  %v2971_v6 = vmul.f32 %v15590_v34, %v15589_v0  ;;  %v15591_v48 = vld [vmem:[#allocation51_spill] sm:$0xff]  ;;  %v15594_v58 = vld [vmem:[#allocation29_spill] sm:$0xff]  ;;  %v15596_v30 = vld [vmem:[#allocation30_spill] sm:$0xff] }
 0x645   : > { %v2972_v3 = vmul.f32 %v15592_v21, %v15591_v48  ;;  %v5433_v9 = vadd.f32 %v5407_v4, %v5405_v41  ;;  %v5434_v28 = vadd.f32 %v5408_v38, %v5406_v23  ;;  %v11407_v18 = vadd.f32 %v2966_v56, %v15594_v58  ;;  %v15595_v13 = vld [vmem:[#allocation31_spill] sm:$0xff]  ;;  %v15597_v39 = vld [vmem:[#allocation53_spill] sm:$0xff]  ;;  %v15600_v23 = vld [vmem:[#allocation54_spill] sm:$0xff] }
 0x646   : > { %v11410_v16 = vadd.f32 %v2967_v19, %v15595_v13  ;;  %v11413_v40 = vadd.f32 %v2968_v11, %v15596_v30  ;;  %v11416_v62 = vadd.f32 %v2969_v47, %v15597_v39  ;;  %v15598_v33 = vld [vmem:[#allocation55_spill] sm:$0xff]  ;;  %v11424_v24 = vadd.f32 %v2971_v6, %v15600_v23  ;;  %v15601_v17 = vld [vmem:[#allocation56_spill] sm:$0xff] }
 0x647   : > { %v11419_v35 = vadd.f32 %v2970_v53, %v15598_v33  ;;  %v11421_v41 = vadd.f32 %v5434_v28, %v5433_v9  ;;  %v11427_v56 = vadd.f32 %v2972_v3, %v15601_v17  ;;  %v14390_v19 = vrot.slane %v15578_v12, 7 }
 0x648   : > { %v14389_v4 = vrot.slane %v15580_v59, 7  ;;  %v14388_v11 = vrot.slane %v15582_v55, 7  ;;  %v14387_v38 = vrot.slane %v15584_v15, 7  ;;  %v14383_v47 = vrot.slane %v15586_v37, 7 }
 0x649   : > { %15599 = vst [vmem:[#allocation249_spill] sm:$0xff] %v11421_v41  ;;  %5465 = vrot.lane.b32.xlu0 %v11421_v41, %s7068_s25  ;;  %v14386_v28 = vrot.slane %v15588_v63, 7  ;;  %v14385_v6 = vrot.slane %v15590_v34, 7  ;;  %v14384_v3 = vrot.slane %v15592_v21, 7  ;;  %v15602_v53 = vrot.slane %v15406_v20, 7  ;;  %v15605_v20 = vld [vmem:[#allocation204_spill] sm:$0xff] }
 0x64a   : > { %v15603_v48 = vrot.slane %v15407_v5, 7  ;;  %v15604_v58 = vrot.slane %v15408_v57, 7  ;;  %v15606_v30 = vrot.slane %v15605_v20, 7  ;;  %v15607_v5 = vld [vmem:[#allocation205_spill] sm:$0xff] }
 0x64b   : > { %v3165_v0 = vsel %vm995_vm7, %v15602_v53, %v14390_v19  ;;  %v15608_v33 = vrot.slane %v15607_v5, 7  ;;  %v15609_v57 = vld [vmem:[#allocation209_spill] sm:$0xff] }
 0x64c   : > { %v3166_v9 = vsel %vm995_vm7, %v15603_v48, %v14389_v4  ;;  %v3167_v13 = vsel %vm995_vm7, %v15604_v58, %v14388_v11  ;;  %v3168_v39 = vsel %vm995_vm7, %v15606_v30, %v14387_v38  ;;  %v15610_v17 = vrot.slane %v15609_v57, 7  ;;  %v15611_v48 = vld [vmem:[#allocation213_spill] sm:$0xff]  ;;  %v15613_v30 = vld [vmem:[#allocation216_spill] sm:$0xff] }
 0x64d   : > { %v3169_v23 = vsel %vm995_vm7, %v15608_v33, %v14383_v47  ;;  %v15612_v58 = vrot.slane %v15611_v48, 7  ;;  %v15614_v5 = vrot.slane %v15613_v30, 7  ;;  %v11488_v47 = vmul.f32 %v15578_v12, %v3165_v0 }
 0x64e   : > { %v3170_v53 = vsel %vm995_vm7, %v15610_v17, %v14386_v28  ;;  %v11491_v57 = vmul.f32 %v15580_v59, %v3166_v9  ;;  %v11494_v17 = vmul.f32 %v15582_v55, %v3167_v13  ;;  %v11497_v48 = vmul.f32 %v15584_v15, %v3168_v39  ;;  %v15615_v13 = vld [vmem:[#allocation143_spill] sm:$0xff] }
 0x64f   : > { %v3171_v20 = vsel %vm995_vm7, %v15612_v58, %v14385_v6  ;;  %v3172_v33 = vsel %vm995_vm7, %v15614_v5, %v14384_v3  ;;  %v11500_v58 = vmul.f32 %v15586_v37, %v3169_v23  ;;  %v11503_v30 = vmul.f32 %v15588_v63, %v3170_v53  ;;  %5581 = vrot.lane.b32.xlu0 %v15615_v13, %s7068_s25 }
 0x650   : > { %v11506_v5 = vmul.f32 %v15590_v34, %v3171_v20  ;;  %v11509_v0 = vmul.f32 %v15592_v21, %v3172_v33  ;;  %v14398_v9 = vrot.slane %v11404_v27, 6  ;;  %v14397_v39 = vrot.slane %v11407_v18, 6 }
 0x651   : > { %v14396_v3 = vrot.slane %v11410_v16, 6  ;;  %v14393_v23 = vrot.slane %v11413_v40, 6  ;;  %v14391_v53 = vrot.slane %v11416_v62, 6  ;;  %v14392_v6 = vrot.slane %v11419_v35, 6 }
 0x652   : > { %v14394_v20 = vrot.slane %v11424_v24, 6  ;;  %v14395_v33 = vrot.slane %v11427_v56, 6  ;;  %v15616_v28 = vrot.slane %v15432_v60, 6  ;;  %v15617_v38 = vrot.slane %v15435_v50, 6 }
 0x653   : > { %v15618_v4 = vrot.slane %v15438_v46, 6  ;;  %v15619_v60 = vrot.slane %v15441_v25, 6  ;;  %v15620_v50 = vrot.slane %v15444_v49, 6  ;;  %v15621_v46 = vrot.slane %v15447_v61, 6 }
 0x654   : > { %v3421_v13 = vsel %vm941_vm6, %v15616_v28, %v14398_v9  ;;  %v3422_v11 = vsel %vm941_vm6, %v15617_v38, %v14397_v39  ;;  %v15622_v25 = vrot.slane %v15450_v2, 6  ;;  %v15623_v49 = vrot.slane %v15453_v14, 6 }
 0x655   : > { %v3423_v19 = vsel %vm941_vm6, %v15618_v4, %v14396_v3  ;;  %v3424_v28 = vsel %vm941_vm6, %v15619_v60, %v14393_v23  ;;  %v3425_v38 = vsel %vm941_vm6, %v15620_v50, %v14391_v53  ;;  %v3426_v4 = vsel %vm941_vm6, %v15621_v46, %v14392_v6 }
 0x656   : > { %v3427_v60 = vsel %vm941_vm6, %v15622_v25, %v14394_v20  ;;  %v3428_v50 = vsel %vm941_vm6, %v15623_v49, %v14395_v33  ;;  %v3541_v53 = vmul.f32 %v3421_v13, %v11488_v47  ;;  %v3542_v61 = vmul.f32 %v3422_v11, %v11491_v57 }
 0x657   : > { %v3543_v46 = vmul.f32 %v3423_v19, %v11494_v17  ;;  %v3544_v6 = vmul.f32 %v3424_v28, %v11497_v48  ;;  %v3545_v2 = vmul.f32 %v3425_v38, %v11500_v58  ;;  %v3546_v23 = vmul.f32 %v3426_v4, %v11503_v30 }
 0x658   : > { %v3547_v25 = vmul.f32 %v3427_v60, %v11506_v5  ;;  %v3548_v20 = vmul.f32 %v3428_v50, %v11509_v0  ;;  %v11578_v14 = vadd.f32 %v3541_v53, %v11404_v27  ;;  %v11581_v49 = vadd.f32 %v3542_v61, %v11407_v18 }
 0x659   : > { %v11584_v11 = vadd.f32 %v3543_v46, %v11410_v16  ;;  %v11587_v19 = vadd.f32 %v3544_v6, %v11413_v40  ;;  %v11590_v13 = vadd.f32 %v3545_v2, %v11416_v62  ;;  %v11593_v28 = vadd.f32 %v3546_v23, %v11419_v35 }
 0x65a   : > { %v11596_v38 = vadd.f32 %v3547_v25, %v11424_v24  ;;  %v11599_v53 = vadd.f32 %v3548_v20, %v11427_v56  ;;  %v14406_v4 = vrot.slane %v11488_v47, 6  ;;  %v14405_v60 = vrot.slane %v11491_v57, 6 }
 0x65b   : > { %15624 = vst [vmem:[#allocation250_spill] sm:$0xff] %v11593_v28  ;;  %v14404_v50 = vrot.slane %v11494_v17, 6  ;;  %v14403_v6 = vrot.slane %v11497_v48, 6  ;;  %v14399_v61 = vrot.slane %v11500_v58, 6  ;;  %v14402_v46 = vrot.slane %v11503_v30, 6 }
 0x65c   : > { %15625 = vst [vmem:[#allocation196_spill] sm:$0xff] %v11596_v38  ;;  %15626 = vst [vmem:[#allocation197_spill] sm:$0xff] %v11599_v53  ;;  %v14401_v23 = vrot.slane %v11506_v5, 6  ;;  %v14400_v2 = vrot.slane %v11509_v0, 6  ;;  %v15627_v20 = vrot.slane %v10886_v44, 6  ;;  %v15628_v33 = vrot.slane %v10891_v32, 6 }
 0x65d   : > { %v15629_v39 = vrot.slane %v10894_v51, 6  ;;  %v15630_v44 = vrot.slane %v10897_v36, 6  ;;  %v15631_v32 = vrot.slane %v10900_v42, 6  ;;  %v15632_v51 = vrot.slane %v10903_v1, 6 }
 0x65e   : > { %v3741_v25 = vsel %vm941_vm6, %v15627_v20, %v14406_v4  ;;  %v3742_v3 = vsel %vm941_vm6, %v15628_v33, %v14405_v60  ;;  %v15633_v36 = vrot.slane %v10906_v26, 6  ;;  %v15634_v42 = vrot.slane %v10909_v31, 6 }
 0x65f   : > { %v3743_v9 = vsel %vm941_vm6, %v15629_v39, %v14404_v50  ;;  %v3744_v20 = vsel %vm941_vm6, %v15630_v44, %v14403_v6  ;;  %v3745_v33 = vsel %vm941_vm6, %v15631_v32, %v14399_v61  ;;  %v3746_v39 = vsel %vm941_vm6, %v15632_v51, %v14402_v46 }
 0x660   : > { %v3747_v44 = vsel %vm941_vm6, %v15633_v36, %v14401_v23  ;;  %v3748_v32 = vsel %vm941_vm6, %v15634_v42, %v14400_v2  ;;  %v11658_v61 = vmul.f32 %v3741_v25, %v11488_v47  ;;  %v11661_v1 = vmul.f32 %v3742_v3, %v11491_v57 }
 0x661   : > { %v11664_v51 = vmul.f32 %v3743_v9, %v11494_v17  ;;  %v11667_v26 = vmul.f32 %v3744_v20, %v11497_v48  ;;  %v11670_v36 = vmul.f32 %v3745_v33, %v11500_v58  ;;  %v11673_v31 = vmul.f32 %v3746_v39, %v11503_v30 }
 0x662   : > { %15635 = vst [vmem:[#allocation237_spill] sm:$0xff] %v11661_v1  ;;  %v11676_v42 = vmul.f32 %v3747_v44, %v11506_v5  ;;  %v11679_v25 = vmul.f32 %v3748_v32, %v11509_v0  ;;  %v14414_v3 = vrot.slane %v11578_v14, 4  ;;  %v14413_v9 = vrot.slane %v11581_v49, 4 }
 0x663   : > { %15636 = vst [vmem:[#allocation238_spill] sm:$0xff] %v11664_v51  ;;  %15637 = vst [vmem:[#allocation239_spill] sm:$0xff] %v11667_v26  ;;  %v14412_v2 = vrot.slane %v11584_v11, 4  ;;  %v14409_v20 = vrot.slane %v11587_v19, 4  ;;  %v14407_v33 = vrot.slane %v11590_v13, 4  ;;  %v14408_v23 = vrot.slane %v11593_v28, 4 }
 0x664   : > { %15638 = vst [vmem:[#allocation240_spill] sm:$0xff] %v11670_v36  ;;  %15639 = vst [vmem:[#allocation241_spill] sm:$0xff] %v11673_v31  ;;  %v14410_v39 = vrot.slane %v11596_v38, 4  ;;  %v14411_v44 = vrot.slane %v11599_v53, 4  ;;  %v15642_v32 = vrot.slane %v10972_v8, 4  ;;  %v15643_v6 = vrot.slane %v10975_v10, 4 }
 0x665   : > { %15640 = vst [vmem:[#allocation242_spill] sm:$0xff] %v11676_v42  ;;  %15641 = vst [vmem:[#allocation73_spill] sm:$0xff] %v11679_v25  ;;  %v15644_v60 = vrot.slane %v10978_v45, 4  ;;  %v15645_v8 = vrot.slane %v10981_v7, 4  ;;  %v15646_v10 = vrot.slane %v10984_v22, 4  ;;  %v15647_v45 = vrot.slane %v10987_v52, 4 }
 0x666   : > { %v3997_v46 = vsel %vm833_vm4, %v15642_v32, %v14414_v3  ;;  %v3998_v50 = vsel %vm833_vm4, %v15643_v6, %v14413_v9  ;;  %v15648_v7 = vrot.slane %v10990_v43, 4  ;;  %v15649_v22 = vrot.slane %v10993_v54, 4 }
 0x667   : > { %v3999_v4 = vsel %vm833_vm4, %v15644_v60, %v14412_v2  ;;  %v4000_v32 = vsel %vm833_vm4, %v15645_v8, %v14409_v20  ;;  %v4001_v6 = vsel %vm833_vm4, %v15646_v10, %v14407_v33  ;;  %v4002_v60 = vsel %vm833_vm4, %v15647_v45, %v14408_v23  ;;  %v15660_v2 = vld [vmem:[#allocation70_spill] sm:$0xff] }
 0x668   : > { %v4003_v8 = vsel %vm833_vm4, %v15648_v7, %v14410_v39  ;;  %v4004_v10 = vsel %vm833_vm4, %v15649_v22, %v14411_v44  ;;  %v4117_v33 = vmul.f32 %v3997_v46, %v11658_v61  ;;  %v4118_v52 = vmul.f32 %v3998_v50, %v11661_v1 }
 0x669   : > { %v4119_v45 = vmul.f32 %v3999_v4, %v11664_v51  ;;  %v4120_v23 = vmul.f32 %v4000_v32, %v11667_v26  ;;  %v4121_v43 = vmul.f32 %v4001_v6, %v11670_v36  ;;  %v4122_v20 = vmul.f32 %v4002_v60, %v11673_v31 }
 0x66a   : > { %v4123_v7 = vmul.f32 %v4003_v8, %v11676_v42  ;;  %v4124_v39 = vmul.f32 %v4004_v10, %v11679_v25  ;;  %v11746_v54 = vadd.f32 %v4117_v33, %v11578_v14  ;;  %v11749_v22 = vadd.f32 %v4118_v52, %v11581_v49 }
 0x66b   : > { %v11752_v50 = vadd.f32 %v4119_v45, %v11584_v11  ;;  %v11755_v4 = vadd.f32 %v4120_v23, %v11587_v19  ;;  %v11758_v46 = vadd.f32 %v4121_v43, %v11590_v13  ;;  %v11761_v32 = vadd.f32 %v4122_v20, %v11593_v28  ;;  %v15662_v45 = vld [vmem:[#allocation72_spill] sm:$0xff] }
 0x66c   : > { %15650 = vst [vmem:[#allocation75_spill] sm:$0xff] %v11746_v54  ;;  %15651 = vst [vmem:[#allocation74_spill] sm:$0xff] %v11749_v22  ;;  %v11764_v6 = vadd.f32 %v4123_v7, %v11596_v38  ;;  %v11767_v33 = vadd.f32 %v4124_v39, %v11599_v53  ;;  %v14415_v60 = vrot.slane %v11658_v61, 4  ;;  %v14417_v8 = vrot.slane %v11661_v1, 4  ;;  %v15658_v39 = vld [vmem:[#allocation71_spill] sm:$0xff] }
 0x66d   : > { %15652 = vst [vmem:[#allocation76_spill] sm:$0xff] %v11752_v50  ;;  %15653 = vst [vmem:[#allocation105_spill] sm:$0xff] %v11755_v4  ;;  %v14419_v10 = vrot.slane %v11664_v51, 4  ;;  %v14421_v23 = vrot.slane %v11667_v26, 4  ;;  %v15659_v7 = vrot.slane %v15658_v39, 4  ;;  %v15661_v9 = vrot.slane %v15660_v2, 4 }
 0x66e   : > { %15654 = vst [vmem:[#allocation107_spill] sm:$0xff] %v11758_v46  ;;  %15655 = vst [vmem:[#allocation106_spill] sm:$0xff] %v11761_v32  ;;  %v15663_v20 = vrot.slane %v15662_v45, 4  ;;  %v15664_v39 = vld [vmem:[#allocation101_spill] sm:$0xff]  ;;  %v15667_v2 = vld [vmem:[#allocation103_spill] sm:$0xff] }
 0x66f   : > { %15656 = vst [vmem:[#allocation108_spill] sm:$0xff] %v11764_v6  ;;  %15657 = vst [vmem:[#allocation133_spill] sm:$0xff] %v11767_v33  ;;  %v4317_v44 = vsel %vm833_vm4, %v15659_v7, %v14415_v60  ;;  %v4318_v3 = vsel %vm833_vm4, %v15661_v9, %v14417_v8  ;;  %v15665_v52 = vrot.slane %v15664_v39, 4  ;;  %v15666_v60 = vrot.slane %v11670_v36, 4  ;;  %v15670_v45 = vld [vmem:[#allocation102_spill] sm:$0xff]  ;;  %v15673_v39 = vld [vmem:[#allocation104_spill] sm:$0xff] }
 0x670   : > { %v4319_v43 = vsel %vm833_vm4, %v15663_v20, %v14419_v10  ;;  %v15668_v41 = vrot.slane %v15667_v2, 4  ;;  %v15669_v8 = vrot.slane %v11673_v31, 4  ;;  %v15671_v53 = vrot.slane %v15670_v45, 4  ;;  %v15676_v2 = vld [vmem:[#allocation201_spill] sm:$0xff] }
 0x671   : > { %v4320_v7 = vsel %vm833_vm4, %v15665_v52, %v14421_v23  ;;  %v15672_v10 = vrot.slane %v11676_v42, 4  ;;  %v15674_v38 = vrot.slane %v15673_v39, 4  ;;  %v15675_v23 = vrot.slane %v11679_v25, 4 }
 0x672   : > { %v4321_v9 = vsel %vm833_vm4, %v15668_v41, %v15666_v60  ;;  %v4322_v20 = vsel %vm833_vm4, %v15671_v53, %v15669_v8  ;;  %v15677_v28 = vrot.slane %v15676_v2, 4  ;;  %v11826_v60 = vmul.f32 %v4317_v44, %v11658_v61 }
 0x673   : > { %v4323_v52 = vsel %vm833_vm4, %v15674_v38, %v15672_v10  ;;  %v11829_v45 = vmul.f32 %v4318_v3, %v11661_v1  ;;  %v11832_v53 = vmul.f32 %v4319_v43, %v11664_v51  ;;  %v11835_v8 = vmul.f32 %v4320_v7, %v11667_v26  ;;  %v15686_v3 = vld [vmem:[#allocation202_spill] sm:$0xff]  ;;  %v15687_v43 = vld [vmem:[#allocation203_spill] sm:$0xff]  ;;  %v15688_v7 = vld [vmem:[#allocation148_spill] sm:$0xff] }
 0x674   : > { %v4324_v41 = vsel %vm833_vm4, %v15677_v28, %v15675_v23  ;;  %15678 = vst [vmem:[#allocation135_spill] sm:$0xff] %v11826_v60  ;;  %v11838_v38 = vmul.f32 %v4321_v9, %v11670_v36  ;;  %v11841_v10 = vmul.f32 %v4322_v20, %v11673_v31  ;;  %v11844_v28 = vmul.f32 %v4323_v52, %v11676_v42  ;;  %v15689_v9 = vld [vmem:[#allocation149_spill] sm:$0xff]  ;;  %v15690_v20 = vld [vmem:[#allocation150_spill] sm:$0xff]  ;;  %v15691_v52 = vld [vmem:[#allocation151_spill] sm:$0xff] }
 0x675   : > { %15679 = vst [vmem:[#allocation134_spill] sm:$0xff] %v11829_v45  ;;  %15680 = vst [vmem:[#allocation136_spill] sm:$0xff] %v11832_v53  ;;  %v11847_v44 = vmul.f32 %v4324_v41, %v11679_v25  ;;  %v4573_v23 = vmul.f32 %v11826_v60, %v15686_v3  ;;  %v4574_v39 = vmul.f32 %v11829_v45, %v15687_v43  ;;  %v15692_v41 = vld [vmem:[#allocation152_spill] sm:$0xff]  ;;  %v15693_v26 = vld [vmem:[#allocation153_spill] sm:$0xff] }
 0x676   : > { %15681 = vst [vmem:[#allocation25_spill] sm:$0xff] %v11835_v8  ;;  %15682 = vst [vmem:[#allocation142_spill] sm:$0xff] %v11838_v38  ;;  %v4575_v2 = vmul.f32 %v11832_v53, %v15688_v7  ;;  %v4576_v36 = vmul.f32 %v11835_v8, %v15689_v9  ;;  %v4577_v31 = vmul.f32 %v11838_v38, %v15690_v20 }
 0x677   : > { %15683 = vst [vmem:[#allocation27_spill] sm:$0xff] %v11841_v10  ;;  %15684 = vst [vmem:[#allocation39_spill] sm:$0xff] %v11844_v28  ;;  %v4578_v42 = vmul.f32 %v11841_v10, %v15691_v52  ;;  %v4579_v25 = vmul.f32 %v11844_v28, %v15692_v41  ;;  %v4580_v3 = vmul.f32 %v11847_v44, %v15693_v26 }
 0x678   : > { %15685 = vst [vmem:[#allocation26_spill] sm:$0xff] %v11847_v44  ;;  %v11866_v43 = vadd.f32 %v4573_v23, %v11746_v54  ;;  %v11869_v7 = vadd.f32 %v4574_v39, %v11749_v22  ;;  %v11872_v9 = vadd.f32 %v4575_v2, %v11752_v50  ;;  %v11875_v20 = vadd.f32 %v4576_v36, %v11755_v4  ;;  %v15702_v39 = vld [vmem:[#allocation154_spill] sm:$0xff]  ;;  %v15704_v2 = vld [vmem:[#allocation155_spill] sm:$0xff] }
 0x679   : > { %v11878_v52 = vadd.f32 %v4577_v31, %v11758_v46  ;;  %v11881_v41 = vadd.f32 %v4578_v42, %v11761_v32  ;;  %v11884_v26 = vadd.f32 %v4579_v25, %v11764_v6  ;;  %v11887_v23 = vadd.f32 %v4580_v3, %v11767_v33  ;;  %v15706_v4 = vld [vmem:[#allocation50_spill] sm:$0xff]  ;;  %v15708_v42 = vld [vmem:[#allocation52_spill] sm:$0xff]  ;;  %v15710_v25 = vld [vmem:[#allocation223_spill] sm:$0xff] }
 0x67a   : > { %15694 = vst [vmem:[#allocation63_spill] sm:$0xff] %v11866_v43  ;;  %15695 = vst [vmem:[#allocation28_spill] sm:$0xff] %v11869_v7  ;;  %v11891_v22 = vmul.f32 %v11826_v60, %v15702_v39  ;;  %v11895_v36 = vmul.f32 %v11829_v45, %v15704_v2  ;;  %v11899_v31 = vmul.f32 %v11832_v53, %v15706_v4  ;;  %v15712_v33 = vld [vmem:[#allocation224_spill] sm:$0xff]  ;;  %v15714_v60 = vld [vmem:[#allocation225_spill] sm:$0xff] }
 0x67b   : > { %15696 = vst [vmem:[#allocation62_spill] sm:$0xff] %v11872_v9  ;;  %15697 = vst [vmem:[#allocation49_spill] sm:$0xff] %v11875_v20  ;;  %v11903_v32 = vmul.f32 %v11835_v8, %v15708_v42  ;;  %v11907_v3 = vmul.f32 %v11838_v38, %v15710_v25  ;;  %v11911_v39 = vmul.f32 %v11841_v10, %v15712_v33  ;;  %v15716_v45 = vld [vmem:[#allocation226_spill] sm:$0xff]  ;;  %v15719_v8 = vld [vmem:[#allocation24_spill] sm:$0xff] }
 0x67c   : > { %15698 = vst [vmem:[#allocation64_spill] sm:$0xff] %v11878_v52  ;;  %15699 = vst [vmem:[#allocation51_spill] sm:$0xff] %v11881_v41  ;;  %v11915_v2 = vmul.f32 %v11844_v28, %v15714_v60  ;;  %v11919_v4 = vmul.f32 %v11847_v44, %v15716_v45  ;;  %v15718_v53 = vld [vmem:[#allocation22_spill] sm:$0xff]  ;;  %v4902_v6 = vmul.f32 %v11895_v36, %v15719_v8  ;;  %v15720_v25 = vld [vmem:[#allocation45_spill] sm:$0xff] }
 0x67d   : > { %15700 = vst [vmem:[#allocation200_spill] sm:$0xff] %v11884_v26  ;;  %15701 = vst [vmem:[#allocation132_spill] sm:$0xff] %v11887_v23  ;;  %v4901_v42 = vmul.f32 %v11891_v22, %v15718_v53  ;;  %v4903_v38 = vmul.f32 %v11899_v31, %v15720_v25  ;;  %v15721_v46 = vld [vmem:[#allocation47_spill] sm:$0xff]  ;;  %v15722_v10 = vld [vmem:[#allocation46_spill] sm:$0xff] }
 0x67e   : > { %15703 = vst [vmem:[#allocation29_spill] sm:$0xff] %v11891_v22  ;;  %15705 = vst [vmem:[#allocation31_spill] sm:$0xff] %v11895_v36  ;;  %v4904_v33 = vmul.f32 %v11903_v32, %v15721_v46  ;;  %v4905_v60 = vmul.f32 %v11907_v3, %v15722_v10  ;;  %v15723_v28 = vld [vmem:[#allocation48_spill] sm:$0xff]  ;;  %v15724_v45 = vld [vmem:[#allocation221_spill] sm:$0xff]  ;;  %v11941_v25 = vadd.f32 %v4902_v6, %v11869_v7 }
 0x67f   : > { %15707 = vst [vmem:[#allocation30_spill] sm:$0xff] %v11899_v31  ;;  %15709 = vst [vmem:[#allocation53_spill] sm:$0xff] %v11903_v32  ;;  %v4906_v50 = vmul.f32 %v11911_v39, %v15723_v28  ;;  %v4907_v44 = vmul.f32 %v11915_v2, %v15724_v45  ;;  %v15725_v54 = vld [vmem:[#allocation198_spill] sm:$0xff]  ;;  %v11938_v8 = vadd.f32 %v4901_v42, %v11866_v43  ;;  %v15741_v43 = vld [vmem:[#allocation259_spill] sm:$0xff] }
 0x680   : > { %15711 = vst [vmem:[#allocation55_spill] sm:$0xff] %v11907_v3  ;;  %15713 = vst [vmem:[#allocation54_spill] sm:$0xff] %v11911_v39  ;;  %v4908_v53 = vmul.f32 %v11919_v4, %v15725_v54  ;;  %v11944_v46 = vadd.f32 %v4903_v38, %v11872_v9  ;;  %v11947_v10 = vadd.f32 %v4904_v33, %v11875_v20  ;;  %v15734_v6 = vld [vmem:[#allocation222_spill] sm:$0xff]  ;;  %v15735_v38 = vld [vmem:[#allocation199_spill] sm:$0xff] }
 0x681   : > { %15715 = vst [vmem:[#allocation56_spill] sm:$0xff] %v11915_v2  ;;  %15717 = vst [vmem:[#allocation204_spill] sm:$0xff] %v11919_v4  ;;  %v11950_v28 = vadd.f32 %v4905_v60, %v11878_v52  ;;  %v11953_v45 = vadd.f32 %v4906_v50, %v11881_v41  ;;  %v11956_v54 = vadd.f32 %v4907_v44, %v11884_v26  ;;  %v15736_v33 = vld [vmem:[#allocation139_spill] sm:$0xff]  ;;  %v15737_v60 = vld [vmem:[#allocation44_spill] sm:$0xff] }
 0x682   : > { %15726 = vst [vmem:[#allocation205_spill] sm:$0xff] %v11938_v8  ;;  %15727 = vst [vmem:[#allocation209_spill] sm:$0xff] %v11941_v25  ;;  %v11959_v42 = vadd.f32 %v4908_v53, %v11887_v23  ;;  %v5093_v7 = vmul.f32 %v11891_v22, %v15734_v6  ;;  %v5094_v9 = vmul.f32 %v11895_v36, %v15735_v38  ;;  %v15738_v50 = vld [vmem:[#allocation193_spill] sm:$0xff]  ;;  %v15739_v44 = vld [vmem:[#allocation194_spill] sm:$0xff] }
 0x683   : > { %15728 = vst [vmem:[#allocation213_spill] sm:$0xff] %v11944_v46  ;;  %15729 = vst [vmem:[#allocation216_spill] sm:$0xff] %v11947_v10  ;;  %v5095_v20 = vmul.f32 %v11899_v31, %v15736_v33  ;;  %v5096_v52 = vmul.f32 %v11903_v32, %v15737_v60  ;;  %v5097_v41 = vmul.f32 %v11907_v3, %v15738_v50  ;;  %v15740_v53 = vld [vmem:[#allocation195_spill] sm:$0xff] }
 0x684   : > { %15730 = vst [vmem:[#allocation143_spill] sm:$0xff] %v11950_v28  ;;  %15731 = vst [vmem:[#allocation71_spill] sm:$0xff] %v11953_v45  ;;  %v5098_v26 = vmul.f32 %v11911_v39, %v15739_v44  ;;  %v5099_v23 = vmul.f32 %v11915_v2, %v15740_v53  ;;  %v5100_v6 = vmul.f32 %v11919_v4, %v15741_v43  ;;  %v5229_v22 = vmul.f32 0.0, %v5093_v7 }
 0x685   : > { %15732 = vst [vmem:[#allocation70_spill] sm:$0xff] %v11956_v54  ;;  %15733 = vst [vmem:[#allocation72_spill] sm:$0xff] %v11959_v42  ;;  %v5230_v38 = vmul.f32 0.0, %v5094_v9  ;;  %v5231_v36 = vmul.f32 0.0, %v5095_v20  ;;  %v5232_v51 = vmul.f32 0.0, %v5096_v52  ;;  %v5233_v33 = vmul.f32 0.0, %v5097_v41 }
 0x686   : > { %v5234_v31 = vmul.f32 0.0, %v5098_v26  ;;  %v5235_v1 = vmul.f32 0.0, %v5099_v23  ;;  %v5236_v60 = vmul.f32 0.0, %v5100_v6  ;;  %v5293_v32 = vadd.f32 %v5229_v22, %v11938_v8  ;;  %v15742_v20 = vld [vmem:[#allocation77_spill] sm:$0xff]  ;;  %v15743_v41 = vld [vmem:[#allocation79_spill] sm:$0xff]  ;;  %v15744_v23 = vld [vmem:[#allocation78_spill] sm:$0xff] }
 0x687   : > { %v5294_v50 = vadd.f32 %v5230_v38, %v11941_v25  ;;  %v5295_v44 = vadd.f32 %v5231_v36, %v11944_v46  ;;  %v5296_v39 = vadd.f32 %v5232_v51, %v11947_v10  ;;  %v5297_v53 = vadd.f32 %v5233_v33, %v11950_v28  ;;  %v15745_v6 = vld [vmem:[#allocation80_spill] sm:$0xff]  ;;  %v15746_v25 = vld [vmem:[#allocation109_spill] sm:$0xff]  ;;  %v15747_v46 = vld [vmem:[#allocation111_spill] sm:$0xff] }
 0x688   : > { %v5298_v43 = vadd.f32 %v5234_v31, %v11953_v45  ;;  %v5299_v7 = vadd.f32 %v5235_v1, %v11956_v54  ;;  %v5300_v9 = vadd.f32 %v5236_v60, %v11959_v42  ;;  %v5357_v52 = vmul.f32 %v5293_v32, %v15742_v20  ;;  %v15748_v10 = vld [vmem:[#allocation110_spill] sm:$0xff]  ;;  %v15749_v28 = vld [vmem:[#allocation112_spill] sm:$0xff]  ;;  %v15750_v45 = vld [vmem:[#allocation217_spill] sm:$0xff] }
 0x689   : > { %v5358_v26 = vmul.f32 %v5294_v50, %v15743_v41  ;;  %v5359_v22 = vmul.f32 %v5295_v44, %v15744_v23  ;;  %v5360_v38 = vmul.f32 %v5296_v39, %v15745_v6  ;;  %v5361_v36 = vmul.f32 %v5297_v53, %v15746_v25  ;;  %v15751_v60 = vld [vmem:[#allocation131_spill] sm:$0xff]  ;;  %v15752_v32 = vld [vmem:[#allocation32_spill] sm:$0xff]  ;;  %v15753_v50 = vld [vmem:[#allocation218_spill] sm:$0xff] }
 0x68a   : > { %v5362_v51 = vmul.f32 %v5298_v43, %v15747_v46  ;;  %v5363_v33 = vmul.f32 %v5299_v7, %v15748_v10  ;;  %v5364_v31 = vmul.f32 %v5300_v9, %v15749_v28  ;;  %v14472_v1 = vrot.slane %v15750_v45, 7  ;;  %v15754_v6 = vld [vmem:[#allocation219_spill] sm:$0xff]  ;;  %v15755_v53 = vld [vmem:[#allocation220_spill] sm:$0xff]  ;;  %v15756_v43 = vld [vmem:[#allocation21_spill] sm:$0xff] }
 0x68b   : > { %v5409_v54 = vadd.f32 %v5361_v36, %v5357_v52  ;;  %v14471_v42 = vrot.slane %v15751_v60, 7  ;;  %v14470_v20 = vrot.slane %v15752_v32, 7  ;;  %v14469_v25 = vrot.slane %v15754_v6, 7  ;;  %v15757_v7 = vld [vmem:[#allocation23_spill] sm:$0xff] }
 0x68c   : > { %v5410_v44 = vadd.f32 %v5362_v51, %v5358_v26  ;;  %v5411_v23 = vadd.f32 %v5363_v33, %v5359_v22  ;;  %v5412_v39 = vadd.f32 %v5364_v31, %v5360_v38  ;;  %v14468_v46 = vrot.slane %v15755_v53, 7 }
 0x68d   : > { %v14467_v10 = vrot.slane %v15756_v43, 7  ;;  %v14466_v28 = vrot.slane %v15757_v7, 7  ;;  %v15758_v9 = vrot.slane %v15578_v12, 7  ;;  %v15759_v26 = vrot.slane %v15580_v59, 7 }
 0x68e   : > { %v5435_v36 = vadd.f32 %v5411_v23, %v5409_v54  ;;  %v5436_v41 = vadd.f32 %v5412_v39, %v5410_v44  ;;  %v15760_v38 = vrot.slane %v15582_v55, 7  ;;  %v15761_v12 = vrot.slane %v15753_v50, 7 }
 0x68f   : > { %v3157_v52 = vsel %vm995_vm7, %v15758_v9, %v14472_v1  ;;  %v3158_v22 = vsel %vm995_vm7, %v15759_v26, %v14471_v42  ;;  %v15762_v33 = vrot.slane %v15584_v15, 7  ;;  %v15763_v59 = vrot.slane %v15586_v37, 7 }
 0x690   : > { %v3159_v51 = vsel %vm995_vm7, %v15760_v38, %v14470_v20  ;;  %v15764_v55 = vrot.slane %v15588_v63, 7  ;;  %v15765_v15 = vrot.slane %v15590_v34, 7  ;;  %v12043_v39 = vadd.f32 %v5436_v41, %v5435_v36 }
 0x691   : > { %v3160_v54 = vsel %vm995_vm7, %v15762_v33, %v15761_v12  ;;  %v3161_v31 = vsel %vm995_vm7, %v15763_v59, %v14469_v25  ;;  %v15767_v37 = vrot.slane %v15592_v21, 7  ;;  %v12052_v63 = vmul.f32 %v15750_v45, %v3157_v52 }
 0x692   : > { %v3162_v44 = vsel %vm995_vm7, %v15764_v55, %v14468_v46  ;;  %v3163_v23 = vsel %vm995_vm7, %v15765_v15, %v14467_v10  ;;  %15766 = vst [vmem:[#allocation101_spill] sm:$0xff] %v12043_v39  ;;  %v12055_v26 = vmul.f32 %v15751_v60, %v3158_v22  ;;  %v12058_v34 = vmul.f32 %v15752_v32, %v3159_v51  ;;  %v15768_v22 = vld [vmem:[#allocation229_spill] sm:$0xff] }
 0x693   : > { %v3164_v9 = vsel %vm995_vm7, %v15767_v37, %v14466_v28  ;;  %v12061_v38 = vmul.f32 %v15753_v50, %v3160_v54  ;;  %v12064_v41 = vmul.f32 %v15754_v6, %v3161_v31  ;;  %v12067_v21 = vmul.f32 %v15755_v53, %v3162_v44  ;;  %5467 = vrot.lane.b32.xlu1 %v12043_v39, %s7068_s25  ;;  %v15771_v54 = vld [vmem:[#allocation230_spill] sm:$0xff]  ;;  %v15774_v44 = vld [vmem:[#allocation231_spill] sm:$0xff] }
 0x694   : > { %v12072_v52 = vmul.f32 %v15756_v43, %v3163_v23  ;;  %v12075_v36 = vmul.f32 %v15757_v7, %v3164_v9  ;;  %v15769_v51 = vrot.slane %v15768_v22, 6  ;;  %v15770_v12 = vrot.slane %v11404_v27, 6  ;;  %v15777_v9 = vld [vmem:[#allocation232_spill] sm:$0xff] }
 0x695   : > { %v15772_v59 = vrot.slane %v15771_v54, 6  ;;  %v15773_v31 = vrot.slane %v11407_v18, 6  ;;  %v15775_v15 = vrot.slane %v15774_v44, 6  ;;  %v15776_v23 = vrot.slane %v11410_v16, 6 }
 0x696   : > { %v3413_v33 = vsel %vm941_vm6, %v15770_v12, %v15769_v51  ;;  %v15778_v28 = vrot.slane %v15777_v9, 6  ;;  %v15779_v27 = vrot.slane %v11413_v40, 6  ;;  %v15780_v12 = vld [vmem:[#allocation233_spill] sm:$0xff]  ;;  %v15782_v18 = vrot.slane %v11416_v62, 6 }
 0x697   : > { %v3414_v55 = vsel %vm941_vm6, %v15773_v31, %v15772_v59  ;;  %v3415_v37 = vsel %vm941_vm6, %v15776_v23, %v15775_v15  ;;  %v15781_v10 = vrot.slane %v15780_v12, 6  ;;  %v15783_v31 = vld [vmem:[#allocation234_spill] sm:$0xff]  ;;  %v15785_v16 = vrot.slane %v11419_v35, 6  ;;  %v15786_v23 = vld [vmem:[#allocation235_spill] sm:$0xff] }
 0x698   : > { %v3416_v51 = vsel %vm941_vm6, %v15779_v27, %v15778_v28  ;;  %v15784_v46 = vrot.slane %v15783_v31, 6  ;;  %v15787_v25 = vrot.slane %v15786_v23, 6  ;;  %v15788_v40 = vrot.slane %v11424_v24, 6  ;;  %v15789_v27 = vld [vmem:[#allocation236_spill] sm:$0xff] }
 0x699   : > { %v3417_v59 = vsel %vm941_vm6, %v15782_v18, %v15781_v10  ;;  %v15790_v20 = vrot.slane %v15789_v27, 6  ;;  %v15791_v62 = vrot.slane %v11427_v56, 6  ;;  %v3549_v18 = vmul.f32 %v3413_v33, %v12052_v63 }
 0x69a   : > { %v3418_v15 = vsel %vm941_vm6, %v15785_v16, %v15784_v46  ;;  %v3419_v28 = vsel %vm941_vm6, %v15788_v40, %v15787_v25  ;;  %v3550_v35 = vmul.f32 %v3414_v55, %v12055_v26  ;;  %v3551_v46 = vmul.f32 %v3415_v37, %v12058_v34  ;;  %v15792_v25 = vld [vmem:[#allocation141_spill] sm:$0xff] }
 0x69b   : > { %v3420_v10 = vsel %vm941_vm6, %v15791_v62, %v15790_v20  ;;  %v3552_v16 = vmul.f32 %v3416_v51, %v12061_v38  ;;  %v3553_v24 = vmul.f32 %v3417_v59, %v12064_v41  ;;  %v3554_v42 = vmul.f32 %v3418_v15, %v12067_v21  ;;  %5583 = vrot.lane.b32.xlu1 %v15792_v25, %s7068_s25 }
 0x69c   : > { %v3555_v56 = vmul.f32 %v3419_v28, %v12072_v52  ;;  %v3556_v40 = vmul.f32 %v3420_v10, %v12075_v36  ;;  %v12136_v20 = vadd.f32 %v3549_v18, %v15768_v22  ;;  %v12139_v33 = vadd.f32 %v3550_v35, %v15771_v54 }
 0x69d   : > { %v12142_v55 = vadd.f32 %v3551_v46, %v15774_v44  ;;  %v12145_v37 = vadd.f32 %v3552_v16, %v15777_v9  ;;  %v12148_v51 = vadd.f32 %v3553_v24, %v15780_v12  ;;  %v12151_v59 = vadd.f32 %v3554_v42, %v15783_v31 }
 0x69e   : > { %v12154_v15 = vadd.f32 %v3555_v56, %v15786_v23  ;;  %v12157_v28 = vadd.f32 %v3556_v40, %v15789_v27  ;;  %v14478_v62 = vrot.slane %v12052_v63, 6  ;;  %v14477_v10 = vrot.slane %v12055_v26, 6 }
 0x69f   : > { %15793 = vst [vmem:[#allocation103_spill] sm:$0xff] %v12142_v55  ;;  %15794 = vst [vmem:[#allocation102_spill] sm:$0xff] %v12145_v37  ;;  %v14473_v18 = vrot.slane %v12058_v34, 6  ;;  %v14474_v35 = vrot.slane %v12061_v38, 6  ;;  %v14475_v46 = vrot.slane %v12064_v41, 6  ;;  %v14476_v16 = vrot.slane %v12067_v21, 6 }
 0x6a0   : > { %15795 = vst [vmem:[#allocation104_spill] sm:$0xff] %v12148_v51  ;;  %15796 = vst [vmem:[#allocation201_spill] sm:$0xff] %v12151_v59  ;;  %v15799_v25 = vrot.slane %v11488_v47, 6  ;;  %v15800_v40 = vrot.slane %v11491_v57, 6  ;;  %v15801_v42 = vrot.slane %v11494_v17, 6  ;;  %v15802_v47 = vrot.slane %v11497_v48, 6 }
 0x6a1   : > { %15797 = vst [vmem:[#allocation202_spill] sm:$0xff] %v12154_v15  ;;  %15798 = vst [vmem:[#allocation203_spill] sm:$0xff] %v12157_v28  ;;  %v15803_v57 = vrot.slane %v11500_v58, 6  ;;  %v15804_v17 = vrot.slane %v11503_v30, 6  ;;  %v15806_v48 = vrot.slane %v11506_v5, 6  ;;  %v15808_v58 = vrot.slane %v11509_v0, 6 }
 0x6a2   : > { %v3733_v56 = vsel %vm941_vm6, %v15799_v25, %v14478_v62  ;;  %v3734_v1 = vsel %vm941_vm6, %v15800_v40, %v14477_v10  ;;  %v3735_v24 = vsel %vm941_vm6, %v15801_v42, %v14473_v18  ;;  %v3736_v25 = vsel %vm941_vm6, %v15802_v47, %v14474_v35 }
 0x6a3   : > { %v3737_v40 = vsel %vm941_vm6, %v15803_v57, %v14475_v46  ;;  %v3738_v42 = vsel %vm941_vm6, %v15804_v17, %v14476_v16  ;;  %v15805_v18 = vrot.slane %v12072_v52, 6  ;;  %v15807_v35 = vrot.slane %v12075_v36, 6 }
 0x6a4   : > { %v12216_v46 = vmul.f32 %v3733_v56, %v12052_v63  ;;  %v12219_v30 = vmul.f32 %v3734_v1, %v12055_v26  ;;  %v12222_v17 = vmul.f32 %v3735_v24, %v12058_v34  ;;  %v12225_v5 = vmul.f32 %v3736_v25, %v12061_v38 }
 0x6a5   : > { %v3739_v47 = vsel %vm941_vm6, %v15806_v48, %v15805_v18  ;;  %v3740_v57 = vsel %vm941_vm6, %v15808_v58, %v15807_v35  ;;  %v12228_v18 = vmul.f32 %v3737_v40, %v12064_v41  ;;  %v12231_v0 = vmul.f32 %v3738_v42, %v12067_v21 }
 0x6a6   : > { %15809 = vst [vmem:[#allocation148_spill] sm:$0xff] %v12216_v46  ;;  %15810 = vst [vmem:[#allocation149_spill] sm:$0xff] %v12219_v30  ;;  %v12234_v35 = vmul.f32 %v3739_v47, %v12072_v52  ;;  %v12237_v56 = vmul.f32 %v3740_v57, %v12075_v36  ;;  %v14481_v1 = vrot.slane %v12136_v20, 4  ;;  %v14479_v24 = vrot.slane %v12139_v33, 4 }
 0x6a7   : > { %15811 = vst [vmem:[#allocation150_spill] sm:$0xff] %v12222_v17  ;;  %15812 = vst [vmem:[#allocation151_spill] sm:$0xff] %v12225_v5  ;;  %v14480_v48 = vrot.slane %v12142_v55, 4  ;;  %v14482_v25 = vrot.slane %v12145_v37, 4  ;;  %v14484_v40 = vrot.slane %v12148_v51, 4  ;;  %v14485_v58 = vrot.slane %v12151_v59, 4 }
 0x6a8   : > { %15813 = vst [vmem:[#allocation152_spill] sm:$0xff] %v12228_v18  ;;  %15814 = vst [vmem:[#allocation153_spill] sm:$0xff] %v12231_v0  ;;  %v15817_v57 = vrot.slane %v11578_v14, 4  ;;  %v15818_v10 = vrot.slane %v11581_v49, 4  ;;  %v15819_v42 = vrot.slane %v11584_v11, 4  ;;  %v15820_v14 = vrot.slane %v11587_v19, 4 }
 0x6a9   : > { %15815 = vst [vmem:[#allocation154_spill] sm:$0xff] %v12234_v35  ;;  %15816 = vst [vmem:[#allocation155_spill] sm:$0xff] %v12237_v56  ;;  %v15821_v49 = vrot.slane %v11590_v13, 4  ;;  %v15822_v11 = vld [vmem:[#allocation250_spill] sm:$0xff]  ;;  %v15825_v19 = vld [vmem:[#allocation196_spill] sm:$0xff]  ;;  %v15844_v4 = vrot.slane %v12225_v5, 4 }
 0x6aa   : > { %v3989_v16 = vsel %vm833_vm4, %v15817_v57, %v14481_v1  ;;  %v3990_v62 = vsel %vm833_vm4, %v15818_v10, %v14479_v24  ;;  %v3991_v47 = vsel %vm833_vm4, %v15819_v42, %v14480_v48  ;;  %v3992_v57 = vsel %vm833_vm4, %v15820_v14, %v14482_v25  ;;  %v15828_v13 = vld [vmem:[#allocation197_spill] sm:$0xff] }
 0x6ab   : > { %v3993_v10 = vsel %vm833_vm4, %v15821_v49, %v14484_v40  ;;  %v15823_v24 = vrot.slane %v15822_v11, 4  ;;  %v15824_v48 = vrot.slane %v12154_v15, 4  ;;  %v15826_v1 = vrot.slane %v15825_v19, 4 }
 0x6ac   : > { %v15827_v25 = vrot.slane %v12157_v28, 4  ;;  %v15829_v39 = vrot.slane %v15828_v13, 4  ;;  %v4125_v40 = vmul.f32 %v3989_v16, %v12216_v46  ;;  %v4126_v11 = vmul.f32 %v3990_v62, %v12219_v30 }
 0x6ad   : > { %v3994_v42 = vsel %vm833_vm4, %v15823_v24, %v14485_v58  ;;  %v3995_v14 = vsel %vm833_vm4, %v15826_v1, %v15824_v48  ;;  %v4127_v24 = vmul.f32 %v3991_v47, %v12222_v17  ;;  %v4128_v58 = vmul.f32 %v3992_v57, %v12225_v5 }
 0x6ae   : > { %v3996_v49 = vsel %vm833_vm4, %v15829_v39, %v15827_v25  ;;  %v4129_v19 = vmul.f32 %v3993_v10, %v12228_v18  ;;  %v4130_v8 = vmul.f32 %v3994_v42, %v12231_v0  ;;  %v4131_v1 = vmul.f32 %v3995_v14, %v12234_v35 }
 0x6af   : > { %v4132_v48 = vmul.f32 %v3996_v49, %v12237_v56  ;;  %v12304_v13 = vadd.f32 %v4125_v40, %v12136_v20  ;;  %v12307_v39 = vadd.f32 %v4126_v11, %v12139_v33  ;;  %v12310_v62 = vadd.f32 %v4127_v24, %v12142_v55 }
 0x6b0   : > { %v12313_v16 = vadd.f32 %v4128_v58, %v12145_v37  ;;  %v12316_v25 = vadd.f32 %v4129_v19, %v12148_v51  ;;  %v12319_v47 = vadd.f32 %v4130_v8, %v12151_v59  ;;  %v12322_v57 = vadd.f32 %v4131_v1, %v12154_v15  ;;  %v15842_v58 = vld [vmem:[#allocation238_spill] sm:$0xff] }
 0x6b1   : > { %15830 = vst [vmem:[#allocation50_spill] sm:$0xff] %v12304_v13  ;;  %15831 = vst [vmem:[#allocation52_spill] sm:$0xff] %v12307_v39  ;;  %v12325_v40 = vadd.f32 %v4132_v48, %v12157_v28  ;;  %v14489_v10 = vrot.slane %v12216_v46, 4  ;;  %v14491_v42 = vrot.slane %v12219_v30, 4  ;;  %v15838_v19 = vrot.slane %v11658_v61, 4  ;;  %v15839_v48 = vld [vmem:[#allocation237_spill] sm:$0xff] }
 0x6b2   : > { %15832 = vst [vmem:[#allocation223_spill] sm:$0xff] %v12310_v62  ;;  %15833 = vst [vmem:[#allocation224_spill] sm:$0xff] %v12313_v16  ;;  %v15840_v14 = vrot.slane %v15839_v48, 4  ;;  %v15841_v11 = vrot.slane %v12222_v17, 4  ;;  %v15843_v8 = vrot.slane %v15842_v58, 4  ;;  %v15845_v61 = vld [vmem:[#allocation239_spill] sm:$0xff] }
 0x6b3   : > { %15834 = vst [vmem:[#allocation225_spill] sm:$0xff] %v12316_v25  ;;  %15835 = vst [vmem:[#allocation226_spill] sm:$0xff] %v12319_v47  ;;  %v4309_v1 = vsel %vm833_vm4, %v15838_v19, %v14489_v10  ;;  %v15846_v2 = vrot.slane %v15845_v61, 4  ;;  %v15847_v10 = vrot.slane %v12228_v18, 4  ;;  %v15848_v48 = vld [vmem:[#allocation240_spill] sm:$0xff]  ;;  %v15851_v58 = vld [vmem:[#allocation241_spill] sm:$0xff] }
 0x6b4   : > { %15836 = vst [vmem:[#allocation22_spill] sm:$0xff] %v12322_v57  ;;  %15837 = vst [vmem:[#allocation24_spill] sm:$0xff] %v12325_v40  ;;  %v4310_v49 = vsel %vm833_vm4, %v15840_v14, %v14491_v42  ;;  %v4311_v24 = vsel %vm833_vm4, %v15843_v8, %v15841_v11  ;;  %v15849_v3 = vrot.slane %v15848_v48, 4  ;;  %v15850_v42 = vrot.slane %v12231_v0, 4  ;;  %v15854_v61 = vld [vmem:[#allocation242_spill] sm:$0xff]  ;;  %v15857_v48 = vld [vmem:[#allocation73_spill] sm:$0xff] }
 0x6b5   : > { %v4312_v19 = vsel %vm833_vm4, %v15846_v2, %v15844_v4  ;;  %v15852_v28 = vrot.slane %v15851_v58, 4  ;;  %v15853_v8 = vrot.slane %v12234_v35, 4  ;;  %v15855_v15 = vrot.slane %v15854_v61, 4 }
 0x6b6   : > { %v4313_v14 = vsel %vm833_vm4, %v15849_v3, %v15847_v10  ;;  %v15856_v4 = vrot.slane %v12237_v56, 4  ;;  %v15858_v59 = vrot.slane %v15857_v48, 4  ;;  %v12384_v10 = vmul.f32 %v4309_v1, %v12216_v46 }
 0x6b7   : > { %v4314_v11 = vsel %vm833_vm4, %v15852_v28, %v15850_v42  ;;  %v4315_v2 = vsel %vm833_vm4, %v15855_v15, %v15853_v8  ;;  %v12387_v58 = vmul.f32 %v4310_v49, %v12219_v30  ;;  %v12390_v28 = vmul.f32 %v4311_v24, %v12222_v17  ;;  %v15867_v49 = vld [vmem:[#allocation75_spill] sm:$0xff]  ;;  %v15868_v24 = vld [vmem:[#allocation74_spill] sm:$0xff] }
 0x6b8   : > { %v4316_v3 = vsel %vm833_vm4, %v15858_v59, %v15856_v4  ;;  %15859 = vst [vmem:[#allocation45_spill] sm:$0xff] %v12384_v10  ;;  %v12393_v42 = vmul.f32 %v4312_v19, %v12225_v5  ;;  %v12396_v15 = vmul.f32 %v4313_v14, %v12228_v18  ;;  %v12399_v8 = vmul.f32 %v4314_v11, %v12231_v0  ;;  %v15869_v19 = vld [vmem:[#allocation76_spill] sm:$0xff]  ;;  %v15870_v14 = vld [vmem:[#allocation105_spill] sm:$0xff]  ;;  %v15871_v11 = vld [vmem:[#allocation107_spill] sm:$0xff] }
 0x6b9   : > { %15860 = vst [vmem:[#allocation47_spill] sm:$0xff] %v12387_v58  ;;  %15861 = vst [vmem:[#allocation46_spill] sm:$0xff] %v12390_v28  ;;  %v12402_v59 = vmul.f32 %v4315_v2, %v12234_v35  ;;  %v12405_v1 = vmul.f32 %v4316_v3, %v12237_v56  ;;  %v4581_v61 = vmul.f32 %v12384_v10, %v15867_v49  ;;  %v15872_v2 = vld [vmem:[#allocation106_spill] sm:$0xff]  ;;  %v15873_v3 = vld [vmem:[#allocation108_spill] sm:$0xff] }
 0x6ba   : > { %15862 = vst [vmem:[#allocation48_spill] sm:$0xff] %v12393_v42  ;;  %15863 = vst [vmem:[#allocation221_spill] sm:$0xff] %v12396_v15  ;;  %v4582_v4 = vmul.f32 %v12387_v58, %v15868_v24  ;;  %v4583_v48 = vmul.f32 %v12390_v28, %v15869_v19  ;;  %v4584_v18 = vmul.f32 %v12393_v42, %v15870_v14  ;;  %v15874_v5 = vld [vmem:[#allocation133_spill] sm:$0xff] }
 0x6bb   : > { %15864 = vst [vmem:[#allocation198_spill] sm:$0xff] %v12399_v8  ;;  %15865 = vst [vmem:[#allocation222_spill] sm:$0xff] %v12402_v59  ;;  %v4585_v0 = vmul.f32 %v12396_v15, %v15871_v11  ;;  %v4586_v35 = vmul.f32 %v12399_v8, %v15872_v2  ;;  %v4587_v56 = vmul.f32 %v12402_v59, %v15873_v3 }
 0x6bc   : > { %15866 = vst [vmem:[#allocation199_spill] sm:$0xff] %v12405_v1  ;;  %v4588_v49 = vmul.f32 %v12405_v1, %v15874_v5  ;;  %v12424_v24 = vadd.f32 %v4581_v61, %v12304_v13  ;;  %v12427_v19 = vadd.f32 %v4582_v4, %v12307_v39  ;;  %v12430_v14 = vadd.f32 %v4583_v48, %v12310_v62  ;;  %v15883_v4 = vld [vmem:[#allocation135_spill] sm:$0xff]  ;;  %v15885_v48 = vld [vmem:[#allocation134_spill] sm:$0xff] }
 0x6bd   : > { %v12433_v11 = vadd.f32 %v4584_v18, %v12313_v16  ;;  %v12436_v2 = vadd.f32 %v4585_v0, %v12316_v25  ;;  %v12439_v3 = vadd.f32 %v4586_v35, %v12319_v47  ;;  %v12442_v5 = vadd.f32 %v4587_v56, %v12322_v57  ;;  %v15887_v16 = vld [vmem:[#allocation136_spill] sm:$0xff]  ;;  %v15889_v35 = vld [vmem:[#allocation25_spill] sm:$0xff]  ;;  %v15891_v56 = vld [vmem:[#allocation142_spill] sm:$0xff] }
 0x6be   : > { %15875 = vst [vmem:[#allocation139_spill] sm:$0xff] %v12424_v24  ;;  %15876 = vst [vmem:[#allocation44_spill] sm:$0xff] %v12427_v19  ;;  %v12445_v61 = vadd.f32 %v4588_v49, %v12325_v40  ;;  %v12449_v39 = vmul.f32 %v12384_v10, %v15883_v4  ;;  %v12453_v18 = vmul.f32 %v12387_v58, %v15885_v48  ;;  %v15893_v40 = vld [vmem:[#allocation27_spill] sm:$0xff]  ;;  %v15897_v58 = vld [vmem:[#allocation26_spill] sm:$0xff] }
 0x6bf   : > { %15877 = vst [vmem:[#allocation193_spill] sm:$0xff] %v12430_v14  ;;  %15878 = vst [vmem:[#allocation194_spill] sm:$0xff] %v12433_v11  ;;  %v12457_v0 = vmul.f32 %v12390_v28, %v15887_v16  ;;  %v12461_v47 = vmul.f32 %v12393_v42, %v15889_v35  ;;  %v12465_v49 = vmul.f32 %v12396_v15, %v15891_v56  ;;  %v15895_v10 = vld [vmem:[#allocation39_spill] sm:$0xff]  ;;  %v15900_v42 = vld [vmem:[#allocation228_spill] sm:$0xff] }
 0x6c0   : > { %15879 = vst [vmem:[#allocation195_spill] sm:$0xff] %v12436_v2  ;;  %15880 = vst [vmem:[#allocation259_spill] sm:$0xff] %v12439_v3  ;;  %v12469_v4 = vmul.f32 %v12399_v8, %v15893_v40  ;;  %v12473_v48 = vmul.f32 %v12402_v59, %v15895_v10  ;;  %v12477_v16 = vmul.f32 %v12405_v1, %v15897_v58  ;;  %v15899_v28 = vld [vmem:[#allocation227_spill] sm:$0xff]  ;;  %v15901_v56 = vld [vmem:[#allocation140_spill] sm:$0xff] }
 0x6c1   : > { %15881 = vst [vmem:[#allocation77_spill] sm:$0xff] %v12442_v5  ;;  %15882 = vst [vmem:[#allocation79_spill] sm:$0xff] %v12445_v61  ;;  %v4909_v35 = vmul.f32 %v12449_v39, %v15899_v28  ;;  %v4910_v57 = vmul.f32 %v12453_v18, %v15900_v42  ;;  %v4911_v15 = vmul.f32 %v12457_v0, %v15901_v56  ;;  %v15902_v25 = vld [vmem:[#allocation67_spill] sm:$0xff]  ;;  %v15903_v8 = vld [vmem:[#allocation66_spill] sm:$0xff] }
 0x6c2   : > { %15884 = vst [vmem:[#allocation78_spill] sm:$0xff] %v12449_v39  ;;  %15886 = vst [vmem:[#allocation80_spill] sm:$0xff] %v12453_v18  ;;  %v4912_v40 = vmul.f32 %v12461_v47, %v15902_v25  ;;  %v4913_v10 = vmul.f32 %v12465_v49, %v15903_v8  ;;  %v15904_v59 = vld [vmem:[#allocation68_spill] sm:$0xff]  ;;  %v15905_v58 = vld [vmem:[#allocation97_spill] sm:$0xff] }
 0x6c3   : > { %15888 = vst [vmem:[#allocation109_spill] sm:$0xff] %v12457_v0  ;;  %15890 = vst [vmem:[#allocation111_spill] sm:$0xff] %v12461_v47  ;;  %v4914_v62 = vmul.f32 %v12469_v4, %v15904_v59  ;;  %v4915_v1 = vmul.f32 %v12473_v48, %v15905_v58  ;;  %v15906_v13 = vld [vmem:[#allocation99_spill] sm:$0xff]  ;;  %v4973_v42 = vadd.f32 %v4909_v35, %v12424_v24  ;;  %v15907_v58 = vld [vmem:[#allocation98_spill] sm:$0xff] }
 0x6c4   : > { %15892 = vst [vmem:[#allocation110_spill] sm:$0xff] %v12465_v49  ;;  %15894 = vst [vmem:[#allocation112_spill] sm:$0xff] %v12469_v4  ;;  %v4916_v28 = vmul.f32 %v12477_v16, %v15906_v13  ;;  %v4974_v17 = vadd.f32 %v4910_v57, %v12427_v19  ;;  %v4975_v56 = vadd.f32 %v4911_v15, %v12430_v14  ;;  %v15908_v13 = vld [vmem:[#allocation100_spill] sm:$0xff]  ;;  %v15910_v15 = vld [vmem:[#allocation157_spill] sm:$0xff] }
 0x6c5   : > { %15896 = vst [vmem:[#allocation217_spill] sm:$0xff] %v12473_v48  ;;  %15898 = vst [vmem:[#allocation131_spill] sm:$0xff] %v12477_v16  ;;  %v4976_v25 = vadd.f32 %v4912_v40, %v12433_v11  ;;  %v4977_v30 = vadd.f32 %v4913_v10, %v12436_v2  ;;  %v4978_v8 = vadd.f32 %v4914_v62, %v12439_v3  ;;  %v15909_v24 = vld [vmem:[#allocation156_spill] sm:$0xff]  ;;  %v15911_v11 = vld [vmem:[#allocation158_spill] sm:$0xff] }
 0x6c6   : > { %v4979_v59 = vadd.f32 %v4915_v1, %v12442_v5  ;;  %v4980_v46 = vadd.f32 %v4916_v28, %v12445_v61  ;;  %v5101_v51 = vmul.f32 %v12449_v39, %v15907_v58  ;;  %v5102_v35 = vmul.f32 %v12453_v18, %v15908_v13  ;;  %v15912_v62 = vld [vmem:[#allocation159_spill] sm:$0xff]  ;;  %v15913_v5 = vld [vmem:[#allocation160_spill] sm:$0xff]  ;;  %v15914_v61 = vld [vmem:[#allocation161_spill] sm:$0xff] }
 0x6c7   : > { %v5103_v57 = vmul.f32 %v12457_v0, %v15909_v24  ;;  %v5104_v40 = vmul.f32 %v12461_v47, %v15910_v15  ;;  %v5105_v10 = vmul.f32 %v12465_v49, %v15911_v11  ;;  %v5106_v1 = vmul.f32 %v12469_v4, %v15912_v62  ;;  %v15915_v39 = vld [vmem:[#allocation251_spill] sm:$0xff]  ;;  %v15916_v18 = vld [vmem:[#allocation252_spill] sm:$0xff]  ;;  %v15917_v24 = vld [vmem:[#allocation253_spill] sm:$0xff] }
 0x6c8   : > { %v5107_v28 = vmul.f32 %v12473_v48, %v15913_v5  ;;  %v5108_v58 = vmul.f32 %v12477_v16, %v15914_v61  ;;  %v5237_v13 = vmul.f32 %v5101_v51, %v15915_v39  ;;  %v5238_v3 = vmul.f32 %v5102_v35, %v15916_v18  ;;  %v15918_v2 = vld [vmem:[#allocation254_spill] sm:$0xff]  ;;  %v15919_v47 = vld [vmem:[#allocation255_spill] sm:$0xff]  ;;  %v15920_v11 = vld [vmem:[#allocation256_spill] sm:$0xff] }
 0x6c9   : > { %v5239_v0 = vmul.f32 %v5103_v57, %v15917_v24  ;;  %v5240_v15 = vmul.f32 %v5104_v40, %v15918_v2  ;;  %v5241_v14 = vmul.f32 %v5105_v10, %v15919_v47  ;;  %v5242_v49 = vmul.f32 %v5106_v1, %v15920_v11  ;;  %v15921_v19 = vld [vmem:[#allocation257_spill] sm:$0xff]  ;;  %v15922_v4 = vld [vmem:[#allocation258_spill] sm:$0xff]  ;;  %v15924_v24 = vld [vmem:[#allocation83_spill] sm:$0xff] }
 0x6ca   : > { %v5243_v62 = vmul.f32 %v5107_v28, %v15921_v19  ;;  %v5244_v37 = vmul.f32 %v5108_v58, %v15922_v4  ;;  %v5301_v5 = vadd.f32 %v5237_v13, %v4973_v42  ;;  %v5302_v48 = vadd.f32 %v5238_v3, %v4974_v17  ;;  %v15923_v35 = vld [vmem:[#allocation81_spill] sm:$0xff]  ;;  %v15925_v40 = vld [vmem:[#allocation82_spill] sm:$0xff]  ;;  %v15926_v10 = vld [vmem:[#allocation84_spill] sm:$0xff] }
 0x6cb   : > { %v5303_v55 = vadd.f32 %v5239_v0, %v4975_v56  ;;  %v5304_v61 = vadd.f32 %v5240_v15, %v4976_v25  ;;  %v5305_v16 = vadd.f32 %v5241_v14, %v4977_v30  ;;  %v5306_v51 = vadd.f32 %v5242_v49, %v4978_v8  ;;  %v15927_v11 = vld [vmem:[#allocation113_spill] sm:$0xff]  ;;  %v15928_v28 = vld [vmem:[#allocation115_spill] sm:$0xff]  ;;  %v15929_v42 = vld [vmem:[#allocation114_spill] sm:$0xff] }
 0x6cc   : > { %v5307_v39 = vadd.f32 %v5243_v62, %v4979_v59  ;;  %v5308_v18 = vadd.f32 %v5244_v37, %v4980_v46  ;;  %v5365_v57 = vmul.f32 %v5301_v5, %v15923_v35  ;;  %v5366_v2 = vmul.f32 %v5302_v48, %v15924_v24  ;;  %v15930_v3 = vld [vmem:[#allocation116_spill] sm:$0xff]  ;;  %v15931_v30 = vld [vmem:[#allocation33_spill] sm:$0xff]  ;;  %v15933_v37 = vld [vmem:[#allocation35_spill] sm:$0xff] }
 0x6cd   : > { %v5367_v47 = vmul.f32 %v5303_v55, %v15925_v40  ;;  %v5368_v1 = vmul.f32 %v5304_v61, %v15926_v10  ;;  %v5369_v19 = vmul.f32 %v5305_v16, %v15927_v11  ;;  %v5370_v4 = vmul.f32 %v5306_v51, %v15928_v28  ;;  %v15932_v14 = vld [vmem:[#allocation164_spill] sm:$0xff]  ;;  %v15934_v46 = vld [vmem:[#allocation165_spill] sm:$0xff]  ;;  %v15935_v8 = vld [vmem:[#allocation34_spill] sm:$0xff] }
 0x6ce   : > { %v5371_v17 = vmul.f32 %v5307_v39, %v15929_v42  ;;  %v5372_v0 = vmul.f32 %v5308_v18, %v15930_v3  ;;  %v2981_v49 = vmul.f32 %v15932_v14, %v15931_v30  ;;  %v2982_v56 = vmul.f32 %v15934_v46, %v15933_v37  ;;  %v15936_v55 = vld [vmem:[#allocation166_spill] sm:$0xff]  ;;  %v15937_v58 = vld [vmem:[#allocation36_spill] sm:$0xff]  ;;  %v15938_v13 = vld [vmem:[#allocation167_spill] sm:$0xff] }
 0x6cf   : > { %v5413_v25 = vadd.f32 %v5369_v19, %v5365_v57  ;;  %v5414_v48 = vadd.f32 %v5370_v4, %v5366_v2  ;;  %v2983_v59 = vmul.f32 %v15936_v55, %v15935_v8  ;;  %v2984_v16 = vmul.f32 %v15938_v13, %v15937_v58  ;;  %v15939_v5 = vld [vmem:[#allocation57_spill] sm:$0xff]  ;;  %v15940_v61 = vld [vmem:[#allocation168_spill] sm:$0xff]  ;;  %v15941_v39 = vld [vmem:[#allocation59_spill] sm:$0xff] }
 0x6d0   : > { %v5415_v15 = vadd.f32 %v5371_v17, %v5367_v47  ;;  %v5416_v62 = vadd.f32 %v5372_v0, %v5368_v1  ;;  %v2985_v51 = vmul.f32 %v15940_v61, %v15939_v5  ;;  %v15942_v18 = vld [vmem:[#allocation169_spill] sm:$0xff]  ;;  %v15943_v24 = vld [vmem:[#allocation58_spill] sm:$0xff]  ;;  %v15945_v11 = vld [vmem:[#allocation60_spill] sm:$0xff] }
 0x6d1   : > { %v2986_v35 = vmul.f32 %v15942_v18, %v15941_v39  ;;  %v15944_v40 = vld [vmem:[#allocation170_spill] sm:$0xff]  ;;  %v15946_v57 = vld [vmem:[#allocation171_spill] sm:$0xff]  ;;  %v15947_v19 = vld [vmem:[#allocation137_spill] sm:$0xff] }
 0x6d2   : > { %v2987_v10 = vmul.f32 %v15944_v40, %v15943_v24  ;;  %v2988_v2 = vmul.f32 %v15946_v57, %v15945_v11  ;;  %v12552_v28 = vadd.f32 %v2981_v49, %v15947_v19  ;;  %v15948_v4 = vld [vmem:[#allocation138_spill] sm:$0xff]  ;;  %v5437_v47 = vadd.f32 %v5415_v15, %v5413_v25  ;;  %v15949_v17 = vld [vmem:[#allocation129_spill] sm:$0xff]  ;;  %v15953_v39 = vld [vmem:[#allocation40_spill] sm:$0xff] }
 0x6d3   : > { %v12555_v42 = vadd.f32 %v2982_v56, %v15948_v4  ;;  %v5438_v1 = vadd.f32 %v5416_v62, %v5414_v48  ;;  %v12558_v3 = vadd.f32 %v2983_v59, %v15949_v17  ;;  %v15950_v0 = vld [vmem:[#allocation130_spill] sm:$0xff]  ;;  %v15951_v37 = vld [vmem:[#allocation37_spill] sm:$0xff]  ;;  %v15956_v48 = vrot.slane %v15932_v14, 7 }
 0x6d4   : > { %v12561_v30 = vadd.f32 %v2984_v16, %v15950_v0  ;;  %v12564_v8 = vadd.f32 %v2985_v51, %v15951_v37  ;;  %v15952_v58 = vld [vmem:[#allocation38_spill] sm:$0xff]  ;;  %v12570_v49 = vadd.f32 %v2987_v10, %v15953_v39  ;;  %v15954_v24 = vld [vmem:[#allocation61_spill] sm:$0xff]  ;;  %v15957_v59 = vrot.slane %v15750_v45, 7 }
 0x6d5   : > { %v12567_v5 = vadd.f32 %v2986_v35, %v15952_v58  ;;  %v12573_v56 = vadd.f32 %v2988_v2, %v15954_v24  ;;  %v12575_v25 = vadd.f32 %v5438_v1, %v5437_v47  ;;  %v15958_v15 = vrot.slane %v15934_v46, 7 }
 0x6d6   : > { %v3149_v16 = vsel %vm995_vm7, %v15957_v59, %v15956_v48  ;;  %v15959_v62 = vrot.slane %v15751_v60, 7  ;;  %v15960_v35 = vrot.slane %v15936_v55, 7  ;;  %v15961_v10 = vrot.slane %v15752_v32, 7 }
 0x6d7   : > { %15955 = vst [vmem:[#allocation32_spill] sm:$0xff] %v12575_v25  ;;  %v15962_v2 = vrot.slane %v15938_v13, 7  ;;  %v15963_v45 = vrot.slane %v15753_v50, 7  ;;  %v15964_v4 = vrot.slane %v15940_v61, 7  ;;  %v15965_v60 = vrot.slane %v15754_v6, 7  ;;  %5469 = vrot.lane.b32.xlu0 %v12575_v25, %s7068_s25  ;;  %v16048_v25 = vld [vmem:[#allocation24_spill] sm:$0xff] }
 0x6d8   : > { %v3150_v51 = vsel %vm995_vm7, %v15959_v62, %v15958_v15  ;;  %v3151_v11 = vsel %vm995_vm7, %v15961_v10, %v15960_v35  ;;  %v15966_v1 = vrot.slane %v15942_v18, 7  ;;  %v15967_v32 = vrot.slane %v15755_v53, 7 }
 0x6d9   : > { %v3152_v19 = vsel %vm995_vm7, %v15963_v45, %v15962_v2  ;;  %v3153_v47 = vsel %vm995_vm7, %v15965_v60, %v15964_v4  ;;  %v15968_v0 = vrot.slane %v15944_v40, 7  ;;  %v15969_v50 = vrot.slane %v15756_v43, 7  ;;  %v15975_v45 = vld [vmem:[#allocation145_spill] sm:$0xff] }
 0x6da   : > { %v3154_v17 = vsel %vm995_vm7, %v15967_v32, %v15966_v1  ;;  %v15970_v6 = vrot.slane %v15946_v57, 7  ;;  %v15971_v58 = vrot.slane %v15757_v7, 7  ;;  %v12628_v39 = vmul.f32 %v15932_v14, %v3149_v16 }
 0x6db   : > { %v3155_v37 = vsel %vm995_vm7, %v15969_v50, %v15968_v0  ;;  %v12631_v24 = vmul.f32 %v15934_v46, %v3150_v51  ;;  %v12634_v43 = vmul.f32 %v15936_v55, %v3151_v11  ;;  %v12637_v48 = vmul.f32 %v15938_v13, %v3152_v19  ;;  %5585 = vrot.lane.b32.xlu0 %v15975_v45, %s7068_s25 }
 0x6dc   : > { %v3156_v53 = vsel %vm995_vm7, %v15971_v58, %v15970_v6  ;;  %v12640_v59 = vmul.f32 %v15940_v61, %v3153_v47  ;;  %v12643_v7 = vmul.f32 %v15942_v18, %v3154_v17  ;;  %v12646_v15 = vmul.f32 %v15944_v40, %v3155_v37 }
 0x6dd   : > { %v12649_v14 = vmul.f32 %v15946_v57, %v3156_v53  ;;  %v14569_v46 = vrot.slane %v12552_v28, 6  ;;  %v14568_v55 = vrot.slane %v12555_v42, 6  ;;  %v14567_v16 = vrot.slane %v12558_v3, 6 }
 0x6de   : > { %v14566_v13 = vrot.slane %v12561_v30, 6  ;;  %v14557_v61 = vrot.slane %v12564_v8, 6  ;;  %v14556_v62 = vrot.slane %v12567_v5, 6  ;;  %v14555_v18 = vrot.slane %v12570_v49, 6 }
 0x6df   : > { %v14554_v40 = vrot.slane %v12573_v56, 6  ;;  %v15972_v57 = vrot.slane %v15768_v22, 6  ;;  %v15973_v35 = vrot.slane %v15771_v54, 6  ;;  %v15974_v11 = vrot.slane %v15774_v44, 6 }
 0x6e0   : > { %v15976_v22 = vrot.slane %v15777_v9, 6  ;;  %v15977_v19 = vrot.slane %v15780_v12, 6  ;;  %v15978_v4 = vrot.slane %v15783_v31, 6  ;;  %v15979_v9 = vrot.slane %v15786_v23, 6 }
 0x6e1   : > { %v3405_v51 = vsel %vm941_vm6, %v15972_v57, %v14569_v46  ;;  %v3406_v10 = vsel %vm941_vm6, %v15973_v35, %v14568_v55  ;;  %v3407_v2 = vsel %vm941_vm6, %v15974_v11, %v14567_v16  ;;  %v15980_v12 = vrot.slane %v15789_v27, 6 }
 0x6e2   : > { %v3408_v54 = vsel %vm941_vm6, %v15976_v22, %v14566_v13  ;;  %v3409_v44 = vsel %vm941_vm6, %v15977_v19, %v14557_v61  ;;  %v3410_v60 = vsel %vm941_vm6, %v15978_v4, %v14556_v62  ;;  %v3411_v47 = vsel %vm941_vm6, %v15979_v9, %v14555_v18 }
 0x6e3   : > { %v3412_v1 = vsel %vm941_vm6, %v15980_v12, %v14554_v40  ;;  %v3557_v32 = vmul.f32 %v3405_v51, %v12628_v39  ;;  %v3558_v31 = vmul.f32 %v3406_v10, %v12631_v24  ;;  %v3559_v17 = vmul.f32 %v3407_v2, %v12634_v43  ;;  %v16021_v40 = vld [vmem:[#allocation150_spill] sm:$0xff] }
 0x6e4   : > { %v3560_v0 = vmul.f32 %v3408_v54, %v12637_v48  ;;  %v3561_v23 = vmul.f32 %v3409_v44, %v12640_v59  ;;  %v3562_v50 = vmul.f32 %v3410_v60, %v12643_v7  ;;  %v3563_v37 = vmul.f32 %v3411_v47, %v12646_v15 }
 0x6e5   : > { %v3564_v6 = vmul.f32 %v3412_v1, %v12649_v14  ;;  %v12718_v27 = vadd.f32 %v3557_v32, %v12552_v28  ;;  %v12721_v58 = vadd.f32 %v3558_v31, %v12555_v42  ;;  %v12724_v53 = vadd.f32 %v3559_v17, %v12558_v3 }
 0x6e6   : > { %v12727_v57 = vadd.f32 %v3560_v0, %v12561_v30  ;;  %v12730_v51 = vadd.f32 %v3561_v23, %v12564_v8  ;;  %v12733_v35 = vadd.f32 %v3562_v50, %v12567_v5  ;;  %v12736_v10 = vadd.f32 %v3563_v37, %v12570_v49 }
 0x6e7   : > { %v12739_v11 = vadd.f32 %v3564_v6, %v12573_v56  ;;  %v14553_v2 = vrot.slane %v12628_v39, 6  ;;  %v14552_v45 = vrot.slane %v12631_v24, 6  ;;  %v14551_v22 = vrot.slane %v12634_v43, 6 }
 0x6e8   : > { %v14548_v54 = vrot.slane %v12637_v48, 6  ;;  %v14541_v19 = vrot.slane %v12640_v59, 6  ;;  %v14540_v44 = vrot.slane %v12643_v7, 6  ;;  %v14539_v4 = vrot.slane %v12646_v15, 6 }
 0x6e9   : > { %v14538_v60 = vrot.slane %v12649_v14, 6  ;;  %v15981_v9 = vrot.slane %v12052_v63, 6  ;;  %v15982_v12 = vrot.slane %v12055_v26, 6  ;;  %v15983_v32 = vrot.slane %v12058_v34, 6 }
 0x6ea   : > { %v15984_v63 = vrot.slane %v12061_v38, 6  ;;  %v15985_v26 = vrot.slane %v12064_v41, 6  ;;  %v15986_v34 = vrot.slane %v12067_v21, 6  ;;  %v15987_v38 = vrot.slane %v12072_v52, 6 }
 0x6eb   : > { %v3725_v47 = vsel %vm941_vm6, %v15981_v9, %v14553_v2  ;;  %v3726_v1 = vsel %vm941_vm6, %v15982_v12, %v14552_v45  ;;  %v3727_v31 = vsel %vm941_vm6, %v15983_v32, %v14551_v22  ;;  %v15988_v41 = vrot.slane %v12075_v36, 6  ;;  %v16019_v22 = vld [vmem:[#allocation149_spill] sm:$0xff] }
 0x6ec   : > { %v3728_v17 = vsel %vm941_vm6, %v15984_v63, %v14548_v54  ;;  %v3729_v0 = vsel %vm941_vm6, %v15985_v26, %v14541_v19  ;;  %v3730_v23 = vsel %vm941_vm6, %v15986_v34, %v14540_v44  ;;  %v3731_v50 = vsel %vm941_vm6, %v15987_v38, %v14539_v4 }
 0x6ed   : > { %v3732_v37 = vsel %vm941_vm6, %v15988_v41, %v14538_v60  ;;  %v12798_v6 = vmul.f32 %v3725_v47, %v12628_v39  ;;  %v12801_v21 = vmul.f32 %v3726_v1, %v12631_v24  ;;  %v12804_v9 = vmul.f32 %v3727_v31, %v12634_v43  ;;  %v15997_v60 = vld [vmem:[#allocation103_spill] sm:$0xff] }
 0x6ee   : > { %v12807_v52 = vmul.f32 %v3728_v17, %v12637_v48  ;;  %v12810_v12 = vmul.f32 %v3729_v0, %v12640_v59  ;;  %v12813_v36 = vmul.f32 %v3730_v23, %v12643_v7  ;;  %v12816_v32 = vmul.f32 %v3731_v50, %v12646_v15 }
 0x6ef   : > { %15989 = vst [vmem:[#allocation218_spill] sm:$0xff] %v12804_v9  ;;  %v12819_v47 = vmul.f32 %v3732_v37, %v12649_v14  ;;  %v14542_v1 = vrot.slane %v12718_v27, 4  ;;  %v14543_v31 = vrot.slane %v12721_v58, 4  ;;  %v14544_v63 = vrot.slane %v12724_v53, 4 }
 0x6f0   : > { %15990 = vst [vmem:[#allocation219_spill] sm:$0xff] %v12807_v52  ;;  %15991 = vst [vmem:[#allocation220_spill] sm:$0xff] %v12810_v12  ;;  %v14545_v17 = vrot.slane %v12727_v57, 4  ;;  %v14546_v26 = vrot.slane %v12730_v51, 4  ;;  %v14547_v0 = vrot.slane %v12733_v35, 4  ;;  %v14549_v34 = vrot.slane %v12736_v10, 4 }
 0x6f1   : > { %15992 = vst [vmem:[#allocation21_spill] sm:$0xff] %v12813_v36  ;;  %15993 = vst [vmem:[#allocation23_spill] sm:$0xff] %v12816_v32  ;;  %v14550_v23 = vrot.slane %v12739_v11, 4  ;;  %v15995_v38 = vrot.slane %v12136_v20, 4  ;;  %v15996_v41 = vrot.slane %v12139_v33, 4  ;;  %v15998_v4 = vrot.slane %v15997_v60, 4 }
 0x6f2   : > { %15994 = vst [vmem:[#allocation229_spill] sm:$0xff] %v12819_v47  ;;  %v15999_v20 = vld [vmem:[#allocation102_spill] sm:$0xff]  ;;  %v16001_v33 = vld [vmem:[#allocation104_spill] sm:$0xff]  ;;  %v16003_v60 = vld [vmem:[#allocation201_spill] sm:$0xff]  ;;  %v16020_v45 = vrot.slane %v16019_v22, 4  ;;  %v16022_v18 = vrot.slane %v16021_v40, 4 }
 0x6f3   : > { %v3981_v50 = vsel %vm833_vm4, %v15995_v38, %v14542_v1  ;;  %v3982_v37 = vsel %vm833_vm4, %v15996_v41, %v14543_v31  ;;  %v3983_v44 = vsel %vm833_vm4, %v15998_v4, %v14544_v63  ;;  %v16000_v19 = vrot.slane %v15999_v20, 4  ;;  %v16005_v20 = vld [vmem:[#allocation202_spill] sm:$0xff]  ;;  %v16025_v22 = vld [vmem:[#allocation152_spill] sm:$0xff]  ;;  %v16027_v40 = vld [vmem:[#allocation153_spill] sm:$0xff] }
 0x6f4   : > { %v16002_v1 = vrot.slane %v16001_v33, 4  ;;  %v16004_v31 = vrot.slane %v16003_v60, 4  ;;  %v16006_v63 = vrot.slane %v16005_v20, 4  ;;  %v16007_v33 = vld [vmem:[#allocation203_spill] sm:$0xff]  ;;  %v4134_v60 = vmul.f32 %v3982_v37, %v12801_v21 }
 0x6f5   : > { %v3984_v38 = vsel %vm833_vm4, %v16000_v19, %v14545_v17  ;;  %v16008_v17 = vrot.slane %v16007_v33, 4 }
 0x6f6   : > { %v3985_v41 = vsel %vm833_vm4, %v16002_v1, %v14546_v26  ;;  %v3986_v4 = vsel %vm833_vm4, %v16004_v31, %v14547_v0  ;;  %v3987_v19 = vsel %vm833_vm4, %v16006_v63, %v14549_v34  ;;  %v4133_v26 = vmul.f32 %v3981_v50, %v12798_v6 }
 0x6f7   : > { %v3988_v1 = vsel %vm833_vm4, %v16008_v17, %v14550_v23  ;;  %v4135_v31 = vmul.f32 %v3983_v44, %v12804_v9  ;;  %v4136_v0 = vmul.f32 %v3984_v38, %v12807_v52  ;;  %v4137_v20 = vmul.f32 %v3985_v41, %v12810_v12 }
 0x6f8   : > { %v4138_v54 = vmul.f32 %v3986_v4, %v12813_v36  ;;  %v4139_v63 = vmul.f32 %v3987_v19, %v12816_v32  ;;  %v4140_v34 = vmul.f32 %v3988_v1, %v12819_v47  ;;  %v12886_v33 = vadd.f32 %v4133_v26, %v12718_v27 }
 0x6f9   : > { %v12889_v17 = vadd.f32 %v4134_v60, %v12721_v58  ;;  %v12892_v50 = vadd.f32 %v4135_v31, %v12724_v53  ;;  %v12895_v44 = vadd.f32 %v4136_v0, %v12727_v57  ;;  %v12898_v37 = vadd.f32 %v4137_v20, %v12730_v51 }
 0x6fa   : > { %16009 = vst [vmem:[#allocation230_spill] sm:$0xff] %v12886_v33  ;;  %v12901_v38 = vadd.f32 %v4138_v54, %v12733_v35  ;;  %v12904_v41 = vadd.f32 %v4139_v63, %v12736_v10  ;;  %v12907_v26 = vadd.f32 %v4140_v34, %v12739_v11  ;;  %v14558_v4 = vrot.slane %v12798_v6, 4  ;;  %v16017_v34 = vld [vmem:[#allocation148_spill] sm:$0xff] }
 0x6fb   : > { %16010 = vst [vmem:[#allocation231_spill] sm:$0xff] %v12889_v17  ;;  %16011 = vst [vmem:[#allocation232_spill] sm:$0xff] %v12892_v50  ;;  %v14559_v19 = vrot.slane %v12801_v21, 4  ;;  %v14560_v1 = vrot.slane %v12804_v9, 4  ;;  %v14561_v0 = vrot.slane %v12807_v52, 4  ;;  %v14562_v60 = vrot.slane %v12810_v12, 4 }
 0x6fc   : > { %16012 = vst [vmem:[#allocation233_spill] sm:$0xff] %v12895_v44  ;;  %16013 = vst [vmem:[#allocation234_spill] sm:$0xff] %v12898_v37  ;;  %v14565_v31 = vrot.slane %v12813_v36, 4  ;;  %v14564_v54 = vrot.slane %v12816_v32, 4  ;;  %v14563_v20 = vrot.slane %v12819_v47, 4  ;;  %v16018_v63 = vrot.slane %v16017_v34, 4 }
 0x6fd   : > { %16014 = vst [vmem:[#allocation235_spill] sm:$0xff] %v12901_v38  ;;  %16015 = vst [vmem:[#allocation236_spill] sm:$0xff] %v12904_v41  ;;  %v4302_v2 = vsel %vm833_vm4, %v16020_v45, %v14559_v19  ;;  %v4303_v62 = vsel %vm833_vm4, %v16022_v18, %v14560_v1  ;;  %v16023_v34 = vld [vmem:[#allocation151_spill] sm:$0xff]  ;;  %v16028_v19 = vrot.slane %v16027_v40, 4 }
 0x6fe   : > { %16016 = vst [vmem:[#allocation141_spill] sm:$0xff] %v12907_v26  ;;  %v4301_v23 = vsel %vm833_vm4, %v16018_v63, %v14558_v4  ;;  %v16024_v61 = vrot.slane %v16023_v34, 4  ;;  %v16026_v4 = vrot.slane %v16025_v22, 4  ;;  %v16029_v34 = vld [vmem:[#allocation154_spill] sm:$0xff]  ;;  %v16031_v22 = vld [vmem:[#allocation155_spill] sm:$0xff]  ;;  %v12969_v40 = vmul.f32 %v4302_v2, %v12801_v21 }
 0x6ff   : > { %v4306_v18 = vsel %vm833_vm4, %v16028_v19, %v14565_v31  ;;  %v16030_v1 = vrot.slane %v16029_v34, 4  ;;  %v12972_v19 = vmul.f32 %v4303_v62, %v12804_v9  ;;  %v16041_v2 = vld [vmem:[#allocation50_spill] sm:$0xff]  ;;  %v16042_v62 = vld [vmem:[#allocation52_spill] sm:$0xff] }
 0x700   : > { %v4304_v63 = vsel %vm833_vm4, %v16024_v61, %v14561_v0  ;;  %v4305_v45 = vsel %vm833_vm4, %v16026_v4, %v14562_v60  ;;  %v16032_v0 = vrot.slane %v16031_v22, 4  ;;  %v12966_v60 = vmul.f32 %v4301_v23, %v12798_v6  ;;  %16034 = vst [vmem:[#allocation196_spill] sm:$0xff] %v12969_v40 }
 0x701   : > { %v4307_v61 = vsel %vm833_vm4, %v16030_v1, %v14564_v54  ;;  %16035 = vst [vmem:[#allocation197_spill] sm:$0xff] %v12972_v19  ;;  %v12975_v34 = vmul.f32 %v4304_v63, %v12807_v52  ;;  %v12978_v1 = vmul.f32 %v4305_v45, %v12810_v12  ;;  %v12981_v22 = vmul.f32 %v4306_v18, %v12813_v36  ;;  %v16043_v63 = vld [vmem:[#allocation223_spill] sm:$0xff]  ;;  %v16044_v45 = vld [vmem:[#allocation224_spill] sm:$0xff]  ;;  %v16045_v18 = vld [vmem:[#allocation225_spill] sm:$0xff] }
 0x702   : > { %v4308_v4 = vsel %vm833_vm4, %v16032_v0, %v14563_v20  ;;  %16033 = vst [vmem:[#allocation250_spill] sm:$0xff] %v12966_v60  ;;  %v12984_v0 = vmul.f32 %v4307_v61, %v12816_v32  ;;  %v4589_v20 = vmul.f32 %v12966_v60, %v16041_v2  ;;  %v4590_v54 = vmul.f32 %v12969_v40, %v16042_v62  ;;  %v16046_v61 = vld [vmem:[#allocation226_spill] sm:$0xff] }
 0x703   : > { %16036 = vst [vmem:[#allocation237_spill] sm:$0xff] %v12975_v34  ;;  %16037 = vst [vmem:[#allocation238_spill] sm:$0xff] %v12978_v1  ;;  %v12987_v23 = vmul.f32 %v4308_v4, %v12819_v47  ;;  %v4591_v31 = vmul.f32 %v12972_v19, %v16043_v63  ;;  %v4592_v13 = vmul.f32 %v12975_v34, %v16044_v45  ;;  %v16047_v4 = vld [vmem:[#allocation22_spill] sm:$0xff] }
 0x704   : > { %16038 = vst [vmem:[#allocation239_spill] sm:$0xff] %v12981_v22  ;;  %16039 = vst [vmem:[#allocation240_spill] sm:$0xff] %v12984_v0  ;;  %v4593_v16 = vmul.f32 %v12978_v1, %v16045_v18  ;;  %v4594_v55 = vmul.f32 %v12981_v22, %v16046_v61  ;;  %v4595_v46 = vmul.f32 %v12984_v0, %v16047_v4 }
 0x705   : > { %16040 = vst [vmem:[#allocation241_spill] sm:$0xff] %v12987_v23  ;;  %v4596_v2 = vmul.f32 %v12987_v23, %v16048_v25  ;;  %v13006_v62 = vadd.f32 %v4589_v20, %v12886_v33  ;;  %v13009_v63 = vadd.f32 %v4590_v54, %v12889_v17  ;;  %v13012_v45 = vadd.f32 %v4591_v31, %v12892_v50  ;;  %v16057_v54 = vld [vmem:[#allocation45_spill] sm:$0xff]  ;;  %v16059_v31 = vld [vmem:[#allocation47_spill] sm:$0xff]  ;;  %v16080_v33 = vld [vmem:[#allocation132_spill] sm:$0xff] }
 0x706   : > { %v13015_v18 = vadd.f32 %v4592_v13, %v12895_v44  ;;  %v13018_v61 = vadd.f32 %v4593_v16, %v12898_v37  ;;  %v13021_v4 = vadd.f32 %v4594_v55, %v12901_v38  ;;  %v13024_v25 = vadd.f32 %v4595_v46, %v12904_v41  ;;  %v16061_v44 = vld [vmem:[#allocation46_spill] sm:$0xff]  ;;  %v16063_v55 = vld [vmem:[#allocation48_spill] sm:$0xff]  ;;  %v16065_v46 = vld [vmem:[#allocation221_spill] sm:$0xff] }
 0x707   : > { %16049 = vst [vmem:[#allocation242_spill] sm:$0xff] %v13006_v62  ;;  %16050 = vst [vmem:[#allocation73_spill] sm:$0xff] %v13009_v63  ;;  %v13027_v20 = vadd.f32 %v4596_v2, %v12907_v26  ;;  %v13031_v17 = vmul.f32 %v12966_v60, %v16057_v54  ;;  %v13035_v13 = vmul.f32 %v12969_v40, %v16059_v31  ;;  %v16067_v26 = vld [vmem:[#allocation198_spill] sm:$0xff]  ;;  %v16071_v40 = vld [vmem:[#allocation199_spill] sm:$0xff] }
 0x708   : > { %16051 = vst [vmem:[#allocation75_spill] sm:$0xff] %v13012_v45  ;;  %16052 = vst [vmem:[#allocation74_spill] sm:$0xff] %v13015_v18  ;;  %v13039_v16 = vmul.f32 %v12972_v19, %v16061_v44  ;;  %v13043_v38 = vmul.f32 %v12975_v34, %v16063_v55  ;;  %v13047_v2 = vmul.f32 %v12978_v1, %v16065_v46  ;;  %v16069_v60 = vld [vmem:[#allocation222_spill] sm:$0xff]  ;;  %v16073_v19 = vld [vmem:[#allocation63_spill] sm:$0xff] }
 0x709   : > { %16053 = vst [vmem:[#allocation76_spill] sm:$0xff] %v13018_v61  ;;  %16054 = vst [vmem:[#allocation105_spill] sm:$0xff] %v13021_v4  ;;  %v13051_v54 = vmul.f32 %v12981_v22, %v16067_v26  ;;  %v13055_v31 = vmul.f32 %v12984_v0, %v16069_v60  ;;  %v13059_v44 = vmul.f32 %v12987_v23, %v16071_v40  ;;  %v16074_v34 = vld [vmem:[#allocation28_spill] sm:$0xff]  ;;  %v16075_v46 = vld [vmem:[#allocation62_spill] sm:$0xff] }
 0x70a   : > { %16055 = vst [vmem:[#allocation107_spill] sm:$0xff] %v13024_v25  ;;  %16056 = vst [vmem:[#allocation106_spill] sm:$0xff] %v13027_v20  ;;  %v4917_v55 = vmul.f32 %v13031_v17, %v16073_v19  ;;  %v4918_v41 = vmul.f32 %v13035_v13, %v16074_v34  ;;  %v4919_v1 = vmul.f32 %v13039_v16, %v16075_v46  ;;  %v16076_v37 = vld [vmem:[#allocation49_spill] sm:$0xff]  ;;  %v16077_v22 = vld [vmem:[#allocation64_spill] sm:$0xff] }
 0x70b   : > { %16058 = vst [vmem:[#allocation108_spill] sm:$0xff] %v13031_v17  ;;  %16060 = vst [vmem:[#allocation133_spill] sm:$0xff] %v13035_v13  ;;  %v4920_v26 = vmul.f32 %v13043_v38, %v16076_v37  ;;  %v4921_v60 = vmul.f32 %v13047_v2, %v16077_v22  ;;  %v16078_v0 = vld [vmem:[#allocation51_spill] sm:$0xff]  ;;  %v16079_v40 = vld [vmem:[#allocation200_spill] sm:$0xff]  ;;  %v4924_v19 = vmul.f32 %v13059_v44, %v16080_v33 }
 0x70c   : > { %16062 = vst [vmem:[#allocation135_spill] sm:$0xff] %v13039_v16  ;;  %16064 = vst [vmem:[#allocation134_spill] sm:$0xff] %v13043_v38  ;;  %v4922_v50 = vmul.f32 %v13051_v54, %v16078_v0  ;;  %v4923_v23 = vmul.f32 %v13055_v31, %v16079_v40  ;;  %v4981_v34 = vadd.f32 %v4917_v55, %v13006_v62  ;;  %v16081_v40 = vld [vmem:[#allocation29_spill] sm:$0xff]  ;;  %v16082_v33 = vld [vmem:[#allocation31_spill] sm:$0xff] }
 0x70d   : > { %16066 = vst [vmem:[#allocation136_spill] sm:$0xff] %v13047_v2  ;;  %16068 = vst [vmem:[#allocation25_spill] sm:$0xff] %v13051_v54  ;;  %v4982_v47 = vadd.f32 %v4918_v41, %v13009_v63  ;;  %v4983_v46 = vadd.f32 %v4919_v1, %v13012_v45  ;;  %v4984_v37 = vadd.f32 %v4920_v26, %v13015_v18  ;;  %v16083_v62 = vld [vmem:[#allocation30_spill] sm:$0xff]  ;;  %v16084_v1 = vld [vmem:[#allocation53_spill] sm:$0xff] }
 0x70e   : > { %16070 = vst [vmem:[#allocation142_spill] sm:$0xff] %v13055_v31  ;;  %16072 = vst [vmem:[#allocation27_spill] sm:$0xff] %v13059_v44  ;;  %v4985_v32 = vadd.f32 %v4921_v60, %v13018_v61  ;;  %v4986_v22 = vadd.f32 %v4922_v50, %v13021_v4  ;;  %v4987_v0 = vadd.f32 %v4923_v23, %v13024_v25  ;;  %v16085_v18 = vld [vmem:[#allocation55_spill] sm:$0xff]  ;;  %v16086_v50 = vld [vmem:[#allocation54_spill] sm:$0xff] }
 0x70f   : > { %v4988_v36 = vadd.f32 %v4924_v19, %v13027_v20  ;;  %v5109_v12 = vmul.f32 %v13031_v17, %v16081_v40  ;;  %v5110_v55 = vmul.f32 %v13035_v13, %v16082_v33  ;;  %v5111_v41 = vmul.f32 %v13039_v16, %v16083_v62  ;;  %v16087_v25 = vld [vmem:[#allocation56_spill] sm:$0xff]  ;;  %v16090_v13 = vld [vmem:[#allocation261_spill] sm:$0xff]  ;;  %v16091_v62 = vld [vmem:[#allocation262_spill] sm:$0xff] }
 0x710   : > { %v5112_v26 = vmul.f32 %v13043_v38, %v16084_v1  ;;  %v5113_v60 = vmul.f32 %v13047_v2, %v16085_v18  ;;  %v5114_v23 = vmul.f32 %v13051_v54, %v16086_v50  ;;  %v5115_v19 = vmul.f32 %v13055_v31, %v16087_v25  ;;  %v16088_v20 = vld [vmem:[#allocation204_spill] sm:$0xff]  ;;  %v16092_v61 = vld [vmem:[#allocation263_spill] sm:$0xff]  ;;  %v16094_v18 = vld [vmem:[#allocation265_spill] sm:$0xff] }
 0x711   : > { %v5116_v40 = vmul.f32 %v13059_v44, %v16088_v20  ;;  %v16089_v17 = vld [vmem:[#allocation260_spill] sm:$0xff]  ;;  %v5246_v4 = vmul.f32 %v5110_v55, %v16090_v13  ;;  %v5247_v16 = vmul.f32 %v5111_v41, %v16091_v62  ;;  %v16095_v63 = vld [vmem:[#allocation266_spill] sm:$0xff]  ;;  %v16096_v54 = vld [vmem:[#allocation267_spill] sm:$0xff] }
 0x712   : > { %v5245_v33 = vmul.f32 %v5109_v12, %v16089_v17  ;;  %v5248_v1 = vmul.f32 %v5112_v26, %v16092_v61  ;;  %v16093_v38 = vld [vmem:[#allocation264_spill] sm:$0xff]  ;;  %v5250_v2 = vmul.f32 %v5114_v23, %v16094_v18  ;;  %v5251_v50 = vmul.f32 %v5115_v19, %v16095_v63  ;;  %v16097_v55 = vld [vmem:[#allocation85_spill] sm:$0xff]  ;;  %v16098_v62 = vld [vmem:[#allocation87_spill] sm:$0xff] }
 0x713   : > { %v5249_v45 = vmul.f32 %v5113_v60, %v16093_v38  ;;  %v5252_v52 = vmul.f32 %v5116_v40, %v16096_v54  ;;  %v5310_v31 = vadd.f32 %v5246_v4, %v4982_v47  ;;  %v5311_v9 = vadd.f32 %v5247_v16, %v4983_v46  ;;  %v16099_v26 = vld [vmem:[#allocation86_spill] sm:$0xff]  ;;  %v16100_v60 = vld [vmem:[#allocation88_spill] sm:$0xff]  ;;  %v16101_v18 = vld [vmem:[#allocation117_spill] sm:$0xff] }
 0x714   : > { %v5309_v25 = vadd.f32 %v5245_v33, %v4981_v34  ;;  %v5312_v20 = vadd.f32 %v5248_v1, %v4984_v37  ;;  %v5314_v12 = vadd.f32 %v5250_v2, %v4986_v22  ;;  %v5315_v17 = vadd.f32 %v5251_v50, %v4987_v0  ;;  %v16102_v19 = vld [vmem:[#allocation119_spill] sm:$0xff]  ;;  %v16103_v34 = vld [vmem:[#allocation118_spill] sm:$0xff]  ;;  %v16104_v4 = vld [vmem:[#allocation120_spill] sm:$0xff] }
 0x715   : > { %v5313_v44 = vadd.f32 %v5249_v45, %v4985_v32  ;;  %v5316_v13 = vadd.f32 %v5252_v52, %v4988_v36  ;;  %v5374_v61 = vmul.f32 %v5310_v31, %v16098_v62  ;;  %v5375_v38 = vmul.f32 %v5311_v9, %v16099_v26  ;;  %v16105_v32 = vld [vmem:[#allocation206_spill] sm:$0xff]  ;;  %v16108_v2 = vld [vmem:[#allocation207_spill] sm:$0xff]  ;;  %v16111_v46 = vld [vmem:[#allocation208_spill] sm:$0xff] }
 0x716   : > { %v5373_v41 = vmul.f32 %v5309_v25, %v16097_v55  ;;  %v5376_v23 = vmul.f32 %v5312_v20, %v16100_v60  ;;  %v5378_v54 = vmul.f32 %v5314_v12, %v16102_v19  ;;  %v5379_v47 = vmul.f32 %v5315_v17, %v16103_v34  ;;  %v16114_v1 = vld [vmem:[#allocation210_spill] sm:$0xff]  ;;  %v16117_v12 = vld [vmem:[#allocation211_spill] sm:$0xff]  ;;  %v16120_v55 = vld [vmem:[#allocation212_spill] sm:$0xff] }
 0x717   : > { %v5377_v63 = vmul.f32 %v5313_v44, %v16101_v18  ;;  %v5380_v16 = vmul.f32 %v5316_v13, %v16104_v4  ;;  %v16106_v45 = vrot.slane %v16105_v32, 6  ;;  %v16107_v52 = vrot.slane %v12552_v28, 6  ;;  %v16123_v26 = vld [vmem:[#allocation214_spill] sm:$0xff]  ;;  %v16126_v18 = vld [vmem:[#allocation215_spill] sm:$0xff]  ;;  %v16130_v34 = vld [vmem:[#allocation184_spill] sm:$0xff] }
 0x718   : > { %v16109_v31 = vrot.slane %v16108_v2, 6  ;;  %v16110_v9 = vrot.slane %v12555_v42, 6  ;;  %v16112_v37 = vrot.slane %v16111_v46, 6  ;;  %v16113_v22 = vrot.slane %v12558_v3, 6 }
 0x719   : > { %v3397_v36 = vsel %vm941_vm6, %v16107_v52, %v16106_v45  ;;  %v5417_v40 = vadd.f32 %v5377_v63, %v5373_v41  ;;  %v5418_v33 = vadd.f32 %v5378_v54, %v5374_v61  ;;  %v5419_v28 = vadd.f32 %v5379_v47, %v5375_v38  ;;  %v16129_v54 = vld [vmem:[#allocation180_spill] sm:$0xff]  ;;  %v16132_v52 = vld [vmem:[#allocation191_spill] sm:$0xff] }
 0x71a   : > { %v3398_v44 = vsel %vm941_vm6, %v16110_v9, %v16109_v31  ;;  %v3399_v0 = vsel %vm941_vm6, %v16113_v22, %v16112_v37  ;;  %v16115_v50 = vrot.slane %v16114_v1, 6  ;;  %v16116_v25 = vrot.slane %v12561_v30, 6  ;;  %v16133_v31 = vld [vmem:[#allocation192_spill] sm:$0xff]  ;;  %v16134_v37 = vld [vmem:[#allocation41_spill] sm:$0xff] }
 0x71b   : > { %v5420_v20 = vadd.f32 %v5380_v16, %v5376_v23  ;;  %v16118_v17 = vrot.slane %v16117_v12, 6  ;;  %v16119_v13 = vrot.slane %v12564_v8, 6  ;;  %v16121_v62 = vrot.slane %v16120_v55, 6  ;;  %v16131_v16 = vld [vmem:[#allocation189_spill] sm:$0xff] }
 0x71c   : > { %v3400_v42 = vsel %vm941_vm6, %v16116_v25, %v16115_v50  ;;  %v16122_v41 = vrot.slane %v12567_v5, 6  ;;  %v16124_v30 = vrot.slane %v16123_v26, 6  ;;  %v16125_v38 = vrot.slane %v12570_v49, 6  ;;  %v16136_v50 = vld [vmem:[#allocation42_spill] sm:$0xff] }
 0x71d   : > { %v3401_v3 = vsel %vm941_vm6, %v16119_v13, %v16118_v17  ;;  %v5439_v23 = vadd.f32 %v5419_v28, %v5417_v40  ;;  %v16127_v8 = vrot.slane %v16126_v18, 6  ;;  %v16128_v63 = vrot.slane %v12573_v56, 6  ;;  %v16135_v40 = vld [vmem:[#allocation43_spill] sm:$0xff] }
 0x71e   : > { %v3402_v61 = vsel %vm941_vm6, %v16122_v41, %v16121_v62  ;;  %v3403_v60 = vsel %vm941_vm6, %v16125_v38, %v16124_v30  ;;  %v3565_v5 = vmul.f32 %v3397_v36, %v16129_v54  ;;  %v3566_v47 = vmul.f32 %v3398_v44, %v16130_v34 }
 0x71f   : > { %v3404_v19 = vsel %vm941_vm6, %v16128_v63, %v16127_v8  ;;  %v5440_v4 = vadd.f32 %v5420_v20, %v5418_v33  ;;  %v3567_v45 = vmul.f32 %v3399_v0, %v16131_v16  ;;  %v3568_v49 = vmul.f32 %v3400_v42, %v16132_v52 }
 0x720   : > { %v3569_v9 = vmul.f32 %v3401_v3, %v16133_v31  ;;  %v3570_v22 = vmul.f32 %v3402_v61, %v16134_v37  ;;  %v3571_v28 = vmul.f32 %v3403_v60, %v16135_v40  ;;  %v3572_v56 = vmul.f32 %v3404_v19, %v16136_v50 }
 0x721   : > { %v13174_v25 = vadd.f32 %v3565_v5, %v16105_v32  ;;  %v13176_v17 = vadd.f32 %v5440_v4, %v5439_v23  ;;  %v13179_v36 = vadd.f32 %v3566_v47, %v16108_v2  ;;  %v13182_v44 = vadd.f32 %v3567_v45, %v16111_v46 }
 0x722   : > { %v13185_v0 = vadd.f32 %v3568_v49, %v16114_v1  ;;  %v13188_v33 = vadd.f32 %v3569_v9, %v16117_v12  ;;  %v13191_v42 = vadd.f32 %v3570_v22, %v16120_v55  ;;  %v13194_v32 = vadd.f32 %v3571_v28, %v16123_v26 }
 0x723   : > { %16137 = vst [vmem:[#allocation39_spill] sm:$0xff] %v13176_v17  ;;  %v13197_v20 = vadd.f32 %v3572_v56, %v16126_v18  ;;  %5471 = vrot.lane.b32.xlu1 %v13176_v17, %s7068_s25  ;;  %v16138_v2 = vrot.slane %v16129_v54, 6  ;;  %v16139_v46 = vrot.slane %v12628_v39, 6  ;;  %v16140_v12 = vrot.slane %v16130_v34, 6 }
 0x724   : > { %v16141_v13 = vrot.slane %v12631_v24, 6  ;;  %v16142_v55 = vrot.slane %v16131_v16, 6  ;;  %v16143_v62 = vrot.slane %v12634_v43, 6  ;;  %v16144_v61 = vrot.slane %v16132_v52, 6 }
 0x725   : > { %v3717_v1 = vsel %vm941_vm6, %v16139_v46, %v16138_v2  ;;  %v16145_v39 = vrot.slane %v12637_v48, 6  ;;  %v16146_v30 = vrot.slane %v16133_v31, 6  ;;  %v16147_v24 = vrot.slane %v12640_v59, 6 }
 0x726   : > { %v3718_v3 = vsel %vm941_vm6, %v16141_v13, %v16140_v12  ;;  %v3719_v41 = vsel %vm941_vm6, %v16143_v62, %v16142_v55  ;;  %v16148_v60 = vrot.slane %v16134_v37, 6  ;;  %v16149_v43 = vrot.slane %v12643_v7, 6 }
 0x727   : > { %v3720_v26 = vsel %vm941_vm6, %v16145_v39, %v16144_v61  ;;  %v3721_v38 = vsel %vm941_vm6, %v16147_v24, %v16146_v30  ;;  %v16150_v18 = vrot.slane %v16135_v40, 6  ;;  %v16151_v48 = vrot.slane %v12646_v15, 6 }
 0x728   : > { %v3722_v23 = vsel %vm941_vm6, %v16149_v43, %v16148_v60  ;;  %v16152_v63 = vrot.slane %v16136_v50, 6  ;;  %v16153_v59 = vrot.slane %v12649_v14, 6  ;;  %v13250_v5 = vmul.f32 %v3717_v1, %v16129_v54 }
 0x729   : > { %v3723_v8 = vsel %vm941_vm6, %v16151_v48, %v16150_v18  ;;  %v13253_v7 = vmul.f32 %v3718_v3, %v16130_v34  ;;  %v13256_v47 = vmul.f32 %v3719_v41, %v16131_v16  ;;  %v13259_v15 = vmul.f32 %v3720_v26, %v16132_v52  ;;  %v16154_v34 = vld [vmem:[#allocation144_spill] sm:$0xff] }
 0x72a   : > { %v3724_v19 = vsel %vm941_vm6, %v16153_v59, %v16152_v63  ;;  %v13262_v4 = vmul.f32 %v3721_v38, %v16133_v31  ;;  %v13265_v14 = vmul.f32 %v3722_v23, %v16134_v37  ;;  %v13268_v45 = vmul.f32 %v3723_v8, %v16135_v40  ;;  %5587 = vrot.lane.b32.xlu1 %v16154_v34, %s7068_s25 }
 0x72b   : > { %v13271_v54 = vmul.f32 %v3724_v19, %v16136_v50  ;;  %v14624_v16 = vrot.slane %v13174_v25, 4  ;;  %v14623_v52 = vrot.slane %v13179_v36, 4  ;;  %v14622_v49 = vrot.slane %v13182_v44, 4 }
 0x72c   : > { %v14621_v31 = vrot.slane %v13185_v0, 4  ;;  %v14620_v9 = vrot.slane %v13188_v33, 4  ;;  %v14619_v37 = vrot.slane %v13191_v42, 4  ;;  %v14618_v22 = vrot.slane %v13194_v32, 4 }
 0x72d   : > { %v14617_v40 = vrot.slane %v13197_v20, 4  ;;  %v16155_v28 = vrot.slane %v12718_v27, 4  ;;  %v16156_v56 = vrot.slane %v12721_v58, 4  ;;  %v16157_v46 = vrot.slane %v12724_v53, 4 }
 0x72e   : > { %v16158_v27 = vrot.slane %v12727_v57, 4  ;;  %v16159_v58 = vrot.slane %v12730_v51, 4  ;;  %v16160_v53 = vrot.slane %v12733_v35, 4  ;;  %v16161_v57 = vrot.slane %v12736_v10, 4 }
 0x72f   : > { %v3973_v50 = vsel %vm833_vm4, %v16155_v28, %v14624_v16  ;;  %v3974_v2 = vsel %vm833_vm4, %v16156_v56, %v14623_v52  ;;  %v3975_v1 = vsel %vm833_vm4, %v16157_v46, %v14622_v49  ;;  %v16162_v51 = vrot.slane %v12739_v11, 4  ;;  %v16209_v49 = vld [vmem:[#allocation194_spill] sm:$0xff]  ;;  %v16210_v52 = vld [vmem:[#allocation195_spill] sm:$0xff] }
 0x730   : > { %v3976_v12 = vsel %vm833_vm4, %v16158_v27, %v14621_v31  ;;  %v3977_v13 = vsel %vm833_vm4, %v16159_v58, %v14620_v9  ;;  %v3978_v3 = vsel %vm833_vm4, %v16160_v53, %v14619_v37  ;;  %v3979_v55 = vsel %vm833_vm4, %v16161_v57, %v14618_v22  ;;  %v16170_v58 = vld [vmem:[#allocation218_spill] sm:$0xff]  ;;  %v16206_v22 = vld [vmem:[#allocation139_spill] sm:$0xff]  ;;  %v16207_v37 = vld [vmem:[#allocation44_spill] sm:$0xff] }
 0x731   : > { %v3980_v62 = vsel %vm833_vm4, %v16162_v51, %v14617_v40  ;;  %v4141_v41 = vmul.f32 %v3973_v50, %v13250_v5  ;;  %v4142_v35 = vmul.f32 %v3974_v2, %v13253_v7  ;;  %v4143_v61 = vmul.f32 %v3975_v1, %v13256_v47  ;;  %v16205_v40 = vld [vmem:[#allocation241_spill] sm:$0xff] }
 0x732   : > { %v4144_v39 = vmul.f32 %v3976_v12, %v13259_v15  ;;  %v4145_v10 = vmul.f32 %v3977_v13, %v13262_v4  ;;  %v4146_v26 = vmul.f32 %v3978_v3, %v13265_v14  ;;  %v4147_v30 = vmul.f32 %v3979_v55, %v13268_v45 }
 0x733   : > { %v4148_v24 = vmul.f32 %v3980_v62, %v13271_v54  ;;  %v13340_v11 = vadd.f32 %v4141_v41, %v13174_v25  ;;  %v13343_v38 = vadd.f32 %v4142_v35, %v13179_v36  ;;  %v13346_v60 = vadd.f32 %v4143_v61, %v13182_v44  ;;  %v16176_v62 = vld [vmem:[#allocation21_spill] sm:$0xff]  ;;  %v16178_v61 = vld [vmem:[#allocation23_spill] sm:$0xff] }
 0x734   : > { %v13349_v43 = vadd.f32 %v4144_v39, %v13185_v0  ;;  %v13352_v23 = vadd.f32 %v4145_v10, %v13188_v33  ;;  %v13355_v18 = vadd.f32 %v4146_v26, %v13191_v42  ;;  %v13358_v48 = vadd.f32 %v4147_v30, %v13194_v32  ;;  %v16180_v26 = vld [vmem:[#allocation229_spill] sm:$0xff] }
 0x735   : > { %v13361_v8 = vadd.f32 %v4148_v24, %v13197_v20  ;;  %v14616_v63 = vrot.slane %v13250_v5, 4  ;;  %v14615_v59 = vrot.slane %v13253_v7, 4  ;;  %v14614_v19 = vrot.slane %v13256_v47, 4 }
 0x736   : > { %16163 = vst [vmem:[#allocation26_spill] sm:$0xff] %v13349_v43  ;;  %16164 = vst [vmem:[#allocation227_spill] sm:$0xff] %v13352_v23  ;;  %v14613_v34 = vrot.slane %v13259_v15, 4  ;;  %v14612_v28 = vrot.slane %v13262_v4, 4  ;;  %v14611_v50 = vrot.slane %v13265_v14, 4  ;;  %v14610_v56 = vrot.slane %v13268_v45, 4 }
 0x737   : > { %16165 = vst [vmem:[#allocation228_spill] sm:$0xff] %v13355_v18  ;;  %16166 = vst [vmem:[#allocation140_spill] sm:$0xff] %v13358_v48  ;;  %v14609_v2 = vrot.slane %v13271_v54, 4  ;;  %v16168_v46 = vrot.slane %v12798_v6, 4  ;;  %v16169_v27 = vrot.slane %v12801_v21, 4  ;;  %v16171_v13 = vrot.slane %v16170_v58, 4 }
 0x738   : > { %16167 = vst [vmem:[#allocation67_spill] sm:$0xff] %v13361_v8  ;;  %v16172_v6 = vld [vmem:[#allocation219_spill] sm:$0xff]  ;;  %v16174_v21 = vld [vmem:[#allocation220_spill] sm:$0xff]  ;;  %v16177_v41 = vrot.slane %v16176_v62, 4  ;;  %v16179_v39 = vrot.slane %v16178_v61, 4  ;;  %v16181_v30 = vrot.slane %v16180_v26, 4 }
 0x739   : > { %v4293_v1 = vsel %vm833_vm4, %v16168_v46, %v14616_v63  ;;  %v4294_v12 = vsel %vm833_vm4, %v16169_v27, %v14615_v59  ;;  %v4295_v53 = vsel %vm833_vm4, %v16171_v13, %v14614_v19  ;;  %v16173_v3 = vrot.slane %v16172_v6, 4  ;;  %v16200_v19 = vld [vmem:[#allocation197_spill] sm:$0xff]  ;;  %v16202_v59 = vld [vmem:[#allocation238_spill] sm:$0xff]  ;;  %v16204_v63 = vld [vmem:[#allocation240_spill] sm:$0xff] }
 0x73a   : > { %v16175_v55 = vrot.slane %v16174_v21, 4  ;;  %v4298_v35 = vsel %vm833_vm4, %v16177_v41, %v14611_v50  ;;  %v4299_v10 = vsel %vm833_vm4, %v16179_v39, %v14610_v56  ;;  %v4300_v24 = vsel %vm833_vm4, %v16181_v30, %v14609_v2  ;;  %v16196_v30 = vld [vmem:[#allocation236_spill] sm:$0xff]  ;;  %v16197_v2 = vld [vmem:[#allocation141_spill] sm:$0xff] }
 0x73b   : > { %v4296_v57 = vsel %vm833_vm4, %v16173_v3, %v14613_v34  ;;  %v13420_v46 = vmul.f32 %v4293_v1, %v13250_v5  ;;  %v13423_v27 = vmul.f32 %v4294_v12, %v13253_v7  ;;  %v13426_v58 = vmul.f32 %v4295_v53, %v13256_v47  ;;  %v16190_v12 = vld [vmem:[#allocation230_spill] sm:$0xff]  ;;  %v16191_v53 = vld [vmem:[#allocation231_spill] sm:$0xff] }
 0x73c   : > { %v4297_v51 = vsel %vm833_vm4, %v16175_v55, %v14612_v28  ;;  %v13429_v13 = vmul.f32 %v4296_v57, %v13259_v15  ;;  %v13435_v3 = vmul.f32 %v4298_v35, %v13265_v14  ;;  %v13438_v21 = vmul.f32 %v4299_v10, %v13268_v45  ;;  %v16192_v57 = vld [vmem:[#allocation232_spill] sm:$0xff]  ;;  %v16194_v35 = vld [vmem:[#allocation234_spill] sm:$0xff]  ;;  %v16195_v10 = vld [vmem:[#allocation235_spill] sm:$0xff] }
 0x73d   : > { %16182 = vst [vmem:[#allocation66_spill] sm:$0xff] %v13420_v46  ;;  %16183 = vst [vmem:[#allocation68_spill] sm:$0xff] %v13423_v27  ;;  %v13432_v6 = vmul.f32 %v4297_v51, %v13262_v4  ;;  %v13441_v1 = vmul.f32 %v4300_v24, %v13271_v54  ;;  %v4597_v55 = vmul.f32 %v13420_v46, %v16190_v12  ;;  %v16193_v51 = vld [vmem:[#allocation233_spill] sm:$0xff] }
 0x73e   : > { %16184 = vst [vmem:[#allocation97_spill] sm:$0xff] %v13426_v58  ;;  %16185 = vst [vmem:[#allocation99_spill] sm:$0xff] %v13429_v13  ;;  %v4598_v62 = vmul.f32 %v13423_v27, %v16191_v53  ;;  %v4599_v41 = vmul.f32 %v13426_v58, %v16192_v57  ;;  %v4600_v61 = vmul.f32 %v13429_v13, %v16193_v51 }
 0x73f   : > { %16186 = vst [vmem:[#allocation98_spill] sm:$0xff] %v13432_v6  ;;  %16187 = vst [vmem:[#allocation100_spill] sm:$0xff] %v13435_v3  ;;  %v4601_v39 = vmul.f32 %v13432_v6, %v16194_v35  ;;  %v4602_v26 = vmul.f32 %v13435_v3, %v16195_v10  ;;  %v4603_v24 = vmul.f32 %v13438_v21, %v16196_v30  ;;  %v16198_v30 = vld [vmem:[#allocation250_spill] sm:$0xff] }
 0x740   : > { %16188 = vst [vmem:[#allocation156_spill] sm:$0xff] %v13438_v21  ;;  %16189 = vst [vmem:[#allocation157_spill] sm:$0xff] %v13441_v1  ;;  %v4604_v12 = vmul.f32 %v13441_v1, %v16197_v2  ;;  %v4661_v53 = vadd.f32 %v4597_v55, %v13340_v11  ;;  %v4662_v56 = vadd.f32 %v4598_v62, %v13343_v38  ;;  %v16199_v2 = vld [vmem:[#allocation196_spill] sm:$0xff] }
 0x741   : > { %v4663_v57 = vadd.f32 %v4599_v41, %v13346_v60  ;;  %v4664_v51 = vadd.f32 %v4600_v61, %v13349_v43  ;;  %v4665_v50 = vadd.f32 %v4601_v39, %v13352_v23  ;;  %v4666_v35 = vadd.f32 %v4602_v26, %v13355_v18  ;;  %v16201_v41 = vld [vmem:[#allocation237_spill] sm:$0xff]  ;;  %v16203_v26 = vld [vmem:[#allocation239_spill] sm:$0xff]  ;;  %v16218_v23 = vld [vmem:[#allocation110_spill] sm:$0xff] }
 0x742   : > { %v4667_v10 = vadd.f32 %v4603_v24, %v13358_v48  ;;  %v4668_v28 = vadd.f32 %v4604_v12, %v13361_v8  ;;  %v4789_v34 = vmul.f32 %v13420_v46, %v16198_v30  ;;  %v4790_v55 = vmul.f32 %v13423_v27, %v16199_v2  ;;  %v16214_v46 = vld [vmem:[#allocation78_spill] sm:$0xff]  ;;  %v16215_v8 = vld [vmem:[#allocation80_spill] sm:$0xff]  ;;  %v16216_v48 = vld [vmem:[#allocation109_spill] sm:$0xff] }
 0x743   : > { %v4791_v62 = vmul.f32 %v13426_v58, %v16200_v19  ;;  %v4792_v61 = vmul.f32 %v13429_v13, %v16201_v41  ;;  %v4793_v39 = vmul.f32 %v13432_v6, %v16202_v59  ;;  %v4794_v24 = vmul.f32 %v13435_v3, %v16203_v26  ;;  %v16208_v19 = vld [vmem:[#allocation193_spill] sm:$0xff]  ;;  %v16211_v59 = vld [vmem:[#allocation259_spill] sm:$0xff]  ;;  %v16219_v43 = vld [vmem:[#allocation112_spill] sm:$0xff] }
 0x744   : > { %v4795_v12 = vmul.f32 %v13438_v21, %v16204_v63  ;;  %v4796_v30 = vmul.f32 %v13441_v1, %v16205_v40  ;;  %v4925_v2 = vmul.f32 %v4789_v34, %v16206_v22  ;;  %v4926_v9 = vmul.f32 %v4790_v55, %v16207_v37  ;;  %v16212_v6 = vld [vmem:[#allocation77_spill] sm:$0xff]  ;;  %v16213_v3 = vld [vmem:[#allocation79_spill] sm:$0xff] }
 0x745   : > { %v4927_v31 = vmul.f32 %v4791_v62, %v16208_v19  ;;  %v4928_v41 = vmul.f32 %v4792_v61, %v16209_v49  ;;  %v4929_v16 = vmul.f32 %v4793_v39, %v16210_v52  ;;  %v4930_v17 = vmul.f32 %v4794_v24, %v16211_v59  ;;  %v16217_v18 = vld [vmem:[#allocation111_spill] sm:$0xff] }
 0x746   : > { %v4931_v26 = vmul.f32 %v4795_v12, %v16212_v6  ;;  %v4932_v13 = vmul.f32 %v4796_v30, %v16213_v3  ;;  %v4989_v63 = vadd.f32 %v4925_v2, %v4661_v53  ;;  %v4990_v21 = vadd.f32 %v4926_v9, %v4662_v56  ;;  %v16220_v53 = vld [vmem:[#allocation217_spill] sm:$0xff] }
 0x747   : > { %v4991_v58 = vadd.f32 %v4927_v31, %v4663_v57  ;;  %v4992_v40 = vadd.f32 %v4928_v41, %v4664_v51  ;;  %v4993_v1 = vadd.f32 %v4929_v16, %v4665_v50  ;;  %v4994_v22 = vadd.f32 %v4930_v17, %v4666_v35  ;;  %v16221_v31 = vld [vmem:[#allocation131_spill] sm:$0xff]  ;;  %v16222_v16 = vld [vmem:[#allocation162_spill] sm:$0xff]  ;;  %v16226_v57 = vld [vmem:[#allocation245_spill] sm:$0xff] }
 0x748   : > { %v4995_v27 = vadd.f32 %v4931_v26, %v4667_v10  ;;  %v4996_v37 = vadd.f32 %v4932_v13, %v4668_v28  ;;  %v5117_v19 = vmul.f32 %v4789_v34, %v16214_v46  ;;  %v5118_v49 = vmul.f32 %v4790_v55, %v16215_v8  ;;  %v16223_v50 = vld [vmem:[#allocation163_spill] sm:$0xff]  ;;  %v16225_v46 = vld [vmem:[#allocation244_spill] sm:$0xff]  ;;  %v16227_v51 = vld [vmem:[#allocation246_spill] sm:$0xff] }
 0x749   : > { %v5119_v52 = vmul.f32 %v4791_v62, %v16216_v48  ;;  %v5120_v59 = vmul.f32 %v4792_v61, %v16217_v18  ;;  %v5121_v6 = vmul.f32 %v4793_v39, %v16218_v23  ;;  %v5122_v3 = vmul.f32 %v4794_v24, %v16219_v43  ;;  %v16224_v13 = vld [vmem:[#allocation243_spill] sm:$0xff]  ;;  %v16229_v10 = vld [vmem:[#allocation248_spill] sm:$0xff]  ;;  %v16230_v41 = vld [vmem:[#allocation89_spill] sm:$0xff] }
 0x74a   : > { %v5123_v9 = vmul.f32 %v4795_v12, %v16220_v53  ;;  %v5124_v56 = vmul.f32 %v4796_v30, %v16221_v31  ;;  %v5253_v17 = vmul.f32 %v5117_v19, %v16222_v16  ;;  %v5254_v28 = vmul.f32 %v5118_v49, %v16223_v50  ;;  %v16228_v35 = vld [vmem:[#allocation247_spill] sm:$0xff]  ;;  %v16234_v53 = vld [vmem:[#allocation121_spill] sm:$0xff] }
 0x74b   : > { %v5255_v34 = vmul.f32 %v5119_v52, %v16224_v13  ;;  %v5256_v8 = vmul.f32 %v5120_v59, %v16225_v46  ;;  %v5257_v48 = vmul.f32 %v5121_v6, %v16226_v57  ;;  %v5258_v18 = vmul.f32 %v5122_v3, %v16227_v51  ;;  %v16231_v19 = vld [vmem:[#allocation91_spill] sm:$0xff]  ;;  %v16232_v52 = vld [vmem:[#allocation90_spill] sm:$0xff]  ;;  %v16233_v6 = vld [vmem:[#allocation92_spill] sm:$0xff] }
 0x74c   : > { %v5259_v23 = vmul.f32 %v5123_v9, %v16228_v35  ;;  %v5260_v43 = vmul.f32 %v5124_v56, %v16229_v10  ;;  %v5317_v55 = vadd.f32 %v5253_v17, %v4989_v63  ;;  %v5318_v62 = vadd.f32 %v5254_v28, %v4990_v21  ;;  %v16235_v31 = vld [vmem:[#allocation123_spill] sm:$0xff]  ;;  %v16236_v63 = vld [vmem:[#allocation122_spill] sm:$0xff]  ;;  %v16241_v16 = vld [vmem:[#allocation173_spill] sm:$0xff] }
 0x74d   : > { %v5319_v61 = vadd.f32 %v5255_v34, %v4991_v58  ;;  %v5320_v39 = vadd.f32 %v5256_v8, %v4992_v40  ;;  %v5321_v24 = vadd.f32 %v5257_v48, %v4993_v1  ;;  %v5322_v12 = vadd.f32 %v5258_v18, %v4994_v22  ;;  %v16237_v58 = vld [vmem:[#allocation124_spill] sm:$0xff]  ;;  %v16244_v13 = vld [vmem:[#allocation174_spill] sm:$0xff]  ;;  %v16247_v57 = vld [vmem:[#allocation175_spill] sm:$0xff] }
 0x74e   : > { %v5323_v30 = vadd.f32 %v5259_v23, %v4995_v27  ;;  %v5324_v2 = vadd.f32 %v5260_v43, %v4996_v37  ;;  %v5381_v26 = vmul.f32 %v5317_v55, %v16230_v41  ;;  %v5382_v49 = vmul.f32 %v5318_v62, %v16231_v19  ;;  %v16238_v1 = vld [vmem:[#allocation172_spill] sm:$0xff]  ;;  %v16253_v62 = vld [vmem:[#allocation177_spill] sm:$0xff]  ;;  %v16259_v41 = vld [vmem:[#allocation179_spill] sm:$0xff] }
 0x74f   : > { %v5383_v59 = vmul.f32 %v5319_v61, %v16232_v52  ;;  %v5384_v3 = vmul.f32 %v5320_v39, %v16233_v6  ;;  %v5385_v9 = vmul.f32 %v5321_v24, %v16234_v53  ;;  %v5386_v56 = vmul.f32 %v5322_v12, %v16235_v31  ;;  %v16250_v10 = vld [vmem:[#allocation176_spill] sm:$0xff]  ;;  %v16256_v24 = vld [vmem:[#allocation178_spill] sm:$0xff]  ;;  %v16264_v53 = vld [vmem:[#allocation183_spill] sm:$0xff] }
 0x750   : > { %v5387_v21 = vmul.f32 %v5323_v30, %v16236_v63  ;;  %v5388_v40 = vmul.f32 %v5324_v2, %v16237_v58  ;;  %v16239_v22 = vrot.slane %v16238_v1, 4  ;;  %v16240_v27 = vrot.slane %v13174_v25, 4  ;;  %v16263_v6 = vld [vmem:[#allocation182_spill] sm:$0xff]  ;;  %v16265_v31 = vld [vmem:[#allocation185_spill] sm:$0xff] }
 0x751   : > { %v16242_v17 = vrot.slane %v16241_v16, 4  ;;  %v16243_v50 = vrot.slane %v13179_v36, 4  ;;  %v16245_v34 = vrot.slane %v16244_v13, 4  ;;  %v16246_v46 = vrot.slane %v13182_v44, 4 }
 0x752   : > { %v3965_v37 = vsel %vm833_vm4, %v16240_v27, %v16239_v22  ;;  %v16248_v48 = vrot.slane %v16247_v57, 4  ;;  %v16249_v25 = vrot.slane %v13185_v0, 4  ;;  %v5421_v18 = vadd.f32 %v5385_v9, %v5381_v26  ;;  %v16269_v27 = vld [vmem:[#allocation190_spill] sm:$0xff] }
 0x753   : > { %v3966_v28 = vsel %vm833_vm4, %v16243_v50, %v16242_v17  ;;  %v3967_v8 = vsel %vm833_vm4, %v16246_v46, %v16245_v34  ;;  %v5422_v35 = vadd.f32 %v5386_v56, %v5382_v49  ;;  %v5423_v36 = vadd.f32 %v5387_v21, %v5383_v59  ;;  %v16266_v56 = vld [vmem:[#allocation186_spill] sm:$0xff]  ;;  %v16267_v21 = vld [vmem:[#allocation187_spill] sm:$0xff] }
 0x754   : > { %v3968_v51 = vsel %vm833_vm4, %v16249_v25, %v16248_v48  ;;  %v5424_v23 = vadd.f32 %v5388_v40, %v5384_v3  ;;  %v16251_v43 = vrot.slane %v16250_v10, 4  ;;  %v16252_v55 = vrot.slane %v13188_v33, 4 }
 0x755   : > { %v16254_v61 = vrot.slane %v16253_v62, 4  ;;  %v16255_v39 = vrot.slane %v13191_v42, 4  ;;  %v16257_v12 = vrot.slane %v16256_v24, 4  ;;  %v16258_v30 = vrot.slane %v13194_v32, 4  ;;  %v16262_v42 = vld [vmem:[#allocation181_spill] sm:$0xff] }
 0x756   : > { %v3969_v44 = vsel %vm833_vm4, %v16252_v55, %v16251_v43  ;;  %v16260_v26 = vrot.slane %v16259_v41, 4  ;;  %v16261_v33 = vrot.slane %v13197_v20, 4  ;;  %v5441_v49 = vadd.f32 %v5423_v36, %v5421_v18  ;;  %v16268_v20 = vld [vmem:[#allocation188_spill] sm:$0xff] }
 0x757   : > { %v3970_v0 = vsel %vm833_vm4, %v16255_v39, %v16254_v61  ;;  %v3971_v2 = vsel %vm833_vm4, %v16258_v30, %v16257_v12  ;;  %v5442_v52 = vadd.f32 %v5424_v23, %v5422_v35  ;;  %v4149_v59 = vmul.f32 %v3965_v37, %v16262_v42 }
 0x758   : > { %v3972_v19 = vsel %vm833_vm4, %v16261_v33, %v16260_v26  ;;  %v4150_v3 = vmul.f32 %v3966_v28, %v16263_v6  ;;  %v4151_v9 = vmul.f32 %v3967_v8, %v16264_v53  ;;  %v4152_v32 = vmul.f32 %v3968_v51, %v16265_v31 }
 0x759   : > { %v4153_v63 = vmul.f32 %v3969_v44, %v16266_v56  ;;  %v4154_v58 = vmul.f32 %v3970_v0, %v16267_v21  ;;  %v13569_v40 = vadd.f32 %v5442_v52, %v5441_v49  ;;  %v4155_v22 = vmul.f32 %v3971_v2, %v16268_v20 }
 0x75a   : > { %v4156_v17 = vmul.f32 %v3972_v19, %v16269_v27  ;;  %v4213_v50 = vadd.f32 %v4149_v59, %v16238_v1  ;;  %v4214_v37 = vadd.f32 %v4150_v3, %v16241_v16  ;;  %v4215_v28 = vadd.f32 %v4151_v9, %v16244_v13 }
 0x75b   : > { %v4216_v34 = vadd.f32 %v4152_v32, %v16247_v57  ;;  %v4217_v46 = vadd.f32 %v4153_v63, %v16250_v10  ;;  %5473 = vrot.lane.b32.xlu0 %v13569_v40, %s7068_s25  ;;  %v4218_v8 = vadd.f32 %v4154_v58, %v16253_v62  ;;  %v4219_v48 = vadd.f32 %v4155_v22, %v16256_v24  ;;  %v13649_v58 = vpop.permute.xlu0 %5461 }
 0x75c   : > { %v4220_v25 = vadd.f32 %v4156_v17, %v16259_v41  ;;  %v16270_v51 = vrot.slane %v16262_v42, 4  ;;  %v16271_v1 = vrot.slane %v13250_v5, 4  ;;  %v16272_v13 = vrot.slane %v16263_v6, 4 }
 0x75d   : > { %v16273_v57 = vrot.slane %v13253_v7, 4  ;;  %v16274_v35 = vrot.slane %v16264_v53, 4  ;;  %v16275_v36 = vrot.slane %v13256_v47, 4  ;;  %v16276_v10 = vrot.slane %v16265_v31, 4 }
 0x75e   : > { %v4285_v16 = vsel %vm833_vm4, %v16271_v1, %v16270_v51  ;;  %v16277_v5 = vrot.slane %v13259_v15, 4  ;;  %v16278_v55 = vrot.slane %v16266_v56, 4  ;;  %v16279_v7 = vrot.slane %v13262_v4, 4  ;;  %v16292_v51 = vld [vmem:[#allocation66_spill] sm:$0xff] }
 0x75f   : > { %v4286_v18 = vsel %vm833_vm4, %v16273_v57, %v16272_v13  ;;  %v4287_v23 = vsel %vm833_vm4, %v16275_v36, %v16274_v35  ;;  %v16280_v62 = vrot.slane %v16267_v21, 4  ;;  %v16281_v47 = vrot.slane %v13265_v14, 4  ;;  %5589 = vrot.lane.b32.xlu0 %v16286_v29, %s7068_s25  ;;  %v16294_v57 = vld [vmem:[#allocation97_spill] sm:$0xff]  ;;  %v16295_v35 = vld [vmem:[#allocation99_spill] sm:$0xff]  ;;  %v16308_v29 = vld [vmem:[#allocation108_spill] sm:$0xff] }
 0x760   : > { %v4288_v43 = vsel %vm833_vm4, %v16277_v5, %v16276_v10  ;;  %v4289_v44 = vsel %vm833_vm4, %v16279_v7, %v16278_v55  ;;  %v16282_v39 = vrot.slane %v16268_v20, 4  ;;  %v16283_v15 = vrot.slane %v13268_v45, 4  ;;  %v16302_v55 = vld [vmem:[#allocation75_spill] sm:$0xff] }
 0x761   : > { %v4290_v61 = vsel %vm833_vm4, %v16281_v47, %v16280_v62  ;;  %v16284_v24 = vrot.slane %v16269_v27, 4  ;;  %v16285_v4 = vrot.slane %v13271_v54, 4  ;;  %v4469_v30 = vmul.f32 %v4285_v16, %v16262_v42  ;;  %v16287_v42 = vld [vmem:[#allocation26_spill] sm:$0xff]  ;;  %v16293_v16 = vld [vmem:[#allocation68_spill] sm:$0xff] }
 0x762   : > { %v4291_v0 = vsel %vm833_vm4, %v16283_v15, %v16282_v39  ;;  %v4470_v14 = vmul.f32 %v4286_v18, %v16263_v6  ;;  %v4471_v2 = vmul.f32 %v4287_v23, %v16264_v53  ;;  %v4472_v41 = vmul.f32 %v4288_v43, %v16265_v31  ;;  %v16288_v6 = vld [vmem:[#allocation227_spill] sm:$0xff]  ;;  %v16289_v53 = vld [vmem:[#allocation228_spill] sm:$0xff]  ;;  %v16296_v23 = vld [vmem:[#allocation98_spill] sm:$0xff] }
 0x763   : > { %v4292_v12 = vsel %vm833_vm4, %v16285_v4, %v16284_v24  ;;  %v4473_v45 = vmul.f32 %v4289_v44, %v16266_v56  ;;  %v4474_v26 = vmul.f32 %v4290_v61, %v16267_v21  ;;  %v4475_v33 = vmul.f32 %v4291_v0, %v16268_v20  ;;  %v16290_v31 = vld [vmem:[#allocation140_spill] sm:$0xff]  ;;  %v16291_v56 = vld [vmem:[#allocation67_spill] sm:$0xff]  ;;  %v16303_v44 = vld [vmem:[#allocation74_spill] sm:$0xff] }
 0x764   : > { %v4476_v19 = vmul.f32 %v4292_v12, %v16269_v27  ;;  %v4605_v54 = vmul.f32 %v4469_v30, %v13340_v11  ;;  %v4606_v49 = vmul.f32 %v4470_v14, %v13343_v38  ;;  %v4607_v52 = vmul.f32 %v4471_v2, %v13346_v60  ;;  %v16298_v43 = vld [vmem:[#allocation156_spill] sm:$0xff]  ;;  %v16305_v39 = vld [vmem:[#allocation105_spill] sm:$0xff]  ;;  %v16306_v0 = vld [vmem:[#allocation107_spill] sm:$0xff] }
 0x765   : > { %v4608_v59 = vmul.f32 %v4472_v41, %v16287_v42  ;;  %v4609_v3 = vmul.f32 %v4473_v45, %v16288_v6  ;;  %v4610_v9 = vmul.f32 %v4474_v26, %v16289_v53  ;;  %v4611_v32 = vmul.f32 %v4475_v33, %v16290_v31  ;;  %v16304_v47 = vld [vmem:[#allocation76_spill] sm:$0xff]  ;;  %v16307_v4 = vld [vmem:[#allocation106_spill] sm:$0xff] }
 0x766   : > { %v4612_v63 = vmul.f32 %v4476_v19, %v16291_v56  ;;  %v4669_v21 = vadd.f32 %v4605_v54, %v4213_v50  ;;  %v4670_v11 = vadd.f32 %v4606_v49, %v4214_v37  ;;  %v4671_v20 = vadd.f32 %v4607_v52, %v4215_v28  ;;  %v16297_v50 = vld [vmem:[#allocation100_spill] sm:$0xff]  ;;  %v16299_v28 = vld [vmem:[#allocation157_spill] sm:$0xff] }
 0x767   : > { %v4672_v22 = vadd.f32 %v4608_v59, %v4216_v34  ;;  %v4673_v27 = vadd.f32 %v4609_v3, %v4217_v46  ;;  %v4674_v38 = vadd.f32 %v4610_v9, %v4218_v8  ;;  %v4675_v17 = vadd.f32 %v4611_v32, %v4219_v48  ;;  %v16300_v46 = vld [vmem:[#allocation242_spill] sm:$0xff]  ;;  %v16301_v48 = vld [vmem:[#allocation73_spill] sm:$0xff]  ;;  %v16310_v59 = vld [vmem:[#allocation135_spill] sm:$0xff] }
 0x768   : > { %v4676_v60 = vadd.f32 %v4612_v63, %v4220_v25  ;;  %v4797_v1 = vmul.f32 %v4469_v30, %v16292_v51  ;;  %v4798_v13 = vmul.f32 %v4470_v14, %v16293_v16  ;;  %v4799_v18 = vmul.f32 %v4471_v2, %v16294_v57  ;;  %v13667_v14 = vpop.permute.xlu0 %5577  ;;  %v16309_v52 = vld [vmem:[#allocation133_spill] sm:$0xff]  ;;  %v16311_v3 = vld [vmem:[#allocation134_spill] sm:$0xff]  ;;  %v16312_v9 = vld [vmem:[#allocation136_spill] sm:$0xff] }
 0x769   : > { %v4800_v36 = vmul.f32 %v4472_v41, %v16295_v35  ;;  %v4801_v10 = vmul.f32 %v4473_v45, %v16296_v23  ;;  %v4802_v5 = vmul.f32 %v4474_v26, %v16297_v50  ;;  %v4803_v37 = vmul.f32 %v4475_v33, %v16298_v43  ;;  %v16313_v32 = vld [vmem:[#allocation25_spill] sm:$0xff]  ;;  %v16314_v63 = vld [vmem:[#allocation142_spill] sm:$0xff]  ;;  %v16321_v35 = vld [vmem:[#allocation71_spill] sm:$0xff] }
 0x76a   : > { %v4804_v34 = vmul.f32 %v4476_v19, %v16299_v28  ;;  %v4933_v8 = vmul.f32 %v4797_v1, %v16300_v46  ;;  %v4934_v25 = vmul.f32 %v4798_v13, %v16301_v48  ;;  %v4935_v7 = vmul.f32 %v4799_v18, %v16302_v55  ;;  %v16322_v23 = vld [vmem:[#allocation70_spill] sm:$0xff]  ;;  %v16323_v50 = vld [vmem:[#allocation72_spill] sm:$0xff] }
 0x76b   : > { %v4936_v62 = vmul.f32 %v4800_v36, %v16303_v44  ;;  %v4937_v61 = vmul.f32 %v4801_v10, %v16304_v47  ;;  %v4938_v15 = vmul.f32 %v4802_v5, %v16305_v39  ;;  %v4939_v24 = vmul.f32 %v4803_v37, %v16306_v0  ;;  %v5609_v48 = vld [vmem:[%s13876_s5] sm:$0xff]  ;;  %v5612_v39 = vld [vmem:[%s13876_s5 + $0x18] sm:$0xff] }
 0x76c   : > { %v4940_v12 = vmul.f32 %v4804_v34, %v16307_v4  ;;  %v4997_v30 = vadd.f32 %v4933_v8, %v4669_v21  ;;  %v4998_v2 = vadd.f32 %v4934_v25, %v4670_v11  ;;  %v4999_v41 = vadd.f32 %v4935_v7, %v4671_v20  ;;  %v16315_v11 = vld [vmem:[#allocation27_spill] sm:$0xff] }
 0x76d   : > { %v5000_v45 = vadd.f32 %v4936_v62, %v4672_v22  ;;  %v5001_v26 = vadd.f32 %v4937_v61, %v4673_v27  ;;  %v5002_v33 = vadd.f32 %v4938_v15, %v4674_v38  ;;  %v5003_v19 = vadd.f32 %v4939_v24, %v4675_v17  ;;  %v16316_v22 = vld [vmem:[#allocation205_spill] sm:$0xff]  ;;  %v5610_v25 = vld [vmem:[%s13876_s5 + $0x8] sm:$0xff]  ;;  %v5611_v61 = vld [vmem:[%s13876_s5 + $0x10] sm:$0xff] }
 0x76e   : > { %v5004_v54 = vadd.f32 %v4940_v12, %v4676_v60  ;;  %v5125_v49 = vmul.f32 %v4797_v1, %v16308_v29  ;;  %v5126_v42 = vmul.f32 %v4798_v13, %v16309_v52  ;;  %v5127_v6 = vmul.f32 %v4799_v18, %v16310_v59  ;;  %v16317_v38 = vld [vmem:[#allocation209_spill] sm:$0xff]  ;;  %v16319_v1 = vld [vmem:[#allocation216_spill] sm:$0xff]  ;;  %v16320_v13 = vld [vmem:[#allocation143_spill] sm:$0xff]  ;;  %v5464_v18 = vpop.permute.xlu1 %5463 }
 0x76f   : > { %v5128_v53 = vmul.f32 %v4800_v36, %v16311_v3  ;;  %v5129_v31 = vmul.f32 %v4801_v10, %v16312_v9  ;;  %v5130_v56 = vmul.f32 %v4802_v5, %v16313_v32  ;;  %v5131_v21 = vmul.f32 %v4803_v37, %v16314_v63  ;;  %v16318_v60 = vld [vmem:[#allocation213_spill] sm:$0xff]  ;;  %v5466_v37 = vpop.permute.xlu0 %5465  ;;  %v16325_v15 = vld [vmem:[#allocation95_spill] sm:$0xff]  ;;  %v16326_v24 = vld [vmem:[#allocation94_spill] sm:$0xff] }
 0x770   : > { %v5132_v20 = vmul.f32 %v4804_v34, %v16315_v11  ;;  %v5261_v27 = vmul.f32 %v5125_v49, %v16316_v22  ;;  %v5262_v17 = vmul.f32 %v5126_v42, %v16317_v38  ;;  %v5263_v51 = vmul.f32 %v5127_v6, %v16318_v60  ;;  %v16324_v62 = vld [vmem:[#allocation93_spill] sm:$0xff]  ;;  %v16327_v12 = vld [vmem:[#allocation96_spill] sm:$0xff]  ;;  %v13705_v52 = vld [vmem:[#allocation2 + $0x4] ss:$0 sm:$0xff] }
 0x771   : > { %v5264_v16 = vmul.f32 %v5128_v53, %v16319_v1  ;;  %v5265_v57 = vmul.f32 %v5129_v31, %v16320_v13  ;;  %v5266_v36 = vmul.f32 %v5130_v56, %v16321_v35  ;;  %v5267_v10 = vmul.f32 %v5131_v21, %v16322_v23  ;;  %v5613_v6 = vld [vmem:[%s13876_s5 + $0x20] sm:$0xff]  ;;  %v5614_v3 = vld [vmem:[%s13876_s5 + $0x28] sm:$0xff]  ;;  %v16332_v53 = vld [vmem:[#allocation65_spill] sm:$0xff] }
 0x772   : > { %v5268_v5 = vmul.f32 %v5132_v20, %v16323_v50  ;;  %v5325_v43 = vadd.f32 %v5261_v27, %v4997_v30  ;;  %v5326_v28 = vadd.f32 %v5262_v17, %v4998_v2  ;;  %v5327_v34 = vadd.f32 %v5263_v51, %v4999_v41  ;;  %v16328_v2 = vld [vmem:[#allocation125_spill] sm:$0xff]  ;;  %v5580_v56 = vpop.permute.xlu1 %5579  ;;  %v16336_v23 = vld [vmem:[#allocation14_spill] sm:$0xff] }
 0x773   : > { %v5328_v46 = vadd.f32 %v5264_v16, %v5000_v45  ;;  %v5329_v8 = vadd.f32 %v5265_v57, %v5001_v26  ;;  %v5330_v55 = vadd.f32 %v5266_v36, %v5002_v33  ;;  %v5331_v7 = vadd.f32 %v5267_v10, %v5003_v19  ;;  %v16329_v45 = vld [vmem:[#allocation127_spill] sm:$0xff]  ;;  %v16330_v33 = vld [vmem:[#allocation126_spill] sm:$0xff]  ;;  %v16333_v31 = vld [vmem:[#allocation13_spill] sm:$0xff]  ;;  %v5582_v20 = vpop.permute.xlu0 %5581 }
 0x774   : > { %v5332_v44 = vadd.f32 %v5268_v5, %v5004_v54  ;;  %v5389_v47 = vmul.f32 %v5325_v43, %v16324_v62  ;;  %v5390_v0 = vmul.f32 %v5326_v28, %v16325_v15  ;;  %v5391_v4 = vmul.f32 %v5327_v34, %v16326_v24  ;;  %v16331_v54 = vld [vmem:[#allocation128_spill] sm:$0xff]  ;;  %v5616_v51 = vld [vmem:[%s13876_s5 + $0x38] sm:$0xff]  ;;  %v16337_v5 = vld [vmem:[#allocation15_spill] sm:$0xff] }
 0x775   : > { %v5392_v30 = vmul.f32 %v5328_v46, %v16327_v12  ;;  %v5393_v41 = vmul.f32 %v5329_v8, %v16328_v2  ;;  %v5394_v26 = vmul.f32 %v5330_v55, %v16329_v45  ;;  %v5395_v19 = vmul.f32 %v5331_v7, %v16330_v33  ;;  %v16334_v16 = vld [vmem:[#allocation69_spill] sm:$0xff]  ;;  %v16338_v28 = vld [vmem:[#allocation12_spill] sm:$0xff]  ;;  %v16339_v34 = vld [vmem:[#allocation147_spill] sm:$0xff] }
 0x776   : > { %v5396_v29 = vmul.f32 %v5332_v44, %v16331_v54  ;;  %v6571_v49 = vpack.c.bf16 %v5610_v25, %v5609_v48  ;;  %v6575_v59 = vpack.c.bf16 %v5612_v39, %v5611_v61  ;;  %v5485_v9 = vadd.f32 %v13649_v58, %v16332_v53  ;;  %v5615_v58 = vld [vmem:[%s13876_s5 + $0x30] sm:$0xff]  ;;  %v16335_v57 = vld [vmem:[#allocation249_spill] sm:$0xff]  ;;  %v5468_v36 = vpop.permute.xlu1 %5467 }
 0x777   : > { %v5425_v42 = vadd.f32 %v5393_v41, %v5389_v47  ;;  %v5497_v32 = vmul.f32 %v13705_v52, %v16333_v31  ;;  %v5426_v63 = vadd.f32 %v5394_v26, %v5390_v0  ;;  %v5427_v21 = vadd.f32 %v5395_v19, %v5391_v4  ;;  %v5470_v50 = vpop.permute.xlu0 %5469  ;;  %v16340_v8 = vld [vmem:[#allocation101_spill] sm:$0xff]  ;;  %v16341_v25 = vld [vmem:[#allocation32_spill] sm:$0xff]  ;;  %v16344_v41 = vld [vmem:[#allocation39_spill] sm:$0xff] }
 0x778   : > { %v5428_v11 = vadd.f32 %v5396_v29, %v5392_v30  ;;  %6572 = vmatprep.subr.bf16.mxu0 %v6571_v49  ;;  %v6579_v17 = vpack.c.bf16 %v5614_v3, %v5613_v6  ;;  %v5486_v13 = vadd.f32 %v5464_v18, %v16334_v16  ;;  %v5487_v35 = vadd.f32 %v5466_v37, %v16335_v57  ;;  %v16342_v7 = vld [vmem:[#allocation16_spill] sm:$0xff]  ;;  %v16343_v62 = vld [vmem:[#allocation17_spill] sm:$0xff]  ;;  %v16345_v26 = vld [vmem:[#allocation18_spill] sm:$0xff] }
 0x779   : > { %6574 = vmatpush3.bf16.msra.mxu0 %v6571_v49  ;;  %v5505_v22 = vadd.f32 %v5497_v32, %v5485_v9  ;;  %v5443_v27 = vadd.f32 %v5427_v21, %v5425_v42  ;;  %v5498_v10 = vmul.f32 %v13705_v52, %v16336_v23  ;;  %v5499_v43 = vmul.f32 %v13705_v52, %v16337_v5 }
 0x77a   : > { %v5444_v38 = vadd.f32 %v5428_v11, %v5426_v63  ;;  %6576 = vmatprep.subr.bf16.mxu0 %v6575_v59  ;;  %v5568_v18 = vmul.f32 %v16339_v34, %v16338_v28  ;;  %v5488_v48 = vadd.f32 %v5468_v36, %v16340_v8  ;;  %v5489_v55 = vadd.f32 %v5470_v50, %v16341_v25  ;;  %v5584_v0 = vpop.permute.xlu1 %5583 }
 0x77b   : > { %v5601_v60 = vmul.f32 %v13667_v14, %v5505_v22  ;;  %v6583_v14 = vpack.c.bf16 %v5616_v51, %v5615_v58  ;;  %v5506_v46 = vadd.f32 %v5498_v10, %v5486_v13  ;;  %v5507_v37 = vadd.f32 %v5499_v43, %v5487_v35  ;;  %v5586_v4 = vpop.permute.xlu0 %5585 }
 0x77c   : > { %v5452_v1 = vadd.f32 %v5444_v38, %v5443_v27  ;;  %v5500_v44 = vmul.f32 %v13705_v52, %v16342_v7  ;;  %v5501_v47 = vmul.f32 %v13705_v52, %v16343_v62  ;;  %v5502_v33 = vmul.f32 %v13705_v52, %v16345_v26 }
 0x77d   : > { %6578 = vmatpush3.bf16.msra.mxu0 %v6575_v59  ;;  %6385 = vmatprep.mubr.msk.f32.mxu0 %vm1245_vm15, %v5601_v60  ;;  %v5602_v61 = vmul.f32 %v5580_v56, %v5506_v46  ;;  %v5603_v15 = vmul.f32 %v5582_v20, %v5507_v37  ;;  %v16346_v59 = vld [vmem:[#allocation19_spill] sm:$0xff]  ;;  %v16347_v56 = vld [vmem:[#allocation20_spill] sm:$0xff] }
 0x77e   : > { %5475 = vrot.lane.b32.xlu1 %v5452_v1, %s7068_s25  ;;  %6580 = vmatprep.subr.bf16.mxu0 %v6579_v17  ;;  %v5508_v39 = vadd.f32 %v5500_v44, %v5488_v48  ;;  %v5509_v24 = vadd.f32 %v5501_v47, %v5489_v55  ;;  %v5503_v6 = vmul.f32 %v13705_v52, %v16346_v59 }
 0x77f   : > { %v5504_v63 = vmul.f32 %v13705_v52, %v16347_v56 }
 0x780   : > { %v5604_v12 = vmul.f32 %v5584_v0, %v5508_v39  ;;  %v5605_v30 = vmul.f32 %v5586_v4, %v5509_v24 }
 0x781   : > { %6582 = vmatpush3.bf16.msra.mxu0 %v6579_v17 }
 0x782   : > { %5591 = vrot.lane.b32.xlu1 %v5568_v18, %s7068_s25  ;;  %6584 = vmatprep.subr.bf16.mxu0 %v6583_v14 }
 0x785   : > { %6586 = vmatpush3.bf16.msra.mxu0 %v6583_v14 }
 0x788   : > { %6386 = vmatmul.mubr.msk.f32.vlgmr.msra.gmra.mrb[72].mxu0 %vm1245_vm15, %v5602_v61 }
 0x789   : > { %6388 = vmatprep.mubr.msk.f32.mxu0 %vm1245_vm15, %v5603_v15 }
 0x78c   : > { %6389 = vmatmul.mubr.msk.f32.gmra.mrb[74].mxu0 %vm1245_vm15, %v5604_v12 }
 0x78d   : > { %6391 = vmatprep.mubr.msk.f32.mxu0 %vm1245_vm15, %v5605_v30 }
 0x795   : > { %v5472_v2 = vpop.permute.xlu1 %5471 }
 0x796   : > { %v5490_v45 = vadd.f32 %v5472_v2, %v16344_v41 }
 0x798   : > { %v5510_v19 = vadd.f32 %v5502_v33, %v5490_v45 }
 0x79c   : > { %v5588_v54 = vpop.permute.xlu1 %5587 }
 0x79d   : > { %v5606_v29 = vmul.f32 %v5588_v54, %v5510_v19 }
 0x79f   : > { %6392 = vmatmul.mubr.msk.f32.gmra.mrb[76].mxu0 %vm1245_vm15, %v5606_v29 }
 0x7cd   : > { %v5474_v49 = vpop.permute.xlu0 %5473 }
 0x7ce   : > { %v5491_v42 = vadd.f32 %v5474_v49, %v13569_v40 }
 0x7d0   : > { %v5511_v3 = vadd.f32 %v5503_v6, %v5491_v42 }
 0x7d1   : > { %v5590_v53 = vpop.permute.xlu0 %5589 }
 0x7d2   : > { %v5607_v9 = vmul.f32 %v5590_v53, %v5511_v3 }
 0x7d4   : > { %6394 = vmatprep.mubr.msk.f32.mxu0 %vm1245_vm15, %v5607_v9 }
 0x7f0   : > { %v5476_v31 = vpop.permute.xlu1 %5475 }
 0x7f1   : > { %v5492_v32 = vadd.f32 %v5476_v31, %v5452_v1 }
 0x7f3   : > { %v5512_v21 = vadd.f32 %v5504_v63, %v5492_v32 }
 0x7f4   : > { %v5592_v11 = vpop.permute.xlu1 %5591 }
 0x7f5   : > { %v5608_v20 = vmul.f32 %v5592_v11, %v5512_v21 }
 0x7f7   : > { %6395 = vmatmul.mubr.msk.f32.gmra.mrb[78].mxu0 %vm1245_vm15, %v5608_v20 }
 0x85b   : > { %v6387_v22 = vpop.f32.mrb[72].mxu0 }
 0x85c   : > { %v5707_v40 = vpop.f32.mrb[73].mxu0  ;;  %v5749_v27 = vsel %vm378_vm0, %v6387_v22, 0.0 }
 0x85d   : > { %5750 = vadd.xlane.f32.xlu1 %v5749_v27  ;;  %v5746_v38 = vsel %vm378_vm0, %v5707_v40, 0.0  ;;  %v5866_v27 = vld [vmem:[#allocation7] sm:$0xff] }
 0x85e   : > { %5747 = vadd.xlane.f32.xlu0 %v5746_v38  ;;  %6413 = vmatprep.mubr.msk.f32.mxu1 %vm378_vm0, %v5866_v27 }
 0x85f   : > { %v6390_v17 = vpop.f32.mrb[74].mxu0 }
 0x860   : > { %v5717_v60 = vpop.f32.mrb[75].mxu0  ;;  %v5755_v52 = vsel %vm378_vm0, %v6390_v17, 0.0 }
 0x861   : > { %v5752_v58 = vsel %vm378_vm0, %v5717_v60, 0.0 }
 0x862   : > { %5753 = vadd.xlane.f32.xlu0 %v5752_v58 }
 0x866   : > { %5756 = vadd.xlane.f32.xlu0 %v5755_v52 }
 0x872   : > { %v6393_v51 = vpop.f32.mrb[76].mxu0 }
 0x873   : > { %v5727_v1 = vpop.f32.mrb[77].mxu0  ;;  %v5761_v16 = vsel %vm378_vm0, %v6393_v51, 0.0 }
 0x874   : > { %5762 = vadd.xlane.f32.xlu1 %v5761_v16  ;;  %v5758_v13 = vsel %vm378_vm0, %v5727_v1, 0.0 }
 0x875   : > { %5759 = vadd.xlane.f32.xlu0 %v5758_v13 }
 0x8ca   : > { %v6396_v57 = vpop.f32.mrb[78].mxu0 }
 0x8cb   : > { %v5737_v35 = vpop.f32.mrb[79].mxu0  ;;  %v5767_v36 = vsel %vm378_vm0, %v6396_v57, 0.0 }
 0x8cc   : > { %5768 = vadd.xlane.f32.xlu1 %v5767_v36  ;;  %v5764_v14 = vsel %vm378_vm0, %v5737_v35, 0.0 }
 0x8cd   : > { %5765 = vadd.xlane.f32.xlu0 %v5764_v14  ;;  %v5871_v14 = vld [vmem:[%s13878_s7 + $0x8] sm:$0xff] }
 0x8ea   : > { %v5751_v23 = vpop.xlane.xlu1 %5750 }
 0x8eb   : > { %v5771_v10 = vmul.f32 0.03125, %v5751_v23  ;;  %v5748_v50 = vpop.xlane.xlu0 %5747 }
 0x8ec   : > { %v5770_v5 = vmul.f32 0.03125, %v5748_v50  ;;  %v7069_v50 = vmov 0  }
 0x8ed   : > { %v13764_v43 = vsub.f32 %v6387_v22, %v5771_v10  ;;  %6668 = vset.pattern.permute.xlu1 %v7069_v50  ;;  %6667 = vset.pattern.permute.xlu0 %v7069_v50 }
 0x8ee   : > { %v13766_v28 = vsub.f32 %v5707_v40, %v5770_v5  ;;  %v5870_v5 = vld [vmem:[%s13878_s7] sm:$0xff] }
 0x8ef   : > { %v5787_v34 = vmul.f32 %v13764_v43, %v13764_v43  ;;  %v5754_v18 = vpop.xlane.xlu0 %5753 }
 0x8f0   : > { %v5786_v46 = vmul.f32 %v13766_v28, %v13766_v28  ;;  %v5772_v8 = vmul.f32 0.03125, %v5754_v18 }
 0x8f1   : > { %v5797_v48 = vsel %vm378_vm0, %v5787_v34, 0.0  ;;  %v5872_v34 = vld [vmem:[%s13878_s7 + $0x10] sm:$0xff] }
 0x8f2   : > { %5798 = vadd.xlane.f32.xlu1 %v5797_v48  ;;  %v5794_v37 = vsel %vm378_vm0, %v5786_v46, 0.0  ;;  %v13774_v25 = vsub.f32 %v5717_v60, %v5772_v8 }
 0x8f3   : > { %5795 = vadd.xlane.f32.xlu0 %v5794_v37  ;;  %v5757_v55 = vpop.xlane.xlu0 %5756  ;;  %v5873_v37 = vld [vmem:[%s13878_s7 + $0x18] sm:$0xff] }
 0x8f4   : > { %v5773_v7 = vmul.f32 0.03125, %v5757_v55  ;;  %v5788_v44 = vmul.f32 %v13774_v25, %v13774_v25 }
 0x8f6   : > { %v13778_v62 = vsub.f32 %v6390_v17, %v5773_v7  ;;  %v5800_v47 = vsel %vm378_vm0, %v5788_v44, 0.0 }
 0x8f7   : > { %5801 = vadd.xlane.f32.xlu0 %v5800_v47 }
 0x8f8   : > { %v5789_v61 = vmul.f32 %v13778_v62, %v13778_v62 }
 0x8fa   : > { %v5803_v39 = vsel %vm378_vm0, %v5789_v61, 0.0 }
 0x8fb   : > { %5804 = vadd.xlane.f32.xlu1 %v5803_v39 }
 0x901   : > { %v5763_v15 = vpop.xlane.xlu1 %5762 }
 0x902   : > { %v5775_v0 = vmul.f32 0.03125, %v5763_v15  ;;  %v5760_v24 = vpop.xlane.xlu0 %5759 }
 0x903   : > { %v5774_v4 = vmul.f32 0.03125, %v5760_v24 }
 0x904   : > { %v13784_v12 = vsub.f32 %v6393_v51, %v5775_v0 }
 0x905   : > { %v13786_v30 = vsub.f32 %v5727_v1, %v5774_v4  ;;  %v13807_v1 = vld [vmem:[#allocation2] ss:$0 sm:$0xff] }
 0x906   : > { %v5791_v2 = vmul.f32 %v13784_v12, %v13784_v12 }
 0x907   : > { %v5790_v41 = vmul.f32 %v13786_v30, %v13786_v30 }
 0x908   : > { %v5809_v45 = vsel %vm378_vm0, %v5791_v2, 0.0 }
 0x909   : > { %5810 = vadd.xlane.f32.xlu1 %v5809_v45  ;;  %v5806_v26 = vsel %vm378_vm0, %v5790_v41, 0.0 }
 0x90a   : > { %5807 = vadd.xlane.f32.xlu0 %v5806_v26 }
 0x959   : > { %v5769_v33 = vpop.xlane.xlu1 %5768 }
 0x95a   : > { %v5777_v19 = vmul.f32 0.03125, %v5769_v33  ;;  %v5766_v54 = vpop.xlane.xlu0 %5765 }
 0x95b   : > { %v5776_v29 = vmul.f32 0.03125, %v5766_v54 }
 0x95c   : > { %v13794_v49 = vsub.f32 %v6396_v57, %v5777_v19 }
 0x95d   : > { %v13796_v42 = vsub.f32 %v5737_v35, %v5776_v29  ;;  %v6926_v35 = vld [vmem:[#allocation2 + $0x1] ss:$0 sm:$0xff] }
 0x95e   : > { %v5793_v59 = vmul.f32 %v13794_v49, %v13794_v49 }
 0x95f   : > { %v5792_v6 = vmul.f32 %v13796_v42, %v13796_v42 }
 0x960   : > { %v5815_v3 = vsel %vm378_vm0, %v5793_v59, 0.0 }
 0x961   : > { %5816 = vadd.xlane.f32.xlu1 %v5815_v3  ;;  %v5812_v53 = vsel %vm378_vm0, %v5792_v6, 0.0 }
 0x962   : > { %5813 = vadd.xlane.f32.xlu0 %v5812_v53 }
 0x972   : > { %5881 = vperm.xlu1 %6668, %v5871_v14  }
 0x976   : > { %5886 = vperm.xlu1 %6668, %v5872_v34  }
 0x978   : > { %5876 = vperm.xlu0 %6667, %v5870_v5  }
 0x97a   : > { %5891 = vperm.xlu1 %6668, %v5873_v37  }
 0x97f   : > { %v5799_v9 = vpop.xlane.xlu1 %5798 }
 0x980   : > { %v5819_v31 = vmul.f32 0.03125, %v5799_v9  ;;  %v5796_v32 = vpop.xlane.xlu0 %5795 }
 0x981   : > { %v5818_v56 = vmul.f32 0.03125, %v5796_v32 }
 0x982   : > { %v5827_v63 = vadd.f32 1e-05, %v5819_v31 }
 0x983   : > { %v5826_v21 = vadd.f32 1e-05, %v5818_v56 }
 0x984   : > { %6909 = vrsqrt.f32 %v5827_v63  ;;  %v5802_v11 = vpop.xlane.xlu0 %5801 }
 0x985   : > { %6911 = vrsqrt.f32 %v5826_v21  ;;  %v5820_v20 = vmul.f32 0.03125, %v5802_v11 }
 0x987   : > { %v5828_v22 = vadd.f32 1e-05, %v5820_v20  ;;  %v5867_v20 = vld [vmem:[#allocation7 + $0x8] sm:$0xff] }
 0x988   : > { %v5805_v40 = vpop.xlane.xlu1 %5804 }
 0x989   : > { %6913 = vrsqrt.f32 %v5828_v22  ;;  %v5821_v38 = vmul.f32 0.03125, %v5805_v40  ;;  %v5868_v22 = vld [vmem:[#allocation7 + $0x10] sm:$0xff] }
 0x98b   : > { %v5829_v17 = vadd.f32 1e-05, %v5821_v38 }
 0x98d   : > { %6915 = vrsqrt.f32 %v5829_v17 }
 0x98e   : > { %v6910_v60 = vpop.eup %6909 }
 0x98f   : > { %v6912_v58 = vpop.eup %6911  ;;  %v5843_v52 = vmul.f32 %v6910_v60, %v13764_v43 }
 0x990   : > { %v5842_v51 = vmul.f32 %v6912_v58, %v13766_v28 }
 0x991   : > { %v5851_v16 = vmul.f32 %v13807_v1, %v5843_v52 }
 0x992   : > { %v5850_v13 = vmul.f32 %v13807_v1, %v5842_v51 }
 0x993   : > { %v6914_v57 = vpop.eup %6913  ;;  %v5859_v36 = vadd.f32 %v6926_v35, %v5851_v16 }
 0x994   : > { %v5844_v23 = vmul.f32 %v6914_v57, %v13774_v25  ;;  %v5858_v10 = vadd.f32 %v6926_v35, %v5850_v13 }
 0x996   : > { %v6587_v28 = vpack.c.bf16 %v5859_v36, %v5858_v10  ;;  %v5852_v8 = vmul.f32 %v13807_v1, %v5844_v23  ;;  %v5811_v44 = vpop.xlane.xlu1 %5810 }
 0x997   : > { %v6916_v18 = vpop.eup %6915  ;;  %v5808_v47 = vpop.xlane.xlu0 %5807 }
 0x998   : > { %v5845_v46 = vmul.f32 %v6916_v18, %v13778_v62  ;;  %6589 = vmatprep.subr.msk.bf16.mxu1 %vm13820_vm1, %v6587_v28  ;;  %v5860_v25 = vadd.f32 %v6926_v35, %v5852_v8  ;;  %v5823_v62 = vmul.f32 0.03125, %v5811_v44  ;;  %v5822_v61 = vmul.f32 0.03125, %v5808_v47 }
 0x999   : > { %6592 = vmatpush3.bf16.xpose.msk.msra.mxu1 %vm13820_vm1, %v6587_v28 }
 0x99a   : > { %v5853_v48 = vmul.f32 %v13807_v1, %v5845_v46  ;;  %v5831_v39 = vadd.f32 1e-05, %v5823_v62  ;;  %v5830_v15 = vadd.f32 1e-05, %v5822_v61 }
 0x99c   : > { %v5861_v55 = vadd.f32 %v6926_v35, %v5853_v48  ;;  %6917 = vrsqrt.f32 %v5831_v39 }
 0x99d   : > { %6919 = vrsqrt.f32 %v5830_v15 }
 0x99e   : > { %v6593_v7 = vpack.c.bf16 %v5861_v55, %v5860_v25 }
 0x9a0   : > { %6595 = vmatprep.subr.msk.bf16.mxu1 %vm13820_vm1, %v6593_v7 }
 0x9a1   : > { %6598 = vmatpush3.bf16.xpose.msk.msra.mxu1 %vm13820_vm1, %v6593_v7 }
 0x9a6   : > { %v6918_v0 = vpop.eup %6917 }
 0x9a7   : > { %v6920_v24 = vpop.eup %6919  ;;  %v5847_v4 = vmul.f32 %v6918_v0, %v13784_v12 }
 0x9a8   : > { %v5846_v2 = vmul.f32 %v6920_v24, %v13786_v30 }
 0x9a9   : > { %v5855_v41 = vmul.f32 %v13807_v1, %v5847_v4 }
 0x9aa   : > { %v5854_v45 = vmul.f32 %v13807_v1, %v5846_v2 }
 0x9ab   : > { %v5863_v26 = vadd.f32 %v6926_v35, %v5855_v41 }
 0x9ac   : > { %v5862_v33 = vadd.f32 %v6926_v35, %v5854_v45 }
 0x9ae   : > { %v6599_v19 = vpack.c.bf16 %v5863_v26, %v5862_v33 }
 0x9b0   : > { %6601 = vmatprep.subr.msk.bf16.mxu1 %vm13820_vm1, %v6599_v19 }
 0x9b1   : > { %6604 = vmatpush3.bf16.xpose.msk.msra.mxu1 %vm13820_vm1, %v6599_v19 }
 0x9ee   : > { %v5817_v54 = vpop.xlane.xlu1 %5816 }
 0x9ef   : > { %v5825_v29 = vmul.f32 0.03125, %v5817_v54  ;;  %v5814_v59 = vpop.xlane.xlu0 %5813 }
 0x9f0   : > { %v5824_v6 = vmul.f32 0.03125, %v5814_v59 }
 0x9f1   : > { %v5833_v12 = vadd.f32 1e-05, %v5825_v29 }
 0x9f2   : > { %v5832_v3 = vadd.f32 1e-05, %v5824_v6 }
 0x9f3   : > { %6921 = vrsqrt.f32 %v5833_v12 }
 0x9f4   : > { %6923 = vrsqrt.f32 %v5832_v3 }
 0x9f7   : > { %v5877_v27 = vpop.permute.xlu0 %5876 }
 0x9fd   : > { %v6922_v30 = vpop.eup %6921 }
 0x9fe   : > { %v6924_v53 = vpop.eup %6923  ;;  %v5849_v9 = vmul.f32 %v6922_v30, %v13794_v49  ;;  %v5869_v49 = vld [vmem:[#allocation7 + $0x18] sm:$0xff] }
 0x9ff   : > { %v5848_v31 = vmul.f32 %v6924_v53, %v13796_v42  ;;  %v5882_v42 = vpop.permute.xlu1 %5881 }
 0xa00   : > { %v5857_v32 = vmul.f32 %v13807_v1, %v5849_v9 }
 0xa01   : > { %v5856_v56 = vmul.f32 %v13807_v1, %v5848_v31 }
 0xa02   : > { %v5865_v63 = vadd.f32 %v6926_v35, %v5857_v32 }
 0xa03   : > { %v5864_v21 = vadd.f32 %v6926_v35, %v5856_v56  ;;  %v5887_v40 = vpop.permute.xlu1 %5886 }
 0xa05   : > { %v6605_v11 = vpack.c.bf16 %v5865_v63, %v5864_v21 }
 0xa07   : > { %6607 = vmatprep.subr.msk.bf16.mxu1 %vm13820_vm1, %v6605_v11  ;;  %v5892_v52 = vpop.permute.xlu1 %5891 }
 0xa08   : > { %6610 = vmatpush3.bf16.xpose.msk.msra.mxu1 %vm13820_vm1, %v6605_v11 }
 0xa0f   : > { %6414 = vmatmul.mubr.msk.f32.vlgmr.msra.gmra.mrb[72].mxu1 %vm378_vm0, %v5867_v20 }
 0xa10   : > { %6416 = vmatprep.mubr.msk.f32.mxu1 %vm378_vm0, %v5868_v22 }
 0xa13   : > { %6417 = vmatmul.mubr.msk.f32.gmra.mrb[74].mxu1 %vm378_vm0, %v5869_v49 }
 0xae2   : > { %v6415_v38 = vpop.f32.mrb[72].mxu1 }
 0xae3   : > { %v6002_v17 = vadd.f32 %v6415_v38, %v5882_v42  ;;  %v5996_v60 = vpop.f32.mrb[73].mxu1 }
 0xae4   : > { %v5997_v58 = vadd.f32 %v5996_v60, %v5877_v27 }
 0xae5   : > { %6016 = vst.msk [vmem:[%s364_s13 + $0x8] sm:$0xff] %vm1245_vm15, %v6002_v17 }
 0xae6   : > { %6015 = vst.msk [vmem:[%s364_s13] sm:$0xff] %vm1245_vm15, %v5997_v58  ;;  %v6418_v51 = vpop.f32.mrb[74].mxu1 }
 0xae7   : > { %v6012_v1 = vadd.f32 %v6418_v51, %v5892_v52  ;;  %v6006_v16 = vpop.f32.mrb[75].mxu1 }
 0xae8   : > { %v6007_v13 = vadd.f32 %v6006_v16, %v5887_v40 }
 0xae9   : > { %6018 = vst.msk [vmem:[%s364_s13 + $0x18] sm:$0xff] %vm1245_vm15, %v6012_v1 }
 0xaea   : > { %6017 = vst.msk [vmem:[%s364_s13 + $0x10] sm:$0xff] %vm1245_vm15, %v6007_v13 }
 0xaeb PF: > { %s21_s27 = sadd.s32 1, %s7057_s27  }
 0xaec   : > { %p18_p6 = scmp.ge.s32.totalorder %s21_s27, 4  }
 0xaee   :  { %20 = sbr.rel (!%p18_p6) target bundleno = 3 (0x3), region = 99 }
 0xaf5   :  { %6040 = vsyncpa [#allocation3], 1 }
 0xaf6   :  { %6042 = vsyncpa [#allocation3 + $0x1], 1 }
 0xaf7   :  { %6043 = vsyncpa [#allocation5], 1 }
 0xaf8   :  { %6044 = vsyncpa [#allocation8], 1 }

</bundles_post_ra>
